<compile_context>
chip_gen: v5e
topology: v5e:2x2
jax: 0.10.0
libtpu: 0.0.40
codegen_flags: <defaults>
</compile_context>

<pallas_src>
import functools

import numpy as np
import jax
import jax.numpy as jnp
from jax.experimental import pallas as pl
from jax.experimental.pallas import tpu as pltpu

BN_EPS = 1e-5   # nn.BatchNorm3d default
LN_EPS = 1e-6   # norm_layer = partial(nn.LayerNorm, eps=1e-6)

# MXU operand dtype (accumulation is always f32 via preferred_element_type).
_MATMUL_DTYPE = jnp.bfloat16

_S_TILE = 2048          # bound on the im2col slab width (lane dim), multiple of 128
_VMEM_LIMIT = 32 * 1024 * 1024


# ---------------------------------------------------------------------------
# Left branch: fused conv_path kernel (per sample), channels-first (C, S) layout.
#   BN -> Conv3x3x3 -> BN -> ReLU -> Conv3x3x3 -> BN -> ReLU -> Conv1x1 -> ReLU
# ---------------------------------------------------------------------------
def _conv_path_kernel(x_ref, masks_ref,
                      bn1s_ref, bn1h_ref, w1_ref, b1_ref,
                      bn2s_ref, bn2h_ref, w2_ref, b2_ref,
                      bn3s_ref, bn3h_ref, w3_ref, b3_ref,
                      o_ref, pad_ref, col_ref, acc_ref,
                      *, d, h, w, c, lp, s_tile):
    s = d * h * w
    hw = h * w
    taps = [(dd, dh, dw) for dd in (-1, 0, 1) for dh in (-1, 0, 1) for dw in (-1, 0, 1)]

    # Zero only the halo margins (once per grid step); the interior is fully
    # rewritten by each conv.
    pad_ref[:, :lp] = jnp.zeros((c, lp), jnp.float32)
    pad_ref[:, lp + s:] = jnp.zeros((c, lp), jnp.float32)

    def conv3x3x3(act_cs, wref, bias_col):
        # act_cs: (C, S) f32.  Returns (Cout, S) f32 via one K=27*Cin MXU dot per S chunk.
        pad_ref[:, lp:lp + s] = act_cs                       # lane-aligned interior store
        for t0 in range(0, s, s_tile):
            cur = min(s_tile, s - t0)
            for t, (dd, dh, dw) in enumerate(taps):
                delta = dd * hw + dh * w + dw                # flat-index shift of this tap
                tap = pad_ref[:, lp + t0 + delta: lp + t0 + delta + cur]
                mask = masks_ref[t][:, t0:t0 + cur]          # (1, cur) validity mask
                col_ref[t * c:(t + 1) * c, :cur] = (tap * mask).astype(col_ref.dtype)
            acc_ref[:, t0:t0 + cur] = jnp.dot(
                wref[...], col_ref[:, :cur],
                preferred_element_type=jnp.float32) + bias_col
        return acc_ref[...]

    x = x_ref[0].astype(jnp.float32)                              # (C, S), lane-dense load
    a0 = x * bn1s_ref[...] + bn1h_ref[...]                        # BN1
    h1 = conv3x3x3(a0, w1_ref, b1_ref[...])                       # Conv1 (3x3x3, pad 1)
    a1 = jnp.maximum(h1 * bn2s_ref[...] + bn2h_ref[...], 0.0)     # BN2 + ReLU
    h2 = conv3x3x3(a1, w2_ref, b2_ref[...])                       # Conv2 (3x3x3, pad 1)
    a2 = jnp.maximum(h2 * bn3s_ref[...] + bn3h_ref[...], 0.0)     # BN3 + ReLU
    h3 = jnp.dot(w3_ref[...], a2.astype(_MATMUL_DTYPE),
                 preferred_element_type=jnp.float32) + b3_ref[...]
    o_ref[0] = jnp.maximum(h3, 0.0).astype(o_ref.dtype)           # Conv1x1 + ReLU, lane-dense store


def _tap_masks(d, h, w):
    """(27, 1, S) f32 masks: 1 where the tap (dd,dh,dw) reads an in-bounds voxel."""
    di, hi, wi = np.meshgrid(np.arange(d), np.arange(h), np.arange(w), indexing="ij")
    out = []
    for dd in (-1, 0, 1):
        for dh in (-1, 0, 1):
            for dw in (-1, 0, 1):
                ok = ((di + dd >= 0) & (di + dd < d) &
                      (hi + dh >= 0) & (hi + dh < h) &
                      (wi + dw >= 0) & (wi + dw < w))
                out.append(ok.reshape(1, -1))
    return jnp.asarray(np.stack(out).astype(np.float32))


def conv_path(x_cs, kp, d, h, w):
    n, c, s = x_cs.shape
    lp = ((h * w + w + 1 + 127) // 128) * 128        # lane-aligned halo margin >= max |shift|
    stile = min(s, _S_TILE)
    masks = _tap_masks(d, h, w)
    kernel = functools.partial(_conv_path_kernel, d=d, h=h, w=w, c=c, lp=lp, s_tile=stile)

    vec = pl.BlockSpec((c, 1), lambda i: (0, 0))
    wsp = pl.BlockSpec((c, 27 * c), lambda i: (0, 0))
    act = pl.BlockSpec((1, c, s), lambda i: (i, 0, 0))
    msp = pl.BlockSpec((27, 1, s), lambda i: (0, 0, 0))
    return pl.pallas_call(
        kernel,
        out_shape=jax.ShapeDtypeStruct((n, c, s), x_cs.dtype),
        grid=(n,),
        in_specs=[act, msp,
                  vec, vec, wsp, vec,
                  vec, vec, wsp, vec,
                  vec, vec, pl.BlockSpec((c, c), lambda i: (0, 0)), vec],
        out_specs=act,
        scratch_shapes=[
            pltpu.VMEM((c, s + 2 * lp), jnp.float32),       # flat zero-margined activation
            pltpu.VMEM((27 * c, stile), _MATMUL_DTYPE),     # im2col slab (bf16, S-chunked)
            pltpu.VMEM((c, s), jnp.float32),                # conv accumulator
        ],
        compiler_params=pltpu.CompilerParams(
            dimension_semantics=("parallel",),
            vmem_limit_bytes=_VMEM_LIMIT),
    )(x_cs, masks,
      kp["bn1_s"], kp["bn1_h"], kp["w1"], kp["b1"],
      kp["bn2_s"], kp["bn2_h"], kp["w2"], kp["b2"],
      kp["bn3_s"], kp["bn3_h"], kp["w3"], kp["b3"])


# ---------------------------------------------------------------------------
# Right branch: fused windowed-attention kernel, Wb windows per grid step.
#   LayerNorm(norm_attn) -> +pos_embed -> MHSA (qkv, SDPA, proj) -> LayerNorm(norm_ssm).
# Windows are channels-last (NW, vol, C); at production channel counts (>=128) this
# layout is lane-dense for the LN / elementwise work and needs no in-kernel transposes.
# ---------------------------------------------------------------------------
def _window_attn_kernel(xw_ref, lag_ref, lab_ref, pos_ref,
                        wqkv_ref, bqkv_ref, wp_ref, bp_ref,
                        lsg_ref, lsb_ref, o_ref, *, c, nheads, wb, vol):
    hd = c // nheads
    scale = float(hd) ** -0.5
    n = wb * vol

    x = xw_ref[...].astype(jnp.float32)                           # (Wb, vol, C)
    mu = jnp.mean(x, axis=-1, keepdims=True)
    xc = x - mu
    var = jnp.mean(xc * xc, axis=-1, keepdims=True)
    xn = xc * jax.lax.rsqrt(var + LN_EPS) * lag_ref[...] + lab_ref[...]
    hin = (xn + pos_ref[...][None]).reshape(n, c)                 # +pos, flatten windows

    qkv = jnp.dot(hin.astype(_MATMUL_DTYPE), wqkv_ref[...],
                  preferred_element_type=jnp.float32) + bqkv_ref[...]   # (Wb*vol, 3C)

    y = jnp.zeros((n, c), jnp.float32)
    for i in range(nheads):
        q = (qkv[:, i * hd:(i + 1) * hd] * scale).reshape(wb, vol, hd)
        k = qkv[:, c + i * hd: c + (i + 1) * hd].reshape(wb, vol, hd)
        v = qkv[:, 2 * c + i * hd: 2 * c + (i + 1) * hd].reshape(wb, vol, hd)
        s = jnp.einsum('bqd,bkd->bqk', q.astype(_MATMUL_DTYPE), k.astype(_MATMUL_DTYPE),
                       preferred_element_type=jnp.float32)        # (Wb, vol, vol)
        s = s - jnp.max(s, axis=-1, keepdims=True)
        e = jnp.exp(s)
        p = e * pl.reciprocal(jnp.sum(e, axis=-1, keepdims=True), approx=True)
        oh = jnp.einsum('bqk,bkd->bqd', p.astype(_MATMUL_DTYPE), v.astype(_MATMUL_DTYPE),
                        preferred_element_type=jnp.float32)       # (Wb, vol, hd)
        # proj folded per head: concat_h(o_h) @ Wp == sum_h o_h @ Wp[h]
        y = y + jnp.dot(oh.reshape(n, hd).astype(_MATMUL_DTYPE), wp_ref[i],
                        preferred_element_type=jnp.float32)
    y = y + bp_ref[...]

    mu2 = jnp.mean(y, axis=-1, keepdims=True)
    yc = y - mu2
    var2 = jnp.mean(yc * yc, axis=-1, keepdims=True)
    yn = yc * jax.lax.rsqrt(var2 + LN_EPS) * lsg_ref[...] + lsb_ref[...]
    # TODO(synk): SS3D (self.ssm) has no definition in the spec -> identity here.
    o_ref[...] = yn.reshape(wb, vol, c).astype(o_ref.dtype)


def _pick_wb(n_windows, target=8):
    wb = 1
    for cand in range(1, min(n_windows, target) + 1):
        if n_windows % cand == 0:
            wb = cand
    return wb


def window_attention(xw, ap, num_heads):
    nw_total, vol, ch = xw.shape
    wb = _pick_wb(nw_total)
    kernel = functools.partial(_window_attn_kernel, c=ch, nheads=num_heads, wb=wb, vol=vol)
    win = pl.BlockSpec((wb, vol, ch), lambda i: (i, 0, 0))

    def full(shape):
        return pl.BlockSpec(shape, lambda i, _s=shape: tuple(0 for _ in _s))

    return pl.pallas_call(
        kernel,
        out_shape=jax.ShapeDtypeStruct((nw_total, vol, ch), xw.dtype),
        grid=(nw_total // wb,),
        in_specs=[win,
                  full((1, ch)), full((1, ch)),
                  full((vol, ch)),
                  full((ch, 3 * ch)), full((1, 3 * ch)),
                  full((num_heads, ch // num_heads, ch)), full((1, ch)),
                  full((1, ch)), full((1, ch))],
        out_specs=win,
        compiler_params=pltpu.CompilerParams(
            dimension_semantics=("parallel",),
            vmem_limit_bytes=_VMEM_LIMIT),
    )(xw, ap["ln_a_g"], ap["ln_a_b"], ap["pos"], ap["wqkv"], ap["bqkv"],
      ap["wproj"], ap["bproj"], ap["ln_s_g"], ap["ln_s_b"])


# ---------------------------------------------------------------------------
# Parameter preparation / init and the public forward pass.
# ---------------------------------------------------------------------------
def _prep_conv_params(p):
    c = p["b1"].shape[0]

    def bn_fold(g, b, m, v):  # eval-mode BN -> per-channel scale / shift (f32 columns)
        sc = g / jnp.sqrt(v + BN_EPS)
        return sc.reshape(c, 1), (b - m * sc).reshape(c, 1)

    def conv_w(wk):  # (3,3,3,Cin,Cout) -> (Cout, 27*Cin) bf16, col order (kd,kh,kw,cin)
        cout = wk.shape[4]
        return jnp.transpose(wk, (4, 0, 1, 2, 3)).reshape(cout, -1).astype(_MATMUL_DTYPE)

    bn1_s, bn1_h = bn_fold(p["bn1_g"], p["bn1_b"], p["bn1_m"], p["bn1_v"])
    bn2_s, bn2_h = bn_fold(p["bn2_g"], p["bn2_b"], p["bn2_m"], p["bn2_v"])
    bn3_s, bn3_h = bn_fold(p["bn3_g"], p["bn3_b"], p["bn3_m"], p["bn3_v"])
    return {
        "bn1_s": bn1_s, "bn1_h": bn1_h,
        "bn2_s": bn2_s, "bn2_h": bn2_h,
        "bn3_s": bn3_s, "bn3_h": bn3_h,
        "w1": conv_w(p["w1"]), "b1": p["b1"].reshape(c, 1),
        "w2": conv_w(p["w2"]), "b2": p["b2"].reshape(c, 1),
        "w3": p["w3"].T.astype(_MATMUL_DTYPE), "b3": p["b3"].reshape(c, 1),
    }


def _prep_attn_params(p, num_heads):
    ch = p["ln_a_g"].shape[0]
    hd = ch // num_heads
    return {
        "ln_a_g": p["ln_a_g"].reshape(1, ch), "ln_a_b": p["ln_a_b"].reshape(1, ch),
        "pos": p["pos"].astype(jnp.float32),
        "wqkv": p["wqkv"].astype(_MATMUL_DTYPE),
        "bqkv": p["bqkv"].reshape(1, 3 * ch),
        "wproj": p["wproj"].astype(_MATMUL_DTYPE).reshape(num_heads, hd, ch),
        "bproj": p["bproj"].reshape(1, ch),
        "ln_s_g": p["ln_s_g"].reshape(1, ch), "ln_s_b": p["ln_s_b"].reshape(1, ch),
    }


def ss_conv_ssm_3d_forward(x, p, *, window_size=(4, 4, 4), num_heads=4):
    """Pallas forward of SS_Conv_SSM_3D (input / output NCDHW)."""
    b, cfull, d, h, w = x.shape
    assert cfull % 2 == 0
    ch = cfull // 2
    assert ch % num_heads == 0
    s = d * h * w

    # ---- left branch: fused conv path ----
    x_left = x[:, :ch].reshape(b, ch, s)
    left = conv_path(x_left, _prep_conv_params(p), d, h, w)          # (B, ch, S) f32

    # ---- right branch: LN + windowed MHSA + LN ----
    wd, wh, ww = window_size
    pd, ph, pw = (-d) % wd, (-h) % wh, (-w) % ww
    xr = x[:, ch:]
    if pd or ph or pw:
        xr = jnp.pad(xr, ((0, 0), (0, 0), (0, pd), (0, ph), (0, pw)))
    dp, hp_, wp_ = d + pd, h + ph, w + pw
    nd, nh, nw = dp // wd, hp_ // wh, wp_ // ww
    vol = wd * wh * ww

    # single wrapper transpose -> channels-last windows (NW, vol, C)
    t = xr.reshape(b, ch, nd, wd, nh, wh, nw, ww)
    t = jnp.transpose(t, (0, 2, 4, 6, 3, 5, 7, 1))
    xw = t.reshape(b * nd * nh * nw, vol, ch)

    ow = window_attention(xw, _prep_attn_params(p, num_heads), num_heads)

    y = ow.reshape(b, nd, nh, nw, wd, wh, ww, ch)
    y = jnp.transpose(y, (0, 7, 1, 4, 2, 5, 3, 6)).reshape(b, ch, dp, hp_, wp_)
    right = y[:, :, :d, :h, :w].reshape(b, ch, s)

    # ---- channel shuffle (groups=2) of cat(left, right) == interleave, + residual x ----
    out = jnp.stack([left, right], axis=2).reshape(b, cfull, d, h, w)
    return out + x


def init_params(key, hidden_dim, window_volume):
    ch = hidden_dim // 2
    ks = iter(jax.random.split(key, 32))

    def nrm(shape, std=0.1):
        return std * jax.random.normal(next(ks), shape, jnp.float32)

    p = {}
    for i in (1, 2, 3):
        p[f"bn{i}_g"] = 1.0 + nrm((ch,))
        p[f"bn{i}_b"] = nrm((ch,))
        p[f"bn{i}_m"] = nrm((ch,))
        p[f"bn{i}_v"] = 0.8 + 0.4 * jax.random.uniform(next(ks), (ch,), jnp.float32)
    p["w1"] = nrm((3, 3, 3, ch, ch)); p["b1"] = nrm((ch,), 0.05)
    p["w2"] = nrm((3, 3, 3, ch, ch)); p["b2"] = nrm((ch,), 0.05)
    p["w3"] = nrm((ch, ch));          p["b3"] = nrm((ch,), 0.05)
    p["ln_a_g"] = 1.0 + nrm((ch,)); p["ln_a_b"] = nrm((ch,))
    p["ln_s_g"] = 1.0 + nrm((ch,)); p["ln_s_b"] = nrm((ch,))
    p["pos"] = nrm((window_volume, ch), 0.02)
    p["wqkv"] = nrm((ch, 3 * ch))
    p["bqkv"] = jnp.zeros((3 * ch,), jnp.float32)      # qkv_bias=False in the module
    p["wproj"] = nrm((ch, ch)); p["bproj"] = nrm((ch,), 0.05)
    return p


# ---------------------------------------------------------------------------
# Pure-JAX reference (correctness check only).
# ---------------------------------------------------------------------------
def _ref_ln(t, g, b):
    mu = jnp.mean(t, axis=-1, keepdims=True)
    var = jnp.mean((t - mu) ** 2, axis=-1, keepdims=True)
    return (t - mu) * jax.lax.rsqrt(var + LN_EPS) * g + b


def ref_forward(x, p, window_size, num_heads):
    b, cfull, d, h, w = x.shape
    ch = cfull // 2
    hi = jax.lax.Precision.HIGHEST

    def bn(t, i):
        g, be, m, v = p[f"bn{i}_g"], p[f"bn{i}_b"], p[f"bn{i}_m"], p[f"bn{i}_v"]
        sc = g / jnp.sqrt(v + BN_EPS)
        sh = be - m * sc
        return t * sc[None, :, None, None, None] + sh[None, :, None, None, None]

    def conv3(t, wk, bias):
        w_oidhw = jnp.transpose(wk, (4, 3, 0, 1, 2))
        y = jax.lax.conv_general_dilated(
            t, w_oidhw, (1, 1, 1), [(1, 1)] * 3,
            dimension_numbers=("NCDHW", "OIDHW", "NCDHW"), precision=hi)
        return y + bias[None, :, None, None, None]

    # left (conv path)
    t = bn(x[:, :ch], 1)
    t = conv3(t, p["w1"], p["b1"])
    t = jnp.maximum(bn(t, 2), 0.0)
    t = conv3(t, p["w2"], p["b2"])
    t = jnp.maximum(bn(t, 3), 0.0)
    t = jnp.einsum("ncdhw,ck->nkdhw", t, p["w3"], precision=hi)
    left = jnp.maximum(t + p["b3"][None, :, None, None, None], 0.0)

    # right (windowed attention)
    wd, wh, ww = window_size
    pd, ph, pw = (-d) % wd, (-h) % wh, (-w) % ww
    xr = x[:, ch:]
    if pd or ph or pw:
        xr = jnp.pad(xr, ((0, 0), (0, 0), (0, pd), (0, ph), (0, pw)))
    dp, hpd, wpd = d + pd, h + ph, w + pw
    nd, nh, nw = dp // wd, hpd // wh, wpd // ww
    vol = wd * wh * ww
    xcl = jnp.transpose(xr, (0, 2, 3, 4, 1))
    xn = _ref_ln(xcl, p["ln_a_g"], p["ln_a_b"])
    win = xn.reshape(b, nd, wd, nh, wh, nw, ww, ch)
    win = jnp.transpose(win, (0, 1, 3, 5, 2, 4, 6, 7)).reshape(-1, vol, ch)
    a_in = win + p["pos"][None]
    qkv = jnp.einsum("nvc,ck->nvk", a_in, p["wqkv"], precision=hi) + p["bqkv"]
    hd = ch // num_heads
    qkv = qkv.reshape(-1, vol, 3, num_heads, hd)
    q = jnp.transpose(qkv[:, :, 0], (0, 2, 1, 3))
    k = jnp.transpose(qkv[:, :, 1], (0, 2, 1, 3))
    v = jnp.transpose(qkv[:, :, 2], (0, 2, 1, 3))
    s = jnp.einsum("bhqd,bhkd->bhqk", q, k, precision=hi) * (float(hd) ** -0.5)
    s = s - jnp.max(s, axis=-1, keepdims=True)
    e = jnp.exp(s)
    attn = e / jnp.sum(e, axis=-1, keepdims=True)
    o = jnp.einsum("bhqk,bhkd->bhqd", attn, v, precision=hi)
    o = jnp.transpose(o, (0, 2, 1, 3)).reshape(-1, vol, ch)
    o = jnp.einsum("nvc,ck->nvk", o, p["wproj"], precision=hi) + p["bproj"]
    y = o.reshape(b, nd, nh, nw, wd, wh, ww, ch)
    y = jnp.transpose(y, (0, 7, 1, 4, 2, 5, 3, 6)).reshape(b, ch, dp, hpd, wpd)
    y = y[:, :, :d, :h, :w]
    yn = _ref_ln(jnp.transpose(y, (0, 2, 3, 4, 1)), p["ln_s_g"], p["ln_s_b"])
    right = jnp.transpose(yn, (0, 4, 1, 2, 3))          # SS3D: identity (not in spec)

    out = jnp.concatenate([left, right], axis=1)
    out = out.reshape(b, 2, ch, d, h, w)
    out = jnp.transpose(out, (0, 2, 1, 3, 4, 5)).reshape(b, cfull, d, h, w)
    return out + x


if __name__ == "__main__":
    key = jax.random.PRNGKey(0)
    kx, kp = jax.random.split(key)

    # (N, C, D, H, W) = (2, 32, 8, 8, 8): hidden_dim=32 -> dim_half=16,
    # window_size=(4,4,4) -> winVol=64, num_heads=4 -> head_dim=4.
    B, C, D, H, W = 2, 32, 8, 8, 8
    window_size = (4, 4, 4)
    num_heads = 4

    x = jax.random.normal(kx, (B, C, D, H, W), jnp.float32)
    params = init_params(kp, C, window_size[0] * window_size[1] * window_size[2])

    out = ss_conv_ssm_3d_forward(x, params, window_size=window_size, num_heads=num_heads)
    jax.block_until_ready(out)

    ref = ref_forward(x, params, window_size, num_heads)
    err = float(jnp.max(jnp.abs(out - ref)) / (jnp.max(jnp.abs(ref)) + 1e-6))

    assert out.shape == (B, C, D, H, W), out.shape
    assert err < 5e-2, f"mismatch vs reference: rel err {err}"
    print("KERNEL_OK")
</pallas_src>

<mosaic_0001>
module attributes {stable_mosaic.version = 11 : i64} {
  func.func @_conv_path_kernel(%arg0: i32, %arg1: memref<1x16x512xf32, #tpu.memory_space<vmem>>, %arg2: memref<27x1x512xf32, #tpu.memory_space<vmem>>, %arg3: memref<16x1xf32, #tpu.memory_space<vmem>>, %arg4: memref<16x1xf32, #tpu.memory_space<vmem>>, %arg5: memref<16x432xbf16, #tpu.memory_space<vmem>>, %arg6: memref<16x1xf32, #tpu.memory_space<vmem>>, %arg7: memref<16x1xf32, #tpu.memory_space<vmem>>, %arg8: memref<16x1xf32, #tpu.memory_space<vmem>>, %arg9: memref<16x432xbf16, #tpu.memory_space<vmem>>, %arg10: memref<16x1xf32, #tpu.memory_space<vmem>>, %arg11: memref<16x1xf32, #tpu.memory_space<vmem>>, %arg12: memref<16x1xf32, #tpu.memory_space<vmem>>, %arg13: memref<16x16xbf16, #tpu.memory_space<vmem>>, %arg14: memref<16x1xf32, #tpu.memory_space<vmem>>, %arg15: memref<1x16x512xf32, #tpu.memory_space<vmem>>, %arg16: memref<16x768xf32, #tpu.memory_space<vmem>>, %arg17: memref<432x512xbf16, #tpu.memory_space<vmem>>, %arg18: memref<16x512xf32, #tpu.memory_space<vmem>>) attributes {dimension_semantics = [#tpu.dimension_semantics<parallel>], iteration_bounds = array<i64: 2>, scalar_prefetch = 0 : i64, scratch_operands = 3 : i64, tpu.core_type = #tpu.core_type<tc>, window_params = [{transform_indices = @transform_0, window_bounds = array<i64: 1, 16, 512>}, {pipeline_mode = #tpu.pipeline_mode<synchronous>, transform_indices = @transform_1, window_bounds = array<i64: 27, 1, 512>}, {pipeline_mode = #tpu.pipeline_mode<synchronous>, transform_indices = @transform_2, window_bounds = array<i64: 16, 1>}, {pipeline_mode = #tpu.pipeline_mode<synchronous>, transform_indices = @transform_3, window_bounds = array<i64: 16, 1>}, {pipeline_mode = #tpu.pipeline_mode<synchronous>, transform_indices = @transform_4, window_bounds = array<i64: 16, 432>}, {pipeline_mode = #tpu.pipeline_mode<synchronous>, transform_indices = @transform_5, window_bounds = array<i64: 16, 1>}, {pipeline_mode = #tpu.pipeline_mode<synchronous>, transform_indices = @transform_6, window_bounds = array<i64: 16, 1>}, {pipeline_mode = #tpu.pipeline_mode<synchronous>, transform_indices = @transform_7, window_bounds = array<i64: 16, 1>}, {pipeline_mode = #tpu.pipeline_mode<synchronous>, transform_indices = @transform_8, window_bounds = array<i64: 16, 432>}, {pipeline_mode = #tpu.pipeline_mode<synchronous>, transform_indices = @transform_9, window_bounds = array<i64: 16, 1>}, {pipeline_mode = #tpu.pipeline_mode<synchronous>, transform_indices = @transform_10, window_bounds = array<i64: 16, 1>}, {pipeline_mode = #tpu.pipeline_mode<synchronous>, transform_indices = @transform_11, window_bounds = array<i64: 16, 1>}, {pipeline_mode = #tpu.pipeline_mode<synchronous>, transform_indices = @transform_12, window_bounds = array<i64: 16, 16>}, {pipeline_mode = #tpu.pipeline_mode<synchronous>, transform_indices = @transform_13, window_bounds = array<i64: 16, 1>}, {transform_indices = @transform_14, window_bounds = array<i64: 1, 16, 512>}]} {
    %cst = arith.constant 0.000000e+00 : f32
    %0 = vector.broadcast %cst : f32 to vector<16x128xf32>
    %c0 = arith.constant 0 : index
    %c0_0 = arith.constant 0 : index
    %1 = vector.load %arg16[%c0, %c0_0] : memref<16x768xf32, #tpu.memory_space<vmem>>, vector<16x128xf32>
    tpu.vector_store %arg16[%c0, %c0_0], %0 {strides = array<i32>} : memref<16x768xf32, #tpu.memory_space<vmem>>, vector<16x128xf32>,
    %cst_1 = arith.constant 0.000000e+00 : f32
    %2 = vector.broadcast %cst_1 : f32 to vector<16x128xf32>
    %c0_2 = arith.constant 0 : index
    %c640 = arith.constant 640 : index
    %3 = vector.load %arg16[%c0_2, %c640] : memref<16x768xf32, #tpu.memory_space<vmem>>, vector<16x128xf32>
    tpu.vector_store %arg16[%c0_2, %c640], %2 {strides = array<i32>} : memref<16x768xf32, #tpu.memory_space<vmem>>, vector<16x128xf32>,
    %c0_3 = arith.constant 0 : index
    %c0_4 = arith.constant 0 : index
    %c0_5 = arith.constant 0 : index
    %4 = vector.load %arg1[%c0_3, %c0_4, %c0_5] : memref<1x16x512xf32, #tpu.memory_space<vmem>>, vector<1x16x512xf32>
    %5 = vector.shape_cast %4 : vector<1x16x512xf32> to vector<16x512xf32>
    %c0_6 = arith.constant 0 : index
    %c0_7 = arith.constant 0 : index
    %6 = vector.load %arg3[%c0_6, %c0_7] : memref<16x1xf32, #tpu.memory_space<vmem>>, vector<16x1xf32>
    %7 = vector.broadcast %6 : vector<16x1xf32> to vector<16x512xf32>
    %8 = arith.mulf %5, %7 : vector<16x512xf32>
    %c0_8 = arith.constant 0 : index
    %c0_9 = arith.constant 0 : index
    %9 = vector.load %arg4[%c0_8, %c0_9] : memref<16x1xf32, #tpu.memory_space<vmem>>, vector<16x1xf32>
    %10 = vector.broadcast %9 : vector<16x1xf32> to vector<16x512xf32>
    %11 = arith.addf %8, %10 : vector<16x512xf32>
    %c0_10 = arith.constant 0 : index
    %c0_11 = arith.constant 0 : index
    %12 = vector.load %arg6[%c0_10, %c0_11] : memref<16x1xf32, #tpu.memory_space<vmem>>, vector<16x1xf32>
    %c0_12 = arith.constant 0 : index
    %c128 = arith.constant 128 : index
    %13 = vector.load %arg16[%c0_12, %c128] : memref<16x768xf32, #tpu.memory_space<vmem>>, vector<16x512xf32>
    tpu.vector_store %arg16[%c0_12, %c128], %11 {strides = array<i32>} : memref<16x768xf32, #tpu.memory_space<vmem>>, vector<16x512xf32>,
    %c0_13 = arith.constant 0 : index
    %c55 = arith.constant 55 : index
    %14 = vector.load %arg16[%c0_13, %c55] : memref<16x768xf32, #tpu.memory_space<vmem>>, vector<16x512xf32>
    %c0_14 = arith.constant 0 : index
    %c0_15 = arith.constant 0 : index
    %c0_16 = arith.constant 0 : index
    %15 = vector.load %arg2[%c0_14, %c0_15, %c0_16] : memref<27x1x512xf32, #tpu.memory_space<vmem>>, vector<1x1x512xf32>
    %16 = vector.shape_cast %15 : vector<1x1x512xf32> to vector<1x512xf32>
    %17 = vector.broadcast %16 : vector<1x512xf32> to vector<16x512xf32>
    %18 = arith.mulf %14, %17 : vector<16x512xf32>
    %19 = arith.truncf %18 : vector<16x512xf32> to vector<16x512xbf16>
    %c0_17 = arith.constant 0 : index
    %c0_18 = arith.constant 0 : index
    %20 = vector.load %arg17[%c0_17, %c0_18] : memref<432x512xbf16, #tpu.memory_space<vmem>>, vector<16x512xbf16>
    tpu.vector_store %arg17[%c0_17, %c0_18], %19 {strides = array<i32>} : memref<432x512xbf16, #tpu.memory_space<vmem>>, vector<16x512xbf16>,
    %c0_19 = arith.constant 0 : index
    %c56 = arith.constant 56 : index
    %21 = vector.load %arg16[%c0_19, %c56] : memref<16x768xf32, #tpu.memory_space<vmem>>, vector<16x512xf32>
    %c1 = arith.constant 1 : index
    %c0_20 = arith.constant 0 : index
    %c0_21 = arith.constant 0 : index
    %22 = vector.load %arg2[%c1, %c0_20, %c0_21] : memref<27x1x512xf32, #tpu.memory_space<vmem>>, vector<1x1x512xf32>
    %23 = vector.shape_cast %22 : vector<1x1x512xf32> to vector<1x512xf32>
    %24 = vector.broadcast %23 : vector<1x512xf32> to vector<16x512xf32>
    %25 = arith.mulf %21, %24 : vector<16x512xf32>
    %26 = arith.truncf %25 : vector<16x512xf32> to vector<16x512xbf16>
    %c16 = arith.constant 16 : index
    %c0_22 = arith.constant 0 : index
    %27 = vector.load %arg17[%c16, %c0_22] : memref<432x512xbf16, #tpu.memory_space<vmem>>, vector<16x512xbf16>
    tpu.vector_store %arg17[%c16, %c0_22], %26 {strides = array<i32>} : memref<432x512xbf16, #tpu.memory_space<vmem>>, vector<16x512xbf16>,
    %c0_23 = arith.constant 0 : index
    %c57 = arith.constant 57 : index
    %28 = vector.load %arg16[%c0_23, %c57] : memref<16x768xf32, #tpu.memory_space<vmem>>, vector<16x512xf32>
    %c2 = arith.constant 2 : index
    %c0_24 = arith.constant 0 : index
    %c0_25 = arith.constant 0 : index
    %29 = vector.load %arg2[%c2, %c0_24, %c0_25] : memref<27x1x512xf32, #tpu.memory_space<vmem>>, vector<1x1x512xf32>
    %30 = vector.shape_cast %29 : vector<1x1x512xf32> to vector<1x512xf32>
    %31 = vector.broadcast %30 : vector<1x512xf32> to vector<16x512xf32>
    %32 = arith.mulf %28, %31 : vector<16x512xf32>
    %33 = arith.truncf %32 : vector<16x512xf32> to vector<16x512xbf16>
    %c32 = arith.constant 32 : index
    %c0_26 = arith.constant 0 : index
    %34 = vector.load %arg17[%c32, %c0_26] : memref<432x512xbf16, #tpu.memory_space<vmem>>, vector<16x512xbf16>
    tpu.vector_store %arg17[%c32, %c0_26], %33 {strides = array<i32>} : memref<432x512xbf16, #tpu.memory_space<vmem>>, vector<16x512xbf16>,
    %c0_27 = arith.constant 0 : index
    %c63 = arith.constant 63 : index
    %35 = vector.load %arg16[%c0_27, %c63] : memref<16x768xf32, #tpu.memory_space<vmem>>, vector<16x512xf32>
    %c3 = arith.constant 3 : index
    %c0_28 = arith.constant 0 : index
    %c0_29 = arith.constant 0 : index
    %36 = vector.load %arg2[%c3, %c0_28, %c0_29] : memref<27x1x512xf32, #tpu.memory_space<vmem>>, vector<1x1x512xf32>
    %37 = vector.shape_cast %36 : vector<1x1x512xf32> to vector<1x512xf32>
    %38 = vector.broadcast %37 : vector<1x512xf32> to vector<16x512xf32>
    %39 = arith.mulf %35, %38 : vector<16x512xf32>
    %40 = arith.truncf %39 : vector<16x512xf32> to vector<16x512xbf16>
    %c48 = arith.constant 48 : index
    %c0_30 = arith.constant 0 : index
    %41 = vector.load %arg17[%c48, %c0_30] : memref<432x512xbf16, #tpu.memory_space<vmem>>, vector<16x512xbf16>
    tpu.vector_store %arg17[%c48, %c0_30], %40 {strides = array<i32>} : memref<432x512xbf16, #tpu.memory_space<vmem>>, vector<16x512xbf16>,
    %c0_31 = arith.constant 0 : index
    %c64 = arith.constant 64 : index
    %42 = vector.load %arg16[%c0_31, %c64] : memref<16x768xf32, #tpu.memory_space<vmem>>, vector<16x512xf32>
    %c4 = arith.constant 4 : index
    %c0_32 = arith.constant 0 : index
    %c0_33 = arith.constant 0 : index
    %43 = vector.load %arg2[%c4, %c0_32, %c0_33] : memref<27x1x512xf32, #tpu.memory_space<vmem>>, vector<1x1x512xf32>
    %44 = vector.shape_cast %43 : vector<1x1x512xf32> to vector<1x512xf32>
    %45 = vector.broadcast %44 : vector<1x512xf32> to vector<16x512xf32>
    %46 = arith.mulf %42, %45 : vector<16x512xf32>
    %47 = arith.truncf %46 : vector<16x512xf32> to vector<16x512xbf16>
    %c64_34 = arith.constant 64 : index
    %c0_35 = arith.constant 0 : index
    %48 = vector.load %arg17[%c64_34, %c0_35] : memref<432x512xbf16, #tpu.memory_space<vmem>>, vector<16x512xbf16>
    tpu.vector_store %arg17[%c64_34, %c0_35], %47 {strides = array<i32>} : memref<432x512xbf16, #tpu.memory_space<vmem>>, vector<16x512xbf16>,
    %c0_36 = arith.constant 0 : index
    %c65 = arith.constant 65 : index
    %49 = vector.load %arg16[%c0_36, %c65] : memref<16x768xf32, #tpu.memory_space<vmem>>, vector<16x512xf32>
    %c5 = arith.constant 5 : index
    %c0_37 = arith.constant 0 : index
    %c0_38 = arith.constant 0 : index
    %50 = vector.load %arg2[%c5, %c0_37, %c0_38] : memref<27x1x512xf32, #tpu.memory_space<vmem>>, vector<1x1x512xf32>
    %51 = vector.shape_cast %50 : vector<1x1x512xf32> to vector<1x512xf32>
    %52 = vector.broadcast %51 : vector<1x512xf32> to vector<16x512xf32>
    %53 = arith.mulf %49, %52 : vector<16x512xf32>
    %54 = arith.truncf %53 : vector<16x512xf32> to vector<16x512xbf16>
    %c80 = arith.constant 80 : index
    %c0_39 = arith.constant 0 : index
    %55 = vector.load %arg17[%c80, %c0_39] : memref<432x512xbf16, #tpu.memory_space<vmem>>, vector<16x512xbf16>
    tpu.vector_store %arg17[%c80, %c0_39], %54 {strides = array<i32>} : memref<432x512xbf16, #tpu.memory_space<vmem>>, vector<16x512xbf16>,
    %c0_40 = arith.constant 0 : index
    %c71 = arith.constant 71 : index
    %56 = vector.load %arg16[%c0_40, %c71] : memref<16x768xf32, #tpu.memory_space<vmem>>, vector<16x512xf32>
    %c6 = arith.constant 6 : index
    %c0_41 = arith.constant 0 : index
    %c0_42 = arith.constant 0 : index
    %57 = vector.load %arg2[%c6, %c0_41, %c0_42] : memref<27x1x512xf32, #tpu.memory_space<vmem>>, vector<1x1x512xf32>
    %58 = vector.shape_cast %57 : vector<1x1x512xf32> to vector<1x512xf32>
    %59 = vector.broadcast %58 : vector<1x512xf32> to vector<16x512xf32>
    %60 = arith.mulf %56, %59 : vector<16x512xf32>
    %61 = arith.truncf %60 : vector<16x512xf32> to vector<16x512xbf16>
    %c96 = arith.constant 96 : index
    %c0_43 = arith.constant 0 : index
    %62 = vector.load %arg17[%c96, %c0_43] : memref<432x512xbf16, #tpu.memory_space<vmem>>, vector<16x512xbf16>
    tpu.vector_store %arg17[%c96, %c0_43], %61 {strides = array<i32>} : memref<432x512xbf16, #tpu.memory_space<vmem>>, vector<16x512xbf16>,
    %c0_44 = arith.constant 0 : index
    %c72 = arith.constant 72 : index
    %63 = vector.load %arg16[%c0_44, %c72] : memref<16x768xf32, #tpu.memory_space<vmem>>, vector<16x512xf32>
    %c7 = arith.constant 7 : index
    %c0_45 = arith.constant 0 : index
    %c0_46 = arith.constant 0 : index
    %64 = vector.load %arg2[%c7, %c0_45, %c0_46] : memref<27x1x512xf32, #tpu.memory_space<vmem>>, vector<1x1x512xf32>
    %65 = vector.shape_cast %64 : vector<1x1x512xf32> to vector<1x512xf32>
    %66 = vector.broadcast %65 : vector<1x512xf32> to vector<16x512xf32>
    %67 = arith.mulf %63, %66 : vector<16x512xf32>
    %68 = arith.truncf %67 : vector<16x512xf32> to vector<16x512xbf16>
    %c112 = arith.constant 112 : index
    %c0_47 = arith.constant 0 : index
    %69 = vector.load %arg17[%c112, %c0_47] : memref<432x512xbf16, #tpu.memory_space<vmem>>, vector<16x512xbf16>
    tpu.vector_store %arg17[%c112, %c0_47], %68 {strides = array<i32>} : memref<432x512xbf16, #tpu.memory_space<vmem>>, vector<16x512xbf16>,
    %c0_48 = arith.constant 0 : index
    %c73 = arith.constant 73 : index
    %70 = vector.load %arg16[%c0_48, %c73] : memref<16x768xf32, #tpu.memory_space<vmem>>, vector<16x512xf32>
    %c8 = arith.constant 8 : index
    %c0_49 = arith.constant 0 : index
    %c0_50 = arith.constant 0 : index
    %71 = vector.load %arg2[%c8, %c0_49, %c0_50] : memref<27x1x512xf32, #tpu.memory_space<vmem>>, vector<1x1x512xf32>
    %72 = vector.shape_cast %71 : vector<1x1x512xf32> to vector<1x512xf32>
    %73 = vector.broadcast %72 : vector<1x512xf32> to vector<16x512xf32>
    %74 = arith.mulf %70, %73 : vector<16x512xf32>
    %75 = arith.truncf %74 : vector<16x512xf32> to vector<16x512xbf16>
    %c128_51 = arith.constant 128 : index
    %c0_52 = arith.constant 0 : index
    %76 = vector.load %arg17[%c128_51, %c0_52] : memref<432x512xbf16, #tpu.memory_space<vmem>>, vector<16x512xbf16>
    tpu.vector_store %arg17[%c128_51, %c0_52], %75 {strides = array<i32>} : memref<432x512xbf16, #tpu.memory_space<vmem>>, vector<16x512xbf16>,
    %c0_53 = arith.constant 0 : index
    %c119 = arith.constant 119 : index
    %77 = vector.load %arg16[%c0_53, %c119] : memref<16x768xf32, #tpu.memory_space<vmem>>, vector<16x512xf32>
    %c9 = arith.constant 9 : index
    %c0_54 = arith.constant 0 : index
    %c0_55 = arith.constant 0 : index
    %78 = vector.load %arg2[%c9, %c0_54, %c0_55] : memref<27x1x512xf32, #tpu.memory_space<vmem>>, vector<1x1x512xf32>
    %79 = vector.shape_cast %78 : vector<1x1x512xf32> to vector<1x512xf32>
    %80 = vector.broadcast %79 : vector<1x512xf32> to vector<16x512xf32>
    %81 = arith.mulf %77, %80 : vector<16x512xf32>
    %82 = arith.truncf %81 : vector<16x512xf32> to vector<16x512xbf16>
    %c144 = arith.constant 144 : index
    %c0_56 = arith.constant 0 : index
    %83 = vector.load %arg17[%c144, %c0_56] : memref<432x512xbf16, #tpu.memory_space<vmem>>, vector<16x512xbf16>
    tpu.vector_store %arg17[%c144, %c0_56], %82 {strides = array<i32>} : memref<432x512xbf16, #tpu.memory_space<vmem>>, vector<16x512xbf16>,
    %c0_57 = arith.constant 0 : index
    %c120 = arith.constant 120 : index
    %84 = vector.load %arg16[%c0_57, %c120] : memref<16x768xf32, #tpu.memory_space<vmem>>, vector<16x512xf32>
    %c10 = arith.constant 10 : index
    %c0_58 = arith.constant 0 : index
    %c0_59 = arith.constant 0 : index
    %85 = vector.load %arg2[%c10, %c0_58, %c0_59] : memref<27x1x512xf32, #tpu.memory_space<vmem>>, vector<1x1x512xf32>
    %86 = vector.shape_cast %85 : vector<1x1x512xf32> to vector<1x512xf32>
    %87 = vector.broadcast %86 : vector<1x512xf32> to vector<16x512xf32>
    %88 = arith.mulf %84, %87 : vector<16x512xf32>
    %89 = arith.truncf %88 : vector<16x512xf32> to vector<16x512xbf16>
    %c160 = arith.constant 160 : index
    %c0_60 = arith.constant 0 : index
    %90 = vector.load %arg17[%c160, %c0_60] : memref<432x512xbf16, #tpu.memory_space<vmem>>, vector<16x512xbf16>
    tpu.vector_store %arg17[%c160, %c0_60], %89 {strides = array<i32>} : memref<432x512xbf16, #tpu.memory_space<vmem>>, vector<16x512xbf16>,
    %c0_61 = arith.constant 0 : index
    %c121 = arith.constant 121 : index
    %91 = vector.load %arg16[%c0_61, %c121] : memref<16x768xf32, #tpu.memory_space<vmem>>, vector<16x512xf32>
    %c11 = arith.constant 11 : index
    %c0_62 = arith.constant 0 : index
    %c0_63 = arith.constant 0 : index
    %92 = vector.load %arg2[%c11, %c0_62, %c0_63] : memref<27x1x512xf32, #tpu.memory_space<vmem>>, vector<1x1x512xf32>
    %93 = vector.shape_cast %92 : vector<1x1x512xf32> to vector<1x512xf32>
    %94 = vector.broadcast %93 : vector<1x512xf32> to vector<16x512xf32>
    %95 = arith.mulf %91, %94 : vector<16x512xf32>
    %96 = arith.truncf %95 : vector<16x512xf32> to vector<16x512xbf16>
    %c176 = arith.constant 176 : index
    %c0_64 = arith.constant 0 : index
    %97 = vector.load %arg17[%c176, %c0_64] : memref<432x512xbf16, #tpu.memory_space<vmem>>, vector<16x512xbf16>
    tpu.vector_store %arg17[%c176, %c0_64], %96 {strides = array<i32>} : memref<432x512xbf16, #tpu.memory_space<vmem>>, vector<16x512xbf16>,
    %c0_65 = arith.constant 0 : index
    %c127 = arith.constant 127 : index
    %98 = vector.load %arg16[%c0_65, %c127] : memref<16x768xf32, #tpu.memory_space<vmem>>, vector<16x512xf32>
    %c12 = arith.constant 12 : index
    %c0_66 = arith.constant 0 : index
    %c0_67 = arith.constant 0 : index
    %99 = vector.load %arg2[%c12, %c0_66, %c0_67] : memref<27x1x512xf32, #tpu.memory_space<vmem>>, vector<1x1x512xf32>
    %100 = vector.shape_cast %99 : vector<1x1x512xf32> to vector<1x512xf32>
    %101 = vector.broadcast %100 : vector<1x512xf32> to vector<16x512xf32>
    %102 = arith.mulf %98, %101 : vector<16x512xf32>
    %103 = arith.truncf %102 : vector<16x512xf32> to vector<16x512xbf16>
    %c192 = arith.constant 192 : index
    %c0_68 = arith.constant 0 : index
    %104 = vector.load %arg17[%c192, %c0_68] : memref<432x512xbf16, #tpu.memory_space<vmem>>, vector<16x512xbf16>
    tpu.vector_store %arg17[%c192, %c0_68], %103 {strides = array<i32>} : memref<432x512xbf16, #tpu.memory_space<vmem>>, vector<16x512xbf16>,
    %c0_69 = arith.constant 0 : index
    %c128_70 = arith.constant 128 : index
    %105 = vector.load %arg16[%c0_69, %c128_70] : memref<16x768xf32, #tpu.memory_space<vmem>>, vector<16x512xf32>
    %c13 = arith.constant 13 : index
    %c0_71 = arith.constant 0 : index
    %c0_72 = arith.constant 0 : index
    %106 = vector.load %arg2[%c13, %c0_71, %c0_72] : memref<27x1x512xf32, #tpu.memory_space<vmem>>, vector<1x1x512xf32>
    %107 = vector.shape_cast %106 : vector<1x1x512xf32> to vector<1x512xf32>
    %108 = vector.broadcast %107 : vector<1x512xf32> to vector<16x512xf32>
    %109 = arith.mulf %105, %108 : vector<16x512xf32>
    %110 = arith.truncf %109 : vector<16x512xf32> to vector<16x512xbf16>
    %c208 = arith.constant 208 : index
    %c0_73 = arith.constant 0 : index
    %111 = vector.load %arg17[%c208, %c0_73] : memref<432x512xbf16, #tpu.memory_space<vmem>>, vector<16x512xbf16>
    tpu.vector_store %arg17[%c208, %c0_73], %110 {strides = array<i32>} : memref<432x512xbf16, #tpu.memory_space<vmem>>, vector<16x512xbf16>,
    %c0_74 = arith.constant 0 : index
    %c129 = arith.constant 129 : index
    %112 = vector.load %arg16[%c0_74, %c129] : memref<16x768xf32, #tpu.memory_space<vmem>>, vector<16x512xf32>
    %c14 = arith.constant 14 : index
    %c0_75 = arith.constant 0 : index
    %c0_76 = arith.constant 0 : index
    %113 = vector.load %arg2[%c14, %c0_75, %c0_76] : memref<27x1x512xf32, #tpu.memory_space<vmem>>, vector<1x1x512xf32>
    %114 = vector.shape_cast %113 : vector<1x1x512xf32> to vector<1x512xf32>
    %115 = vector.broadcast %114 : vector<1x512xf32> to vector<16x512xf32>
    %116 = arith.mulf %112, %115 : vector<16x512xf32>
    %117 = arith.truncf %116 : vector<16x512xf32> to vector<16x512xbf16>
    %c224 = arith.constant 224 : index
    %c0_77 = arith.constant 0 : index
    %118 = vector.load %arg17[%c224, %c0_77] : memref<432x512xbf16, #tpu.memory_space<vmem>>, vector<16x512xbf16>
    tpu.vector_store %arg17[%c224, %c0_77], %117 {strides = array<i32>} : memref<432x512xbf16, #tpu.memory_space<vmem>>, vector<16x512xbf16>,
    %c0_78 = arith.constant 0 : index
    %c135 = arith.constant 135 : index
    %119 = vector.load %arg16[%c0_78, %c135] : memref<16x768xf32, #tpu.memory_space<vmem>>, vector<16x512xf32>
    %c15 = arith.constant 15 : index
    %c0_79 = arith.constant 0 : index
    %c0_80 = arith.constant 0 : index
    %120 = vector.load %arg2[%c15, %c0_79, %c0_80] : memref<27x1x512xf32, #tpu.memory_space<vmem>>, vector<1x1x512xf32>
    %121 = vector.shape_cast %120 : vector<1x1x512xf32> to vector<1x512xf32>
    %122 = vector.broadcast %121 : vector<1x512xf32> to vector<16x512xf32>
    %123 = arith.mulf %119, %122 : vector<16x512xf32>
    %124 = arith.truncf %123 : vector<16x512xf32> to vector<16x512xbf16>
    %c240 = arith.constant 240 : index
    %c0_81 = arith.constant 0 : index
    %125 = vector.load %arg17[%c240, %c0_81] : memref<432x512xbf16, #tpu.memory_space<vmem>>, vector<16x512xbf16>
    tpu.vector_store %arg17[%c240, %c0_81], %124 {strides = array<i32>} : memref<432x512xbf16, #tpu.memory_space<vmem>>, vector<16x512xbf16>,
    %c0_82 = arith.constant 0 : index
    %c136 = arith.constant 136 : index
    %126 = vector.load %arg16[%c0_82, %c136] : memref<16x768xf32, #tpu.memory_space<vmem>>, vector<16x512xf32>
    %c16_83 = arith.constant 16 : index
    %c0_84 = arith.constant 0 : index
    %c0_85 = arith.constant 0 : index
    %127 = vector.load %arg2[%c16_83, %c0_84, %c0_85] : memref<27x1x512xf32, #tpu.memory_space<vmem>>, vector<1x1x512xf32>
    %128 = vector.shape_cast %127 : vector<1x1x512xf32> to vector<1x512xf32>
    %129 = vector.broadcast %128 : vector<1x512xf32> to vector<16x512xf32>
    %130 = arith.mulf %126, %129 : vector<16x512xf32>
    %131 = arith.truncf %130 : vector<16x512xf32> to vector<16x512xbf16>
    %c256 = arith.constant 256 : index
    %c0_86 = arith.constant 0 : index
    %132 = vector.load %arg17[%c256, %c0_86] : memref<432x512xbf16, #tpu.memory_space<vmem>>, vector<16x512xbf16>
    tpu.vector_store %arg17[%c256, %c0_86], %131 {strides = array<i32>} : memref<432x512xbf16, #tpu.memory_space<vmem>>, vector<16x512xbf16>,
    %c0_87 = arith.constant 0 : index
    %c137 = arith.constant 137 : index
    %133 = vector.load %arg16[%c0_87, %c137] : memref<16x768xf32, #tpu.memory_space<vmem>>, vector<16x512xf32>
    %c17 = arith.constant 17 : index
    %c0_88 = arith.constant 0 : index
    %c0_89 = arith.constant 0 : index
    %134 = vector.load %arg2[%c17, %c0_88, %c0_89] : memref<27x1x512xf32, #tpu.memory_space<vmem>>, vector<1x1x512xf32>
    %135 = vector.shape_cast %134 : vector<1x1x512xf32> to vector<1x512xf32>
    %136 = vector.broadcast %135 : vector<1x512xf32> to vector<16x512xf32>
    %137 = arith.mulf %133, %136 : vector<16x512xf32>
    %138 = arith.truncf %137 : vector<16x512xf32> to vector<16x512xbf16>
    %c272 = arith.constant 272 : index
    %c0_90 = arith.constant 0 : index
    %139 = vector.load %arg17[%c272, %c0_90] : memref<432x512xbf16, #tpu.memory_space<vmem>>, vector<16x512xbf16>
    tpu.vector_store %arg17[%c272, %c0_90], %138 {strides = array<i32>} : memref<432x512xbf16, #tpu.memory_space<vmem>>, vector<16x512xbf16>,
    %c0_91 = arith.constant 0 : index
    %c183 = arith.constant 183 : index
    %140 = vector.load %arg16[%c0_91, %c183] : memref<16x768xf32, #tpu.memory_space<vmem>>, vector<16x512xf32>
    %c18 = arith.constant 18 : index
    %c0_92 = arith.constant 0 : index
    %c0_93 = arith.constant 0 : index
    %141 = vector.load %arg2[%c18, %c0_92, %c0_93] : memref<27x1x512xf32, #tpu.memory_space<vmem>>, vector<1x1x512xf32>
    %142 = vector.shape_cast %141 : vector<1x1x512xf32> to vector<1x512xf32>
    %143 = vector.broadcast %142 : vector<1x512xf32> to vector<16x512xf32>
    %144 = arith.mulf %140, %143 : vector<16x512xf32>
    %145 = arith.truncf %144 : vector<16x512xf32> to vector<16x512xbf16>
    %c288 = arith.constant 288 : index
    %c0_94 = arith.constant 0 : index
    %146 = vector.load %arg17[%c288, %c0_94] : memref<432x512xbf16, #tpu.memory_space<vmem>>, vector<16x512xbf16>
    tpu.vector_store %arg17[%c288, %c0_94], %145 {strides = array<i32>} : memref<432x512xbf16, #tpu.memory_space<vmem>>, vector<16x512xbf16>,
    %c0_95 = arith.constant 0 : index
    %c184 = arith.constant 184 : index
    %147 = vector.load %arg16[%c0_95, %c184] : memref<16x768xf32, #tpu.memory_space<vmem>>, vector<16x512xf32>
    %c19 = arith.constant 19 : index
    %c0_96 = arith.constant 0 : index
    %c0_97 = arith.constant 0 : index
    %148 = vector.load %arg2[%c19, %c0_96, %c0_97] : memref<27x1x512xf32, #tpu.memory_space<vmem>>, vector<1x1x512xf32>
    %149 = vector.shape_cast %148 : vector<1x1x512xf32> to vector<1x512xf32>
    %150 = vector.broadcast %149 : vector<1x512xf32> to vector<16x512xf32>
    %151 = arith.mulf %147, %150 : vector<16x512xf32>
    %152 = arith.truncf %151 : vector<16x512xf32> to vector<16x512xbf16>
    %c304 = arith.constant 304 : index
    %c0_98 = arith.constant 0 : index
    %153 = vector.load %arg17[%c304, %c0_98] : memref<432x512xbf16, #tpu.memory_space<vmem>>, vector<16x512xbf16>
    tpu.vector_store %arg17[%c304, %c0_98], %152 {strides = array<i32>} : memref<432x512xbf16, #tpu.memory_space<vmem>>, vector<16x512xbf16>,
    %c0_99 = arith.constant 0 : index
    %c185 = arith.constant 185 : index
    %154 = vector.load %arg16[%c0_99, %c185] : memref<16x768xf32, #tpu.memory_space<vmem>>, vector<16x512xf32>
    %c20 = arith.constant 20 : index
    %c0_100 = arith.constant 0 : index
    %c0_101 = arith.constant 0 : index
    %155 = vector.load %arg2[%c20, %c0_100, %c0_101] : memref<27x1x512xf32, #tpu.memory_space<vmem>>, vector<1x1x512xf32>
    %156 = vector.shape_cast %155 : vector<1x1x512xf32> to vector<1x512xf32>
    %157 = vector.broadcast %156 : vector<1x512xf32> to vector<16x512xf32>
    %158 = arith.mulf %154, %157 : vector<16x512xf32>
    %159 = arith.truncf %158 : vector<16x512xf32> to vector<16x512xbf16>
    %c320 = arith.constant 320 : index
    %c0_102 = arith.constant 0 : index
    %160 = vector.load %arg17[%c320, %c0_102] : memref<432x512xbf16, #tpu.memory_space<vmem>>, vector<16x512xbf16>
    tpu.vector_store %arg17[%c320, %c0_102], %159 {strides = array<i32>} : memref<432x512xbf16, #tpu.memory_space<vmem>>, vector<16x512xbf16>,
    %c0_103 = arith.constant 0 : index
    %c191 = arith.constant 191 : index
    %161 = vector.load %arg16[%c0_103, %c191] : memref<16x768xf32, #tpu.memory_space<vmem>>, vector<16x512xf32>
    %c21 = arith.constant 21 : index
    %c0_104 = arith.constant 0 : index
    %c0_105 = arith.constant 0 : index
    %162 = vector.load %arg2[%c21, %c0_104, %c0_105] : memref<27x1x512xf32, #tpu.memory_space<vmem>>, vector<1x1x512xf32>
    %163 = vector.shape_cast %162 : vector<1x1x512xf32> to vector<1x512xf32>
    %164 = vector.broadcast %163 : vector<1x512xf32> to vector<16x512xf32>
    %165 = arith.mulf %161, %164 : vector<16x512xf32>
    %166 = arith.truncf %165 : vector<16x512xf32> to vector<16x512xbf16>
    %c336 = arith.constant 336 : index
    %c0_106 = arith.constant 0 : index
    %167 = vector.load %arg17[%c336, %c0_106] : memref<432x512xbf16, #tpu.memory_space<vmem>>, vector<16x512xbf16>
    tpu.vector_store %arg17[%c336, %c0_106], %166 {strides = array<i32>} : memref<432x512xbf16, #tpu.memory_space<vmem>>, vector<16x512xbf16>,
    %c0_107 = arith.constant 0 : index
    %c192_108 = arith.constant 192 : index
    %168 = vector.load %arg16[%c0_107, %c192_108] : memref<16x768xf32, #tpu.memory_space<vmem>>, vector<16x512xf32>
    %c22 = arith.constant 22 : index
    %c0_109 = arith.constant 0 : index
    %c0_110 = arith.constant 0 : index
    %169 = vector.load %arg2[%c22, %c0_109, %c0_110] : memref<27x1x512xf32, #tpu.memory_space<vmem>>, vector<1x1x512xf32>
    %170 = vector.shape_cast %169 : vector<1x1x512xf32> to vector<1x512xf32>
    %171 = vector.broadcast %170 : vector<1x512xf32> to vector<16x512xf32>
    %172 = arith.mulf %168, %171 : vector<16x512xf32>
    %173 = arith.truncf %172 : vector<16x512xf32> to vector<16x512xbf16>
    %c352 = arith.constant 352 : index
    %c0_111 = arith.constant 0 : index
    %174 = vector.load %arg17[%c352, %c0_111] : memref<432x512xbf16, #tpu.memory_space<vmem>>, vector<16x512xbf16>
    tpu.vector_store %arg17[%c352, %c0_111], %173 {strides = array<i32>} : memref<432x512xbf16, #tpu.memory_space<vmem>>, vector<16x512xbf16>,
    %c0_112 = arith.constant 0 : index
    %c193 = arith.constant 193 : index
    %175 = vector.load %arg16[%c0_112, %c193] : memref<16x768xf32, #tpu.memory_space<vmem>>, vector<16x512xf32>
    %c23 = arith.constant 23 : index
    %c0_113 = arith.constant 0 : index
    %c0_114 = arith.constant 0 : index
    %176 = vector.load %arg2[%c23, %c0_113, %c0_114] : memref<27x1x512xf32, #tpu.memory_space<vmem>>, vector<1x1x512xf32>
    %177 = vector.shape_cast %176 : vector<1x1x512xf32> to vector<1x512xf32>
    %178 = vector.broadcast %177 : vector<1x512xf32> to vector<16x512xf32>
    %179 = arith.mulf %175, %178 : vector<16x512xf32>
    %180 = arith.truncf %179 : vector<16x512xf32> to vector<16x512xbf16>
    %c368 = arith.constant 368 : index
    %c0_115 = arith.constant 0 : index
    %181 = vector.load %arg17[%c368, %c0_115] : memref<432x512xbf16, #tpu.memory_space<vmem>>, vector<16x512xbf16>
    tpu.vector_store %arg17[%c368, %c0_115], %180 {strides = array<i32>} : memref<432x512xbf16, #tpu.memory_space<vmem>>, vector<16x512xbf16>,
    %c0_116 = arith.constant 0 : index
    %c199 = arith.constant 199 : index
    %182 = vector.load %arg16[%c0_116, %c199] : memref<16x768xf32, #tpu.memory_space<vmem>>, vector<16x512xf32>
    %c24 = arith.constant 24 : index
    %c0_117 = arith.constant 0 : index
    %c0_118 = arith.constant 0 : index
    %183 = vector.load %arg2[%c24, %c0_117, %c0_118] : memref<27x1x512xf32, #tpu.memory_space<vmem>>, vector<1x1x512xf32>
    %184 = vector.shape_cast %183 : vector<1x1x512xf32> to vector<1x512xf32>
    %185 = vector.broadcast %184 : vector<1x512xf32> to vector<16x512xf32>
    %186 = arith.mulf %182, %185 : vector<16x512xf32>
    %187 = arith.truncf %186 : vector<16x512xf32> to vector<16x512xbf16>
    %c384 = arith.constant 384 : index
    %c0_119 = arith.constant 0 : index
    %188 = vector.load %arg17[%c384, %c0_119] : memref<432x512xbf16, #tpu.memory_space<vmem>>, vector<16x512xbf16>
    tpu.vector_store %arg17[%c384, %c0_119], %187 {strides = array<i32>} : memref<432x512xbf16, #tpu.memory_space<vmem>>, vector<16x512xbf16>,
    %c0_120 = arith.constant 0 : index
    %c200 = arith.constant 200 : index
    %189 = vector.load %arg16[%c0_120, %c200] : memref<16x768xf32, #tpu.memory_space<vmem>>, vector<16x512xf32>
    %c25 = arith.constant 25 : index
    %c0_121 = arith.constant 0 : index
    %c0_122 = arith.constant 0 : index
    %190 = vector.load %arg2[%c25, %c0_121, %c0_122] : memref<27x1x512xf32, #tpu.memory_space<vmem>>, vector<1x1x512xf32>
    %191 = vector.shape_cast %190 : vector<1x1x512xf32> to vector<1x512xf32>
    %192 = vector.broadcast %191 : vector<1x512xf32> to vector<16x512xf32>
    %193 = arith.mulf %189, %192 : vector<16x512xf32>
    %194 = arith.truncf %193 : vector<16x512xf32> to vector<16x512xbf16>
    %c400 = arith.constant 400 : index
    %c0_123 = arith.constant 0 : index
    %195 = vector.load %arg17[%c400, %c0_123] : memref<432x512xbf16, #tpu.memory_space<vmem>>, vector<16x512xbf16>
    tpu.vector_store %arg17[%c400, %c0_123], %194 {strides = array<i32>} : memref<432x512xbf16, #tpu.memory_space<vmem>>, vector<16x512xbf16>,
    %c0_124 = arith.constant 0 : index
    %c201 = arith.constant 201 : index
    %196 = vector.load %arg16[%c0_124, %c201] : memref<16x768xf32, #tpu.memory_space<vmem>>, vector<16x512xf32>
    %c26 = arith.constant 26 : index
    %c0_125 = arith.constant 0 : index
    %c0_126 = arith.constant 0 : index
    %197 = vector.load %arg2[%c26, %c0_125, %c0_126] : memref<27x1x512xf32, #tpu.memory_space<vmem>>, vector<1x1x512xf32>
    %198 = vector.shape_cast %197 : vector<1x1x512xf32> to vector<1x512xf32>
    %199 = vector.broadcast %198 : vector<1x512xf32> to vector<16x512xf32>
    %200 = arith.mulf %196, %199 : vector<16x512xf32>
    %201 = arith.truncf %200 : vector<16x512xf32> to vector<16x512xbf16>
    %c416 = arith.constant 416 : index
    %c0_127 = arith.constant 0 : index
    %202 = vector.load %arg17[%c416, %c0_127] : memref<432x512xbf16, #tpu.memory_space<vmem>>, vector<16x512xbf16>
    tpu.vector_store %arg17[%c416, %c0_127], %201 {strides = array<i32>} : memref<432x512xbf16, #tpu.memory_space<vmem>>, vector<16x512xbf16>,
    %c0_128 = arith.constant 0 : index
    %c0_129 = arith.constant 0 : index
    %203 = vector.load %arg5[%c0_128, %c0_129] : memref<16x432xbf16, #tpu.memory_space<vmem>>, vector<16x432xbf16>
    %c0_130 = arith.constant 0 : index
    %c0_131 = arith.constant 0 : index
    %204 = vector.load %arg17[%c0_130, %c0_131] : memref<432x512xbf16, #tpu.memory_space<vmem>>, vector<432x512xbf16>
    %cst_132 = arith.constant dense<0.000000e+00> : vector<16x512xf32>
    %205 = tpu.matmul %203, %204, %cst_132 {dimension_numbers = #tpu.dot_dimension_numbers<[1], [0], [0], [1], [0, 0, 1, 1], [], []>} : vector<16x432xbf16>, vector<432x512xbf16>, vector<16x512xf32> -> vector<16x512xf32>
    %206 = vector.broadcast %12 : vector<16x1xf32> to vector<16x512xf32>
    %207 = arith.addf %205, %206 : vector<16x512xf32>
    %c0_133 = arith.constant 0 : index
    %c0_134 = arith.constant 0 : index
    %208 = vector.load %arg18[%c0_133, %c0_134] : memref<16x512xf32, #tpu.memory_space<vmem>>, vector<16x512xf32>
    tpu.vector_store %arg18[%c0_133, %c0_134], %207 {strides = array<i32>} : memref<16x512xf32, #tpu.memory_space<vmem>>, vector<16x512xf32>,
    %c0_135 = arith.constant 0 : index
    %c0_136 = arith.constant 0 : index
    %209 = vector.load %arg18[%c0_135, %c0_136] : memref<16x512xf32, #tpu.memory_space<vmem>>, vector<16x512xf32>
    %c0_137 = arith.constant 0 : index
    %c0_138 = arith.constant 0 : index
    %210 = vector.load %arg7[%c0_137, %c0_138] : memref<16x1xf32, #tpu.memory_space<vmem>>, vector<16x1xf32>
    %211 = vector.broadcast %210 : vector<16x1xf32> to vector<16x512xf32>
    %212 = arith.mulf %209, %211 : vector<16x512xf32>
    %c0_139 = arith.constant 0 : index
    %c0_140 = arith.constant 0 : index
    %213 = vector.load %arg8[%c0_139, %c0_140] : memref<16x1xf32, #tpu.memory_space<vmem>>, vector<16x1xf32>
    %214 = vector.broadcast %213 : vector<16x1xf32> to vector<16x512xf32>
    %215 = arith.addf %212, %214 : vector<16x512xf32>
    %cst_141 = arith.constant 0.000000e+00 : f32
    %216 = vector.broadcast %cst_141 : f32 to vector<16x512xf32>
    %217 = arith.maximumf %215, %216 : vector<16x512xf32>
    %c0_142 = arith.constant 0 : index
    %c0_143 = arith.constant 0 : index
    %218 = vector.load %arg10[%c0_142, %c0_143] : memref<16x1xf32, #tpu.memory_space<vmem>>, vector<16x1xf32>
    %c0_144 = arith.constant 0 : index
    %c128_145 = arith.constant 128 : index
    %219 = vector.load %arg16[%c0_144, %c128_145] : memref<16x768xf32, #tpu.memory_space<vmem>>, vector<16x512xf32>
    tpu.vector_store %arg16[%c0_144, %c128_145], %217 {strides = array<i32>} : memref<16x768xf32, #tpu.memory_space<vmem>>, vector<16x512xf32>,
    %c0_146 = arith.constant 0 : index
    %c55_147 = arith.constant 55 : index
    %220 = vector.load %arg16[%c0_146, %c55_147] : memref<16x768xf32, #tpu.memory_space<vmem>>, vector<16x512xf32>
    %c0_148 = arith.constant 0 : index
    %c0_149 = arith.constant 0 : index
    %c0_150 = arith.constant 0 : index
    %221 = vector.load %arg2[%c0_148, %c0_149, %c0_150] : memref<27x1x512xf32, #tpu.memory_space<vmem>>, vector<1x1x512xf32>
    %222 = vector.shape_cast %221 : vector<1x1x512xf32> to vector<1x512xf32>
    %223 = vector.broadcast %222 : vector<1x512xf32> to vector<16x512xf32>
    %224 = arith.mulf %220, %223 : vector<16x512xf32>
    %225 = arith.truncf %224 : vector<16x512xf32> to vector<16x512xbf16>
    %c0_151 = arith.constant 0 : index
    %c0_152 = arith.constant 0 : index
    %226 = vector.load %arg17[%c0_151, %c0_152] : memref<432x512xbf16, #tpu.memory_space<vmem>>, vector<16x512xbf16>
    tpu.vector_store %arg17[%c0_151, %c0_152], %225 {strides = array<i32>} : memref<432x512xbf16, #tpu.memory_space<vmem>>, vector<16x512xbf16>,
    %c0_153 = arith.constant 0 : index
    %c56_154 = arith.constant 56 : index
    %227 = vector.load %arg16[%c0_153, %c56_154] : memref<16x768xf32, #tpu.memory_space<vmem>>, vector<16x512xf32>
    %c1_155 = arith.constant 1 : index
    %c0_156 = arith.constant 0 : index
    %c0_157 = arith.constant 0 : index
    %228 = vector.load %arg2[%c1_155, %c0_156, %c0_157] : memref<27x1x512xf32, #tpu.memory_space<vmem>>, vector<1x1x512xf32>
    %229 = vector.shape_cast %228 : vector<1x1x512xf32> to vector<1x512xf32>
    %230 = vector.broadcast %229 : vector<1x512xf32> to vector<16x512xf32>
    %231 = arith.mulf %227, %230 : vector<16x512xf32>
    %232 = arith.truncf %231 : vector<16x512xf32> to vector<16x512xbf16>
    %c16_158 = arith.constant 16 : index
    %c0_159 = arith.constant 0 : index
    %233 = vector.load %arg17[%c16_158, %c0_159] : memref<432x512xbf16, #tpu.memory_space<vmem>>, vector<16x512xbf16>
    tpu.vector_store %arg17[%c16_158, %c0_159], %232 {strides = array<i32>} : memref<432x512xbf16, #tpu.memory_space<vmem>>, vector<16x512xbf16>,
    %c0_160 = arith.constant 0 : index
    %c57_161 = arith.constant 57 : index
    %234 = vector.load %arg16[%c0_160, %c57_161] : memref<16x768xf32, #tpu.memory_space<vmem>>, vector<16x512xf32>
    %c2_162 = arith.constant 2 : index
    %c0_163 = arith.constant 0 : index
    %c0_164 = arith.constant 0 : index
    %235 = vector.load %arg2[%c2_162, %c0_163, %c0_164] : memref<27x1x512xf32, #tpu.memory_space<vmem>>, vector<1x1x512xf32>
    %236 = vector.shape_cast %235 : vector<1x1x512xf32> to vector<1x512xf32>
    %237 = vector.broadcast %236 : vector<1x512xf32> to vector<16x512xf32>
    %238 = arith.mulf %234, %237 : vector<16x512xf32>
    %239 = arith.truncf %238 : vector<16x512xf32> to vector<16x512xbf16>
    %c32_165 = arith.constant 32 : index
    %c0_166 = arith.constant 0 : index
    %240 = vector.load %arg17[%c32_165, %c0_166] : memref<432x512xbf16, #tpu.memory_space<vmem>>, vector<16x512xbf16>
    tpu.vector_store %arg17[%c32_165, %c0_166], %239 {strides = array<i32>} : memref<432x512xbf16, #tpu.memory_space<vmem>>, vector<16x512xbf16>,
    %c0_167 = arith.constant 0 : index
    %c63_168 = arith.constant 63 : index
    %241 = vector.load %arg16[%c0_167, %c63_168] : memref<16x768xf32, #tpu.memory_space<vmem>>, vector<16x512xf32>
    %c3_169 = arith.constant 3 : index
    %c0_170 = arith.constant 0 : index
    %c0_171 = arith.constant 0 : index
    %242 = vector.load %arg2[%c3_169, %c0_170, %c0_171] : memref<27x1x512xf32, #tpu.memory_space<vmem>>, vector<1x1x512xf32>
    %243 = vector.shape_cast %242 : vector<1x1x512xf32> to vector<1x512xf32>
    %244 = vector.broadcast %243 : vector<1x512xf32> to vector<16x512xf32>
    %245 = arith.mulf %241, %244 : vector<16x512xf32>
    %246 = arith.truncf %245 : vector<16x512xf32> to vector<16x512xbf16>
    %c48_172 = arith.constant 48 : index
    %c0_173 = arith.constant 0 : index
    %247 = vector.load %arg17[%c48_172, %c0_173] : memref<432x512xbf16, #tpu.memory_space<vmem>>, vector<16x512xbf16>
    tpu.vector_store %arg17[%c48_172, %c0_173], %246 {strides = array<i32>} : memref<432x512xbf16, #tpu.memory_space<vmem>>, vector<16x512xbf16>,
    %c0_174 = arith.constant 0 : index
    %c64_175 = arith.constant 64 : index
    %248 = vector.load %arg16[%c0_174, %c64_175] : memref<16x768xf32, #tpu.memory_space<vmem>>, vector<16x512xf32>
    %c4_176 = arith.constant 4 : index
    %c0_177 = arith.constant 0 : index
    %c0_178 = arith.constant 0 : index
    %249 = vector.load %arg2[%c4_176, %c0_177, %c0_178] : memref<27x1x512xf32, #tpu.memory_space<vmem>>, vector<1x1x512xf32>
    %250 = vector.shape_cast %249 : vector<1x1x512xf32> to vector<1x512xf32>
    %251 = vector.broadcast %250 : vector<1x512xf32> to vector<16x512xf32>
    %252 = arith.mulf %248, %251 : vector<16x512xf32>
    %253 = arith.truncf %252 : vector<16x512xf32> to vector<16x512xbf16>
    %c64_179 = arith.constant 64 : index
    %c0_180 = arith.constant 0 : index
    %254 = vector.load %arg17[%c64_179, %c0_180] : memref<432x512xbf16, #tpu.memory_space<vmem>>, vector<16x512xbf16>
    tpu.vector_store %arg17[%c64_179, %c0_180], %253 {strides = array<i32>} : memref<432x512xbf16, #tpu.memory_space<vmem>>, vector<16x512xbf16>,
    %c0_181 = arith.constant 0 : index
    %c65_182 = arith.constant 65 : index
    %255 = vector.load %arg16[%c0_181, %c65_182] : memref<16x768xf32, #tpu.memory_space<vmem>>, vector<16x512xf32>
    %c5_183 = arith.constant 5 : index
    %c0_184 = arith.constant 0 : index
    %c0_185 = arith.constant 0 : index
    %256 = vector.load %arg2[%c5_183, %c0_184, %c0_185] : memref<27x1x512xf32, #tpu.memory_space<vmem>>, vector<1x1x512xf32>
    %257 = vector.shape_cast %256 : vector<1x1x512xf32> to vector<1x512xf32>
    %258 = vector.broadcast %257 : vector<1x512xf32> to vector<16x512xf32>
    %259 = arith.mulf %255, %258 : vector<16x512xf32>
    %260 = arith.truncf %259 : vector<16x512xf32> to vector<16x512xbf16>
    %c80_186 = arith.constant 80 : index
    %c0_187 = arith.constant 0 : index
    %261 = vector.load %arg17[%c80_186, %c0_187] : memref<432x512xbf16, #tpu.memory_space<vmem>>, vector<16x512xbf16>
    tpu.vector_store %arg17[%c80_186, %c0_187], %260 {strides = array<i32>} : memref<432x512xbf16, #tpu.memory_space<vmem>>, vector<16x512xbf16>,
    %c0_188 = arith.constant 0 : index
    %c71_189 = arith.constant 71 : index
    %262 = vector.load %arg16[%c0_188, %c71_189] : memref<16x768xf32, #tpu.memory_space<vmem>>, vector<16x512xf32>
    %c6_190 = arith.constant 6 : index
    %c0_191 = arith.constant 0 : index
    %c0_192 = arith.constant 0 : index
    %263 = vector.load %arg2[%c6_190, %c0_191, %c0_192] : memref<27x1x512xf32, #tpu.memory_space<vmem>>, vector<1x1x512xf32>
    %264 = vector.shape_cast %263 : vector<1x1x512xf32> to vector<1x512xf32>
    %265 = vector.broadcast %264 : vector<1x512xf32> to vector<16x512xf32>
    %266 = arith.mulf %262, %265 : vector<16x512xf32>
    %267 = arith.truncf %266 : vector<16x512xf32> to vector<16x512xbf16>
    %c96_193 = arith.constant 96 : index
    %c0_194 = arith.constant 0 : index
    %268 = vector.load %arg17[%c96_193, %c0_194] : memref<432x512xbf16, #tpu.memory_space<vmem>>, vector<16x512xbf16>
    tpu.vector_store %arg17[%c96_193, %c0_194], %267 {strides = array<i32>} : memref<432x512xbf16, #tpu.memory_space<vmem>>, vector<16x512xbf16>,
    %c0_195 = arith.constant 0 : index
    %c72_196 = arith.constant 72 : index
    %269 = vector.load %arg16[%c0_195, %c72_196] : memref<16x768xf32, #tpu.memory_space<vmem>>, vector<16x512xf32>
    %c7_197 = arith.constant 7 : index
    %c0_198 = arith.constant 0 : index
    %c0_199 = arith.constant 0 : index
    %270 = vector.load %arg2[%c7_197, %c0_198, %c0_199] : memref<27x1x512xf32, #tpu.memory_space<vmem>>, vector<1x1x512xf32>
    %271 = vector.shape_cast %270 : vector<1x1x512xf32> to vector<1x512xf32>
    %272 = vector.broadcast %271 : vector<1x512xf32> to vector<16x512xf32>
    %273 = arith.mulf %269, %272 : vector<16x512xf32>
    %274 = arith.truncf %273 : vector<16x512xf32> to vector<16x512xbf16>
    %c112_200 = arith.constant 112 : index
    %c0_201 = arith.constant 0 : index
    %275 = vector.load %arg17[%c112_200, %c0_201] : memref<432x512xbf16, #tpu.memory_space<vmem>>, vector<16x512xbf16>
    tpu.vector_store %arg17[%c112_200, %c0_201], %274 {strides = array<i32>} : memref<432x512xbf16, #tpu.memory_space<vmem>>, vector<16x512xbf16>,
    %c0_202 = arith.constant 0 : index
    %c73_203 = arith.constant 73 : index
    %276 = vector.load %arg16[%c0_202, %c73_203] : memref<16x768xf32, #tpu.memory_space<vmem>>, vector<16x512xf32>
    %c8_204 = arith.constant 8 : index
    %c0_205 = arith.constant 0 : index
    %c0_206 = arith.constant 0 : index
    %277 = vector.load %arg2[%c8_204, %c0_205, %c0_206] : memref<27x1x512xf32, #tpu.memory_space<vmem>>, vector<1x1x512xf32>
    %278 = vector.shape_cast %277 : vector<1x1x512xf32> to vector<1x512xf32>
    %279 = vector.broadcast %278 : vector<1x512xf32> to vector<16x512xf32>
    %280 = arith.mulf %276, %279 : vector<16x512xf32>
    %281 = arith.truncf %280 : vector<16x512xf32> to vector<16x512xbf16>
    %c128_207 = arith.constant 128 : index
    %c0_208 = arith.constant 0 : index
    %282 = vector.load %arg17[%c128_207, %c0_208] : memref<432x512xbf16, #tpu.memory_space<vmem>>, vector<16x512xbf16>
    tpu.vector_store %arg17[%c128_207, %c0_208], %281 {strides = array<i32>} : memref<432x512xbf16, #tpu.memory_space<vmem>>, vector<16x512xbf16>,
    %c0_209 = arith.constant 0 : index
    %c119_210 = arith.constant 119 : index
    %283 = vector.load %arg16[%c0_209, %c119_210] : memref<16x768xf32, #tpu.memory_space<vmem>>, vector<16x512xf32>
    %c9_211 = arith.constant 9 : index
    %c0_212 = arith.constant 0 : index
    %c0_213 = arith.constant 0 : index
    %284 = vector.load %arg2[%c9_211, %c0_212, %c0_213] : memref<27x1x512xf32, #tpu.memory_space<vmem>>, vector<1x1x512xf32>
    %285 = vector.shape_cast %284 : vector<1x1x512xf32> to vector<1x512xf32>
    %286 = vector.broadcast %285 : vector<1x512xf32> to vector<16x512xf32>
    %287 = arith.mulf %283, %286 : vector<16x512xf32>
    %288 = arith.truncf %287 : vector<16x512xf32> to vector<16x512xbf16>
    %c144_214 = arith.constant 144 : index
    %c0_215 = arith.constant 0 : index
    %289 = vector.load %arg17[%c144_214, %c0_215] : memref<432x512xbf16, #tpu.memory_space<vmem>>, vector<16x512xbf16>
    tpu.vector_store %arg17[%c144_214, %c0_215], %288 {strides = array<i32>} : memref<432x512xbf16, #tpu.memory_space<vmem>>, vector<16x512xbf16>,
    %c0_216 = arith.constant 0 : index
    %c120_217 = arith.constant 120 : index
    %290 = vector.load %arg16[%c0_216, %c120_217] : memref<16x768xf32, #tpu.memory_space<vmem>>, vector<16x512xf32>
    %c10_218 = arith.constant 10 : index
    %c0_219 = arith.constant 0 : index
    %c0_220 = arith.constant 0 : index
    %291 = vector.load %arg2[%c10_218, %c0_219, %c0_220] : memref<27x1x512xf32, #tpu.memory_space<vmem>>, vector<1x1x512xf32>
    %292 = vector.shape_cast %291 : vector<1x1x512xf32> to vector<1x512xf32>
    %293 = vector.broadcast %292 : vector<1x512xf32> to vector<16x512xf32>
    %294 = arith.mulf %290, %293 : vector<16x512xf32>
    %295 = arith.truncf %294 : vector<16x512xf32> to vector<16x512xbf16>
    %c160_221 = arith.constant 160 : index
    %c0_222 = arith.constant 0 : index
    %296 = vector.load %arg17[%c160_221, %c0_222] : memref<432x512xbf16, #tpu.memory_space<vmem>>, vector<16x512xbf16>
    tpu.vector_store %arg17[%c160_221, %c0_222], %295 {strides = array<i32>} : memref<432x512xbf16, #tpu.memory_space<vmem>>, vector<16x512xbf16>,
    %c0_223 = arith.constant 0 : index
    %c121_224 = arith.constant 121 : index
    %297 = vector.load %arg16[%c0_223, %c121_224] : memref<16x768xf32, #tpu.memory_space<vmem>>, vector<16x512xf32>
    %c11_225 = arith.constant 11 : index
    %c0_226 = arith.constant 0 : index
    %c0_227 = arith.constant 0 : index
    %298 = vector.load %arg2[%c11_225, %c0_226, %c0_227] : memref<27x1x512xf32, #tpu.memory_space<vmem>>, vector<1x1x512xf32>
    %299 = vector.shape_cast %298 : vector<1x1x512xf32> to vector<1x512xf32>
    %300 = vector.broadcast %299 : vector<1x512xf32> to vector<16x512xf32>
    %301 = arith.mulf %297, %300 : vector<16x512xf32>
    %302 = arith.truncf %301 : vector<16x512xf32> to vector<16x512xbf16>
    %c176_228 = arith.constant 176 : index
    %c0_229 = arith.constant 0 : index
    %303 = vector.load %arg17[%c176_228, %c0_229] : memref<432x512xbf16, #tpu.memory_space<vmem>>, vector<16x512xbf16>
    tpu.vector_store %arg17[%c176_228, %c0_229], %302 {strides = array<i32>} : memref<432x512xbf16, #tpu.memory_space<vmem>>, vector<16x512xbf16>,
    %c0_230 = arith.constant 0 : index
    %c127_231 = arith.constant 127 : index
    %304 = vector.load %arg16[%c0_230, %c127_231] : memref<16x768xf32, #tpu.memory_space<vmem>>, vector<16x512xf32>
    %c12_232 = arith.constant 12 : index
    %c0_233 = arith.constant 0 : index
    %c0_234 = arith.constant 0 : index
    %305 = vector.load %arg2[%c12_232, %c0_233, %c0_234] : memref<27x1x512xf32, #tpu.memory_space<vmem>>, vector<1x1x512xf32>
    %306 = vector.shape_cast %305 : vector<1x1x512xf32> to vector<1x512xf32>
    %307 = vector.broadcast %306 : vector<1x512xf32> to vector<16x512xf32>
    %308 = arith.mulf %304, %307 : vector<16x512xf32>
    %309 = arith.truncf %308 : vector<16x512xf32> to vector<16x512xbf16>
    %c192_235 = arith.constant 192 : index
    %c0_236 = arith.constant 0 : index
    %310 = vector.load %arg17[%c192_235, %c0_236] : memref<432x512xbf16, #tpu.memory_space<vmem>>, vector<16x512xbf16>
    tpu.vector_store %arg17[%c192_235, %c0_236], %309 {strides = array<i32>} : memref<432x512xbf16, #tpu.memory_space<vmem>>, vector<16x512xbf16>,
    %c0_237 = arith.constant 0 : index
    %c128_238 = arith.constant 128 : index
    %311 = vector.load %arg16[%c0_237, %c128_238] : memref<16x768xf32, #tpu.memory_space<vmem>>, vector<16x512xf32>
    %c13_239 = arith.constant 13 : index
    %c0_240 = arith.constant 0 : index
    %c0_241 = arith.constant 0 : index
    %312 = vector.load %arg2[%c13_239, %c0_240, %c0_241] : memref<27x1x512xf32, #tpu.memory_space<vmem>>, vector<1x1x512xf32>
    %313 = vector.shape_cast %312 : vector<1x1x512xf32> to vector<1x512xf32>
    %314 = vector.broadcast %313 : vector<1x512xf32> to vector<16x512xf32>
    %315 = arith.mulf %311, %314 : vector<16x512xf32>
    %316 = arith.truncf %315 : vector<16x512xf32> to vector<16x512xbf16>
    %c208_242 = arith.constant 208 : index
    %c0_243 = arith.constant 0 : index
    %317 = vector.load %arg17[%c208_242, %c0_243] : memref<432x512xbf16, #tpu.memory_space<vmem>>, vector<16x512xbf16>
    tpu.vector_store %arg17[%c208_242, %c0_243], %316 {strides = array<i32>} : memref<432x512xbf16, #tpu.memory_space<vmem>>, vector<16x512xbf16>,
    %c0_244 = arith.constant 0 : index
    %c129_245 = arith.constant 129 : index
    %318 = vector.load %arg16[%c0_244, %c129_245] : memref<16x768xf32, #tpu.memory_space<vmem>>, vector<16x512xf32>
    %c14_246 = arith.constant 14 : index
    %c0_247 = arith.constant 0 : index
    %c0_248 = arith.constant 0 : index
    %319 = vector.load %arg2[%c14_246, %c0_247, %c0_248] : memref<27x1x512xf32, #tpu.memory_space<vmem>>, vector<1x1x512xf32>
    %320 = vector.shape_cast %319 : vector<1x1x512xf32> to vector<1x512xf32>
    %321 = vector.broadcast %320 : vector<1x512xf32> to vector<16x512xf32>
    %322 = arith.mulf %318, %321 : vector<16x512xf32>
    %323 = arith.truncf %322 : vector<16x512xf32> to vector<16x512xbf16>
    %c224_249 = arith.constant 224 : index
    %c0_250 = arith.constant 0 : index
    %324 = vector.load %arg17[%c224_249, %c0_250] : memref<432x512xbf16, #tpu.memory_space<vmem>>, vector<16x512xbf16>
    tpu.vector_store %arg17[%c224_249, %c0_250], %323 {strides = array<i32>} : memref<432x512xbf16, #tpu.memory_space<vmem>>, vector<16x512xbf16>,
    %c0_251 = arith.constant 0 : index
    %c135_252 = arith.constant 135 : index
    %325 = vector.load %arg16[%c0_251, %c135_252] : memref<16x768xf32, #tpu.memory_space<vmem>>, vector<16x512xf32>
    %c15_253 = arith.constant 15 : index
    %c0_254 = arith.constant 0 : index
    %c0_255 = arith.constant 0 : index
    %326 = vector.load %arg2[%c15_253, %c0_254, %c0_255] : memref<27x1x512xf32, #tpu.memory_space<vmem>>, vector<1x1x512xf32>
    %327 = vector.shape_cast %326 : vector<1x1x512xf32> to vector<1x512xf32>
    %328 = vector.broadcast %327 : vector<1x512xf32> to vector<16x512xf32>
    %329 = arith.mulf %325, %328 : vector<16x512xf32>
    %330 = arith.truncf %329 : vector<16x512xf32> to vector<16x512xbf16>
    %c240_256 = arith.constant 240 : index
    %c0_257 = arith.constant 0 : index
    %331 = vector.load %arg17[%c240_256, %c0_257] : memref<432x512xbf16, #tpu.memory_space<vmem>>, vector<16x512xbf16>
    tpu.vector_store %arg17[%c240_256, %c0_257], %330 {strides = array<i32>} : memref<432x512xbf16, #tpu.memory_space<vmem>>, vector<16x512xbf16>,
    %c0_258 = arith.constant 0 : index
    %c136_259 = arith.constant 136 : index
    %332 = vector.load %arg16[%c0_258, %c136_259] : memref<16x768xf32, #tpu.memory_space<vmem>>, vector<16x512xf32>
    %c16_260 = arith.constant 16 : index
    %c0_261 = arith.constant 0 : index
    %c0_262 = arith.constant 0 : index
    %333 = vector.load %arg2[%c16_260, %c0_261, %c0_262] : memref<27x1x512xf32, #tpu.memory_space<vmem>>, vector<1x1x512xf32>
    %334 = vector.shape_cast %333 : vector<1x1x512xf32> to vector<1x512xf32>
    %335 = vector.broadcast %334 : vector<1x512xf32> to vector<16x512xf32>
    %336 = arith.mulf %332, %335 : vector<16x512xf32>
    %337 = arith.truncf %336 : vector<16x512xf32> to vector<16x512xbf16>
    %c256_263 = arith.constant 256 : index
    %c0_264 = arith.constant 0 : index
    %338 = vector.load %arg17[%c256_263, %c0_264] : memref<432x512xbf16, #tpu.memory_space<vmem>>, vector<16x512xbf16>
    tpu.vector_store %arg17[%c256_263, %c0_264], %337 {strides = array<i32>} : memref<432x512xbf16, #tpu.memory_space<vmem>>, vector<16x512xbf16>,
    %c0_265 = arith.constant 0 : index
    %c137_266 = arith.constant 137 : index
    %339 = vector.load %arg16[%c0_265, %c137_266] : memref<16x768xf32, #tpu.memory_space<vmem>>, vector<16x512xf32>
    %c17_267 = arith.constant 17 : index
    %c0_268 = arith.constant 0 : index
    %c0_269 = arith.constant 0 : index
    %340 = vector.load %arg2[%c17_267, %c0_268, %c0_269] : memref<27x1x512xf32, #tpu.memory_space<vmem>>, vector<1x1x512xf32>
    %341 = vector.shape_cast %340 : vector<1x1x512xf32> to vector<1x512xf32>
    %342 = vector.broadcast %341 : vector<1x512xf32> to vector<16x512xf32>
    %343 = arith.mulf %339, %342 : vector<16x512xf32>
    %344 = arith.truncf %343 : vector<16x512xf32> to vector<16x512xbf16>
    %c272_270 = arith.constant 272 : index
    %c0_271 = arith.constant 0 : index
    %345 = vector.load %arg17[%c272_270, %c0_271] : memref<432x512xbf16, #tpu.memory_space<vmem>>, vector<16x512xbf16>
    tpu.vector_store %arg17[%c272_270, %c0_271], %344 {strides = array<i32>} : memref<432x512xbf16, #tpu.memory_space<vmem>>, vector<16x512xbf16>,
    %c0_272 = arith.constant 0 : index
    %c183_273 = arith.constant 183 : index
    %346 = vector.load %arg16[%c0_272, %c183_273] : memref<16x768xf32, #tpu.memory_space<vmem>>, vector<16x512xf32>
    %c18_274 = arith.constant 18 : index
    %c0_275 = arith.constant 0 : index
    %c0_276 = arith.constant 0 : index
    %347 = vector.load %arg2[%c18_274, %c0_275, %c0_276] : memref<27x1x512xf32, #tpu.memory_space<vmem>>, vector<1x1x512xf32>
    %348 = vector.shape_cast %347 : vector<1x1x512xf32> to vector<1x512xf32>
    %349 = vector.broadcast %348 : vector<1x512xf32> to vector<16x512xf32>
    %350 = arith.mulf %346, %349 : vector<16x512xf32>
    %351 = arith.truncf %350 : vector<16x512xf32> to vector<16x512xbf16>
    %c288_277 = arith.constant 288 : index
    %c0_278 = arith.constant 0 : index
    %352 = vector.load %arg17[%c288_277, %c0_278] : memref<432x512xbf16, #tpu.memory_space<vmem>>, vector<16x512xbf16>
    tpu.vector_store %arg17[%c288_277, %c0_278], %351 {strides = array<i32>} : memref<432x512xbf16, #tpu.memory_space<vmem>>, vector<16x512xbf16>,
    %c0_279 = arith.constant 0 : index
    %c184_280 = arith.constant 184 : index
    %353 = vector.load %arg16[%c0_279, %c184_280] : memref<16x768xf32, #tpu.memory_space<vmem>>, vector<16x512xf32>
    %c19_281 = arith.constant 19 : index
    %c0_282 = arith.constant 0 : index
    %c0_283 = arith.constant 0 : index
    %354 = vector.load %arg2[%c19_281, %c0_282, %c0_283] : memref<27x1x512xf32, #tpu.memory_space<vmem>>, vector<1x1x512xf32>
    %355 = vector.shape_cast %354 : vector<1x1x512xf32> to vector<1x512xf32>
    %356 = vector.broadcast %355 : vector<1x512xf32> to vector<16x512xf32>
    %357 = arith.mulf %353, %356 : vector<16x512xf32>
    %358 = arith.truncf %357 : vector<16x512xf32> to vector<16x512xbf16>
    %c304_284 = arith.constant 304 : index
    %c0_285 = arith.constant 0 : index
    %359 = vector.load %arg17[%c304_284, %c0_285] : memref<432x512xbf16, #tpu.memory_space<vmem>>, vector<16x512xbf16>
    tpu.vector_store %arg17[%c304_284, %c0_285], %358 {strides = array<i32>} : memref<432x512xbf16, #tpu.memory_space<vmem>>, vector<16x512xbf16>,
    %c0_286 = arith.constant 0 : index
    %c185_287 = arith.constant 185 : index
    %360 = vector.load %arg16[%c0_286, %c185_287] : memref<16x768xf32, #tpu.memory_space<vmem>>, vector<16x512xf32>
    %c20_288 = arith.constant 20 : index
    %c0_289 = arith.constant 0 : index
    %c0_290 = arith.constant 0 : index
    %361 = vector.load %arg2[%c20_288, %c0_289, %c0_290] : memref<27x1x512xf32, #tpu.memory_space<vmem>>, vector<1x1x512xf32>
    %362 = vector.shape_cast %361 : vector<1x1x512xf32> to vector<1x512xf32>
    %363 = vector.broadcast %362 : vector<1x512xf32> to vector<16x512xf32>
    %364 = arith.mulf %360, %363 : vector<16x512xf32>
    %365 = arith.truncf %364 : vector<16x512xf32> to vector<16x512xbf16>
    %c320_291 = arith.constant 320 : index
    %c0_292 = arith.constant 0 : index
    %366 = vector.load %arg17[%c320_291, %c0_292] : memref<432x512xbf16, #tpu.memory_space<vmem>>, vector<16x512xbf16>
    tpu.vector_store %arg17[%c320_291, %c0_292], %365 {strides = array<i32>} : memref<432x512xbf16, #tpu.memory_space<vmem>>, vector<16x512xbf16>,
    %c0_293 = arith.constant 0 : index
    %c191_294 = arith.constant 191 : index
    %367 = vector.load %arg16[%c0_293, %c191_294] : memref<16x768xf32, #tpu.memory_space<vmem>>, vector<16x512xf32>
    %c21_295 = arith.constant 21 : index
    %c0_296 = arith.constant 0 : index
    %c0_297 = arith.constant 0 : index
    %368 = vector.load %arg2[%c21_295, %c0_296, %c0_297] : memref<27x1x512xf32, #tpu.memory_space<vmem>>, vector<1x1x512xf32>
    %369 = vector.shape_cast %368 : vector<1x1x512xf32> to vector<1x512xf32>
    %370 = vector.broadcast %369 : vector<1x512xf32> to vector<16x512xf32>
    %371 = arith.mulf %367, %370 : vector<16x512xf32>
    %372 = arith.truncf %371 : vector<16x512xf32> to vector<16x512xbf16>
    %c336_298 = arith.constant 336 : index
    %c0_299 = arith.constant 0 : index
    %373 = vector.load %arg17[%c336_298, %c0_299] : memref<432x512xbf16, #tpu.memory_space<vmem>>, vector<16x512xbf16>
    tpu.vector_store %arg17[%c336_298, %c0_299], %372 {strides = array<i32>} : memref<432x512xbf16, #tpu.memory_space<vmem>>, vector<16x512xbf16>,
    %c0_300 = arith.constant 0 : index
    %c192_301 = arith.constant 192 : index
    %374 = vector.load %arg16[%c0_300, %c192_301] : memref<16x768xf32, #tpu.memory_space<vmem>>, vector<16x512xf32>
    %c22_302 = arith.constant 22 : index
    %c0_303 = arith.constant 0 : index
    %c0_304 = arith.constant 0 : index
    %375 = vector.load %arg2[%c22_302, %c0_303, %c0_304] : memref<27x1x512xf32, #tpu.memory_space<vmem>>, vector<1x1x512xf32>
    %376 = vector.shape_cast %375 : vector<1x1x512xf32> to vector<1x512xf32>
    %377 = vector.broadcast %376 : vector<1x512xf32> to vector<16x512xf32>
    %378 = arith.mulf %374, %377 : vector<16x512xf32>
    %379 = arith.truncf %378 : vector<16x512xf32> to vector<16x512xbf16>
    %c352_305 = arith.constant 352 : index
    %c0_306 = arith.constant 0 : index
    %380 = vector.load %arg17[%c352_305, %c0_306] : memref<432x512xbf16, #tpu.memory_space<vmem>>, vector<16x512xbf16>
    tpu.vector_store %arg17[%c352_305, %c0_306], %379 {strides = array<i32>} : memref<432x512xbf16, #tpu.memory_space<vmem>>, vector<16x512xbf16>,
    %c0_307 = arith.constant 0 : index
    %c193_308 = arith.constant 193 : index
    %381 = vector.load %arg16[%c0_307, %c193_308] : memref<16x768xf32, #tpu.memory_space<vmem>>, vector<16x512xf32>
    %c23_309 = arith.constant 23 : index
    %c0_310 = arith.constant 0 : index
    %c0_311 = arith.constant 0 : index
    %382 = vector.load %arg2[%c23_309, %c0_310, %c0_311] : memref<27x1x512xf32, #tpu.memory_space<vmem>>, vector<1x1x512xf32>
    %383 = vector.shape_cast %382 : vector<1x1x512xf32> to vector<1x512xf32>
    %384 = vector.broadcast %383 : vector<1x512xf32> to vector<16x512xf32>
    %385 = arith.mulf %381, %384 : vector<16x512xf32>
    %386 = arith.truncf %385 : vector<16x512xf32> to vector<16x512xbf16>
    %c368_312 = arith.constant 368 : index
    %c0_313 = arith.constant 0 : index
    %387 = vector.load %arg17[%c368_312, %c0_313] : memref<432x512xbf16, #tpu.memory_space<vmem>>, vector<16x512xbf16>
    tpu.vector_store %arg17[%c368_312, %c0_313], %386 {strides = array<i32>} : memref<432x512xbf16, #tpu.memory_space<vmem>>, vector<16x512xbf16>,
    %c0_314 = arith.constant 0 : index
    %c199_315 = arith.constant 199 : index
    %388 = vector.load %arg16[%c0_314, %c199_315] : memref<16x768xf32, #tpu.memory_space<vmem>>, vector<16x512xf32>
    %c24_316 = arith.constant 24 : index
    %c0_317 = arith.constant 0 : index
    %c0_318 = arith.constant 0 : index
    %389 = vector.load %arg2[%c24_316, %c0_317, %c0_318] : memref<27x1x512xf32, #tpu.memory_space<vmem>>, vector<1x1x512xf32>
    %390 = vector.shape_cast %389 : vector<1x1x512xf32> to vector<1x512xf32>
    %391 = vector.broadcast %390 : vector<1x512xf32> to vector<16x512xf32>
    %392 = arith.mulf %388, %391 : vector<16x512xf32>
    %393 = arith.truncf %392 : vector<16x512xf32> to vector<16x512xbf16>
    %c384_319 = arith.constant 384 : index
    %c0_320 = arith.constant 0 : index
    %394 = vector.load %arg17[%c384_319, %c0_320] : memref<432x512xbf16, #tpu.memory_space<vmem>>, vector<16x512xbf16>
    tpu.vector_store %arg17[%c384_319, %c0_320], %393 {strides = array<i32>} : memref<432x512xbf16, #tpu.memory_space<vmem>>, vector<16x512xbf16>,
    %c0_321 = arith.constant 0 : index
    %c200_322 = arith.constant 200 : index
    %395 = vector.load %arg16[%c0_321, %c200_322] : memref<16x768xf32, #tpu.memory_space<vmem>>, vector<16x512xf32>
    %c25_323 = arith.constant 25 : index
    %c0_324 = arith.constant 0 : index
    %c0_325 = arith.constant 0 : index
    %396 = vector.load %arg2[%c25_323, %c0_324, %c0_325] : memref<27x1x512xf32, #tpu.memory_space<vmem>>, vector<1x1x512xf32>
    %397 = vector.shape_cast %396 : vector<1x1x512xf32> to vector<1x512xf32>
    %398 = vector.broadcast %397 : vector<1x512xf32> to vector<16x512xf32>
    %399 = arith.mulf %395, %398 : vector<16x512xf32>
    %400 = arith.truncf %399 : vector<16x512xf32> to vector<16x512xbf16>
    %c400_326 = arith.constant 400 : index
    %c0_327 = arith.constant 0 : index
    %401 = vector.load %arg17[%c400_326, %c0_327] : memref<432x512xbf16, #tpu.memory_space<vmem>>, vector<16x512xbf16>
    tpu.vector_store %arg17[%c400_326, %c0_327], %400 {strides = array<i32>} : memref<432x512xbf16, #tpu.memory_space<vmem>>, vector<16x512xbf16>,
    %c0_328 = arith.constant 0 : index
    %c201_329 = arith.constant 201 : index
    %402 = vector.load %arg16[%c0_328, %c201_329] : memref<16x768xf32, #tpu.memory_space<vmem>>, vector<16x512xf32>
    %c26_330 = arith.constant 26 : index
    %c0_331 = arith.constant 0 : index
    %c0_332 = arith.constant 0 : index
    %403 = vector.load %arg2[%c26_330, %c0_331, %c0_332] : memref<27x1x512xf32, #tpu.memory_space<vmem>>, vector<1x1x512xf32>
    %404 = vector.shape_cast %403 : vector<1x1x512xf32> to vector<1x512xf32>
    %405 = vector.broadcast %404 : vector<1x512xf32> to vector<16x512xf32>
    %406 = arith.mulf %402, %405 : vector<16x512xf32>
    %407 = arith.truncf %406 : vector<16x512xf32> to vector<16x512xbf16>
    %c416_333 = arith.constant 416 : index
    %c0_334 = arith.constant 0 : index
    %408 = vector.load %arg17[%c416_333, %c0_334] : memref<432x512xbf16, #tpu.memory_space<vmem>>, vector<16x512xbf16>
    tpu.vector_store %arg17[%c416_333, %c0_334], %407 {strides = array<i32>} : memref<432x512xbf16, #tpu.memory_space<vmem>>, vector<16x512xbf16>,
    %c0_335 = arith.constant 0 : index
    %c0_336 = arith.constant 0 : index
    %409 = vector.load %arg9[%c0_335, %c0_336] : memref<16x432xbf16, #tpu.memory_space<vmem>>, vector<16x432xbf16>
    %c0_337 = arith.constant 0 : index
    %c0_338 = arith.constant 0 : index
    %410 = vector.load %arg17[%c0_337, %c0_338] : memref<432x512xbf16, #tpu.memory_space<vmem>>, vector<432x512xbf16>
    %cst_339 = arith.constant dense<0.000000e+00> : vector<16x512xf32>
    %411 = tpu.matmul %409, %410, %cst_339 {dimension_numbers = #tpu.dot_dimension_numbers<[1], [0], [0], [1], [0, 0, 1, 1], [], []>} : vector<16x432xbf16>, vector<432x512xbf16>, vector<16x512xf32> -> vector<16x512xf32>
    %412 = vector.broadcast %218 : vector<16x1xf32> to vector<16x512xf32>
    %413 = arith.addf %411, %412 : vector<16x512xf32>
    %c0_340 = arith.constant 0 : index
    %c0_341 = arith.constant 0 : index
    %414 = vector.load %arg18[%c0_340, %c0_341] : memref<16x512xf32, #tpu.memory_space<vmem>>, vector<16x512xf32>
    tpu.vector_store %arg18[%c0_340, %c0_341], %413 {strides = array<i32>} : memref<16x512xf32, #tpu.memory_space<vmem>>, vector<16x512xf32>,
    %c0_342 = arith.constant 0 : index
    %c0_343 = arith.constant 0 : index
    %415 = vector.load %arg18[%c0_342, %c0_343] : memref<16x512xf32, #tpu.memory_space<vmem>>, vector<16x512xf32>
    %c0_344 = arith.constant 0 : index
    %c0_345 = arith.constant 0 : index
    %416 = vector.load %arg11[%c0_344, %c0_345] : memref<16x1xf32, #tpu.memory_space<vmem>>, vector<16x1xf32>
    %417 = vector.broadcast %416 : vector<16x1xf32> to vector<16x512xf32>
    %418 = arith.mulf %415, %417 : vector<16x512xf32>
    %c0_346 = arith.constant 0 : index
    %c0_347 = arith.constant 0 : index
    %419 = vector.load %arg12[%c0_346, %c0_347] : memref<16x1xf32, #tpu.memory_space<vmem>>, vector<16x1xf32>
    %420 = vector.broadcast %419 : vector<16x1xf32> to vector<16x512xf32>
    %421 = arith.addf %418, %420 : vector<16x512xf32>
    %cst_348 = arith.constant 0.000000e+00 : f32
    %422 = vector.broadcast %cst_348 : f32 to vector<16x512xf32>
    %423 = arith.maximumf %421, %422 : vector<16x512xf32>
    %c0_349 = arith.constant 0 : index
    %c0_350 = arith.constant 0 : index
    %424 = vector.load %arg13[%c0_349, %c0_350] : memref<16x16xbf16, #tpu.memory_space<vmem>>, vector<16x16xbf16>
    %425 = arith.truncf %423 : vector<16x512xf32> to vector<16x512xbf16>
    %cst_351 = arith.constant dense<0.000000e+00> : vector<16x512xf32>
    %426 = tpu.matmul %424, %425, %cst_351 {dimension_numbers = #tpu.dot_dimension_numbers<[1], [0], [0], [1], [0, 0, 1, 1], [], []>} : vector<16x16xbf16>, vector<16x512xbf16>, vector<16x512xf32> -> vector<16x512xf32>
    %c0_352 = arith.constant 0 : index
    %c0_353 = arith.constant 0 : index
    %427 = vector.load %arg14[%c0_352, %c0_353] : memref<16x1xf32, #tpu.memory_space<vmem>>, vector<16x1xf32>
    %428 = vector.broadcast %427 : vector<16x1xf32> to vector<16x512xf32>
    %429 = arith.addf %426, %428 : vector<16x512xf32>
    %cst_354 = arith.constant 0.000000e+00 : f32
    %430 = vector.broadcast %cst_354 : f32 to vector<16x512xf32>
    %431 = arith.maximumf %429, %430 : vector<16x512xf32>
    %c0_355 = arith.constant 0 : index
    %c0_356 = arith.constant 0 : index
    %c0_357 = arith.constant 0 : index
    %432 = vector.load %arg15[%c0_355, %c0_356, %c0_357] : memref<1x16x512xf32, #tpu.memory_space<vmem>>, vector<1x16x512xf32>
    %433 = vector.shape_cast %432 : vector<1x16x512xf32> to vector<16x512xf32>
    %434 = vector.shape_cast %431 : vector<16x512xf32> to vector<1x16x512xf32>
    tpu.vector_store %arg15[%c0_355, %c0_356, %c0_357], %434 {strides = array<i32>} : memref<1x16x512xf32, #tpu.memory_space<vmem>>, vector<1x16x512xf32>,
    return
  }
  func.func @transform_0(%arg0: i32) -> (i32, i32, i32) {
    %c0_i32 = arith.constant 0 : i32
    %c0_i32_0 = arith.constant 0 : i32
    %c0_i32_1 = arith.constant 0 : i32
    return %arg0, %c0_i32, %c0_i32_0 : i32, i32, i32
  }
  func.func @transform_1(%arg0: i32) -> (i32, i32, i32) {
    %c0_i32 = arith.constant 0 : i32
    %c0_i32_0 = arith.constant 0 : i32
    %c0_i32_1 = arith.constant 0 : i32
    %c0_i32_2 = arith.constant 0 : i32
    return %c0_i32, %c0_i32_0, %c0_i32_1 : i32, i32, i32
  }
  func.func @transform_2(%arg0: i32) -> (i32, i32) {
    %c0_i32 = arith.constant 0 : i32
    %c0_i32_0 = arith.constant 0 : i32
    %c0_i32_1 = arith.constant 0 : i32
    return %c0_i32, %c0_i32_0 : i32, i32
  }
  func.func @transform_3(%arg0: i32) -> (i32, i32) {
    %c0_i32 = arith.constant 0 : i32
    %c0_i32_0 = arith.constant 0 : i32
    %c0_i32_1 = arith.constant 0 : i32
    return %c0_i32, %c0_i32_0 : i32, i32
  }
  func.func @transform_4(%arg0: i32) -> (i32, i32) {
    %c0_i32 = arith.constant 0 : i32
    %c0_i32_0 = arith.constant 0 : i32
    %c0_i32_1 = arith.constant 0 : i32
    return %c0_i32, %c0_i32_0 : i32, i32
  }
  func.func @transform_5(%arg0: i32) -> (i32, i32) {
    %c0_i32 = arith.constant 0 : i32
    %c0_i32_0 = arith.constant 0 : i32
    %c0_i32_1 = arith.constant 0 : i32
    return %c0_i32, %c0_i32_0 : i32, i32
  }
  func.func @transform_6(%arg0: i32) -> (i32, i32) {
    %c0_i32 = arith.constant 0 : i32
    %c0_i32_0 = arith.constant 0 : i32
    %c0_i32_1 = arith.constant 0 : i32
    return %c0_i32, %c0_i32_0 : i32, i32
  }
  func.func @transform_7(%arg0: i32) -> (i32, i32) {
    %c0_i32 = arith.constant 0 : i32
    %c0_i32_0 = arith.constant 0 : i32
    %c0_i32_1 = arith.constant 0 : i32
    return %c0_i32, %c0_i32_0 : i32, i32
  }
  func.func @transform_8(%arg0: i32) -> (i32, i32) {
    %c0_i32 = arith.constant 0 : i32
    %c0_i32_0 = arith.constant 0 : i32
    %c0_i32_1 = arith.constant 0 : i32
    return %c0_i32, %c0_i32_0 : i32, i32
  }
  func.func @transform_9(%arg0: i32) -> (i32, i32) {
    %c0_i32 = arith.constant 0 : i32
    %c0_i32_0 = arith.constant 0 : i32
    %c0_i32_1 = arith.constant 0 : i32
    return %c0_i32, %c0_i32_0 : i32, i32
  }
  func.func @transform_10(%arg0: i32) -> (i32, i32) {
    %c0_i32 = arith.constant 0 : i32
    %c0_i32_0 = arith.constant 0 : i32
    %c0_i32_1 = arith.constant 0 : i32
    return %c0_i32, %c0_i32_0 : i32, i32
  }
  func.func @transform_11(%arg0: i32) -> (i32, i32) {
    %c0_i32 = arith.constant 0 : i32
    %c0_i32_0 = arith.constant 0 : i32
    %c0_i32_1 = arith.constant 0 : i32
    return %c0_i32, %c0_i32_0 : i32, i32
  }
  func.func @transform_12(%arg0: i32) -> (i32, i32) {
    %c0_i32 = arith.constant 0 : i32
    %c0_i32_0 = arith.constant 0 : i32
    %c0_i32_1 = arith.constant 0 : i32
    return %c0_i32, %c0_i32_0 : i32, i32
  }
  func.func @transform_13(%arg0: i32) -> (i32, i32) {
    %c0_i32 = arith.constant 0 : i32
    %c0_i32_0 = arith.constant 0 : i32
    %c0_i32_1 = arith.constant 0 : i32
    return %c0_i32, %c0_i32_0 : i32, i32
  }
  func.func @transform_14(%arg0: i32) -> (i32, i32, i32) {
    %c0_i32 = arith.constant 0 : i32
    %c0_i32_0 = arith.constant 0 : i32
    %c0_i32_1 = arith.constant 0 : i32
    return %arg0, %c0_i32, %c0_i32_0 : i32, i32, i32
  }
}

</mosaic_0001>

<bundles_post_ra>
// kernel: tpu_custom_call.1
= control target key start
LH: loop header
LB: loop body
LE: loop exit
PB: predicated region body
PF: predicated region fallthrough
CT: control target
= control target key end

     0   :  { %s11406_s0 = inlined_call_operand.hbm [shape: f32[2,16,512], index: 0, kind: input, shape index: {}]   ;;  %s11407_s1 = inlined_call_operand.hbm [shape: f32[27,1,512], index: 1, kind: input, shape index: {}]   ;;  %s11408_s2 = inlined_call_operand.vmem [shape: f32[16,1], index: 2, kind: input, shape index: {}]   ;;  %s11409_s3 = inlined_call_operand.vmem [shape: f32[16,1], index: 3, kind: input, shape index: {}]   ;;  %s11410_s4 = inlined_call_operand.vmem [shape: bf16[16,432], index: 4, kind: input, shape index: {}]   ;;  %s11411_s5 = inlined_call_operand.vmem [shape: f32[16,1], index: 5, kind: input, shape index: {}]   ;;  %s11412_s6 = inlined_call_operand.vmem [shape: f32[16,1], index: 6, kind: input, shape index: {}]   ;;  %s11413_s7 = inlined_call_operand.vmem [shape: f32[16,1], index: 7, kind: input, shape index: {}]   ;;  %s11414_s8 = inlined_call_operand.vmem [shape: bf16[16,432], index: 8, kind: input, shape index: {}]   ;;  %s11415_s9 = inlined_call_operand.vmem [shape: f32[16,1], index: 9, kind: input, shape index: {}]   ;;  %s11416_s10 = inlined_call_operand.vmem [shape: f32[16,1], index: 10, kind: input, shape index: {}]   ;;  %s11417_s11 = inlined_call_operand.vmem [shape: f32[16,1], index: 11, kind: input, shape index: {}]   ;;  %s11418_s12 = inlined_call_operand.vmem [shape: bf16[16,16], index: 12, kind: input, shape index: {}]   ;;  %s11419_s13 = inlined_call_operand.vmem [shape: f32[16,1], index: 13, kind: input, shape index: {}]   ;;  %s11420_s14 = inlined_call_operand.hbm [shape: f32[2,16,512], index: 14, kind: output, shape index: {}]  }
   0x1   :  { %11473 = sst [smem:[#allocation19_spill]] %s11406_s0 }
   0x2   :  { %11474 = sst [smem:[#allocation20_spill]] %s11407_s1 }
   0x3   :  { %11475 = sst [smem:[#allocation21_spill]] %s11408_s2 }
   0x4   :  { %11476 = sst [smem:[#allocation22_spill]] %s11409_s3 }
   0x5   :  { %11477 = sst [smem:[#allocation23_spill]] %s11410_s4 }
   0x6   :  { %11478 = sst [smem:[#allocation24_spill]] %s11411_s5 }
   0x7   :  { %11479 = sst [smem:[#allocation25_spill]] %s11418_s12 }
   0x8   :  { %11480 = sst [smem:[#allocation26_spill]] %s11420_s14 }
   0x9   :  { %19 = vsyncpa [#allocation6], 0 }
   0xa   :  { %21 = vsyncpa [#allocation6 + $0x1], 0 }
   0xb   :  { %22 = vsyncpa [#allocation9], 0 }
   0xc   :  { %23 = vsyncpa [#allocation7], 0 }
   0xd   :  { %25 = vsyncpa [#allocation7 + $0x1], 0  ;;  %s8897_s29 = smov 0   ;;  %s8899_s30 = smov 0  }
   0xe   :  { %s8901_s15 = smov 0   ;;  %s8903_s16 = smov 0  }
   0xf LB: > { %11481 = sst [smem:[#allocation14_spill]] %s8783_s29  ;;  %s8918_s17 = sadd.s32 4294967295, %s8795_s16   ;;  %s8795_s16 = sphi %s8903_s16, %s11596_s16   ;;  %s8791_s15 = sphi %s8901_s15, %s11598_s15   ;;  %s8787_s30 = sphi %s8899_s30, %s11600_s30   ;;  %s8783_s29 = sphi %s8897_s29, %s11599_s29  }
  0x10   : > { %11482 = sst [smem:[#allocation15_spill]] %s8791_s15  ;;  %s7426_s18 = sadd.s32 4294967294, %s8795_s16  }
  0x11   : > { %p51_p0 = scmp.ne.s32.totalorder %s8787_s30, %s8783_s29  ;;  %p52_p1 = scmp.eq.s32.totalorder %s8918_s17, 0 }
  0x12   : > { %p348_p2 = scmp.eq.s32.totalorder %s8918_s17, 1  ;;  %p354_p3 = scmp.eq.s32.totalorder %s7426_s18, 1 }
  0x13   : > { %p8927_p4 = por %p52_p1, %p51_p0  ;;  %p7427_p5 = scmp.ge.s32.totalorder %s8795_s16, 1 }
  0x14   : > { %p8932_p6 = por %p354_p3, %p51_p0  ;;  %p361_p7 = scmp.lt.s32.totalorder %s8795_s16, 3 }
  0x15   : > { %s11486_s1 = sld [smem:[#allocation20_spill]]  ;;  %s8797_s25 = smov [#allocation8]  }
  0x16   : > { %s11484_s20 = scalar_select %p8932_p6, 1, 0 }
  0x17   : > { %p8940_p8 = pnand %p7427_p5, %p361_p7  ;;  %s374_s26 = sshll.u32 %s8797_s25, 4  ;;  %s375_s26 = int_to_ptr.vmem [resolvable:$true] %s374_s26 }
  0x18   : > { %11485 = sst [smem:[#allocation16_spill]] %s11484_s20  ;;  %s8950_s27 = sadd.s32 1, %s8795_s16  }
  0x19   : > { %p8589_p9 = pneg %p8940_p8  ;;  %11488 = sst [smem:[#allocation17_spill]] %s8950_s27 }
  0x1a   : > { %s8798_s28 = smov 64   ;;  %s8799_s18 = smov 4  }
  0x1b   : > { %s372_s23 = sshll.u32 %s11486_s1, 4  ;;  %p8590_p10 = pnand %p8589_p9, %p52_p1  ;;  %s373_s23 = int_to_ptr.hbm [resolvable:$true] %s372_s23 }
  0x1c   : > { %s35_s21 = ssub.s32 %s8795_s16, %s8950_s27  ;;  %s38_s22 = sadd.s32 1, %s8791_s15 }
  0x1d   : > { %8592 = dma.hbm_to_vmem [thread:$0]  (!%p8590_p10), %s373_s23, 1728, %s375_s26, [#allocation9], %s8798_s28, %s8798_s28, %s8799_s18  }
  0x1e   : > { %p36_p12 = scmp.eq.s32.totalorder %s35_s21, 0  ;;  %p45_p13 = scmp.ne.s32.totalorder %s8791_s15, %s8787_s30 }
  0x1f   : > { %p46_p0 = scmp.eq.s32.totalorder %s8795_s16, 0  ;;  %p8602_p3 = scmp.lt.s32.totalorder %s8795_s16, 2 }
  0x20   : > { %s8960_s25 = scalar_select %p36_p12, %s8791_s15, %s38_s22  }
  0x21   : > { %p47_p5 = por %p46_p0, %p45_p13  ;;  %p8964_p7 = por %p348_p2, %p45_p13 }
  0x22   : > { %11489 = sst [smem:[#allocation18_spill]] %s8960_s25  ;;  %s424_s20 = sand.u32 1, %s8791_s15  }
  0x23   : > { %s8354_s29 = sshll.u32 %s8795_s16, 6  ;;  %s7430_s14 = sshll.u32 %s424_s20, 6 }
  0x24   : > { %s11491_s0 = sld [smem:[#allocation19_spill]]  ;;  %s428_s18 = scalar_lea.vmem [#allocation5], %s7430_s14 }
  0x25   : > { %s436_s21 = sshll.u32 %s428_s18, 4  ;;  %p8975_p9 = pnand %p8602_p3, %p47_p5  ;;  %s437_s21 = int_to_ptr.vmem [resolvable:$true] %s436_s21 }
  0x26   : > { %s425_s25 = scalar_lea.sflag [#allocation6], %s424_s20 }
  0x27   : > { %p8699_p10 = pneg %p8975_p9 }
  0x2a   : > { %s433_s26 = scalar_lea.hbm %s11491_s0, %s8354_s29  ;;  %s8702_s29 = scalar_lea.hbm %s11491_s0, 128 }
  0x2b   : > { %s434_s28 = sshll.u32 %s433_s26, 4  ;;  %s435_s28 = int_to_ptr.hbm [resolvable:$true] %s434_s28 }
  0x2c   : > { %s8695_s27 = sshra.s32 %s435_s28, 4  ;;  %s8696_s27 = int_to_ptr.hbm [resolvable:$true] %s8695_s27 }
  0x2d   : > { %s8697_s15 = scalar_lea.hbm %s8696_s27, 64  ;;  %p8703_p0 = scmp.lt.s32.totalorder %s8696_s27, %s11491_s0 }
  0x2e   : > { %p8698_p2 = scmp.ne.s32.totalorder %s8696_s27, %s8697_s15  ;;  %p8704_p3 = scmp.lt.s32.totalorder %s8702_s29, %s8697_s15 }
  0x30   : > { %p8700_p12 = pnand %p8699_p10, %p8698_p2  ;;  %p8705_p5 = por %p8704_p3, %p8703_p0 }
  0x32   : > { %p8701_p13 = pneg %p8700_p12 }
  0x34   : > { %p8706_p11 = pnand %p8705_p5, %p8701_p13 }
  0x36   : > { %8709 = shalt.err (!%p8706_p11)
}
  0x37   : > { %s8800_s20 = smov 512   ;;  %s8801_s18 = smov 32  }
  0x38   : > { %8596 = dma.hbm_to_vmem [thread:$0]  (!%p8975_p9), %s435_s28, 1024, %s437_s21, %s425_s25, %s8800_s20, %s8800_s20, %s8801_s18  }
  0x39   : > { %448 = sbr.rel (%p8940_p8) target bundleno = 5949 (0x173d), region = 76  ;;  %s8992_s12 = sand.u32 (!%p8940_p8), 1, %s8787_s30  }
  0x3a   : > { %s11427_s27 = sshll.u32 (!%p8940_p8), %s8992_s12, 6  ;;  %s451_s15 = scalar_lea.sflag (!%p8940_p8), [#allocation6], %s8992_s12 }
  0x3b   : > { %s8998_s14 = scalar_lea.vmem (!%p8940_p8), [#allocation5], %s11427_s27 }
  0x3e   : > { %8770 = dma.done.wait (%p8927_p4), %s451_s15, 1024  }
  0x3f   : > { %8772 = vsyncadd (%p8927_p4), %s451_s15, 4294966272 }
  0x40   : > { %8774 = dma.done.wait (%p52_p1), [#allocation9], 1728  }
  0x41   : > { %8776 = vsyncadd (%p52_p1), [#allocation9], 4294965568  ;;  %v8802_v0 = vmov 0   ;;  %s11493_s3 = sld [smem:[#allocation22_spill]]  ;;  %v578_v3 = vld [vmem:[#allocation8] sm:$0xf] }
  0x42   : > { %8663 = vset.pattern.permute.xlu1 %v8802_v0  ;;  %8662 = vset.pattern.permute.xlu0 %v8802_v0  ;;  %s11494_s2 = sld [smem:[#allocation21_spill]]  ;;  %v580_v4 = vperm.slane %v578_v3, 0  ;;  %s11464_s19 = smov 55   ;;  %v581_v7 = vperm.slane %v578_v3, 1  ;;  %v670_v8 = vld [vmem:[#allocation8 + $0x4] sm:$0xf] }
  0x43   : > { %8664 = vset.pattern.permute.xlu2 %v8802_v0  ;;  %v583_v9 = vperm.slane %v578_v3, 3  ;;  %v582_v10 = vperm.slane %v578_v3, 2  ;;  %v672_v11 = vperm.slane %v670_v8, 0  ;;  %s11468_s20 = smov 56   ;;  %v674_v12 = vperm.slane %v670_v8, 2  ;;  %s11459_s18 = smov 57  }
  0x44   : > { %584 = vrot.lane.b32.xlu2 %v580_v4, %s11464_s19  ;;  %v673_v13 = vperm.slane %v670_v8, 1  ;;  %v675_v14 = vperm.slane %v670_v8, 3  ;;  %v761_v15 = vld [vmem:[#allocation8 + $0x8] sm:$0xf]  ;;  %v852_v19 = vld [vmem:[#allocation8 + $0xc] sm:$0xf] }
  0x45   : > { %v764_v16 = vperm.slane %v761_v15, 1  ;;  %v763_v17 = vperm.slane %v761_v15, 0  ;;  %v765_v18 = vperm.slane %v761_v15, 2  ;;  %v854_v20 = vperm.slane %v852_v19, 0  ;;  %s11433_s15 = smov 63   ;;  %s11428_s24 = smov 64  }
  0x46   : > { %v766_v21 = vperm.slane %v761_v15, 3  ;;  %v855_v22 = vperm.slane %v852_v19, 1  ;;  %v943_v23 = vld [vmem:[#allocation8 + $0x10] sm:$0xf]  ;;  %v857_v24 = vperm.slane %v852_v19, 3  ;;  %v856_v25 = vperm.slane %v852_v19, 2 }
  0x47   : > { %v538_v1 = vld [vmem:[%s11493_s3] sm:$0xff]  ;;  %v539_v5 = vld [vmem:[%s11493_s3 + $0x8] sm:$0xff]  ;;  %v945_v26 = vperm.slane %v943_v23, 0  ;;  %v947_v27 = vperm.slane %v943_v23, 2  ;;  %v946_v28 = vperm.slane %v943_v23, 1  ;;  %v948_v29 = vperm.slane %v943_v23, 3 }
  0x48   : > { %v518_v2 = vld [vmem:[%s11494_s2] sm:$0xff]  ;;  %542 = vperm.xlu1 %8663, %v538_v1   ;;  %v519_v6 = vld [vmem:[%s11494_s2 + $0x8] sm:$0xff]  ;;  %v1760_v33 = vld [vmem:[#allocation8 + $0x34] sm:$0xf]  ;;  %vm592_vm0 = vcmask 449536   ;;  %s11466_s25 = smov 73  }
  0x49   : > { %522 = vperm.xlu0 %8662, %v518_v2   ;;  %v510_v32 = vld [vmem:[%s8998_s14] sm:$0xff]  ;;  %v511_v34 = vld [vmem:[%s8998_s14 + $0x8] sm:$0xff]  ;;  %v512_v35 = vld [vmem:[%s8998_s14 + $0x10] sm:$0xff]  ;;  %v1762_v39 = vperm.slane %v1760_v33, 0  ;;  %v1763_v40 = vperm.slane %v1760_v33, 1  ;;  %v1764_v47 = vperm.slane %v1760_v33, 2 }
  0x4a   : > { %v513_v36 = vld [vmem:[%s8998_s14 + $0x18] sm:$0xff]  ;;  %v1765_v48 = vperm.slane %v1760_v33, 3  ;;  %v514_v53 = vld [vmem:[%s8998_s14 + $0x20] sm:$0xff]  ;;  %v515_v57 = vld [vmem:[%s8998_s14 + $0x28] sm:$0xff]  ;;  %vm684_vm1 = vcmask 457728   ;;  %vm775_vm2 = vcmask 465920  }
  0x4b   : > { %v516_v58 = vld [vmem:[%s8998_s14 + $0x30] sm:$0xff]  ;;  %v517_v59 = vld [vmem:[%s8998_s14 + $0x38] sm:$0xff]  ;;  %s11461_s14 = smov 72   ;;  %s11457_s28 = smov 71   ;;  %vm866_vm3 = vcmask 515072   ;;  %vm11432_vm4 = vcmask 523264  }
  0x4c   : > { %586 = vrot.lane.b32.xlu2 %v581_v7, %s11464_s19  ;;  %s11430_s21 = smov 65   ;;  %vm641_vm5 = vcmask 1043456   ;;  %vm643_vm6 = vcmask 596992   ;;  %vm734_vm7 = vcmask 588800   ;;  %vm825_vm8 = vcmask 580608   ;;  %s11455_s22 = smov 119  }
  0x4d   : > { %vm11435_vm9 = vcmask 531456   ;;  %vm1412_vm10 = vcmask 973824   ;;  %s11453_s29 = smov 9   ;;  %s11451_s23 = smov 120   ;;  %vm1462_vm11 = vcmask 72704   ;;  %vm1503_vm12 = vcmask 982016  }
  0x4e   : > { %s11449_s26 = smov 8   ;;  %s11447_s27 = smov 121   ;;  %vm11446_vm13 = vcmask 64512   ;;  %vm11445_vm14 = vcmask 990208   ;;  %vm11444_vm15 = vcmask 56320  }
  0x4f   : > { %s11511_s4 = sld [smem:[#allocation23_spill]]  ;;  %s11543_s0 = smov 56  }
  0x50   : > { %547 = vperm.xlu1 %8663, %v539_v5   ;;  %s11512_s5 = sld [smem:[#allocation24_spill]]  ;;  %s11544_s2 = smov 73  }
  0x51   : > { %527 = vperm.xlu0 %8662, %v519_v6   ;;  %s11545_s3 = smov 55  }
  0x54   : > { %676 = vrot.lane.b32.xlu2 %v672_v11, %s11468_s20 }
  0x58   : > { %590 = vrot.lane.b32.xlu1 %v583_v9, %s11464_s19 }
  0x59   : > { %588 = vrot.lane.b32.xlu0 %v582_v10, %s11464_s19 }
  0x5c   : > { %682 = vrot.lane.b32.xlu2 %v675_v14, %s11468_s20 }
  0x60   : > { %680 = vrot.lane.b32.xlu1 %v674_v12, %s11468_s20 }
  0x61   : > { %678 = vrot.lane.b32.xlu0 %v673_v13, %s11468_s20 }
  0x64   : > { %771 = vrot.lane.b32.xlu2 %v765_v18, %s11459_s18 }
  0x68   : > { %769 = vrot.lane.b32.xlu1 %v764_v16, %s11459_s18 }
  0x69   : > { %767 = vrot.lane.b32.xlu0 %v763_v17, %s11459_s18 }
  0x6c   : > { %860 = vrot.lane.b32.xlu2 %v855_v22, %s11433_s15 }
  0x70   : > { %858 = vrot.lane.b32.xlu1 %v854_v20, %s11433_s15 }
  0x71   : > { %773 = vrot.lane.b32.xlu0 %v766_v21, %s11459_s18 }
  0x74   : > { %949 = vrot.lane.b32.xlu2 %v945_v26, %s11428_s24 }
  0x78   : > { %864 = vrot.lane.b32.xlu1 %v857_v24, %s11433_s15 }
  0x79   : > { %862 = vrot.lane.b32.xlu0 %v856_v25, %s11433_s15 }
  0x7c   : > { %955 = vrot.lane.b32.xlu2 %v948_v29, %s11428_s24 }
  0x80   : > { %953 = vrot.lane.b32.xlu1 %v947_v27, %s11428_s24 }
  0x81   : > { %951 = vrot.lane.b32.xlu0 %v946_v28, %s11428_s24 }
  0x9e   : > { %v585_v30 = vpop.permute.xlu2 %584 }
  0x9f   : > { %v601_v45 = vmul.f32 0.0, %v585_v30 }
  0xa6   : > { %v587_v31 = vpop.permute.xlu2 %586 }
  0xa7   : > { %v593_v46 = vsel %vm592_vm0, %v585_v30, %v587_v31 }
  0xae   : > { %v677_v62 = vpop.permute.xlu2 %676 }
  0xb6   : > { %v683_v25 = vpop.permute.xlu2 %682 }
  0xba   : > { %v543_v37 = vpop.permute.xlu1 %542 }
  0xbb   : > { %v523_v38 = vpop.permute.xlu0 %522 }
  0xbc   : > { %v530_v41 = vmul.f32 %v523_v38, %v510_v32  ;;  %v531_v42 = vmul.f32 %v523_v38, %v511_v34  ;;  %v532_v43 = vmul.f32 %v523_v38, %v512_v35  ;;  %v533_v44 = vmul.f32 %v523_v38, %v513_v36 }
  0xbe   : > { %v9045_v49 = vadd.f32 %v543_v37, %v530_v41  ;;  %v9047_v50 = vadd.f32 %v543_v37, %v531_v42  ;;  %v9049_v51 = vadd.f32 %v543_v37, %v532_v43  ;;  %v9051_v52 = vadd.f32 %v543_v37, %v533_v44 }
  0xc0   : > { %v602_v54 = vmul.f32 %v593_v46, %v9045_v49  ;;  %v1770_v55 = vmul.f32 %v1762_v39, %v9045_v49  ;;  %v1771_v56 = vmul.f32 %v1763_v40, %v9047_v50  ;;  %v1772_v60 = vmul.f32 %v1764_v47, %v9049_v51 }
  0xc1   : > { %v1773_v61 = vmul.f32 %v1765_v48, %v9051_v52  ;;  %v697_v29 = vmul.f32 %v683_v25, %v9051_v52 }
  0xc2   : > { %v611_v63 = vpack.c.bf16 %v602_v54, %v601_v45  ;;  %v1778_v0 = vpack.c.bf16 %v1771_v56, %v1770_v55  ;;  %v548_v1 = vpop.permute.xlu1 %547  ;;  %v772_v56 = vpop.permute.xlu2 %771 }
  0xc3   : > { %v528_v2 = vpop.permute.xlu0 %527  ;;  %v1779_v3 = vpack.c.bf16 %v1773_v61, %v1772_v60 }
  0xc4   : > { %v534_v4 = vmul.f32 %v528_v2, %v514_v53  ;;  %v535_v5 = vmul.f32 %v528_v2, %v515_v57  ;;  %v536_v6 = vmul.f32 %v528_v2, %v516_v58  ;;  %v537_v7 = vmul.f32 %v528_v2, %v517_v59  ;;  %623 = vrot.lane.b32.xlu2 %v611_v63, %s11466_s25 }
  0xc5   : > { %1782 = vst [vmem:[#allocation3 + $0x1a0] sm:$0xff] %v1778_v0 }
  0xc6   : > { %v9063_v8 = vadd.f32 %v548_v1, %v534_v4  ;;  %v9065_v9 = vadd.f32 %v548_v1, %v535_v5  ;;  %v9067_v10 = vadd.f32 %v548_v1, %v536_v6  ;;  %v9069_v11 = vadd.f32 %v548_v1, %v537_v7  ;;  %1783 = vst [vmem:[#allocation3 + $0x1a8] sm:$0xff] %v1779_v3 }
  0xc8   : > { %v607_v12 = vmul.f32 %v593_v46, %v9063_v8  ;;  %v1774_v13 = vmul.f32 %v1762_v39, %v9063_v8  ;;  %v1775_v14 = vmul.f32 %v1763_v40, %v9065_v9  ;;  %v1776_v15 = vmul.f32 %v1764_v47, %v9067_v10 }
  0xc9   : > { %v1777_v16 = vmul.f32 %v1765_v48, %v9069_v11  ;;  %v702_v38 = vmul.f32 %v683_v25, %v9069_v11  ;;  %v693_v46 = vmul.f32 0.0, %v677_v62 }
  0xca   : > { %v614_v17 = vpack.c.bf16 %v607_v12, %v601_v45  ;;  %v1780_v18 = vpack.c.bf16 %v1775_v14, %v1774_v13  ;;  %v591_v19 = vpop.permute.xlu1 %590  ;;  %v861_v14 = vpop.permute.xlu2 %860 }
  0xcb   : > { %v589_v20 = vpop.permute.xlu0 %588  ;;  %v1781_v21 = vpack.c.bf16 %v1777_v16, %v1776_v15  ;;  %v605_v24 = vmul.f32 %v591_v19, %v9051_v52  ;;  %v610_v32 = vmul.f32 %v591_v19, %v9069_v11  ;;  %v708_v45 = vpack.c.bf16 %v702_v38, %v702_v38 }
  0xcc   : > { %v594_v22 = vsel %vm592_vm0, %v587_v31, %v589_v20  ;;  %v595_v23 = vsel %vm592_vm0, %v589_v20, %v591_v19  ;;  %629 = vrot.lane.b32.xlu2 %v614_v17, %s11466_s25  ;;  %1784 = vst [vmem:[#allocation3 + $0x1b0] sm:$0xff] %v1780_v18  ;;  %v705_v31 = vpack.c.bf16 %v697_v29, %v697_v29 }
  0xcd   : > { %v603_v26 = vmul.f32 %v594_v22, %v9047_v50  ;;  %v604_v27 = vmul.f32 %v595_v23, %v9049_v51  ;;  %v613_v28 = vpack.c.bf16 %v605_v24, %v605_v24  ;;  %1785 = vst [vmem:[#allocation3 + $0x1b8] sm:$0xff] %v1781_v21  ;;  %v608_v33 = vmul.f32 %v594_v22, %v9065_v9 }
  0xce   : > { %v609_v34 = vmul.f32 %v595_v23, %v9067_v10  ;;  %v616_v37 = vpack.c.bf16 %v610_v32, %v610_v32 }
  0xcf   : > { %v612_v30 = vpack.c.bf16 %v604_v27, %v603_v26  ;;  %627 = vrot.lane.b32.xlu1 %v613_v28, %s11466_s25 }
  0xd0   : > { %v615_v41 = vpack.c.bf16 %v609_v34, %v608_v33 }
  0xd1   : > { %625 = vrot.lane.b32.xlu0 %v612_v30, %s11466_s25 }
  0xd2   : > { %v681_v36 = vpop.permute.xlu1 %680  ;;  %v950_v26 = vpop.permute.xlu2 %949 }
  0xd3   : > { %v679_v35 = vpop.permute.xlu0 %678  ;;  %v687_v39 = vsel %vm684_vm1, %v681_v36, %v683_v25 }
  0xd4   : > { %719 = vrot.lane.b32.xlu2 %v705_v31, %s11461_s14  ;;  %v686_v40 = vsel %vm684_vm1, %v679_v35, %v681_v36  ;;  %v685_v42 = vsel %vm684_vm1, %v677_v62, %v679_v35  ;;  %v696_v43 = vmul.f32 %v687_v39, %v9049_v51  ;;  %v701_v57 = vmul.f32 %v687_v39, %v9067_v10 }
  0xd5   : > { %v695_v44 = vmul.f32 %v686_v40, %v9047_v50  ;;  %v694_v47 = vmul.f32 %v685_v42, %v9045_v49  ;;  %v700_v58 = vmul.f32 %v686_v40, %v9065_v9  ;;  %v699_v60 = vmul.f32 %v685_v42, %v9063_v8 }
  0xd7   : > { %633 = vrot.lane.b32.xlu1 %v616_v37, %s11466_s25  ;;  %v704_v53 = vpack.c.bf16 %v696_v43, %v695_v44  ;;  %v703_v55 = vpack.c.bf16 %v694_v47, %v693_v46  ;;  %v707_v1 = vpack.c.bf16 %v701_v57, %v700_v58  ;;  %v706_v3 = vpack.c.bf16 %v699_v60, %v693_v46 }
  0xd8   : > { %v966_v58 = vmul.f32 0.0, %v950_v26 }
  0xd9   : > { %631 = vrot.lane.b32.xlu0 %v615_v41, %s11466_s25 }
  0xda   : > { %v770_v54 = vpop.permute.xlu1 %769  ;;  %v956_v39 = vpop.permute.xlu2 %955 }
  0xdb   : > { %v768_v48 = vpop.permute.xlu0 %767  ;;  %v777_v59 = vsel %vm775_vm2, %v770_v54, %v772_v56  ;;  %v970_v43 = vmul.f32 %v956_v39, %v9051_v52  ;;  %v975_v60 = vmul.f32 %v956_v39, %v9069_v11 }
  0xdc   : > { %725 = vrot.lane.b32.xlu2 %v708_v45, %s11461_s14  ;;  %v786_v63 = vmul.f32 %v777_v59, %v9047_v50  ;;  %v776_v2 = vsel %vm775_vm2, %v768_v48, %v770_v54  ;;  %v784_v5 = vmul.f32 0.0, %v768_v48  ;;  %v791_v15 = vmul.f32 %v777_v59, %v9065_v9 }
  0xdd   : > { %v785_v6 = vmul.f32 %v776_v2, %v9045_v49  ;;  %v790_v20 = vmul.f32 %v776_v2, %v9063_v8  ;;  %v978_v54 = vpack.c.bf16 %v970_v43, %v970_v43 }
  0xdf   : > { %717 = vrot.lane.b32.xlu1 %v704_v53, %s11461_s14  ;;  %v794_v16 = vpack.c.bf16 %v785_v6, %v784_v5  ;;  %v797_v27 = vpack.c.bf16 %v790_v20, %v784_v5 }
  0xe1   : > { %715 = vrot.lane.b32.xlu0 %v703_v55, %s11461_s14 }
  0xe2   : > { %v859_v7 = vpop.permute.xlu1 %858 }
  0xe3   : > { %v774_v61 = vpop.permute.xlu0 %773  ;;  %v867_v19 = vsel %vm866_vm3, %v859_v7, %v861_v14  ;;  %v875_v21 = vmul.f32 0.0, %v859_v7 }
  0xe4   : > { %v778_v62 = vsel %vm775_vm2, %v772_v56, %v774_v61  ;;  %v788_v12 = vmul.f32 %v774_v61, %v9051_v52  ;;  %v876_v22 = vmul.f32 %v867_v19, %v9045_v49  ;;  %v793_v23 = vmul.f32 %v774_v61, %v9069_v11 }
  0xe5   : > { %v787_v0 = vmul.f32 %v778_v62, %v9049_v51  ;;  %v792_v13 = vmul.f32 %v778_v62, %v9067_v10  ;;  %v881_v33 = vmul.f32 %v867_v19, %v9063_v8 }
  0xe6   : > { %v796_v17 = vpack.c.bf16 %v788_v12, %v788_v12  ;;  %v799_v28 = vpack.c.bf16 %v793_v23, %v793_v23  ;;  %v885_v29 = vpack.c.bf16 %v876_v22, %v875_v21 }
  0xe7   : > { %v795_v4 = vpack.c.bf16 %v787_v0, %v786_v63  ;;  %723 = vrot.lane.b32.xlu1 %v707_v1, %s11461_s14  ;;  %v798_v18 = vpack.c.bf16 %v792_v13, %v791_v15  ;;  %v888_v38 = vpack.c.bf16 %v881_v33, %v875_v21  ;;  %v981_v63 = vpack.c.bf16 %v975_v60, %v975_v60 }
  0xe9   : > { %721 = vrot.lane.b32.xlu0 %v706_v3, %s11461_s14  ;;  %808 = vrot.lane.b32.xlu2 %v795_v4, %s11457_s28  ;;  %v1034_v4 = vld [vmem:[#allocation8 + $0x14] sm:$0xf] }
  0xea   : > { %v865_v24 = vpop.permute.xlu1 %864  ;;  %v1038_v6 = vperm.slane %v1034_v4, 2  ;;  %v1037_v7 = vperm.slane %v1034_v4, 1  ;;  %v1036_v12 = vperm.slane %v1034_v4, 0  ;;  %v1039_v13 = vperm.slane %v1034_v4, 3 }
  0xeb   : > { %v863_v25 = vpop.permute.xlu0 %862  ;;  %v879_v32 = vmul.f32 %v865_v24, %v9051_v52  ;;  %v884_v40 = vmul.f32 %v865_v24, %v9069_v11 }
  0xec   : > { %v868_v30 = vsel %vm866_vm3, %v861_v14, %v863_v25  ;;  %v869_v31 = vsel %vm866_vm3, %v863_v25, %v865_v24 }
  0xed   : > { %v877_v34 = vmul.f32 %v868_v30, %v9047_v50  ;;  %v878_v35 = vmul.f32 %v869_v31, %v9049_v51  ;;  %v887_v36 = vpack.c.bf16 %v879_v32, %v879_v32  ;;  %v882_v41 = vmul.f32 %v868_v30, %v9065_v9 }
  0xee   : > { %v883_v42 = vmul.f32 %v869_v31, %v9067_v10  ;;  %v890_v46 = vpack.c.bf16 %v884_v40, %v884_v40 }
  0xef   : > { %806 = vrot.lane.b32.xlu1 %v794_v16, %s11457_s28  ;;  %v886_v37 = vpack.c.bf16 %v878_v35, %v877_v34 }
  0xf0   : > { %v889_v53 = vpack.c.bf16 %v883_v42, %v882_v41 }
  0xf1   : > { %810 = vrot.lane.b32.xlu0 %v796_v17, %s11457_s28  ;;  %814 = vrot.lane.b32.xlu2 %v798_v18, %s11457_s28 }
  0xf2   : > { %v954_v44 = vpop.permute.xlu1 %953 }
  0xf3   : > { %v952_v45 = vpop.permute.xlu0 %951  ;;  %v960_v47 = vsel %vm11432_vm4, %v954_v44, %v956_v39 }
  0xf4   : > { %v959_v48 = vsel %vm11432_vm4, %v952_v45, %v954_v44  ;;  %v958_v55 = vsel %vm11432_vm4, %v950_v26, %v952_v45  ;;  %v969_v56 = vmul.f32 %v960_v47, %v9049_v51  ;;  %v974_v0 = vmul.f32 %v960_v47, %v9067_v10 }
  0xf5   : > { %v968_v57 = vmul.f32 %v959_v48, %v9047_v50  ;;  %v967_v59 = vmul.f32 %v958_v55, %v9045_v49  ;;  %v973_v1 = vmul.f32 %v959_v48, %v9065_v9  ;;  %v972_v2 = vmul.f32 %v958_v55, %v9063_v8 }
  0xf7   : > { %812 = vrot.lane.b32.xlu1 %v797_v27, %s11457_s28  ;;  %v977_v61 = vpack.c.bf16 %v969_v56, %v968_v57  ;;  %v976_v62 = vpack.c.bf16 %v967_v59, %v966_v58  ;;  %v980_v3 = vpack.c.bf16 %v974_v0, %v973_v1  ;;  %v979_v5 = vpack.c.bf16 %v972_v2, %v966_v58 }
  0xf9   : > { %816 = vrot.lane.b32.xlu0 %v799_v28, %s11457_s28  ;;  %897 = vrot.lane.b32.xlu2 %v885_v29, %s11430_s21 }
  0xff   : > { %901 = vrot.lane.b32.xlu1 %v887_v36, %s11430_s21 }
 0x101   : > { %899 = vrot.lane.b32.xlu0 %v886_v37, %s11430_s21  ;;  %903 = vrot.lane.b32.xlu2 %v888_v38, %s11430_s21 }
 0x107   : > { %907 = vrot.lane.b32.xlu1 %v890_v46, %s11430_s21 }
 0x109   : > { %905 = vrot.lane.b32.xlu0 %v889_v53, %s11430_s21  ;;  %992 = vrot.lane.b32.xlu2 %v978_v54, %s11428_s24 }
 0x10f   : > { %990 = vrot.lane.b32.xlu1 %v977_v61, %s11428_s24 }
 0x111   : > { %988 = vrot.lane.b32.xlu0 %v976_v62, %s11428_s24  ;;  %998 = vrot.lane.b32.xlu2 %v981_v63, %s11428_s24 }
 0x117   : > { %996 = vrot.lane.b32.xlu1 %v980_v3, %s11428_s24 }
 0x119   : > { %994 = vrot.lane.b32.xlu0 %v979_v5, %s11428_s24  ;;  %1044 = vrot.lane.b32.xlu2 %v1038_v6, %s11430_s21  ;;  %s11440_s24 = smov 7  }
 0x11e   : > { %v624_v14 = vpop.permute.xlu2 %623 }
 0x11f   : > { %1042 = vrot.lane.b32.xlu1 %v1037_v7, %s11430_s21  ;;  %v635_v19 = vrot.slane %v624_v14, 4 }
 0x121   : > { %1040 = vrot.lane.b32.xlu0 %v1036_v12, %s11430_s21 }
 0x126   : > { %v630_v15 = vpop.permute.xlu2 %629 }
 0x127   : > { %v638_v29 = vrot.slane %v630_v15, 4 }
 0x129   : > { %1046 = vrot.lane.b32.xlu0 %v1039_v13, %s11430_s21  ;;  %s11436_s21 = smov 127  }
 0x12e   : > { %v720_v20 = vpop.permute.xlu2 %719 }
 0x12f   : > { %v729_v37 = vrot.slane %v720_v20, 4 }
 0x136   : > { %v726_v31 = vpop.permute.xlu2 %725 }
 0x137   : > { %v732_v47 = vrot.slane %v726_v31, 4 }
 0x141   : > { %v628_v16 = vpop.permute.xlu1 %627 }
 0x142   : > { %v637_v17 = vrot.slane %v628_v16, 4 }
 0x143   : > { %v626_v18 = vpop.permute.xlu0 %625  ;;  %v809_v42 = vpop.permute.xlu2 %808 }
 0x144   : > { %v636_v21 = vrot.slane %v626_v18, 4  ;;  %v819_v61 = vrot.slane %v809_v42, 4 }
 0x146   : > { %v642_v22 = vsel %vm641_vm5, %v635_v19, %v636_v21  ;;  %v645_v23 = vsel %vm641_vm5, %v636_v21, %v637_v17 }
 0x147   : > { %v644_v24 = vsel %vm643_vm6, %v624_v14, %v642_v22  ;;  %v646_v25 = vsel %vm643_vm6, %v626_v18, %v645_v23 }
 0x148   : > { %655 = vst [vmem:[#allocation3] sm:$0xff] %v644_v24 }
 0x149   : > { %656 = vst [vmem:[#allocation3 + $0x8] sm:$0xff] %v646_v25  ;;  %v634_v26 = vpop.permute.xlu1 %633 }
 0x14a   : > { %v640_v27 = vrot.slane %v634_v26, 4 }
 0x14b   : > { %v632_v28 = vpop.permute.xlu0 %631  ;;  %v815_v59 = vpop.permute.xlu2 %814 }
 0x14c   : > { %v639_v30 = vrot.slane %v632_v28, 4  ;;  %v822_v7 = vrot.slane %v815_v59, 4 }
 0x14e   : > { %v647_v32 = vsel %vm641_vm5, %v638_v29, %v639_v30  ;;  %v649_v33 = vsel %vm641_vm5, %v639_v30, %v640_v27 }
 0x14f   : > { %v648_v34 = vsel %vm643_vm6, %v630_v15, %v647_v32  ;;  %v650_v35 = vsel %vm643_vm6, %v632_v28, %v649_v33 }
 0x150   : > { %657 = vst [vmem:[#allocation3 + $0x10] sm:$0xff] %v648_v34 }
 0x151   : > { %658 = vst [vmem:[#allocation3 + $0x18] sm:$0xff] %v650_v35  ;;  %v718_v36 = vpop.permute.xlu1 %717 }
 0x152   : > { %v728_v38 = vrot.slane %v718_v36, 4 }
 0x153   : > { %v716_v39 = vpop.permute.xlu0 %715  ;;  %v898_v5 = vpop.permute.xlu2 %897 }
 0x154   : > { %v727_v40 = vrot.slane %v716_v39, 4  ;;  %v736_v41 = vsel %vm641_vm5, %v728_v38, %v729_v37  ;;  %v909_v22 = vrot.slane %v898_v5, 4 }
 0x155   : > { %v737_v43 = vsel %vm734_vm7, %v718_v36, %v736_v41 }
 0x156   : > { %v733_v44 = vsel %vm641_vm5, %v727_v40, %v728_v38  ;;  %747 = vst [vmem:[#allocation3 + $0x28] sm:$0xff] %v737_v43 }
 0x157   : > { %v735_v45 = vsel %vm734_vm7, %v716_v39, %v733_v44 }
 0x158   : > { %746 = vst [vmem:[#allocation3 + $0x20] sm:$0xff] %v735_v45 }
 0x159   : > { %v724_v46 = vpop.permute.xlu1 %723 }
 0x15a   : > { %v731_v48 = vrot.slane %v724_v46, 4 }
 0x15b   : > { %v722_v53 = vpop.permute.xlu0 %721  ;;  %v904_v23 = vpop.permute.xlu2 %903 }
 0x15c   : > { %v730_v54 = vrot.slane %v722_v53, 4  ;;  %v740_v55 = vsel %vm641_vm5, %v731_v48, %v732_v47  ;;  %v912_v32 = vrot.slane %v904_v23, 4 }
 0x15d   : > { %v741_v56 = vsel %vm734_vm7, %v724_v46, %v740_v55 }
 0x15e   : > { %v738_v57 = vsel %vm641_vm5, %v730_v54, %v731_v48  ;;  %749 = vst [vmem:[#allocation3 + $0x38] sm:$0xff] %v741_v56 }
 0x15f   : > { %v739_v58 = vsel %vm734_vm7, %v722_v53, %v738_v57 }
 0x160   : > { %748 = vst [vmem:[#allocation3 + $0x30] sm:$0xff] %v739_v58 }
 0x161   : > { %v807_v60 = vpop.permute.xlu1 %806 }
 0x162   : > { %v818_v62 = vrot.slane %v807_v60, 4 }
 0x163   : > { %v811_v63 = vpop.permute.xlu0 %810  ;;  %v993_v34 = vpop.permute.xlu2 %992 }
 0x164   : > { %v820_v0 = vrot.slane %v811_v63, 4  ;;  %v824_v1 = vsel %vm641_vm5, %v818_v62, %v819_v61  ;;  %v1002_v40 = vrot.slane %v993_v34, 4 }
 0x165   : > { %v826_v2 = vsel %vm825_vm8, %v807_v60, %v824_v1 }
 0x166   : > { %v827_v3 = vsel %vm641_vm5, %v819_v61, %v820_v0  ;;  %837 = vst [vmem:[#allocation3 + $0x40] sm:$0xff] %v826_v2 }
 0x167   : > { %v828_v4 = vsel %vm825_vm8, %v809_v42, %v827_v3 }
 0x168   : > { %838 = vst [vmem:[#allocation3 + $0x48] sm:$0xff] %v828_v4 }
 0x169   : > { %v813_v6 = vpop.permute.xlu1 %812 }
 0x16a   : > { %v821_v12 = vrot.slane %v813_v6, 4 }
 0x16b   : > { %v817_v13 = vpop.permute.xlu0 %816  ;;  %v999_v48 = vpop.permute.xlu2 %998 }
 0x16c   : > { %v823_v14 = vrot.slane %v817_v13, 4  ;;  %v829_v15 = vsel %vm641_vm5, %v821_v12, %v822_v7  ;;  %v1005_v54 = vrot.slane %v999_v48, 4 }
 0x16d   : > { %v830_v16 = vsel %vm825_vm8, %v813_v6, %v829_v15 }
 0x16e   : > { %v831_v17 = vsel %vm641_vm5, %v822_v7, %v823_v14  ;;  %839 = vst [vmem:[#allocation3 + $0x50] sm:$0xff] %v830_v16 }
 0x16f   : > { %v832_v18 = vsel %vm825_vm8, %v815_v59, %v831_v17 }
 0x170   : > { %840 = vst [vmem:[#allocation3 + $0x58] sm:$0xff] %v832_v18 }
 0x171   : > { %v902_v19 = vpop.permute.xlu1 %901 }
 0x172   : > { %v911_v20 = vrot.slane %v902_v19, 4 }
 0x173   : > { %v900_v21 = vpop.permute.xlu0 %899  ;;  %v1045_v3 = vpop.permute.xlu2 %1044 }
 0x174   : > { %v910_v24 = vrot.slane %v900_v21, 4 }
 0x176   : > { %v915_v25 = vsel %vm641_vm5, %v909_v22, %v910_v24  ;;  %v918_v26 = vsel %vm641_vm5, %v910_v24, %v911_v20  ;;  %v1125_v20 = vld [vmem:[#allocation8 + $0x18] sm:$0xf] }
 0x177   : > { %v917_v27 = vsel %vm11435_vm9, %v898_v5, %v915_v25  ;;  %v919_v28 = vsel %vm11435_vm9, %v900_v21, %v918_v26  ;;  %v1129_v26 = vperm.slane %v1125_v20, 2 }
 0x178   : > { %928 = vst [vmem:[#allocation3 + $0x60] sm:$0xff] %v917_v27  ;;  %v1130_v27 = vperm.slane %v1125_v20, 3 }
 0x179   : > { %929 = vst [vmem:[#allocation3 + $0x68] sm:$0xff] %v919_v28  ;;  %v908_v29 = vpop.permute.xlu1 %907  ;;  %v1128_v28 = vperm.slane %v1125_v20, 1 }
 0x17a   : > { %v914_v30 = vrot.slane %v908_v29, 4 }
 0x17b   : > { %v906_v31 = vpop.permute.xlu0 %905 }
 0x17c   : > { %v913_v33 = vrot.slane %v906_v31, 4 }
 0x17e   : > { %v920_v35 = vsel %vm641_vm5, %v912_v32, %v913_v33  ;;  %v922_v36 = vsel %vm641_vm5, %v913_v33, %v914_v30 }
 0x17f   : > { %v921_v37 = vsel %vm11435_vm9, %v904_v23, %v920_v35  ;;  %v923_v38 = vsel %vm11435_vm9, %v906_v31, %v922_v36  ;;  %v1127_v23 = vperm.slane %v1125_v20, 0 }
 0x180   : > { %930 = vst [vmem:[#allocation3 + $0x70] sm:$0xff] %v921_v37 }
 0x181   : > { %931 = vst [vmem:[#allocation3 + $0x78] sm:$0xff] %v923_v38  ;;  %v991_v39 = vpop.permute.xlu1 %990 }
 0x182   : > { %v1001_v41 = vrot.slane %v991_v39, 4 }
 0x183   : > { %v989_v42 = vpop.permute.xlu0 %988 }
 0x184   : > { %v1000_v43 = vrot.slane %v989_v42, 4  ;;  %v1009_v44 = vsel %vm641_vm5, %v1001_v41, %v1002_v40 }
 0x185   : > { %v1010_v45 = vsel %vm11432_vm4, %v991_v39, %v1009_v44 }
 0x186   : > { %v1006_v46 = vsel %vm641_vm5, %v1000_v43, %v1001_v41  ;;  %1020 = vst [vmem:[#allocation3 + $0x88] sm:$0xff] %v1010_v45 }
 0x187   : > { %v1008_v47 = vsel %vm11432_vm4, %v989_v42, %v1006_v46 }
 0x188   : > { %1019 = vst [vmem:[#allocation3 + $0x80] sm:$0xff] %v1008_v47 }
 0x189   : > { %v997_v53 = vpop.permute.xlu1 %996 }
 0x18a   : > { %v1004_v55 = vrot.slane %v997_v53, 4 }
 0x18b   : > { %v995_v56 = vpop.permute.xlu0 %994 }
 0x18c   : > { %v1003_v57 = vrot.slane %v995_v56, 4  ;;  %v1013_v58 = vsel %vm641_vm5, %v1004_v55, %v1005_v54 }
 0x18d   : > { %v1014_v59 = vsel %vm11432_vm4, %v997_v53, %v1013_v58 }
 0x18e   : > { %v1011_v60 = vsel %vm641_vm5, %v1003_v57, %v1004_v55  ;;  %1022 = vst [vmem:[#allocation3 + $0x98] sm:$0xff] %v1014_v59 }
 0x18f   : > { %v1012_v61 = vsel %vm11432_vm4, %v995_v56, %v1011_v60  ;;  %vm11442_vm4 = vcmask 1039360  }
 0x190   : > { %1021 = vst [vmem:[#allocation3 + $0x90] sm:$0xff] %v1012_v61 }
 0x191   : > { %v1043_v62 = vpop.permute.xlu1 %1042 }
 0x192   : > { %v1050_v5 = vsel %vm11435_vm9, %v1043_v62, %v1045_v3 }
 0x193   : > { %v1041_v63 = vpop.permute.xlu0 %1040  ;;  %v1059_v14 = vmul.f32 %v1050_v5, %v9047_v50  ;;  %v1064_v22 = vmul.f32 %v1050_v5, %v9065_v9 }
 0x194   : > { %v1049_v0 = vsel %vm11435_vm9, %v1041_v63, %v1043_v62  ;;  %v1057_v1 = vmul.f32 0.0, %v1041_v63 }
 0x195   : > { %v1058_v2 = vmul.f32 %v1049_v0, %v9045_v49  ;;  %v1063_v6 = vmul.f32 %v1049_v0, %v9063_v8 }
 0x197   : > { %v1067_v4 = vpack.c.bf16 %v1058_v2, %v1057_v1  ;;  %v1070_v17 = vpack.c.bf16 %v1063_v6, %v1057_v1 }
 0x199   : > { %1079 = vrot.lane.b32.xlu1 %v1067_v4, %s11433_s15 }
 0x19b   : > { %v1047_v7 = vpop.permute.xlu0 %1046 }
 0x19c   : > { %v1051_v12 = vsel %vm11435_vm9, %v1045_v3, %v1047_v7  ;;  %v1061_v13 = vmul.f32 %v1047_v7, %v9051_v52  ;;  %v1066_v19 = vmul.f32 %v1047_v7, %v9069_v11  ;;  %v1216_v7 = vld [vmem:[#allocation8 + $0x1c] sm:$0xf]  ;;  %vm11443_vm9 = vcmask 7168  }
 0x19d   : > { %v1060_v15 = vmul.f32 %v1051_v12, %v9049_v51  ;;  %v1065_v21 = vmul.f32 %v1051_v12, %v9067_v10 }
 0x19e   : > { %v1069_v16 = vpack.c.bf16 %v1061_v13, %v1061_v13  ;;  %v1072_v24 = vpack.c.bf16 %v1066_v19, %v1066_v19  ;;  %v1221_v19 = vperm.slane %v1216_v7, 3 }
 0x19f   : > { %v1068_v18 = vpack.c.bf16 %v1060_v15, %v1059_v14  ;;  %v1071_v25 = vpack.c.bf16 %v1065_v21, %v1064_v22  ;;  %v1218_v14 = vperm.slane %v1216_v7, 0 }
 0x1a0   : > { %1083 = vrot.lane.b32.xlu0 %v1069_v16, %s11433_s15 }
 0x1a1   : > { %1085 = vrot.lane.b32.xlu1 %v1070_v17, %s11433_s15  ;;  %1081 = vrot.lane.b32.xlu2 %v1068_v18, %s11433_s15  ;;  %v1220_v17 = vperm.slane %v1216_v7, 2  ;;  %v1219_v18 = vperm.slane %v1216_v7, 1 }
 0x1a8   : > { %1089 = vrot.lane.b32.xlu0 %v1072_v24, %s11433_s15 }
 0x1a9   : > { %1131 = vrot.lane.b32.xlu1 %v1127_v23, %s11457_s28  ;;  %1087 = vrot.lane.b32.xlu2 %v1071_v25, %s11433_s15  ;;  %s11438_s15 = smov 1  }
 0x1b0   : > { %1135 = vrot.lane.b32.xlu0 %v1129_v26, %s11457_s28 }
 0x1b1   : > { %1137 = vrot.lane.b32.xlu1 %v1130_v27, %s11457_s28  ;;  %1133 = vrot.lane.b32.xlu2 %v1128_v28, %s11457_s28 }
 0x1fb   : > { %v1082_v29 = vpop.permute.xlu2 %1081 }
 0x1fc   : > { %v1092_v31 = vrot.slane %v1082_v29, 4 }
 0x203   : > { %v1088_v35 = vpop.permute.xlu2 %1087 }
 0x204   : > { %v1095_v39 = vrot.slane %v1088_v35, 4 }
 0x20b   : > { %v1080_v30 = vpop.permute.xlu1 %1079  ;;  %v1134_v45 = vpop.permute.xlu2 %1133 }
 0x20c   : > { %v1091_v32 = vrot.slane %v1080_v30, 4 }
 0x20e   : > { %v1097_v33 = vsel %vm641_vm5, %v1091_v32, %v1092_v31 }
 0x20f   : > { %v1099_v34 = vsel %vm866_vm3, %v1080_v30, %v1097_v33 }
 0x210   : > { %1110 = vst [vmem:[#allocation3 + $0xa0] sm:$0xff] %v1099_v34 }
 0x212   : > { %v1084_v36 = vpop.permute.xlu0 %1083 }
 0x213   : > { %v1093_v37 = vrot.slane %v1084_v36, 4  ;;  %v1086_v38 = vpop.permute.xlu1 %1085 }
 0x214   : > { %v1094_v40 = vrot.slane %v1086_v38, 4 }
 0x215   : > { %v1100_v41 = vsel %vm641_vm5, %v1092_v31, %v1093_v37 }
 0x216   : > { %v1101_v42 = vsel %vm866_vm3, %v1082_v29, %v1100_v41  ;;  %v1102_v43 = vsel %vm641_vm5, %v1094_v40, %v1095_v39 }
 0x217   : > { %1111 = vst [vmem:[#allocation3 + $0xa8] sm:$0xff] %v1101_v42  ;;  %v1103_v44 = vsel %vm866_vm3, %v1086_v38, %v1102_v43 }
 0x218   : > { %1112 = vst [vmem:[#allocation3 + $0xb0] sm:$0xff] %v1103_v44 }
 0x21a   : > { %v1090_v46 = vpop.permute.xlu0 %1089 }
 0x21b   : > { %v1096_v47 = vrot.slane %v1090_v46, 4  ;;  %v1132_v48 = vpop.permute.xlu1 %1131  ;;  %v1307_v46 = vld [vmem:[#allocation8 + $0x20] sm:$0xf] }
 0x21c   : > { %v1148_v53 = vmul.f32 0.0, %v1132_v48  ;;  %v1140_v54 = vsel %vm825_vm8, %v1132_v48, %v1134_v45 }
 0x21d   : > { %v1104_v55 = vsel %vm641_vm5, %v1095_v39, %v1096_v47  ;;  %v1149_v56 = vmul.f32 %v1140_v54, %v9045_v49  ;;  %v1154_v60 = vmul.f32 %v1140_v54, %v9063_v8  ;;  %v1311_v47 = vperm.slane %v1307_v46, 2 }
 0x21e   : > { %v1105_v57 = vsel %vm866_vm3, %v1088_v35, %v1104_v55 }
 0x21f   : > { %1113 = vst [vmem:[#allocation3 + $0xb8] sm:$0xff] %v1105_v57  ;;  %v1158_v58 = vpack.c.bf16 %v1149_v56, %v1148_v53  ;;  %v1161_v5 = vpack.c.bf16 %v1154_v60, %v1148_v53 }
 0x221   : > { %1170 = vrot.lane.b32.xlu2 %v1158_v58, %s11459_s18 }
 0x222   : > { %v1136_v59 = vpop.permute.xlu0 %1135 }
 0x223   : > { %v1141_v61 = vsel %vm825_vm8, %v1134_v45, %v1136_v59  ;;  %v1138_v62 = vpop.permute.xlu1 %1137 }
 0x224   : > { %v1150_v63 = vmul.f32 %v1141_v61, %v9047_v50  ;;  %v1142_v0 = vsel %vm825_vm8, %v1136_v59, %v1138_v62  ;;  %v1152_v1 = vmul.f32 %v1138_v62, %v9051_v52  ;;  %v1157_v6 = vmul.f32 %v1138_v62, %v9069_v11 }
 0x225   : > { %v1151_v2 = vmul.f32 %v1142_v0, %v9049_v51  ;;  %v1155_v12 = vmul.f32 %v1141_v61, %v9065_v9  ;;  %v1156_v13 = vmul.f32 %v1142_v0, %v9067_v10 }
 0x226   : > { %v1160_v3 = vpack.c.bf16 %v1152_v1, %v1152_v1  ;;  %v1163_v15 = vpack.c.bf16 %v1157_v6, %v1157_v6  ;;  %v1312_v6 = vperm.slane %v1307_v46, 3 }
 0x227   : > { %v1159_v4 = vpack.c.bf16 %v1151_v2, %v1150_v63  ;;  %v1162_v16 = vpack.c.bf16 %v1156_v13, %v1155_v12 }
 0x228   : > { %1174 = vrot.lane.b32.xlu1 %v1160_v3, %s11459_s18 }
 0x229   : > { %1172 = vrot.lane.b32.xlu0 %v1159_v4, %s11459_s18  ;;  %1176 = vrot.lane.b32.xlu2 %v1161_v5, %s11459_s18  ;;  %v1309_v4 = vperm.slane %v1307_v46, 0  ;;  %v1310_v5 = vperm.slane %v1307_v46, 1 }
 0x230   : > { %1180 = vrot.lane.b32.xlu1 %v1163_v15, %s11459_s18 }
 0x231   : > { %1178 = vrot.lane.b32.xlu0 %v1162_v16, %s11459_s18  ;;  %1222 = vrot.lane.b32.xlu2 %v1218_v14, %s11461_s14 }
 0x238   : > { %1226 = vrot.lane.b32.xlu1 %v1220_v17, %s11461_s14 }
 0x239   : > { %1224 = vrot.lane.b32.xlu0 %v1219_v18, %s11461_s14  ;;  %1228 = vrot.lane.b32.xlu2 %v1221_v19, %s11461_s14 }
 0x27b   : > { %v1171_v20 = vpop.permute.xlu2 %1170 }
 0x27c   : > { %v1182_v30 = vrot.slane %v1171_v20, 4 }
 0x283   : > { %v1177_v21 = vpop.permute.xlu2 %1176 }
 0x284   : > { %v1185_v40 = vrot.slane %v1177_v21, 4 }
 0x28b   : > { %v1223_v22 = vpop.permute.xlu2 %1222 }
 0x28c   : > { %v1239_v58 = vmul.f32 0.0, %v1223_v22 }
 0x293   : > { %v1229_v23 = vpop.permute.xlu2 %1228 }
 0x294   : > { %v1243_v24 = vmul.f32 %v1229_v23, %v9051_v52  ;;  %v1248_v27 = vmul.f32 %v1229_v23, %v9069_v11 }
 0x296   : > { %v1251_v25 = vpack.c.bf16 %v1243_v24, %v1243_v24  ;;  %v1254_v34 = vpack.c.bf16 %v1248_v27, %v1248_v27 }
 0x298   : > { %1265 = vrot.lane.b32.xlu2 %v1251_v25, %s11468_s20 }
 0x29a   : > { %v1175_v26 = vpop.permute.xlu1 %1174 }
 0x29b   : > { %v1184_v28 = vrot.slane %v1175_v26, 4  ;;  %v1173_v29 = vpop.permute.xlu0 %1172 }
 0x29c   : > { %v1183_v31 = vrot.slane %v1173_v29, 4 }
 0x29e   : > { %v1188_v32 = vsel %vm641_vm5, %v1182_v30, %v1183_v31  ;;  %v1191_v33 = vsel %vm641_vm5, %v1183_v31, %v1184_v28 }
 0x29f   : > { %v1190_v35 = vsel %vm775_vm2, %v1171_v20, %v1188_v32  ;;  %v1192_v36 = vsel %vm775_vm2, %v1173_v29, %v1191_v33 }
 0x2a0   : > { %1201 = vst [vmem:[#allocation3 + $0xc0] sm:$0xff] %v1190_v35  ;;  %1271 = vrot.lane.b32.xlu2 %v1254_v34, %s11468_s20 }
 0x2a1   : > { %1202 = vst [vmem:[#allocation3 + $0xc8] sm:$0xff] %v1192_v36 }
 0x2a2   : > { %v1181_v37 = vpop.permute.xlu1 %1180 }
 0x2a3   : > { %v1187_v38 = vrot.slane %v1181_v37, 4  ;;  %v1179_v39 = vpop.permute.xlu0 %1178 }
 0x2a4   : > { %v1186_v41 = vrot.slane %v1179_v39, 4 }
 0x2a6   : > { %v1193_v42 = vsel %vm641_vm5, %v1185_v40, %v1186_v41  ;;  %v1195_v43 = vsel %vm641_vm5, %v1186_v41, %v1187_v38 }
 0x2a7   : > { %v1194_v44 = vsel %vm775_vm2, %v1177_v21, %v1193_v42  ;;  %v1196_v45 = vsel %vm775_vm2, %v1179_v39, %v1195_v43 }
 0x2a8   : > { %1203 = vst [vmem:[#allocation3 + $0xd0] sm:$0xff] %v1194_v44  ;;  %1317 = vrot.lane.b32.xlu2 %v1311_v47, %s11466_s25 }
 0x2a9   : > { %1204 = vst [vmem:[#allocation3 + $0xd8] sm:$0xff] %v1196_v45  ;;  %v7551_v45 = vld [vmem:[#allocation3 + $0xc0] sm:$0xf] }
 0x2aa   : > { %v1227_v48 = vpop.permute.xlu1 %1226 }
 0x2ab   : > { %v1233_v53 = vsel %vm734_vm7, %v1227_v48, %v1229_v23  ;;  %v1225_v54 = vpop.permute.xlu0 %1224 }
 0x2ac   : > { %v1242_v55 = vmul.f32 %v1233_v53, %v9049_v51  ;;  %v1231_v56 = vsel %vm734_vm7, %v1223_v22, %v1225_v54  ;;  %v1232_v57 = vsel %vm734_vm7, %v1225_v54, %v1227_v48  ;;  %v1247_v63 = vmul.f32 %v1233_v53, %v9067_v10 }
 0x2ad   : > { %v1240_v59 = vmul.f32 %v1231_v56, %v9045_v49  ;;  %v1241_v60 = vmul.f32 %v1232_v57, %v9047_v50  ;;  %v1245_v0 = vmul.f32 %v1231_v56, %v9063_v8  ;;  %v1246_v1 = vmul.f32 %v1232_v57, %v9065_v9 }
 0x2af   : > { %v1249_v61 = vpack.c.bf16 %v1240_v59, %v1239_v58  ;;  %v1250_v62 = vpack.c.bf16 %v1242_v55, %v1241_v60  ;;  %v1252_v2 = vpack.c.bf16 %v1245_v0, %v1239_v58  ;;  %v1253_v3 = vpack.c.bf16 %v1247_v63, %v1246_v1  ;;  %v8385_v41 = vld [vmem:[#allocation3 + $0xcc] sm:$0xf0]  ;;  %v7535_v59 = vld [vmem:[#allocation3 + $0xa0] sm:$0xf]  ;;  %v1398_v63 = vld [vmem:[#allocation8 + $0x24] sm:$0xf] }
 0x2b0   : > { %v7552_v47 = vor.u32 %v8385_v41, %v7551_v45  ;;  %v8381_v55 = vld [vmem:[#allocation3 + $0xac] sm:$0xf0]  ;;  %v7519_v0 = vld [vmem:[#allocation3 + $0x80] sm:$0xf] }
 0x2b1   : > { %1261 = vrot.lane.b32.xlu0 %v1249_v61, %s11468_s20  ;;  %1263 = vrot.lane.b32.xlu1 %v1250_v62, %s11468_s20  ;;  %v7536_v60 = vor.u32 %v8381_v55, %v7535_v59  ;;  %v8377_v61 = vld [vmem:[#allocation3 + $0x8c] sm:$0xf0] }
 0x2b9   : > { %1267 = vrot.lane.b32.xlu0 %v1252_v2, %s11468_s20  ;;  %1269 = vrot.lane.b32.xlu1 %v1253_v3, %s11468_s20  ;;  %v7520_v2 = vor.u32 %v8377_v61, %v7519_v0 }
 0x2c1   : > { %1313 = vrot.lane.b32.xlu0 %v1309_v4, %s11466_s25  ;;  %1315 = vrot.lane.b32.xlu1 %v1310_v5, %s11466_s25  ;;  %v1400_v4 = vperm.slane %v1398_v63, 0  ;;  %v8373_v5 = vld [vmem:[#allocation3 + $0x6c] sm:$0xf0] }
 0x2c9   : > { %1319 = vrot.lane.b32.xlu0 %v1312_v6, %s11466_s25 }
 0x2f2   : > { %v1266_v7 = vpop.permute.xlu2 %1265 }
 0x2f3   : > { %v1275_v14 = vrot.slane %v1266_v7, 4 }
 0x2fa   : > { %v1272_v21 = vpop.permute.xlu2 %1271 }
 0x2fb   : > { %v1278_v24 = vrot.slane %v1272_v21, 4  ;;  %v7471_v21 = vld [vmem:[#allocation3 + $0x20] sm:$0xf] }
 0x302   : > { %v1318_v36 = vpop.permute.xlu2 %1317 }
 0x323   : > { %v1262_v12 = vpop.permute.xlu0 %1261  ;;  %v1264_v13 = vpop.permute.xlu1 %1263 }
 0x324   : > { %v1273_v15 = vrot.slane %v1262_v12, 4  ;;  %v1274_v16 = vrot.slane %v1264_v13, 4 }
 0x326   : > { %v1279_v17 = vsel %vm641_vm5, %v1273_v15, %v1274_v16  ;;  %v1282_v18 = vsel %vm641_vm5, %v1274_v16, %v1275_v14  ;;  %v8369_v14 = vld [vmem:[#allocation3 + $0x4c] sm:$0xf0]  ;;  %v7487_v15 = vld [vmem:[#allocation3 + $0x40] sm:$0xf] }
 0x327   : > { %v1281_v19 = vsel %vm684_vm1, %v1262_v12, %v1279_v17  ;;  %v1283_v20 = vsel %vm684_vm1, %v1264_v13, %v1282_v18  ;;  %v7503_v12 = vld [vmem:[#allocation3 + $0x60] sm:$0xf]  ;;  %v7488_v16 = vor.u32 %v8369_v14, %v7487_v15  ;;  %v1402_v17 = vperm.slane %v1398_v63, 2 }
 0x328   : > { %1292 = vst [vmem:[#allocation3 + $0xe0] sm:$0xff] %v1281_v19  ;;  %v7504_v13 = vor.u32 %v8373_v5, %v7503_v12  ;;  %v1403_v18 = vperm.slane %v1398_v63, 3  ;;  %v8365_v19 = vld [vmem:[#allocation3 + $0x2c] sm:$0xf0] }
 0x329   : > { %1293 = vst [vmem:[#allocation3 + $0xe8] sm:$0xff] %v1283_v20  ;;  %v1401_v20 = vperm.slane %v1398_v63, 1 }
 0x32b   : > { %v1268_v22 = vpop.permute.xlu0 %1267  ;;  %v1270_v23 = vpop.permute.xlu1 %1269 }
 0x32c   : > { %v1276_v25 = vrot.slane %v1268_v22, 4  ;;  %v1277_v26 = vrot.slane %v1270_v23, 4 }
 0x32e   : > { %v1284_v27 = vsel %vm641_vm5, %v1276_v25, %v1277_v26  ;;  %v1286_v28 = vsel %vm641_vm5, %v1277_v26, %v1278_v24  ;;  %v7455_v24 = vld [vmem:[#allocation3] sm:$0xf] }
 0x32f   : > { %v1285_v29 = vsel %vm684_vm1, %v1268_v22, %v1284_v27  ;;  %v1287_v30 = vsel %vm684_vm1, %v1270_v23, %v1286_v28  ;;  %v7567_v38 = vld [vmem:[#allocation3 + $0xe0] sm:$0xf]  ;;  %v7472_v22 = vor.u32 %v8365_v19, %v7471_v21  ;;  %v8361_v23 = vld [vmem:[#allocation3 + $0xc] sm:$0xf0] }
 0x330   : > { %1294 = vst [vmem:[#allocation3 + $0xf0] sm:$0xff] %v1285_v29  ;;  %v7456_v25 = vor.u32 %v8361_v23, %v7455_v24 }
 0x331   : > { %1295 = vst [vmem:[#allocation3 + $0xf8] sm:$0xff] %v1287_v30 }
 0x333   : > { %v1314_v31 = vpop.permute.xlu0 %1313  ;;  %v1316_v32 = vpop.permute.xlu1 %1315 }
 0x334   : > { %v1330_v33 = vmul.f32 0.0, %v1314_v31  ;;  %v1322_v34 = vsel %vm643_vm6, %v1314_v31, %v1316_v32  ;;  %v1323_v42 = vsel %vm643_vm6, %v1316_v32, %v1318_v36 }
 0x335   : > { %v1331_v35 = vmul.f32 %v1322_v34, %v9045_v49  ;;  %v1336_v43 = vmul.f32 %v1322_v34, %v9063_v8  ;;  %v1332_v53 = vmul.f32 %v1323_v42, %v9047_v50  ;;  %v1337_v3 = vmul.f32 %v1323_v42, %v9065_v9 }
 0x337   : > { %v1340_v37 = vpack.c.bf16 %v1331_v35, %v1330_v33  ;;  %v8389_v39 = vld [vmem:[#allocation3 + $0xec] sm:$0xf0]  ;;  %v1343_v58 = vpack.c.bf16 %v1336_v43, %v1330_v33 }
 0x338   : > { %v7568_v40 = vor.u32 %v8389_v39, %v7567_v38 }
 0x339   : > { %1352 = vrot.lane.b32.xlu1 %v1340_v37, %s11464_s19 }
 0x33a   : > { %3636 = vmatpush.bf16.msra.mxu0 %v7568_v40 }
 0x33b   : > { %v1320_v44 = vpop.permute.xlu0 %1319 }
 0x33c   : > { %v1324_v46 = vsel %vm643_vm6, %v1318_v36, %v1320_v44  ;;  %v1334_v48 = vmul.f32 %v1320_v44, %v9051_v52  ;;  %v1339_v62 = vmul.f32 %v1320_v44, %v9069_v11 }
 0x33d   : > { %v1333_v54 = vmul.f32 %v1324_v46, %v9049_v51  ;;  %v1338_v1 = vmul.f32 %v1324_v46, %v9067_v10 }
 0x33e   : > { %3637 = vmatpush.bf16.msra.mxu0 %v7552_v47  ;;  %v1342_v56 = vpack.c.bf16 %v1334_v48, %v1334_v48  ;;  %v1345_v6 = vpack.c.bf16 %v1339_v62, %v1339_v62 }
 0x33f   : > { %v1341_v57 = vpack.c.bf16 %v1333_v54, %v1332_v53  ;;  %v1344_v7 = vpack.c.bf16 %v1338_v1, %v1337_v3 }
 0x340   : > { %1356 = vrot.lane.b32.xlu0 %v1342_v56, %s11464_s19 }
 0x341   : > { %1354 = vrot.lane.b32.xlu2 %v1341_v57, %s11464_s19  ;;  %1358 = vrot.lane.b32.xlu1 %v1343_v58, %s11464_s19 }
 0x342   : > { %3638 = vmatpush.bf16.msra.mxu0 %v7536_v60 }
 0x346   : > { %3639 = vmatpush.bf16.msra.mxu0 %v7520_v2 }
 0x348   : > { %1362 = vrot.lane.b32.xlu0 %v1345_v6, %s11464_s19 }
 0x349   : > { %1360 = vrot.lane.b32.xlu2 %v1344_v7, %s11464_s19  ;;  %1404 = vrot.lane.b32.xlu1 %v1400_v4, %s11455_s22  ;;  %v1489_v4 = vld [vmem:[#allocation8 + $0x28] sm:$0xf] }
 0x34a   : > { %3640 = vmatpush.bf16.msra.mxu0 %v7504_v13  ;;  %v1491_v7 = vperm.slane %v1489_v4, 0  ;;  %v1493_v14 = vperm.slane %v1489_v4, 2  ;;  %v1494_v15 = vperm.slane %v1489_v4, 3 }
 0x34e   : > { %3641 = vmatpush.bf16.msra.mxu0 %v7488_v16  ;;  %v1492_v16 = vperm.slane %v1489_v4, 1 }
 0x350   : > { %1408 = vrot.lane.b32.xlu0 %v1402_v17, %s11455_s22 }
 0x351   : > { %1410 = vrot.lane.b32.xlu1 %v1403_v18, %s11455_s22  ;;  %1406 = vrot.lane.b32.xlu2 %v1401_v20, %s11455_s22 }
 0x352   : > { %3642 = vmatpush.bf16.msra.mxu0 %v7472_v22 }
 0x356   : > { %3643 = vmatpush.bf16.msra.mxu0 %v7456_v25 }
 0x39b   : > { %v1355_v26 = vpop.permute.xlu2 %1354 }
 0x39c   : > { %v1365_v28 = vrot.slane %v1355_v26, 4 }
 0x3a3   : > { %v1361_v32 = vpop.permute.xlu2 %1360 }
 0x3a4   : > { %v1368_v36 = vrot.slane %v1361_v32, 4 }
 0x3ab   : > { %v1353_v27 = vpop.permute.xlu1 %1352  ;;  %v1407_v42 = vpop.permute.xlu2 %1406 }
 0x3ac   : > { %v1364_v29 = vrot.slane %v1353_v27, 4 }
 0x3ae   : > { %v1370_v30 = vsel %vm641_vm5, %v1364_v29, %v1365_v28 }
 0x3af   : > { %v1372_v31 = vsel %vm592_vm0, %v1353_v27, %v1370_v30 }
 0x3b0   : > { %1383 = vst [vmem:[#allocation3 + $0x100] sm:$0xff] %v1372_v31 }
 0x3b2   : > { %v1357_v33 = vpop.permute.xlu0 %1356 }
 0x3b3   : > { %v1366_v34 = vrot.slane %v1357_v33, 4  ;;  %v1359_v35 = vpop.permute.xlu1 %1358 }
 0x3b4   : > { %v1367_v37 = vrot.slane %v1359_v35, 4 }
 0x3b5   : > { %v1373_v38 = vsel %vm641_vm5, %v1365_v28, %v1366_v34 }
 0x3b6   : > { %v1374_v39 = vsel %vm592_vm0, %v1355_v26, %v1373_v38  ;;  %v1375_v40 = vsel %vm641_vm5, %v1367_v37, %v1368_v36 }
 0x3b7   : > { %1384 = vst [vmem:[#allocation3 + $0x108] sm:$0xff] %v1374_v39  ;;  %v1376_v41 = vsel %vm592_vm0, %v1359_v35, %v1375_v40 }
 0x3b8   : > { %1385 = vst [vmem:[#allocation3 + $0x110] sm:$0xff] %v1376_v41 }
 0x3ba   : > { %v1363_v43 = vpop.permute.xlu0 %1362 }
 0x3bb   : > { %v1369_v44 = vrot.slane %v1363_v43, 4  ;;  %v1405_v45 = vpop.permute.xlu1 %1404  ;;  %v1580_v43 = vld [vmem:[#allocation8 + $0x2c] sm:$0xf] }
 0x3bc   : > { %v1413_v46 = vsel %vm1412_vm10, %v1405_v45, %v1407_v42  ;;  %v1421_v47 = vmul.f32 0.0, %v1405_v45 }
 0x3bd   : > { %v1377_v48 = vsel %vm641_vm5, %v1368_v36, %v1369_v44  ;;  %v1422_v53 = vmul.f32 %v1413_v46, %v9045_v49  ;;  %v1427_v57 = vmul.f32 %v1413_v46, %v9063_v8  ;;  %v1584_v44 = vperm.slane %v1580_v43, 2 }
 0x3be   : > { %v1378_v54 = vsel %vm592_vm0, %v1361_v32, %v1377_v48 }
 0x3bf   : > { %1386 = vst [vmem:[#allocation3 + $0x118] sm:$0xff] %v1378_v54  ;;  %v1431_v55 = vpack.c.bf16 %v1422_v53, %v1421_v47  ;;  %v1434_v1 = vpack.c.bf16 %v1427_v57, %v1421_v47 }
 0x3c1   : > { %1443 = vrot.lane.b32.xlu2 %v1431_v55, %s11453_s29 }
 0x3c2   : > { %v1409_v56 = vpop.permute.xlu0 %1408 }
 0x3c3   : > { %v1414_v58 = vsel %vm1412_vm10, %v1407_v42, %v1409_v56  ;;  %v1411_v59 = vpop.permute.xlu1 %1410 }
 0x3c4   : > { %v1423_v60 = vmul.f32 %v1414_v58, %v9047_v50  ;;  %v1415_v61 = vsel %vm1412_vm10, %v1409_v56, %v1411_v59  ;;  %v1425_v62 = vmul.f32 %v1411_v59, %v9051_v52  ;;  %v1430_v3 = vmul.f32 %v1411_v59, %v9069_v11 }
 0x3c5   : > { %v1424_v63 = vmul.f32 %v1415_v61, %v9049_v51  ;;  %v1428_v5 = vmul.f32 %v1414_v58, %v9065_v9  ;;  %v1429_v6 = vmul.f32 %v1415_v61, %v9067_v10 }
 0x3c6   : > { %v1433_v0 = vpack.c.bf16 %v1425_v62, %v1425_v62  ;;  %v1436_v12 = vpack.c.bf16 %v1430_v3, %v1430_v3  ;;  %v1585_v3 = vperm.slane %v1580_v43, 3 }
 0x3c7   : > { %v1432_v2 = vpack.c.bf16 %v1424_v63, %v1423_v60  ;;  %v1435_v13 = vpack.c.bf16 %v1429_v6, %v1428_v5 }
 0x3c8   : > { %1447 = vrot.lane.b32.xlu1 %v1433_v0, %s11453_s29 }
 0x3c9   : > { %1449 = vrot.lane.b32.xlu2 %v1434_v1, %s11453_s29  ;;  %1445 = vrot.lane.b32.xlu0 %v1432_v2, %s11453_s29  ;;  %v1583_v1 = vperm.slane %v1580_v43, 1  ;;  %v1582_v2 = vperm.slane %v1580_v43, 0 }
 0x3d0   : > { %1453 = vrot.lane.b32.xlu1 %v1436_v12, %s11453_s29 }
 0x3d1   : > { %1495 = vrot.lane.b32.xlu2 %v1491_v7, %s11451_s23  ;;  %1451 = vrot.lane.b32.xlu0 %v1435_v13, %s11453_s29 }
 0x3d8   : > { %1499 = vrot.lane.b32.xlu1 %v1493_v14, %s11451_s23 }
 0x3d9   : > { %1501 = vrot.lane.b32.xlu2 %v1494_v15, %s11451_s23  ;;  %1497 = vrot.lane.b32.xlu0 %v1492_v16, %s11451_s23 }
 0x41b   : > { %v1444_v17 = vpop.permute.xlu2 %1443 }
 0x41c   : > { %v1455_v27 = vrot.slane %v1444_v17, 4 }
 0x423   : > { %v1450_v18 = vpop.permute.xlu2 %1449 }
 0x424   : > { %v1458_v37 = vrot.slane %v1450_v18, 4 }
 0x42b   : > { %v1496_v19 = vpop.permute.xlu2 %1495 }
 0x42c   : > { %v1512_v55 = vmul.f32 0.0, %v1496_v19 }
 0x433   : > { %v1502_v20 = vpop.permute.xlu2 %1501 }
 0x434   : > { %v1516_v21 = vmul.f32 %v1502_v20, %v9051_v52  ;;  %v1521_v24 = vmul.f32 %v1502_v20, %v9069_v11 }
 0x436   : > { %v1524_v22 = vpack.c.bf16 %v1516_v21, %v1516_v21  ;;  %v1527_v31 = vpack.c.bf16 %v1521_v24, %v1521_v24 }
 0x438   : > { %1538 = vrot.lane.b32.xlu2 %v1524_v22, %s11449_s26 }
 0x43a   : > { %v1448_v23 = vpop.permute.xlu1 %1447 }
 0x43b   : > { %v1457_v25 = vrot.slane %v1448_v23, 4  ;;  %v1446_v26 = vpop.permute.xlu0 %1445 }
 0x43c   : > { %v1456_v28 = vrot.slane %v1446_v26, 4 }
 0x43e   : > { %v1461_v29 = vsel %vm641_vm5, %v1455_v27, %v1456_v28  ;;  %v1464_v30 = vsel %vm641_vm5, %v1456_v28, %v1457_v25 }
 0x43f   : > { %v1463_v32 = vsel %vm1462_vm11, %v1444_v17, %v1461_v29  ;;  %v1465_v33 = vsel %vm1462_vm11, %v1446_v26, %v1464_v30 }
 0x440   : > { %1474 = vst [vmem:[#allocation3 + $0x120] sm:$0xff] %v1463_v32  ;;  %1544 = vrot.lane.b32.xlu2 %v1527_v31, %s11449_s26 }
 0x441   : > { %1475 = vst [vmem:[#allocation3 + $0x128] sm:$0xff] %v1465_v33 }
 0x442   : > { %v1454_v34 = vpop.permute.xlu1 %1453 }
 0x443   : > { %v1460_v35 = vrot.slane %v1454_v34, 4  ;;  %v1452_v36 = vpop.permute.xlu0 %1451 }
 0x444   : > { %v1459_v38 = vrot.slane %v1452_v36, 4 }
 0x446   : > { %v1466_v39 = vsel %vm641_vm5, %v1458_v37, %v1459_v38  ;;  %v1468_v40 = vsel %vm641_vm5, %v1459_v38, %v1460_v35 }
 0x447   : > { %v1467_v41 = vsel %vm1462_vm11, %v1450_v18, %v1466_v39  ;;  %v1469_v42 = vsel %vm1462_vm11, %v1452_v36, %v1468_v40 }
 0x448   : > { %1476 = vst [vmem:[#allocation3 + $0x130] sm:$0xff] %v1467_v41  ;;  %1590 = vrot.lane.b32.xlu2 %v1584_v44, %s11447_s27 }
 0x449   : > { %1477 = vst [vmem:[#allocation3 + $0x138] sm:$0xff] %v1469_v42 }
 0x44a   : > { %v1500_v45 = vpop.permute.xlu1 %1499 }
 0x44b   : > { %v1506_v46 = vsel %vm1503_vm12, %v1500_v45, %v1502_v20  ;;  %v1498_v47 = vpop.permute.xlu0 %1497 }
 0x44c   : > { %v1515_v48 = vmul.f32 %v1506_v46, %v9049_v51  ;;  %v1504_v53 = vsel %vm1503_vm12, %v1496_v19, %v1498_v47  ;;  %v1505_v54 = vsel %vm1503_vm12, %v1498_v47, %v1500_v45  ;;  %v1520_v60 = vmul.f32 %v1506_v46, %v9067_v10  ;;  %v1671_v46 = vld [vmem:[#allocation8 + $0x30] sm:$0xf] }
 0x44d   : > { %v1513_v56 = vmul.f32 %v1504_v53, %v9045_v49  ;;  %v1514_v57 = vmul.f32 %v1505_v54, %v9047_v50  ;;  %v1518_v61 = vmul.f32 %v1504_v53, %v9063_v8  ;;  %v1519_v62 = vmul.f32 %v1505_v54, %v9065_v9 }
 0x44e   : > { %v1673_v53 = vperm.slane %v1671_v46, 0 }
 0x44f   : > { %v1523_v58 = vpack.c.bf16 %v1515_v48, %v1514_v57  ;;  %v1522_v59 = vpack.c.bf16 %v1513_v56, %v1512_v55  ;;  %v1526_v63 = vpack.c.bf16 %v1520_v60, %v1519_v62  ;;  %v1525_v0 = vpack.c.bf16 %v1518_v61, %v1512_v55 }
 0x450   : > { %v1675_v56 = vperm.slane %v1671_v46, 2  ;;  %v1676_v57 = vperm.slane %v1671_v46, 3 }
 0x451   : > { %1536 = vrot.lane.b32.xlu1 %v1523_v58, %s11449_s26  ;;  %1534 = vrot.lane.b32.xlu0 %v1522_v59, %s11449_s26  ;;  %v1674_v58 = vperm.slane %v1671_v46, 1 }
 0x459   : > { %1542 = vrot.lane.b32.xlu1 %v1526_v63, %s11449_s26  ;;  %1540 = vrot.lane.b32.xlu0 %v1525_v0, %s11449_s26 }
 0x461   : > { %1588 = vrot.lane.b32.xlu1 %v1583_v1, %s11447_s27  ;;  %1586 = vrot.lane.b32.xlu0 %v1582_v2, %s11447_s27 }
 0x469   : > { %1592 = vrot.lane.b32.xlu0 %v1585_v3, %s11447_s27 }
 0x492   : > { %v1539_v4 = vpop.permute.xlu2 %1538 }
 0x493   : > { %v1548_v7 = vrot.slane %v1539_v4, 4 }
 0x49a   : > { %v1545_v18 = vpop.permute.xlu2 %1544 }
 0x49b   : > { %v1551_v21 = vrot.slane %v1545_v18, 4 }
 0x4a2   : > { %v1591_v33 = vpop.permute.xlu2 %1590 }
 0x4c3   : > { %v1537_v5 = vpop.permute.xlu1 %1536  ;;  %v1535_v6 = vpop.permute.xlu0 %1534 }
 0x4c4   : > { %v1547_v12 = vrot.slane %v1537_v5, 4  ;;  %v1546_v13 = vrot.slane %v1535_v6, 4 }
 0x4c6   : > { %v1555_v14 = vsel %vm641_vm5, %v1547_v12, %v1548_v7  ;;  %v1552_v15 = vsel %vm641_vm5, %v1546_v13, %v1547_v12 }
 0x4c7   : > { %v1556_v16 = vsel %vm11446_vm13, %v1537_v5, %v1555_v14  ;;  %v1554_v17 = vsel %vm11446_vm13, %v1535_v6, %v1552_v15 }
 0x4c8   : > { %1566 = vst [vmem:[#allocation3 + $0x148] sm:$0xff] %v1556_v16 }
 0x4c9   : > { %1565 = vst [vmem:[#allocation3 + $0x140] sm:$0xff] %v1554_v17 }
 0x4cb   : > { %v1543_v19 = vpop.permute.xlu1 %1542  ;;  %v1541_v20 = vpop.permute.xlu0 %1540 }
 0x4cc   : > { %v1550_v22 = vrot.slane %v1543_v19, 4  ;;  %v1549_v23 = vrot.slane %v1541_v20, 4 }
 0x4ce   : > { %v1559_v24 = vsel %vm641_vm5, %v1550_v22, %v1551_v21  ;;  %v1557_v25 = vsel %vm641_vm5, %v1549_v23, %v1550_v22 }
 0x4cf   : > { %v1560_v26 = vsel %vm11446_vm13, %v1543_v19, %v1559_v24  ;;  %v1558_v27 = vsel %vm11446_vm13, %v1541_v20, %v1557_v25 }
 0x4d0   : > { %1568 = vst [vmem:[#allocation3 + $0x158] sm:$0xff] %v1560_v26 }
 0x4d1   : > { %1567 = vst [vmem:[#allocation3 + $0x150] sm:$0xff] %v1558_v27 }
 0x4d3   : > { %v1589_v28 = vpop.permute.xlu1 %1588  ;;  %v1587_v29 = vpop.permute.xlu0 %1586 }
 0x4d4   : > { %v1595_v30 = vsel %vm11445_vm14, %v1587_v29, %v1589_v28  ;;  %v1603_v31 = vmul.f32 0.0, %v1587_v29  ;;  %v1596_v35 = vsel %vm11445_vm14, %v1589_v28, %v1591_v33 }
 0x4d5   : > { %v1604_v32 = vmul.f32 %v1595_v30, %v9045_v49  ;;  %v1609_v36 = vmul.f32 %v1595_v30, %v9063_v8  ;;  %v1605_v40 = vmul.f32 %v1596_v35, %v9047_v50  ;;  %v1610_v48 = vmul.f32 %v1596_v35, %v9065_v9 }
 0x4d7   : > { %v1613_v34 = vpack.c.bf16 %v1604_v32, %v1603_v31  ;;  %v1616_v43 = vpack.c.bf16 %v1609_v36, %v1603_v31 }
 0x4d9   : > { %1625 = vrot.lane.b32.xlu1 %v1613_v34, %s11440_s24 }
 0x4db   : > { %v1593_v37 = vpop.permute.xlu0 %1592 }
 0x4dc   : > { %v1597_v38 = vsel %vm11445_vm14, %v1591_v33, %v1593_v37  ;;  %v1607_v39 = vmul.f32 %v1593_v37, %v9051_v52  ;;  %v1612_v45 = vmul.f32 %v1593_v37, %v9069_v11  ;;  %v1797_v37 = vld [vmem:[#allocation8 + $0x38] sm:$0xf] }
 0x4dd   : > { %v1606_v41 = vmul.f32 %v1597_v38, %v9049_v51  ;;  %v1611_v47 = vmul.f32 %v1597_v38, %v9067_v10 }
 0x4de   : > { %v1615_v42 = vpack.c.bf16 %v1607_v39, %v1607_v39  ;;  %v1618_v54 = vpack.c.bf16 %v1612_v45, %v1612_v45  ;;  %v1802_v45 = vperm.slane %v1797_v37, 3 }
 0x4df   : > { %v1614_v44 = vpack.c.bf16 %v1606_v41, %v1605_v40  ;;  %v1617_v55 = vpack.c.bf16 %v1611_v47, %v1610_v48  ;;  %v1799_v40 = vperm.slane %v1797_v37, 0 }
 0x4e0   : > { %1629 = vrot.lane.b32.xlu0 %v1615_v42, %s11440_s24 }
 0x4e1   : > { %1631 = vrot.lane.b32.xlu1 %v1616_v43, %s11440_s24  ;;  %1627 = vrot.lane.b32.xlu2 %v1614_v44, %s11440_s24  ;;  %v1801_v43 = vperm.slane %v1797_v37, 2  ;;  %v1800_v44 = vperm.slane %v1797_v37, 1 }
 0x4e8   : > { %1635 = vrot.lane.b32.xlu0 %v1618_v54, %s11440_s24 }
 0x4e9   : > { %1677 = vrot.lane.b32.xlu1 %v1673_v53, %s11436_s21  ;;  %1633 = vrot.lane.b32.xlu2 %v1617_v55, %s11440_s24 }
 0x4f0   : > { %1681 = vrot.lane.b32.xlu0 %v1675_v56, %s11436_s21 }
 0x4f1   : > { %1683 = vrot.lane.b32.xlu1 %v1676_v57, %s11436_s21  ;;  %1679 = vrot.lane.b32.xlu2 %v1674_v58, %s11436_s21 }
 0x53b   : > { %v1628_v59 = vpop.permute.xlu2 %1627 }
 0x53c   : > { %v1638_v61 = vrot.slane %v1628_v59, 4 }
 0x543   : > { %v1634_v1 = vpop.permute.xlu2 %1633 }
 0x544   : > { %v1641_v5 = vrot.slane %v1634_v1, 4 }
 0x54b   : > { %v1626_v60 = vpop.permute.xlu1 %1625  ;;  %v1680_v15 = vpop.permute.xlu2 %1679 }
 0x54c   : > { %v1637_v62 = vrot.slane %v1626_v60, 4 }
 0x54e   : > { %v1643_v63 = vsel %vm641_vm5, %v1637_v62, %v1638_v61 }
 0x54f   : > { %v1645_v0 = vsel %vm11444_vm15, %v1626_v60, %v1643_v63 }
 0x550   : > { %1656 = vst [vmem:[#allocation3 + $0x160] sm:$0xff] %v1645_v0 }
 0x552   : > { %v1630_v2 = vpop.permute.xlu0 %1629 }
 0x553   : > { %v1639_v3 = vrot.slane %v1630_v2, 4  ;;  %v1632_v4 = vpop.permute.xlu1 %1631 }
 0x554   : > { %v1640_v6 = vrot.slane %v1632_v4, 4 }
 0x555   : > { %v1646_v7 = vsel %vm641_vm5, %v1638_v61, %v1639_v3 }
 0x556   : > { %v1647_v12 = vsel %vm11444_vm15, %v1628_v59, %v1646_v7  ;;  %v1648_v13 = vsel %vm641_vm5, %v1640_v6, %v1641_v5 }
 0x557   : > { %1657 = vst [vmem:[#allocation3 + $0x168] sm:$0xff] %v1647_v12  ;;  %v1649_v14 = vsel %vm11444_vm15, %v1632_v4, %v1648_v13 }
 0x558   : > { %1658 = vst [vmem:[#allocation3 + $0x170] sm:$0xff] %v1649_v14  ;;  %v1888_v14 = vld [vmem:[#allocation8 + $0x3c] sm:$0xf] }
 0x55a   : > { %v1636_v16 = vpop.permute.xlu0 %1635 }
 0x55b   : > { %v1642_v17 = vrot.slane %v1636_v16, 4  ;;  %v1678_v18 = vpop.permute.xlu1 %1677 }
 0x55c   : > { %v1694_v19 = vmul.f32 0.0, %v1678_v18  ;;  %v1686_v20 = vsel %vm11442_vm4, %v1678_v18, %v1680_v15 }
 0x55d   : > { %v1650_v21 = vsel %vm641_vm5, %v1641_v5, %v1642_v17  ;;  %v1695_v22 = vmul.f32 %v1686_v20, %v9045_v49  ;;  %v1700_v26 = vmul.f32 %v1686_v20, %v9063_v8 }
 0x55e   : > { %v1651_v23 = vsel %vm11444_vm15, %v1634_v1, %v1650_v21 }
 0x55f   : > { %1659 = vst [vmem:[#allocation3 + $0x178] sm:$0xff] %v1651_v23  ;;  %v1704_v24 = vpack.c.bf16 %v1695_v22, %v1694_v19  ;;  %v1707_v35 = vpack.c.bf16 %v1700_v26, %v1694_v19 }
 0x561   : > { %1716 = vrot.lane.b32.xlu2 %v1704_v24, %s11438_s15 }
 0x562   : > { %v1682_v25 = vpop.permute.xlu0 %1681 }
 0x563   : > { %v1687_v27 = vsel %vm11442_vm4, %v1680_v15, %v1682_v25  ;;  %v1684_v28 = vpop.permute.xlu1 %1683  ;;  %v1892_v15 = vperm.slane %v1888_v14, 2 }
 0x564   : > { %v1696_v29 = vmul.f32 %v1687_v27, %v9047_v50  ;;  %v1688_v30 = vsel %vm11442_vm4, %v1682_v25, %v1684_v28  ;;  %v1698_v31 = vmul.f32 %v1684_v28, %v9051_v52  ;;  %v1703_v36 = vmul.f32 %v1684_v28, %v9069_v11 }
 0x565   : > { %v1697_v32 = vmul.f32 %v1688_v30, %v9049_v51  ;;  %v1701_v38 = vmul.f32 %v1687_v27, %v9065_v9  ;;  %v1702_v39 = vmul.f32 %v1688_v30, %v9067_v10 }
 0x566   : > { %v1706_v33 = vpack.c.bf16 %v1698_v31, %v1698_v31  ;;  %v1709_v41 = vpack.c.bf16 %v1703_v36, %v1703_v36 }
 0x567   : > { %v1705_v34 = vpack.c.bf16 %v1697_v32, %v1696_v29  ;;  %v1708_v42 = vpack.c.bf16 %v1702_v39, %v1701_v38 }
 0x568   : > { %1720 = vrot.lane.b32.xlu1 %v1706_v33, %s11438_s15  ;;  %v1890_v33 = vperm.slane %v1888_v14, 0 }
 0x569   : > { %1718 = vrot.lane.b32.xlu0 %v1705_v34, %s11438_s15  ;;  %1722 = vrot.lane.b32.xlu2 %v1707_v35, %s11438_s15  ;;  %v1891_v34 = vperm.slane %v1888_v14, 1  ;;  %v1893_v35 = vperm.slane %v1888_v14, 3 }
 0x570   : > { %1726 = vrot.lane.b32.xlu1 %v1709_v41, %s11438_s15 }
 0x571   : > { %1724 = vrot.lane.b32.xlu0 %v1708_v42, %s11438_s15  ;;  %1803 = vrot.lane.b32.xlu2 %v1799_v40, %s11438_s15 }
 0x578   : > { %1807 = vrot.lane.b32.xlu1 %v1801_v43, %s11438_s15 }
 0x579   : > { %1805 = vrot.lane.b32.xlu0 %v1800_v44, %s11438_s15  ;;  %1809 = vrot.lane.b32.xlu2 %v1802_v45, %s11438_s15  ;;  %s11496_s15 = smov 65  }
 0x5bb   : > { %v1717_v46 = vpop.permute.xlu2 %1716 }
 0x5bc   : > { %v1728_v59 = vrot.slane %v1717_v46, 4 }
 0x5c3   : > { %v1723_v47 = vpop.permute.xlu2 %1722 }
 0x5c4   : > { %v1731_v4 = vrot.slane %v1723_v47, 4 }
 0x5cb   : > { %v1804_v48 = vpop.permute.xlu2 %1803 }
 0x5cc   : > { %v1820_v22 = vmul.f32 %v1804_v48, %v9045_v49  ;;  %v1825_v30 = vmul.f32 %v1804_v48, %v9063_v8 }
 0x5d3   : > { %v1810_v53 = vpop.permute.xlu2 %1809 }
 0x5d4   : > { %v1824_v54 = vmul.f32 0.0, %v1810_v53 }
 0x5d6   : > { %v1832_v55 = vpack.c.bf16 %v1824_v54, %v1824_v54 }
 0x5d8   : > { %1846 = vrot.lane.b32.xlu2 %v1832_v55, %s11436_s21 }
 0x5da   : > { %v1721_v56 = vpop.permute.xlu1 %1720 }
 0x5db   : > { %v1730_v57 = vrot.slane %v1721_v56, 4  ;;  %v1719_v58 = vpop.permute.xlu0 %1718 }
 0x5dc   : > { %v1729_v60 = vrot.slane %v1719_v58, 4 }
 0x5de   : > { %v1734_v61 = vsel %vm641_vm5, %v1728_v59, %v1729_v60  ;;  %v1737_v62 = vsel %vm641_vm5, %v1729_v60, %v1730_v57 }
 0x5df   : > { %v1736_v63 = vsel %vm11443_vm9, %v1717_v46, %v1734_v61  ;;  %v1738_v0 = vsel %vm11443_vm9, %v1719_v58, %v1737_v62 }
 0x5e0   : > { %1747 = vst [vmem:[#allocation3 + $0x180] sm:$0xff] %v1736_v63  ;;  %1852 = vrot.lane.b32.xlu2 %v1832_v55, %s11436_s21 }
 0x5e1   : > { %1748 = vst [vmem:[#allocation3 + $0x188] sm:$0xff] %v1738_v0 }
 0x5e2   : > { %v1727_v1 = vpop.permute.xlu1 %1726 }
 0x5e3   : > { %v1733_v2 = vrot.slane %v1727_v1, 4  ;;  %v1725_v3 = vpop.permute.xlu0 %1724 }
 0x5e4   : > { %v1732_v5 = vrot.slane %v1725_v3, 4 }
 0x5e6   : > { %v1739_v6 = vsel %vm641_vm5, %v1731_v4, %v1732_v5  ;;  %v1741_v7 = vsel %vm641_vm5, %v1732_v5, %v1733_v2 }
 0x5e7   : > { %v1740_v12 = vsel %vm11443_vm9, %v1723_v47, %v1739_v6  ;;  %v1742_v13 = vsel %vm11443_vm9, %v1725_v3, %v1741_v7 }
 0x5e8   : > { %1749 = vst [vmem:[#allocation3 + $0x190] sm:$0xff] %v1740_v12  ;;  %1898 = vrot.lane.b32.xlu2 %v1892_v15, %s11440_s24 }
 0x5e9   : > { %1750 = vst [vmem:[#allocation3 + $0x198] sm:$0xff] %v1742_v13 }
 0x5ea   : > { %v1808_v16 = vpop.permute.xlu1 %1807 }
 0x5eb   : > { %v1814_v17 = vsel %vm11443_vm9, %v1808_v16, %v1810_v53  ;;  %v1806_v18 = vpop.permute.xlu0 %1805 }
 0x5ec   : > { %v1823_v19 = vmul.f32 %v1814_v17, %v9051_v52  ;;  %v1812_v20 = vsel %vm11443_vm9, %v1804_v48, %v1806_v18  ;;  %v1813_v21 = vsel %vm11443_vm9, %v1806_v18, %v1808_v16  ;;  %v1828_v27 = vmul.f32 %v1814_v17, %v9069_v11  ;;  %v1979_v18 = vld [vmem:[#allocation8 + $0x40] sm:$0xf] }
 0x5ed   : > { %v1821_v23 = vmul.f32 %v1812_v20, %v9047_v50  ;;  %v1822_v24 = vmul.f32 %v1813_v21, %v9049_v51  ;;  %v1826_v28 = vmul.f32 %v1812_v20, %v9065_v9  ;;  %v1827_v29 = vmul.f32 %v1813_v21, %v9067_v10 }
 0x5ee   : > { %v1981_v21 = vperm.slane %v1979_v18, 0 }
 0x5ef   : > { %v1830_v25 = vpack.c.bf16 %v1821_v23, %v1820_v22  ;;  %v1831_v26 = vpack.c.bf16 %v1823_v19, %v1822_v24  ;;  %v1833_v31 = vpack.c.bf16 %v1826_v28, %v1825_v30  ;;  %v1834_v32 = vpack.c.bf16 %v1828_v27, %v1827_v29 }
 0x5f0   : > { %v1983_v23 = vperm.slane %v1979_v18, 2  ;;  %v1984_v24 = vperm.slane %v1979_v18, 3 }
 0x5f1   : > { %1842 = vrot.lane.b32.xlu0 %v1830_v25, %s11436_s21  ;;  %1844 = vrot.lane.b32.xlu1 %v1831_v26, %s11436_s21  ;;  %v1982_v25 = vperm.slane %v1979_v18, 1  ;;  %v7665_v18 = vld [vmem:[#allocation3 + $0x1b0] sm:$0xf0] }
 0x5f9   : > { %1848 = vrot.lane.b32.xlu0 %v1833_v31, %s11436_s21  ;;  %1850 = vrot.lane.b32.xlu1 %v1834_v32, %s11436_s21  ;;  %s11495_s21 = smov 63  }
 0x601   : > { %1894 = vrot.lane.b32.xlu0 %v1890_v33, %s11440_s24  ;;  %1896 = vrot.lane.b32.xlu1 %v1891_v34, %s11440_s24 }
 0x609   : > { %1900 = vrot.lane.b32.xlu0 %v1893_v35, %s11440_s24  ;;  %s11497_s24 = smov 64  }
 0x632   : > { %v1847_v36 = vpop.permute.xlu2 %1846 }
 0x633   : > { %v1856_v39 = vrot.slane %v1847_v36, 4 }
 0x63a   : > { %v1853_v46 = vpop.permute.xlu2 %1852 }
 0x63b   : > { %v1859_v53 = vrot.slane %v1853_v46, 4 }
 0x642   : > { %v1899_v1 = vpop.permute.xlu2 %1898 }
 0x663   : > { %v1843_v37 = vpop.permute.xlu0 %1842  ;;  %v1845_v38 = vpop.permute.xlu1 %1844 }
 0x664   : > { %v1854_v40 = vrot.slane %v1843_v37, 4  ;;  %v1855_v41 = vrot.slane %v1845_v38, 4 }
 0x666   : > { %v1860_v42 = vsel %vm641_vm5, %v1854_v40, %v1855_v41  ;;  %v1863_v43 = vsel %vm641_vm5, %v1855_v41, %v1856_v39 }
 0x667   : > { %v1862_v44 = vsel %vm11442_vm4, %v1843_v37, %v1860_v42  ;;  %v1864_v45 = vsel %vm11442_vm4, %v1845_v38, %v1863_v43 }
 0x668   : > { %1873 = vst [vmem:[#allocation3 + $0x1c0] sm:$0xff] %v1862_v44 }
 0x669   : > { %1874 = vst [vmem:[#allocation3 + $0x1c8] sm:$0xff] %v1864_v45 }
 0x66b   : > { %v1849_v47 = vpop.permute.xlu0 %1848  ;;  %v1851_v48 = vpop.permute.xlu1 %1850 }
 0x66c   : > { %v1857_v54 = vrot.slane %v1849_v47, 4  ;;  %v1858_v55 = vrot.slane %v1851_v48, 4 }
 0x66e   : > { %v1865_v56 = vsel %vm641_vm5, %v1857_v54, %v1858_v55  ;;  %v1867_v57 = vsel %vm641_vm5, %v1858_v55, %v1859_v53 }
 0x66f   : > { %v1866_v58 = vsel %vm11442_vm4, %v1849_v47, %v1865_v56  ;;  %v1868_v59 = vsel %vm11442_vm4, %v1851_v48, %v1867_v57  ;;  %vm11498_vm4 = vcmask 531456  }
 0x670   : > { %1875 = vst [vmem:[#allocation3 + $0x1d0] sm:$0xff] %v1866_v58  ;;  %vm11499_vm9 = vmmov %vm11498_vm4 }
 0x671   : > { %1876 = vst [vmem:[#allocation3 + $0x1d8] sm:$0xff] %v1868_v59 }
 0x673   : > { %v1895_v60 = vpop.permute.xlu0 %1894  ;;  %v1897_v61 = vpop.permute.xlu1 %1896 }
 0x674   : > { %v1911_v62 = vmul.f32 %v1895_v60, %v9045_v49  ;;  %v1903_v63 = vsel %vm11444_vm15, %v1895_v60, %v1897_v61  ;;  %v1904_v3 = vsel %vm11444_vm15, %v1897_v61, %v1899_v1  ;;  %v1916_v4 = vmul.f32 %v1895_v60, %v9063_v8 }
 0x675   : > { %v1912_v0 = vmul.f32 %v1903_v63, %v9047_v50  ;;  %v1917_v5 = vmul.f32 %v1903_v63, %v9065_v9  ;;  %v1913_v13 = vmul.f32 %v1904_v3, %v9049_v51  ;;  %v1918_v20 = vmul.f32 %v1904_v3, %v9067_v10 }
 0x677   : > { %v1921_v2 = vpack.c.bf16 %v1912_v0, %v1911_v62  ;;  %v1924_v16 = vpack.c.bf16 %v1917_v5, %v1916_v4  ;;  %v8417_v62 = vld [vmem:[#allocation3 + $0x1cc] sm:$0xf0]  ;;  %v7681_v63 = vld [vmem:[#allocation3 + $0x1d0] sm:$0xf0] }
 0x679   : > { %1933 = vrot.lane.b32.xlu1 %v1921_v2, %s11447_s27 }
 0x67b   : > { %v1901_v6 = vpop.permute.xlu0 %1900 }
 0x67c   : > { %v1905_v7 = vsel %vm11444_vm15, %v1899_v1, %v1901_v6  ;;  %v1915_v12 = vmul.f32 0.0, %v1901_v6  ;;  %v7679_v1 = vld [vmem:[#allocation3 + $0x1c0] sm:$0xf]  ;;  %vm11500_vm15 = vmmov %vm11498_vm4 }
 0x67d   : > { %v1914_v14 = vmul.f32 %v1905_v7, %v9051_v52  ;;  %v1919_v19 = vmul.f32 %v1905_v7, %v9069_v11  ;;  %v7680_v6 = vor.u32 %v8417_v62, %v7679_v1  ;;  %v8415_v7 = vld [vmem:[#allocation3 + $0x1c4] sm:$0xf]  ;;  %v8393_v62 = vld [vmem:[#allocation3 + $0x10c] sm:$0xf0] }
 0x67e   : > { %v1923_v15 = vpack.c.bf16 %v1915_v12, %v1915_v12  ;;  %v8391_v1 = vld [vmem:[#allocation3 + $0x104] sm:$0xf] }
 0x67f   : > { %v1922_v17 = vpack.c.bf16 %v1914_v14, %v1913_v13  ;;  %v1925_v22 = vpack.c.bf16 %v1919_v19, %v1918_v20 }
 0x680   : > { %1937 = vrot.lane.b32.xlu0 %v1923_v15, %s11447_s27 }
 0x681   : > { %1935 = vrot.lane.b32.xlu2 %v1922_v17, %s11447_s27  ;;  %1939 = vrot.lane.b32.xlu1 %v1924_v16, %s11447_s27  ;;  %v8413_v17 = vld [vmem:[#allocation3 + $0x1ac] sm:$0xf0] }
 0x688   : > { %1943 = vrot.lane.b32.xlu0 %v1923_v15, %s11447_s27  ;;  %v7684_v15 = vor.u32 %v8415_v7, %v7681_v63  ;;  %v7585_v63 = vld [vmem:[#allocation3 + $0x110] sm:$0xf0] }
 0x689   : > { %1941 = vrot.lane.b32.xlu2 %v1925_v22, %s11447_s27  ;;  %1985 = vrot.lane.b32.xlu1 %v1981_v21, %s11449_s26  ;;  %v7663_v22 = vld [vmem:[#allocation3 + $0x1a0] sm:$0xf]  ;;  %s11529_s27 = smov 9  }
 0x690   : > { %1989 = vrot.lane.b32.xlu0 %v1983_v23, %s11449_s26  ;;  %v8411_v23 = vld [vmem:[#allocation3 + $0x1a4] sm:$0xf] }
 0x691   : > { %1991 = vrot.lane.b32.xlu1 %v1984_v24, %s11449_s26  ;;  %1987 = vrot.lane.b32.xlu2 %v1982_v25, %s11449_s26  ;;  %v7664_v24 = vor.u32 %v8413_v17, %v7663_v22  ;;  %v7668_v25 = vor.u32 %v8411_v23, %v7665_v18  ;;  %s11532_s26 = smov 121  }
 0x6db   : > { %v1936_v26 = vpop.permute.xlu2 %1935 }
 0x6dc   : > { %v1946_v28 = vrot.slane %v1936_v26, 4 }
 0x6e3   : > { %v1942_v32 = vpop.permute.xlu2 %1941 }
 0x6e4   : > { %v1949_v36 = vrot.slane %v1942_v32, 4 }
 0x6eb   : > { %v1934_v27 = vpop.permute.xlu1 %1933  ;;  %v1988_v42 = vpop.permute.xlu2 %1987 }
 0x6ec   : > { %v1945_v29 = vrot.slane %v1934_v27, 4 }
 0x6ee   : > { %v1951_v30 = vsel %vm641_vm5, %v1945_v29, %v1946_v28 }
 0x6ef   : > { %v1953_v31 = vsel %vm11445_vm14, %v1934_v27, %v1951_v30  ;;  %v7649_v27 = vld [vmem:[#allocation3 + $0x190] sm:$0xf0] }
 0x6f0   : > { %1964 = vst [vmem:[#allocation3 + $0x1e0] sm:$0xff] %v1953_v31  ;;  %v7647_v31 = vld [vmem:[#allocation3 + $0x180] sm:$0xf] }
 0x6f2   : > { %v1938_v33 = vpop.permute.xlu0 %1937 }
 0x6f3   : > { %v1947_v34 = vrot.slane %v1938_v33, 4  ;;  %v1940_v35 = vpop.permute.xlu1 %1939 }
 0x6f4   : > { %v1948_v37 = vrot.slane %v1940_v35, 4 }
 0x6f5   : > { %v1954_v38 = vsel %vm641_vm5, %v1946_v28, %v1947_v34  ;;  %v2070_v28 = vld [vmem:[#allocation8 + $0x44] sm:$0xf] }
 0x6f6   : > { %v1955_v39 = vsel %vm11445_vm14, %v1936_v26, %v1954_v38  ;;  %v1956_v40 = vsel %vm641_vm5, %v1948_v37, %v1949_v36  ;;  %v8409_v26 = vld [vmem:[#allocation3 + $0x18c] sm:$0xf0]  ;;  %v7633_v37 = vld [vmem:[#allocation3 + $0x170] sm:$0xf0] }
 0x6f7   : > { %1965 = vst [vmem:[#allocation3 + $0x1e8] sm:$0xff] %v1955_v39  ;;  %v1957_v41 = vsel %vm11445_vm14, %v1940_v35, %v1956_v40  ;;  %v7695_v55 = vld [vmem:[#allocation3 + $0x1e0] sm:$0xf]  ;;  %v8419_v56 = vld [vmem:[#allocation3 + $0x1e4] sm:$0xf]  ;;  %v7648_v33 = vor.u32 %v8409_v26, %v7647_v31  ;;  %v2072_v35 = vperm.slane %v2070_v28, 0 }
 0x6f8   : > { %1966 = vst [vmem:[#allocation3 + $0x1f0] sm:$0xff] %v1957_v41  ;;  %v7631_v39 = vld [vmem:[#allocation3 + $0x160] sm:$0xf]  ;;  %v8403_v40 = vld [vmem:[#allocation3 + $0x164] sm:$0xf] }
 0x6fa   : > { %v1944_v43 = vpop.permute.xlu0 %1943 }
 0x6fb   : > { %v1950_v44 = vrot.slane %v1944_v43, 4  ;;  %v1986_v45 = vpop.permute.xlu1 %1985  ;;  %v8401_v43 = vld [vmem:[#allocation3 + $0x14c] sm:$0xf0] }
 0x6fc   : > { %v1994_v46 = vsel %vm11446_vm13, %v1986_v45, %v1988_v42  ;;  %v2002_v47 = vmul.f32 %v1986_v45, %v9045_v49  ;;  %v2007_v2 = vmul.f32 %v1986_v45, %v9063_v8  ;;  %v7615_v45 = vld [vmem:[#allocation3 + $0x140] sm:$0xf] }
 0x6fd   : > { %v1958_v48 = vsel %vm641_vm5, %v1949_v36, %v1950_v44  ;;  %v2003_v53 = vmul.f32 %v1994_v46, %v9047_v50  ;;  %v2008_v3 = vmul.f32 %v1994_v46, %v9065_v9  ;;  %v8405_v36 = vld [vmem:[#allocation3 + $0x16c] sm:$0xf0]  ;;  %v7617_v44 = vld [vmem:[#allocation3 + $0x150] sm:$0xf0]  ;;  %v8399_v46 = vld [vmem:[#allocation3 + $0x144] sm:$0xf] }
 0x6fe   : > { %v1959_v54 = vsel %vm11445_vm14, %v1942_v32, %v1958_v48  ;;  %v8407_v32 = vld [vmem:[#allocation3 + $0x184] sm:$0xf]  ;;  %v7632_v41 = vor.u32 %v8405_v36, %v7631_v39  ;;  %v7620_v48 = vor.u32 %v8399_v46, %v7617_v44  ;;  %vm11502_vm14 = vmmov %vm11499_vm9 }
 0x6ff   : > { %1967 = vst [vmem:[#allocation3 + $0x1f8] sm:$0xff] %v1959_v54  ;;  %v2012_v57 = vpack.c.bf16 %v2003_v53, %v2002_v47  ;;  %v8421_v58 = vld [vmem:[#allocation3 + $0x1ec] sm:$0xf0]  ;;  %v7697_v59 = vld [vmem:[#allocation3 + $0x1f0] sm:$0xf0]  ;;  %v2015_v21 = vpack.c.bf16 %v2008_v3, %v2007_v2  ;;  %v7652_v34 = vor.u32 %v8407_v32, %v7649_v27  ;;  %v7616_v47 = vor.u32 %v8401_v43, %v7615_v45 }
 0x700   : > { %v7696_v60 = vor.u32 %v8421_v58, %v7695_v55  ;;  %v7700_v61 = vor.u32 %v8419_v56, %v7697_v59  ;;  %v2074_v53 = vperm.slane %v2070_v28, 2  ;;  %v2073_v54 = vperm.slane %v2070_v28, 1  ;;  %v8397_v55 = vld [vmem:[#allocation3 + $0x12c] sm:$0xf0]  ;;  %v7601_v56 = vld [vmem:[#allocation3 + $0x130] sm:$0xf0] }
 0x701   : > { %2024 = vrot.lane.b32.xlu2 %v2012_v57, %s11451_s23  ;;  %v2075_v57 = vperm.slane %v2070_v28, 3  ;;  %v7599_v58 = vld [vmem:[#allocation3 + $0x120] sm:$0xf]  ;;  %v8395_v59 = vld [vmem:[#allocation3 + $0x124] sm:$0xf]  ;;  %v7588_v3 = vor.u32 %v8391_v1, %v7585_v63 }
 0x702   : > { %v1990_v0 = vpop.permute.xlu0 %1989  ;;  %3650 = vmatpush.bf16.msra.mxu1 %v7696_v60  ;;  %3706 = vmatpush.bf16.msrb.mxu0 %v7700_v61  ;;  %v7600_v60 = vor.u32 %v8397_v55, %v7599_v58  ;;  %v7604_v61 = vor.u32 %v8395_v59, %v7601_v56  ;;  %v2161_v32 = vld [vmem:[#allocation8 + $0x48] sm:$0xf] }
 0x703   : > { %v1995_v4 = vsel %vm11446_vm13, %v1988_v42, %v1990_v0  ;;  %v1992_v5 = vpop.permute.xlu1 %1991  ;;  %v7636_v42 = vor.u32 %v8403_v40, %v7633_v37  ;;  %v2164_v55 = vperm.slane %v2161_v32, 1  ;;  %v2163_v56 = vperm.slane %v2161_v32, 0 }
 0x704   : > { %v2004_v12 = vmul.f32 %v1995_v4, %v9049_v51  ;;  %v1996_v13 = vsel %vm11446_vm13, %v1990_v0, %v1992_v5  ;;  %v2006_v14 = vmul.f32 0.0, %v1992_v5  ;;  %v2009_v29 = vmul.f32 %v1995_v4, %v9067_v10  ;;  %v7583_v0 = vld [vmem:[#allocation3 + $0x100] sm:$0xf] }
 0x705   : > { %v2005_v16 = vmul.f32 %v1996_v13, %v9051_v52  ;;  %v2010_v30 = vmul.f32 %v1996_v13, %v9069_v11  ;;  %v7584_v2 = vor.u32 %v8393_v62, %v7583_v0 }
 0x706   : > { %v2014_v19 = vpack.c.bf16 %v2006_v14, %v2006_v14  ;;  %3651 = vmatpush.bf16.msra.mxu1 %v7680_v6  ;;  %3707 = vmatpush.bf16.msrb.mxu0 %v7684_v15 }
 0x707   : > { %v2013_v20 = vpack.c.bf16 %v2005_v16, %v2004_v12  ;;  %v2016_v38 = vpack.c.bf16 %v2010_v30, %v2009_v29 }
 0x708   : > { %2028 = vrot.lane.b32.xlu1 %v2014_v19, %s11451_s23 }
 0x709   : > { %2030 = vrot.lane.b32.xlu2 %v2015_v21, %s11451_s23  ;;  %2026 = vrot.lane.b32.xlu0 %v2013_v20, %s11451_s23 }
 0x70a   : > { %3652 = vmatpush.bf16.msra.mxu1 %v7664_v24  ;;  %3708 = vmatpush.bf16.msrb.mxu0 %v7668_v25 }
 0x70e   : > { %3653 = vmatpush.bf16.msra.mxu1 %v7648_v33  ;;  %3709 = vmatpush.bf16.msrb.mxu0 %v7652_v34  ;;  %v2165_v33 = vperm.slane %v2161_v32, 2 }
 0x710   : > { %2034 = vrot.lane.b32.xlu1 %v2014_v19, %s11451_s23 }
 0x711   : > { %2076 = vrot.lane.b32.xlu2 %v2072_v35, %s11453_s29  ;;  %2032 = vrot.lane.b32.xlu0 %v2016_v38, %s11451_s23  ;;  %s11531_s23 = smov 8  }
 0x712   : > { %3654 = vmatpush.bf16.msra.mxu1 %v7632_v41  ;;  %3710 = vmatpush.bf16.msrb.mxu0 %v7636_v42 }
 0x716   : > { %3655 = vmatpush.bf16.msra.mxu1 %v7616_v47  ;;  %3711 = vmatpush.bf16.msrb.mxu0 %v7620_v48 }
 0x718   : > { %2080 = vrot.lane.b32.xlu1 %v2074_v53, %s11453_s29 }
 0x719   : > { %2078 = vrot.lane.b32.xlu0 %v2073_v54, %s11453_s29  ;;  %2082 = vrot.lane.b32.xlu2 %v2075_v57, %s11453_s29  ;;  %v2166_v57 = vperm.slane %v2161_v32, 3  ;;  %s11530_s29 = smov 120  }
 0x71a   : > { %3656 = vmatpush.bf16.msra.mxu1 %v7600_v60  ;;  %3712 = vmatpush.bf16.msrb.mxu0 %v7604_v61 }
 0x71e   : > { %3657 = vmatpush.bf16.msra.mxu1 %v7584_v2  ;;  %3713 = vmatpush.bf16.msrb.mxu0 %v7588_v3 }
 0x75b   : > { %v2025_v4 = vpop.permute.xlu2 %2024 }
 0x75c   : > { %v2036_v17 = vrot.slane %v2025_v4, 4 }
 0x763   : > { %v2031_v5 = vpop.permute.xlu2 %2030 }
 0x764   : > { %v2039_v26 = vrot.slane %v2031_v5, 4 }
 0x76b   : > { %v2077_v6 = vpop.permute.xlu2 %2076 }
 0x76c   : > { %v2093_v40 = vmul.f32 %v2077_v6, %v9045_v49  ;;  %v2098_v48 = vmul.f32 %v2077_v6, %v9063_v8 }
 0x773   : > { %v2083_v7 = vpop.permute.xlu2 %2082 }
 0x774   : > { %v2097_v12 = vmul.f32 0.0, %v2083_v7 }
 0x776   : > { %v2105_v13 = vpack.c.bf16 %v2097_v12, %v2097_v12 }
 0x778   : > { %2119 = vrot.lane.b32.xlu2 %v2105_v13, %s11455_s22 }
 0x77a   : > { %v2029_v14 = vpop.permute.xlu1 %2028 }
 0x77b   : > { %v2038_v15 = vrot.slane %v2029_v14, 4  ;;  %v2027_v16 = vpop.permute.xlu0 %2026 }
 0x77c   : > { %v2037_v18 = vrot.slane %v2027_v16, 4 }
 0x77e   : > { %v2042_v19 = vsel %vm641_vm5, %v2036_v17, %v2037_v18  ;;  %v2045_v20 = vsel %vm641_vm5, %v2037_v18, %v2038_v15 }
 0x77f   : > { %v2044_v21 = vsel %vm1503_vm12, %v2025_v4, %v2042_v19  ;;  %v2046_v22 = vsel %vm1503_vm12, %v2027_v16, %v2045_v20 }
 0x780   : > { %2055 = vst [vmem:[#allocation3 + $0x200] sm:$0xff] %v2044_v21  ;;  %2125 = vrot.lane.b32.xlu2 %v2105_v13, %s11455_s22 }
 0x781   : > { %2056 = vst [vmem:[#allocation3 + $0x208] sm:$0xff] %v2046_v22 }
 0x782   : > { %v2035_v23 = vpop.permute.xlu1 %2034 }
 0x783   : > { %v2041_v24 = vrot.slane %v2035_v23, 4  ;;  %v2033_v25 = vpop.permute.xlu0 %2032 }
 0x784   : > { %v2040_v27 = vrot.slane %v2033_v25, 4 }
 0x786   : > { %v2047_v28 = vsel %vm641_vm5, %v2039_v26, %v2040_v27  ;;  %v2049_v29 = vsel %vm641_vm5, %v2040_v27, %v2041_v24 }
 0x787   : > { %v2048_v30 = vsel %vm1503_vm12, %v2031_v5, %v2047_v28  ;;  %v2050_v31 = vsel %vm1503_vm12, %v2033_v25, %v2049_v29 }
 0x788   : > { %2057 = vst [vmem:[#allocation3 + $0x210] sm:$0xff] %v2048_v30  ;;  %2171 = vrot.lane.b32.xlu2 %v2165_v33, %s11464_s19 }
 0x789   : > { %2058 = vst [vmem:[#allocation3 + $0x218] sm:$0xff] %v2050_v31 }
 0x78a   : > { %v2081_v34 = vpop.permute.xlu1 %2080 }
 0x78b   : > { %v2087_v35 = vsel %vm1462_vm11, %v2081_v34, %v2083_v7  ;;  %v2079_v36 = vpop.permute.xlu0 %2078 }
 0x78c   : > { %v2096_v37 = vmul.f32 %v2087_v35, %v9051_v52  ;;  %v2085_v38 = vsel %vm1462_vm11, %v2077_v6, %v2079_v36  ;;  %v2086_v39 = vsel %vm1462_vm11, %v2079_v36, %v2081_v34  ;;  %v2101_v45 = vmul.f32 %v2087_v35, %v9069_v11  ;;  %v2250_v36 = vld [vmem:[#allocation8 + $0x4c] sm:$0xf] }
 0x78d   : > { %v2094_v41 = vmul.f32 %v2085_v38, %v9047_v50  ;;  %v2095_v42 = vmul.f32 %v2086_v39, %v9049_v51  ;;  %v2099_v46 = vmul.f32 %v2085_v38, %v9065_v9  ;;  %v2100_v47 = vmul.f32 %v2086_v39, %v9067_v10 }
 0x78e   : > { %v2252_v39 = vperm.slane %v2250_v36, 0 }
 0x78f   : > { %v2103_v43 = vpack.c.bf16 %v2094_v41, %v2093_v40  ;;  %v2104_v44 = vpack.c.bf16 %v2096_v37, %v2095_v42  ;;  %v2106_v53 = vpack.c.bf16 %v2099_v46, %v2098_v48  ;;  %v2107_v54 = vpack.c.bf16 %v2101_v45, %v2100_v47 }
 0x790   : > { %v2254_v41 = vperm.slane %v2250_v36, 2  ;;  %v2255_v42 = vperm.slane %v2250_v36, 3 }
 0x791   : > { %2117 = vrot.lane.b32.xlu1 %v2104_v44, %s11455_s22  ;;  %2115 = vrot.lane.b32.xlu0 %v2103_v43, %s11455_s22  ;;  %v2253_v43 = vperm.slane %v2250_v36, 1 }
 0x799   : > { %2123 = vrot.lane.b32.xlu1 %v2107_v54, %s11455_s22  ;;  %2121 = vrot.lane.b32.xlu0 %v2106_v53, %s11455_s22  ;;  %s11528_s22 = smov 119  }
 0x7a1   : > { %2169 = vrot.lane.b32.xlu1 %v2164_v55, %s11464_s19  ;;  %2167 = vrot.lane.b32.xlu0 %v2163_v56, %s11464_s19 }
 0x7a9   : > { %2173 = vrot.lane.b32.xlu0 %v2166_v57, %s11464_s19 }
 0x7d2   : > { %v2120_v58 = vpop.permute.xlu2 %2119 }
 0x7d3   : > { %v2129_v61 = vrot.slane %v2120_v58, 4 }
 0x7da   : > { %v2126_v4 = vpop.permute.xlu2 %2125 }
 0x7db   : > { %v2132_v7 = vrot.slane %v2126_v4, 4 }
 0x7e2   : > { %v2172_v23 = vpop.permute.xlu2 %2171 }
 0x803   : > { %v2118_v59 = vpop.permute.xlu1 %2117  ;;  %v2116_v60 = vpop.permute.xlu0 %2115 }
 0x804   : > { %v2128_v62 = vrot.slane %v2118_v59, 4  ;;  %v2127_v63 = vrot.slane %v2116_v60, 4 }
 0x806   : > { %v2136_v0 = vsel %vm641_vm5, %v2128_v62, %v2129_v61  ;;  %v2133_v1 = vsel %vm641_vm5, %v2127_v63, %v2128_v62 }
 0x807   : > { %v2137_v2 = vsel %vm1412_vm10, %v2118_v59, %v2136_v0  ;;  %v2135_v3 = vsel %vm1412_vm10, %v2116_v60, %v2133_v1 }
 0x808   : > { %2147 = vst [vmem:[#allocation3 + $0x228] sm:$0xff] %v2137_v2 }
 0x809   : > { %2146 = vst [vmem:[#allocation3 + $0x220] sm:$0xff] %v2135_v3 }
 0x80b   : > { %v2124_v5 = vpop.permute.xlu1 %2123  ;;  %v2122_v6 = vpop.permute.xlu0 %2121 }
 0x80c   : > { %v2131_v12 = vrot.slane %v2124_v5, 4  ;;  %v2130_v13 = vrot.slane %v2122_v6, 4 }
 0x80e   : > { %v2140_v14 = vsel %vm641_vm5, %v2131_v12, %v2132_v7  ;;  %v2138_v15 = vsel %vm641_vm5, %v2130_v13, %v2131_v12 }
 0x80f   : > { %v2141_v16 = vsel %vm1412_vm10, %v2124_v5, %v2140_v14  ;;  %v2139_v17 = vsel %vm1412_vm10, %v2122_v6, %v2138_v15 }
 0x810   : > { %2149 = vst [vmem:[#allocation3 + $0x238] sm:$0xff] %v2141_v16 }
 0x811   : > { %2148 = vst [vmem:[#allocation3 + $0x230] sm:$0xff] %v2139_v17 }
 0x813   : > { %v2170_v18 = vpop.permute.xlu1 %2169  ;;  %v2168_v19 = vpop.permute.xlu0 %2167 }
 0x814   : > { %v2175_v20 = vsel %vm592_vm0, %v2168_v19, %v2170_v18  ;;  %v2183_v21 = vmul.f32 %v2168_v19, %v9045_v49  ;;  %v2176_v25 = vsel %vm592_vm0, %v2170_v18, %v2172_v23  ;;  %v2188_v26 = vmul.f32 %v2168_v19, %v9063_v8 }
 0x815   : > { %v2184_v22 = vmul.f32 %v2175_v20, %v9047_v50  ;;  %v2189_v27 = vmul.f32 %v2175_v20, %v9065_v9  ;;  %v2185_v31 = vmul.f32 %v2176_v25, %v9049_v51  ;;  %v2190_v38 = vmul.f32 %v2176_v25, %v9067_v10 }
 0x817   : > { %v2193_v24 = vpack.c.bf16 %v2184_v22, %v2183_v21  ;;  %v2196_v35 = vpack.c.bf16 %v2189_v27, %v2188_v26  ;;  %v2339_v26 = vld [vmem:[#allocation8 + $0x50] sm:$0xf] }
 0x819   : > { %2205 = vrot.lane.b32.xlu1 %v2193_v24, %s11466_s25 }
 0x81b   : > { %v2174_v28 = vpop.permute.xlu0 %2173 }
 0x81c   : > { %v2177_v29 = vsel %vm592_vm0, %v2172_v23, %v2174_v28  ;;  %v2187_v30 = vmul.f32 0.0, %v2174_v28 }
 0x81d   : > { %v2186_v32 = vmul.f32 %v2177_v29, %v9051_v52  ;;  %v2191_v37 = vmul.f32 %v2177_v29, %v9069_v11  ;;  %v2341_v29 = vperm.slane %v2339_v26, 0 }
 0x81e   : > { %v2195_v33 = vpack.c.bf16 %v2187_v30, %v2187_v30 }
 0x81f   : > { %v2194_v34 = vpack.c.bf16 %v2186_v32, %v2185_v31  ;;  %v2197_v40 = vpack.c.bf16 %v2191_v37, %v2190_v38  ;;  %v2343_v31 = vperm.slane %v2339_v26, 2  ;;  %v2342_v32 = vperm.slane %v2339_v26, 1 }
 0x820   : > { %2209 = vrot.lane.b32.xlu0 %v2195_v33, %s11466_s25 }
 0x821   : > { %2211 = vrot.lane.b32.xlu1 %v2196_v35, %s11466_s25  ;;  %2207 = vrot.lane.b32.xlu2 %v2194_v34, %s11466_s25 }
 0x828   : > { %2215 = vrot.lane.b32.xlu0 %v2195_v33, %s11466_s25  ;;  %v2344_v33 = vperm.slane %v2339_v26, 3 }
 0x829   : > { %2256 = vrot.lane.b32.xlu1 %v2252_v39, %s11468_s20  ;;  %2213 = vrot.lane.b32.xlu2 %v2197_v40, %s11466_s25 }
 0x830   : > { %2260 = vrot.lane.b32.xlu0 %v2254_v41, %s11468_s20 }
 0x831   : > { %2262 = vrot.lane.b32.xlu1 %v2255_v42, %s11468_s20  ;;  %2258 = vrot.lane.b32.xlu2 %v2253_v43, %s11468_s20 }
 0x87b   : > { %v2208_v44 = vpop.permute.xlu2 %2207 }
 0x87c   : > { %v2218_v46 = vrot.slane %v2208_v44, 4 }
 0x883   : > { %v2214_v54 = vpop.permute.xlu2 %2213 }
 0x884   : > { %v2221_v58 = vrot.slane %v2214_v54, 4 }
 0x88b   : > { %v2206_v45 = vpop.permute.xlu1 %2205  ;;  %v2259_v0 = vpop.permute.xlu2 %2258 }
 0x88c   : > { %v2217_v47 = vrot.slane %v2206_v45, 4 }
 0x88e   : > { %v2223_v48 = vsel %vm641_vm5, %v2217_v47, %v2218_v46 }
 0x88f   : > { %v2224_v53 = vsel %vm643_vm6, %v2206_v45, %v2223_v48 }
 0x890   : > { %2235 = vst [vmem:[#allocation3 + $0x240] sm:$0xff] %v2224_v53 }
 0x892   : > { %v2210_v55 = vpop.permute.xlu0 %2209 }
 0x893   : > { %v2219_v56 = vrot.slane %v2210_v55, 4  ;;  %v2212_v57 = vpop.permute.xlu1 %2211 }
 0x894   : > { %v2220_v59 = vrot.slane %v2212_v57, 4 }
 0x895   : > { %v2225_v60 = vsel %vm641_vm5, %v2218_v46, %v2219_v56 }
 0x896   : > { %v2226_v61 = vsel %vm643_vm6, %v2208_v44, %v2225_v60  ;;  %v2227_v62 = vsel %vm641_vm5, %v2220_v59, %v2221_v58 }
 0x897   : > { %2236 = vst [vmem:[#allocation3 + $0x248] sm:$0xff] %v2226_v61  ;;  %v2228_v63 = vsel %vm643_vm6, %v2212_v57, %v2227_v62  ;;  %v2428_v62 = vld [vmem:[#allocation8 + $0x54] sm:$0xf] }
 0x898   : > { %2237 = vst [vmem:[#allocation3 + $0x250] sm:$0xff] %v2228_v63  ;;  %v2432_v63 = vperm.slane %v2428_v62, 2 }
 0x89a   : > { %v2216_v1 = vpop.permute.xlu0 %2215 }
 0x89b   : > { %v2222_v2 = vrot.slane %v2216_v1, 4  ;;  %v2257_v3 = vpop.permute.xlu1 %2256 }
 0x89c   : > { %v2272_v4 = vmul.f32 %v2257_v3, %v9045_v49  ;;  %v2264_v5 = vsel %vm684_vm1, %v2257_v3, %v2259_v0  ;;  %v2277_v15 = vmul.f32 %v2257_v3, %v9063_v8 }
 0x89d   : > { %v2229_v6 = vsel %vm641_vm5, %v2221_v58, %v2222_v2  ;;  %v2273_v7 = vmul.f32 %v2264_v5, %v9047_v50  ;;  %v2278_v16 = vmul.f32 %v2264_v5, %v9065_v9 }
 0x89e   : > { %v2230_v12 = vsel %vm643_vm6, %v2214_v54, %v2229_v6 }
 0x89f   : > { %2238 = vst [vmem:[#allocation3 + $0x258] sm:$0xff] %v2230_v12  ;;  %v2282_v13 = vpack.c.bf16 %v2273_v7, %v2272_v4  ;;  %v2285_v24 = vpack.c.bf16 %v2278_v16, %v2277_v15 }
 0x8a1   : > { %2294 = vrot.lane.b32.xlu2 %v2282_v13, %s11461_s14 }
 0x8a2   : > { %v2261_v14 = vpop.permute.xlu0 %2260 }
 0x8a3   : > { %v2265_v17 = vsel %vm684_vm1, %v2259_v0, %v2261_v14  ;;  %v2263_v18 = vpop.permute.xlu1 %2262 }
 0x8a4   : > { %v2274_v19 = vmul.f32 %v2265_v17, %v9049_v51  ;;  %v2266_v20 = vsel %vm684_vm1, %v2261_v14, %v2263_v18  ;;  %v2276_v21 = vmul.f32 0.0, %v2263_v18  ;;  %v2279_v27 = vmul.f32 %v2265_v17, %v9067_v10 }
 0x8a5   : > { %v2275_v22 = vmul.f32 %v2266_v20, %v9051_v52  ;;  %v2280_v28 = vmul.f32 %v2266_v20, %v9069_v11 }
 0x8a6   : > { %v2284_v23 = vpack.c.bf16 %v2276_v21, %v2276_v21  ;;  %v2430_v21 = vperm.slane %v2428_v62, 0 }
 0x8a7   : > { %v2283_v25 = vpack.c.bf16 %v2275_v22, %v2274_v19  ;;  %v2286_v30 = vpack.c.bf16 %v2280_v28, %v2279_v27  ;;  %v2431_v22 = vperm.slane %v2428_v62, 1 }
 0x8a8   : > { %2298 = vrot.lane.b32.xlu1 %v2284_v23, %s11461_s14 }
 0x8a9   : > { %2296 = vrot.lane.b32.xlu0 %v2283_v25, %s11461_s14  ;;  %2300 = vrot.lane.b32.xlu2 %v2285_v24, %s11461_s14 }
 0x8b0   : > { %2304 = vrot.lane.b32.xlu1 %v2284_v23, %s11461_s14  ;;  %v2433_v23 = vperm.slane %v2428_v62, 3 }
 0x8b1   : > { %2302 = vrot.lane.b32.xlu0 %v2286_v30, %s11461_s14  ;;  %2345 = vrot.lane.b32.xlu2 %v2341_v29, %s11459_s18 }
 0x8b8   : > { %2349 = vrot.lane.b32.xlu1 %v2343_v31, %s11459_s18 }
 0x8b9   : > { %2347 = vrot.lane.b32.xlu0 %v2342_v32, %s11459_s18  ;;  %2351 = vrot.lane.b32.xlu2 %v2344_v33, %s11459_s18 }
 0x8fb   : > { %v2295_v34 = vpop.permute.xlu2 %2294 }
 0x8fc   : > { %v2306_v43 = vrot.slane %v2295_v34, 4 }
 0x903   : > { %v2301_v35 = vpop.permute.xlu2 %2300 }
 0x904   : > { %v2309_v56 = vrot.slane %v2301_v35, 4 }
 0x90b   : > { %v2346_v36 = vpop.permute.xlu2 %2345 }
 0x90c   : > { %v2361_v6 = vmul.f32 %v2346_v36, %v9045_v49  ;;  %v2366_v18 = vmul.f32 %v2346_v36, %v9063_v8 }
 0x913   : > { %v2352_v37 = vpop.permute.xlu2 %2351 }
 0x914   : > { %v2365_v38 = vmul.f32 0.0, %v2352_v37 }
 0x916   : > { %v2373_v39 = vpack.c.bf16 %v2365_v38, %v2365_v38 }
 0x918   : > { %2387 = vrot.lane.b32.xlu2 %v2373_v39, %s11457_s28 }
 0x91a   : > { %v2299_v40 = vpop.permute.xlu1 %2298 }
 0x91b   : > { %v2308_v41 = vrot.slane %v2299_v40, 4  ;;  %v2297_v42 = vpop.permute.xlu0 %2296 }
 0x91c   : > { %v2307_v44 = vrot.slane %v2297_v42, 4 }
 0x91e   : > { %v2312_v45 = vsel %vm641_vm5, %v2306_v43, %v2307_v44  ;;  %v2314_v46 = vsel %vm641_vm5, %v2307_v44, %v2308_v41 }
 0x91f   : > { %v2313_v47 = vsel %vm734_vm7, %v2295_v34, %v2312_v45  ;;  %v2315_v48 = vsel %vm734_vm7, %v2297_v42, %v2314_v46 }
 0x920   : > { %2324 = vst [vmem:[#allocation3 + $0x260] sm:$0xff] %v2313_v47  ;;  %2393 = vrot.lane.b32.xlu2 %v2373_v39, %s11457_s28 }
 0x921   : > { %2325 = vst [vmem:[#allocation3 + $0x268] sm:$0xff] %v2315_v48 }
 0x922   : > { %v2305_v53 = vpop.permute.xlu1 %2304 }
 0x923   : > { %v2311_v54 = vrot.slane %v2305_v53, 4  ;;  %v2303_v55 = vpop.permute.xlu0 %2302 }
 0x924   : > { %v2310_v57 = vrot.slane %v2303_v55, 4 }
 0x926   : > { %v2316_v58 = vsel %vm641_vm5, %v2309_v56, %v2310_v57  ;;  %v2318_v59 = vsel %vm641_vm5, %v2310_v57, %v2311_v54 }
 0x927   : > { %v2317_v60 = vsel %vm734_vm7, %v2301_v35, %v2316_v58  ;;  %v2319_v61 = vsel %vm734_vm7, %v2303_v55, %v2318_v59 }
 0x928   : > { %2326 = vst [vmem:[#allocation3 + $0x270] sm:$0xff] %v2317_v60  ;;  %2438 = vrot.lane.b32.xlu2 %v2432_v63, %s11495_s21 }
 0x929   : > { %2327 = vst [vmem:[#allocation3 + $0x278] sm:$0xff] %v2319_v61 }
 0x92a   : > { %v2350_v0 = vpop.permute.xlu1 %2349 }
 0x92b   : > { %v2355_v1 = vsel %vm775_vm2, %v2350_v0, %v2352_v37  ;;  %v2348_v2 = vpop.permute.xlu0 %2347 }
 0x92c   : > { %v2364_v3 = vmul.f32 %v2355_v1, %v9051_v52  ;;  %v2353_v4 = vsel %vm775_vm2, %v2346_v36, %v2348_v2  ;;  %v2354_v5 = vsel %vm775_vm2, %v2348_v2, %v2350_v0  ;;  %v2369_v15 = vmul.f32 %v2355_v1, %v9069_v11  ;;  %v2517_v2 = vld [vmem:[#allocation8 + $0x58] sm:$0xf] }
 0x92d   : > { %v2362_v7 = vmul.f32 %v2353_v4, %v9047_v50  ;;  %v2363_v12 = vmul.f32 %v2354_v5, %v9049_v51  ;;  %v2367_v16 = vmul.f32 %v2353_v4, %v9065_v9  ;;  %v2368_v17 = vmul.f32 %v2354_v5, %v9067_v10 }
 0x92e   : > { %v2519_v5 = vperm.slane %v2517_v2, 0 }
 0x92f   : > { %v2371_v13 = vpack.c.bf16 %v2362_v7, %v2361_v6  ;;  %v2372_v14 = vpack.c.bf16 %v2364_v3, %v2363_v12  ;;  %v2374_v19 = vpack.c.bf16 %v2367_v16, %v2366_v18  ;;  %v2375_v20 = vpack.c.bf16 %v2369_v15, %v2368_v17 }
 0x930   : > { %v2521_v7 = vperm.slane %v2517_v2, 2  ;;  %v2522_v12 = vperm.slane %v2517_v2, 3 }
 0x931   : > { %2383 = vrot.lane.b32.xlu0 %v2371_v13, %s11457_s28  ;;  %2385 = vrot.lane.b32.xlu1 %v2372_v14, %s11457_s28  ;;  %v2520_v13 = vperm.slane %v2517_v2, 1 }
 0x939   : > { %2389 = vrot.lane.b32.xlu0 %v2374_v19, %s11457_s28  ;;  %2391 = vrot.lane.b32.xlu1 %v2375_v20, %s11457_s28 }
 0x941   : > { %2434 = vrot.lane.b32.xlu0 %v2430_v21, %s11495_s21  ;;  %2436 = vrot.lane.b32.xlu1 %v2431_v22, %s11495_s21 }
 0x949   : > { %2440 = vrot.lane.b32.xlu0 %v2433_v23, %s11495_s21 }
 0x972   : > { %v2388_v24 = vpop.permute.xlu2 %2387 }
 0x973   : > { %v2397_v27 = vrot.slane %v2388_v24, 4 }
 0x97a   : > { %v2394_v34 = vpop.permute.xlu2 %2393 }
 0x97b   : > { %v2400_v37 = vrot.slane %v2394_v34, 4 }
 0x982   : > { %v2439_v53 = vpop.permute.xlu2 %2438 }
 0x9a3   : > { %v2384_v25 = vpop.permute.xlu0 %2383  ;;  %v2386_v26 = vpop.permute.xlu1 %2385 }
 0x9a4   : > { %v2395_v28 = vrot.slane %v2384_v25, 4  ;;  %v2396_v29 = vrot.slane %v2386_v26, 4 }
 0x9a6   : > { %v2401_v30 = vsel %vm641_vm5, %v2395_v28, %v2396_v29  ;;  %v2403_v31 = vsel %vm641_vm5, %v2396_v29, %v2397_v27 }
 0x9a7   : > { %v2402_v32 = vsel %vm825_vm8, %v2384_v25, %v2401_v30  ;;  %v2404_v33 = vsel %vm825_vm8, %v2386_v26, %v2403_v31 }
 0x9a8   : > { %2413 = vst [vmem:[#allocation3 + $0x280] sm:$0xff] %v2402_v32 }
 0x9a9   : > { %2414 = vst [vmem:[#allocation3 + $0x288] sm:$0xff] %v2404_v33 }
 0x9ab   : > { %v2390_v35 = vpop.permute.xlu0 %2389  ;;  %v2392_v36 = vpop.permute.xlu1 %2391 }
 0x9ac   : > { %v2398_v38 = vrot.slane %v2390_v35, 4  ;;  %v2399_v39 = vrot.slane %v2392_v36, 4 }
 0x9ae   : > { %v2405_v40 = vsel %vm641_vm5, %v2398_v38, %v2399_v39  ;;  %v2407_v41 = vsel %vm641_vm5, %v2399_v39, %v2400_v37 }
 0x9af   : > { %v2406_v42 = vsel %vm825_vm8, %v2390_v35, %v2405_v40  ;;  %v2408_v43 = vsel %vm825_vm8, %v2392_v36, %v2407_v41 }
 0x9b0   : > { %2415 = vst [vmem:[#allocation3 + $0x290] sm:$0xff] %v2406_v42 }
 0x9b1   : > { %2416 = vst [vmem:[#allocation3 + $0x298] sm:$0xff] %v2408_v43 }
 0x9b3   : > { %v2435_v44 = vpop.permute.xlu0 %2434  ;;  %v2437_v45 = vpop.permute.xlu1 %2436 }
 0x9b4   : > { %v2450_v46 = vmul.f32 %v2435_v44, %v9045_v49  ;;  %v2442_v47 = vsel %vm866_vm3, %v2435_v44, %v2437_v45  ;;  %v2443_v55 = vsel %vm866_vm3, %v2437_v45, %v2439_v53  ;;  %v2455_v56 = vmul.f32 %v2435_v44, %v9063_v8 }
 0x9b5   : > { %v2451_v48 = vmul.f32 %v2442_v47, %v9047_v50  ;;  %v2456_v57 = vmul.f32 %v2442_v47, %v9065_v9  ;;  %v2452_v61 = vmul.f32 %v2443_v55, %v9049_v51  ;;  %v2457_v4 = vmul.f32 %v2443_v55, %v9067_v10 }
 0x9b7   : > { %v2460_v54 = vpack.c.bf16 %v2451_v48, %v2450_v46  ;;  %v2463_v0 = vpack.c.bf16 %v2456_v57, %v2455_v56  ;;  %v2606_v56 = vld [vmem:[#allocation8 + $0x5c] sm:$0xf] }
 0x9b9   : > { %2472 = vrot.lane.b32.xlu1 %v2460_v54, %s11496_s15 }
 0x9bb   : > { %v2441_v58 = vpop.permute.xlu0 %2440 }
 0x9bc   : > { %v2444_v59 = vsel %vm866_vm3, %v2439_v53, %v2441_v58  ;;  %v2454_v60 = vmul.f32 0.0, %v2441_v58 }
 0x9bd   : > { %v2453_v62 = vmul.f32 %v2444_v59, %v9051_v52  ;;  %v2458_v3 = vmul.f32 %v2444_v59, %v9069_v11  ;;  %v2608_v59 = vperm.slane %v2606_v56, 0 }
 0x9be   : > { %v2462_v63 = vpack.c.bf16 %v2454_v60, %v2454_v60 }
 0x9bf   : > { %v2461_v1 = vpack.c.bf16 %v2453_v62, %v2452_v61  ;;  %v2464_v6 = vpack.c.bf16 %v2458_v3, %v2457_v4  ;;  %v2610_v61 = vperm.slane %v2606_v56, 2  ;;  %v2609_v62 = vperm.slane %v2606_v56, 1 }
 0x9c0   : > { %2476 = vrot.lane.b32.xlu0 %v2462_v63, %s11496_s15 }
 0x9c1   : > { %2474 = vrot.lane.b32.xlu2 %v2461_v1, %s11496_s15  ;;  %2478 = vrot.lane.b32.xlu1 %v2463_v0, %s11496_s15 }
 0x9c8   : > { %2482 = vrot.lane.b32.xlu0 %v2462_v63, %s11496_s15  ;;  %v2611_v63 = vperm.slane %v2606_v56, 3 }
 0x9c9   : > { %2480 = vrot.lane.b32.xlu2 %v2464_v6, %s11496_s15  ;;  %2523 = vrot.lane.b32.xlu1 %v2519_v5, %s11497_s24 }
 0x9d0   : > { %2527 = vrot.lane.b32.xlu0 %v2521_v7, %s11497_s24 }
 0x9d1   : > { %2529 = vrot.lane.b32.xlu1 %v2522_v12, %s11497_s24  ;;  %2525 = vrot.lane.b32.xlu2 %v2520_v13, %s11497_s24 }
 0xa1b   : > { %v2475_v14 = vpop.permute.xlu2 %2474 }
 0xa1c   : > { %v2485_v16 = vrot.slane %v2475_v14, 4 }
 0xa23   : > { %v2481_v20 = vpop.permute.xlu2 %2480 }
 0xa24   : > { %v2488_v24 = vrot.slane %v2481_v20, 4 }
 0xa2b   : > { %v2473_v15 = vpop.permute.xlu1 %2472  ;;  %v2526_v30 = vpop.permute.xlu2 %2525 }
 0xa2c   : > { %v2484_v17 = vrot.slane %v2473_v15, 4 }
 0xa2e   : > { %v2490_v18 = vsel %vm641_vm5, %v2484_v17, %v2485_v16 }
 0xa2f   : > { %v2491_v19 = vsel %vm11498_vm4, %v2473_v15, %v2490_v18  ;;  %vm11501_vm4 = vcmask 523264  }
 0xa30   : > { %2502 = vst [vmem:[#allocation3 + $0x2a0] sm:$0xff] %v2491_v19 }
 0xa32   : > { %v2477_v21 = vpop.permute.xlu0 %2476 }
 0xa33   : > { %v2486_v22 = vrot.slane %v2477_v21, 4  ;;  %v2479_v23 = vpop.permute.xlu1 %2478 }
 0xa34   : > { %v2487_v25 = vrot.slane %v2479_v23, 4 }
 0xa35   : > { %v2492_v26 = vsel %vm641_vm5, %v2485_v16, %v2486_v22 }
 0xa36   : > { %v2493_v27 = vsel %vm11499_vm9, %v2475_v14, %v2492_v26  ;;  %v2494_v28 = vsel %vm641_vm5, %v2487_v25, %v2488_v24  ;;  %vm11503_vm9 = vmmov %vm11501_vm4 }
 0xa37   : > { %2503 = vst [vmem:[#allocation3 + $0x2a8] sm:$0xff] %v2493_v27  ;;  %v2495_v29 = vsel %vm11500_vm15, %v2479_v23, %v2494_v28  ;;  %vm11504_vm15 = vmmov %vm11501_vm4  ;;  %v2695_v28 = vld [vmem:[#allocation8 + $0x60] sm:$0xf] }
 0xa38   : > { %2504 = vst [vmem:[#allocation3 + $0x2b0] sm:$0xff] %v2495_v29  ;;  %v2699_v29 = vperm.slane %v2695_v28, 2 }
 0xa3a   : > { %v2483_v31 = vpop.permute.xlu0 %2482 }
 0xa3b   : > { %v2489_v32 = vrot.slane %v2483_v31, 4  ;;  %v2524_v33 = vpop.permute.xlu1 %2523 }
 0xa3c   : > { %v2531_v34 = vsel %vm11501_vm4, %v2524_v33, %v2526_v30  ;;  %v2539_v35 = vmul.f32 %v2524_v33, %v9045_v49  ;;  %v2544_v41 = vmul.f32 %v2524_v33, %v9063_v8 }
 0xa3d   : > { %v2496_v36 = vsel %vm641_vm5, %v2488_v24, %v2489_v32  ;;  %v2540_v37 = vmul.f32 %v2531_v34, %v9047_v50  ;;  %v2545_v42 = vmul.f32 %v2531_v34, %v9065_v9 }
 0xa3e   : > { %v2497_v38 = vsel %vm11502_vm14, %v2481_v20, %v2496_v36  ;;  %vm11505_vm14 = vmmov %vm11501_vm4 }
 0xa3f   : > { %2505 = vst [vmem:[#allocation3 + $0x2b8] sm:$0xff] %v2497_v38  ;;  %v2549_v39 = vpack.c.bf16 %v2540_v37, %v2539_v35  ;;  %v2552_v55 = vpack.c.bf16 %v2545_v42, %v2544_v41 }
 0xa41   : > { %2561 = vrot.lane.b32.xlu2 %v2549_v39, %s11497_s24 }
 0xa42   : > { %v2528_v40 = vpop.permute.xlu0 %2527 }
 0xa43   : > { %v2532_v43 = vsel %vm11503_vm9, %v2526_v30, %v2528_v40  ;;  %v2530_v44 = vpop.permute.xlu1 %2529  ;;  %vm11506_vm9 = vmmov %vm11501_vm4 }
 0xa44   : > { %v2541_v45 = vmul.f32 %v2532_v43, %v9049_v51  ;;  %v2533_v46 = vsel %vm11504_vm15, %v2528_v40, %v2530_v44  ;;  %v2543_v47 = vmul.f32 0.0, %v2530_v44  ;;  %v2546_v57 = vmul.f32 %v2532_v43, %v9067_v10  ;;  %vm11507_vm15 = vmmov %vm11501_vm4 }
 0xa45   : > { %v2542_v48 = vmul.f32 %v2533_v46, %v9051_v52  ;;  %v2547_v58 = vmul.f32 %v2533_v46, %v9069_v11 }
 0xa46   : > { %v2551_v53 = vpack.c.bf16 %v2543_v47, %v2543_v47  ;;  %v2698_v47 = vperm.slane %v2695_v28, 1 }
 0xa47   : > { %v2550_v54 = vpack.c.bf16 %v2542_v48, %v2541_v45  ;;  %v2553_v60 = vpack.c.bf16 %v2547_v58, %v2546_v57  ;;  %v2697_v48 = vperm.slane %v2695_v28, 0 }
 0xa48   : > { %2565 = vrot.lane.b32.xlu1 %v2551_v53, %s11497_s24 }
 0xa49   : > { %2567 = vrot.lane.b32.xlu2 %v2552_v55, %s11497_s24  ;;  %2563 = vrot.lane.b32.xlu0 %v2550_v54, %s11497_s24  ;;  %v7439_v54 = vld [vmem:[%s11511_s4] sm:$0xf]  ;;  %v8357_v55 = vld [vmem:[%s11511_s4 + $0xc] sm:$0xf0] }
 0xa4a   : > { %v9721_v56 = vor.u32 %v8357_v55, %v7439_v54  ;;  %v8446_v54 = vld [vmem:[#allocation3 + $0x2b4] sm:$0xf0] }
 0xa4c   : > { %3644 = vmatmul.bf16.vlgmr.msra.gmra.mxu0 %v9721_v56 }
 0xa50   : > { %2571 = vrot.lane.b32.xlu1 %v2551_v53, %s11497_s24  ;;  %v2700_v53 = vperm.slane %v2695_v28, 3 }
 0xa51   : > { %2612 = vrot.lane.b32.xlu2 %v2608_v59, %s11496_s15  ;;  %2569 = vrot.lane.b32.xlu0 %v2553_v60, %s11497_s24 }
 0xa58   : > { %2616 = vrot.lane.b32.xlu1 %v2610_v61, %s11496_s15 }
 0xa59   : > { %2614 = vrot.lane.b32.xlu0 %v2609_v62, %s11496_s15  ;;  %2618 = vrot.lane.b32.xlu2 %v2611_v63, %s11496_s15 }
 0xa9b   : > { %v2562_v0 = vpop.permute.xlu2 %2561 }
 0xa9c   : > { %v2573_v13 = vrot.slane %v2562_v0, 4 }
 0xaa3   : > { %v2568_v1 = vpop.permute.xlu2 %2567 }
 0xaa4   : > { %v2576_v22 = vrot.slane %v2568_v1, 4 }
 0xaab   : > { %v2613_v2 = vpop.permute.xlu2 %2612 }
 0xaac   : > { %v2628_v36 = vmul.f32 %v2613_v2, %v9045_v49  ;;  %v2633_v44 = vmul.f32 %v2613_v2, %v9063_v8 }
 0xab3   : > { %v2619_v3 = vpop.permute.xlu2 %2618 }
 0xab4   : > { %v2632_v4 = vmul.f32 0.0, %v2619_v3 }
 0xab6   : > { %v2640_v5 = vpack.c.bf16 %v2632_v4, %v2632_v4 }
 0xab8   : > { %2654 = vrot.lane.b32.xlu2 %v2640_v5, %s11495_s21 }
 0xaba   : > { %v2566_v6 = vpop.permute.xlu1 %2565 }
 0xabb   : > { %v2575_v7 = vrot.slane %v2566_v6, 4  ;;  %v2564_v12 = vpop.permute.xlu0 %2563 }
 0xabc   : > { %v2574_v14 = vrot.slane %v2564_v12, 4 }
 0xabe   : > { %v2579_v15 = vsel %vm641_vm5, %v2573_v13, %v2574_v14  ;;  %v2581_v16 = vsel %vm641_vm5, %v2574_v14, %v2575_v7 }
 0xabf   : > { %v2580_v17 = vsel %vm11505_vm14, %v2562_v0, %v2579_v15  ;;  %v2582_v18 = vsel %vm11501_vm4, %v2564_v12, %v2581_v16  ;;  %vm11508_vm14 = vcmask 531456  }
 0xac0   : > { %2591 = vst [vmem:[#allocation3 + $0x2c0] sm:$0xff] %v2580_v17  ;;  %2660 = vrot.lane.b32.xlu2 %v2640_v5, %s11495_s21  ;;  %vm11509_vm4 = vmmov %vm11508_vm14 }
 0xac1   : > { %2592 = vst [vmem:[#allocation3 + $0x2c8] sm:$0xff] %v2582_v18  ;;  %vm11510_vm13 = vmmov %vm11509_vm4 }
 0xac2   : > { %v2572_v19 = vpop.permute.xlu1 %2571 }
 0xac3   : > { %v2578_v20 = vrot.slane %v2572_v19, 4  ;;  %v2570_v21 = vpop.permute.xlu0 %2569 }
 0xac4   : > { %v2577_v23 = vrot.slane %v2570_v21, 4 }
 0xac6   : > { %v2583_v24 = vsel %vm641_vm5, %v2576_v22, %v2577_v23  ;;  %v2585_v25 = vsel %vm641_vm5, %v2577_v23, %v2578_v20 }
 0xac7   : > { %v2584_v26 = vsel %vm11506_vm9, %v2568_v1, %v2583_v24  ;;  %v2586_v27 = vsel %vm11507_vm15, %v2570_v21, %v2585_v25  ;;  %vm11516_vm9 = vmmov %vm11509_vm4 }
 0xac8   : > { %2593 = vst [vmem:[#allocation3 + $0x2d0] sm:$0xff] %v2584_v26  ;;  %2705 = vrot.lane.b32.xlu2 %v2699_v29, %s11457_s28  ;;  %vm11517_vm15 = vmmov %vm11509_vm4 }
 0xac9   : > { %2594 = vst [vmem:[#allocation3 + $0x2d8] sm:$0xff] %v2586_v27 }
 0xaca   : > { %v2617_v30 = vpop.permute.xlu1 %2616 }
 0xacb   : > { %v2622_v31 = vsel %vm11508_vm14, %v2617_v30, %v2619_v3  ;;  %v2615_v32 = vpop.permute.xlu0 %2614  ;;  %vm11518_vm14 = vmmov %vm11509_vm4 }
 0xacc   : > { %v2631_v33 = vmul.f32 %v2622_v31, %v9051_v52  ;;  %v2620_v34 = vsel %vm11509_vm4, %v2613_v2, %v2615_v32  ;;  %v2621_v35 = vsel %vm11510_vm13, %v2615_v32, %v2617_v30  ;;  %v2636_v41 = vmul.f32 %v2622_v31, %v9069_v11 }
 0xacd   : > { %v2629_v37 = vmul.f32 %v2620_v34, %v9047_v50  ;;  %v2630_v38 = vmul.f32 %v2621_v35, %v9049_v51  ;;  %v2634_v42 = vmul.f32 %v2620_v34, %v9065_v9  ;;  %v2635_v43 = vmul.f32 %v2621_v35, %v9067_v10 }
 0xace   : > { %vm11463_vm13 = vcmask 392192   ;;  %vm11519_vm4 = vcmask 523264  }
 0xacf   : > { %v2638_v39 = vpack.c.bf16 %v2629_v37, %v2628_v36  ;;  %v2639_v40 = vpack.c.bf16 %v2631_v33, %v2630_v38  ;;  %v2641_v45 = vpack.c.bf16 %v2634_v42, %v2633_v44  ;;  %v2642_v46 = vpack.c.bf16 %v2636_v41, %v2635_v43  ;;  %v8449_v35 = vld [vmem:[#allocation3 + $0x2cc] sm:$0xf0]  ;;  %v7809_v36 = vld [vmem:[#allocation3 + $0x2d0] sm:$0xf0]  ;;  %v7807_v43 = vld [vmem:[#allocation3 + $0x2c0] sm:$0xf] }
 0xad0   : > { %v8450_v33 = vld [vmem:[#allocation3 + $0x2d4] sm:$0xf0]  ;;  %v8447_v44 = vld [vmem:[#allocation3 + $0x2c4] sm:$0xf] }
 0xad1   : > { %2652 = vrot.lane.b32.xlu1 %v2639_v40, %s11495_s21  ;;  %2650 = vrot.lane.b32.xlu0 %v2638_v39, %s11495_s21  ;;  %v7815_v40 = vld [vmem:[#allocation3 + $0x2c8] sm:$0xf] }
 0xad9   : > { %2658 = vrot.lane.b32.xlu1 %v2642_v46, %s11495_s21  ;;  %2656 = vrot.lane.b32.xlu0 %v2641_v45, %s11495_s21  ;;  %v7816_v45 = vor.u32 %v8450_v33, %v7815_v40  ;;  %v7751_v33 = vld [vmem:[#allocation3 + $0x248] sm:$0xf] }
 0xae1   : > { %2703 = vrot.lane.b32.xlu1 %v2698_v47, %s11457_s28  ;;  %2701 = vrot.lane.b32.xlu0 %v2697_v48, %s11457_s28  ;;  %v7808_v48 = vor.u32 %v8449_v35, %v7807_v43  ;;  %v8431_v35 = vld [vmem:[#allocation3 + $0x244] sm:$0xf]  ;;  %v8429_v43 = vld [vmem:[#allocation3 + $0x22c] sm:$0xf0] }
 0xae9   : > { %2707 = vrot.lane.b32.xlu0 %v2700_v53, %s11457_s28  ;;  %v7812_v53 = vor.u32 %v8447_v44, %v7809_v36  ;;  %v7729_v44 = vld [vmem:[#allocation3 + $0x230] sm:$0xf0]  ;;  %s11515_s28 = smov 71  }
 0xb12   : > { %v2655_v57 = vpop.permute.xlu2 %2654 }
 0xb13   : > { %v2664_v60 = vrot.slane %v2655_v57, 4  ;;  %v8445_v57 = vld [vmem:[#allocation3 + $0x2ac] sm:$0xf0] }
 0xb1a   : > { %v2661_v3 = vpop.permute.xlu2 %2660 }
 0xb1b   : > { %v2667_v6 = vrot.slane %v2661_v3, 4  ;;  %v8442_v3 = vld [vmem:[#allocation3 + $0x294] sm:$0xf0] }
 0xb22   : > { %v2706_v22 = vpop.permute.xlu2 %2705 }
 0xb43   : > { %v2653_v58 = vpop.permute.xlu1 %2652  ;;  %v2651_v59 = vpop.permute.xlu0 %2650 }
 0xb44   : > { %v2663_v61 = vrot.slane %v2653_v58, 4  ;;  %v2662_v62 = vrot.slane %v2651_v59, 4 }
 0xb46   : > { %v2670_v63 = vsel %vm641_vm5, %v2663_v61, %v2664_v60  ;;  %v2668_v0 = vsel %vm641_vm5, %v2662_v62, %v2663_v61  ;;  %v7799_v61 = vld [vmem:[#allocation3 + $0x2a8] sm:$0xf]  ;;  %v7791_v62 = vld [vmem:[#allocation3 + $0x2a0] sm:$0xf] }
 0xb47   : > { %v2671_v1 = vsel %vm866_vm3, %v2653_v58, %v2670_v63  ;;  %v2669_v2 = vsel %vm866_vm3, %v2651_v59, %v2668_v0  ;;  %v7793_v58 = vld [vmem:[#allocation3 + $0x2b0] sm:$0xf0]  ;;  %v8443_v63 = vld [vmem:[#allocation3 + $0x2a4] sm:$0xf]  ;;  %v7800_v0 = vor.u32 %v8446_v54, %v7799_v61 }
 0xb48   : > { %2681 = vst [vmem:[#allocation3 + $0x2e8] sm:$0xff] %v2671_v1  ;;  %v7792_v1 = vor.u32 %v8445_v57, %v7791_v62  ;;  %v8425_v57 = vld [vmem:[#allocation3 + $0x20c] sm:$0xf0]  ;;  %v8423_v61 = vld [vmem:[#allocation3 + $0x204] sm:$0xf] }
 0xb49   : > { %2680 = vst [vmem:[#allocation3 + $0x2e0] sm:$0xff] %v2669_v2  ;;  %v7796_v2 = vor.u32 %v8443_v63, %v7793_v58  ;;  %v7713_v58 = vld [vmem:[#allocation3 + $0x210] sm:$0xf0] }
 0xb4b   : > { %v2659_v4 = vpop.permute.xlu1 %2658  ;;  %v2657_v5 = vpop.permute.xlu0 %2656 }
 0xb4c   : > { %v2666_v7 = vrot.slane %v2659_v4, 4  ;;  %v2665_v12 = vrot.slane %v2657_v5, 4 }
 0xb4e   : > { %v2674_v13 = vsel %vm641_vm5, %v2666_v7, %v2667_v6  ;;  %v2672_v14 = vsel %vm641_vm5, %v2665_v12, %v2666_v7  ;;  %v2784_v6 = vld [vmem:[#allocation8 + $0x64] sm:$0xf]  ;;  %v7783_v12 = vld [vmem:[#allocation3 + $0x288] sm:$0xf] }
 0xb4f   : > { %v2675_v15 = vsel %vm866_vm3, %v2659_v4, %v2674_v13  ;;  %v2673_v16 = vsel %vm866_vm3, %v2657_v5, %v2672_v14  ;;  %v7831_v25 = vld [vmem:[#allocation3 + $0x2e8] sm:$0xf]  ;;  %v8441_v4 = vld [vmem:[#allocation3 + $0x28c] sm:$0xf0]  ;;  %v7777_v5 = vld [vmem:[#allocation3 + $0x290] sm:$0xf0] }
 0xb50   : > { %2683 = vst [vmem:[#allocation3 + $0x2f8] sm:$0xff] %v2675_v15  ;;  %v7823_v24 = vld [vmem:[#allocation3 + $0x2e0] sm:$0xf]  ;;  %v8451_v28 = vld [vmem:[#allocation3 + $0x2e4] sm:$0xf]  ;;  %v7784_v15 = vor.u32 %v8442_v3, %v7783_v12  ;;  %v2789_v40 = vperm.slane %v2784_v6, 3 }
 0xb51   : > { %2682 = vst [vmem:[#allocation3 + $0x2f0] sm:$0xff] %v2673_v16  ;;  %v7775_v13 = vld [vmem:[#allocation3 + $0x280] sm:$0xf]  ;;  %v8439_v14 = vld [vmem:[#allocation3 + $0x284] sm:$0xf] }
 0xb53   : > { %v2704_v17 = vpop.permute.xlu1 %2703  ;;  %v2702_v18 = vpop.permute.xlu0 %2701 }
 0xb54   : > { %v2709_v19 = vsel %vm825_vm8, %v2702_v18, %v2704_v17  ;;  %v2717_v20 = vmul.f32 %v2702_v18, %v9045_v49  ;;  %v2710_v34 = vsel %vm825_vm8, %v2704_v17, %v2706_v22  ;;  %v2722_v37 = vmul.f32 %v2702_v18, %v9063_v8 }
 0xb55   : > { %v2718_v21 = vmul.f32 %v2709_v19, %v9047_v50  ;;  %v2723_v38 = vmul.f32 %v2709_v19, %v9065_v9  ;;  %v2719_v46 = vmul.f32 %v2710_v34, %v9049_v51  ;;  %v2724_v16 = vmul.f32 %v2710_v34, %v9067_v10  ;;  %v7743_v34 = vld [vmem:[#allocation3 + $0x240] sm:$0xf] }
 0xb56   : > { %v7776_v17 = vor.u32 %v8441_v4, %v7775_v13  ;;  %v7780_v18 = vor.u32 %v8439_v14, %v7777_v5  ;;  %v2786_v19 = vperm.slane %v2784_v6, 0 }
 0xb57   : > { %v2727_v23 = vpack.c.bf16 %v2718_v21, %v2717_v20  ;;  %v8454_v26 = vld [vmem:[#allocation3 + $0x2f4] sm:$0xf0]  ;;  %v2730_v60 = vpack.c.bf16 %v2723_v38, %v2722_v37  ;;  %v8437_v21 = vld [vmem:[#allocation3 + $0x26c] sm:$0xf0]  ;;  %v2788_v37 = vperm.slane %v2784_v6, 2 }
 0xb58   : > { %v8453_v27 = vld [vmem:[#allocation3 + $0x2ec] sm:$0xf0]  ;;  %v7825_v29 = vld [vmem:[#allocation3 + $0x2f0] sm:$0xf0]  ;;  %v7832_v30 = vor.u32 %v8454_v26, %v7831_v25  ;;  %v8438_v20 = vld [vmem:[#allocation3 + $0x274] sm:$0xf0] }
 0xb59   : > { %2739 = vrot.lane.b32.xlu1 %v2727_v23, %s11459_s18  ;;  %v7824_v31 = vor.u32 %v8453_v27, %v7823_v24  ;;  %v7828_v32 = vor.u32 %v8451_v28, %v7825_v29  ;;  %v7767_v24 = vld [vmem:[#allocation3 + $0x268] sm:$0xf]  ;;  %v7759_v25 = vld [vmem:[#allocation3 + $0x260] sm:$0xf]  ;;  %v8435_v26 = vld [vmem:[#allocation3 + $0x264] sm:$0xf] }
 0xb5a   : > { %3776 = vmatpush.bf16.msra.mxu0 %v7832_v30  ;;  %v7768_v27 = vor.u32 %v8438_v20, %v7767_v24  ;;  %v7760_v28 = vor.u32 %v8437_v21, %v7759_v25  ;;  %v8434_v30 = vld [vmem:[#allocation3 + $0x254] sm:$0xf0] }
 0xb5b   : > { %3664 = vmatpush.bf16.msra.mxu2 %v7824_v31  ;;  %3720 = vmatpush.bf16.msrb.mxu1 %v7828_v32  ;;  %v2708_v39 = vpop.permute.xlu0 %2707  ;;  %v8433_v31 = vld [vmem:[#allocation3 + $0x24c] sm:$0xf0]  ;;  %v7745_v32 = vld [vmem:[#allocation3 + $0x250] sm:$0xf0]  ;;  %v7752_v36 = vor.u32 %v8434_v30, %v7751_v33 }
 0xb5c   : > { %v2711_v41 = vsel %vm825_vm8, %v2706_v22, %v2708_v39  ;;  %v2721_v42 = vmul.f32 0.0, %v2708_v39  ;;  %v7761_v22 = vld [vmem:[#allocation3 + $0x270] sm:$0xf0]  ;;  %v7744_v38 = vor.u32 %v8433_v31, %v7743_v34  ;;  %v7748_v39 = vor.u32 %v8431_v35, %v7745_v32 }
 0xb5d   : > { %v2720_v47 = vmul.f32 %v2711_v41, %v9051_v52  ;;  %v2725_v7 = vmul.f32 %v2711_v41, %v9069_v11  ;;  %v7764_v29 = vor.u32 %v8435_v26, %v7761_v22  ;;  %v8430_v41 = vld [vmem:[#allocation3 + $0x234] sm:$0xf0] }
 0xb5e   : > { %v2729_v55 = vpack.c.bf16 %v2721_v42, %v2721_v42  ;;  %3777 = vmatpush.bf16.msra.mxu0 %v7816_v45  ;;  %v2787_v42 = vperm.slane %v2784_v6, 1  ;;  %v7735_v45 = vld [vmem:[#allocation3 + $0x228] sm:$0xf] }
 0xb5f   : > { %v2728_v59 = vpack.c.bf16 %v2720_v47, %v2719_v46  ;;  %3665 = vmatpush.bf16.msra.mxu2 %v7808_v48  ;;  %3721 = vmatpush.bf16.msrb.mxu1 %v7812_v53  ;;  %v2731_v23 = vpack.c.bf16 %v2725_v7, %v2724_v16  ;;  %v7727_v46 = vld [vmem:[#allocation3 + $0x220] sm:$0xf]  ;;  %v8427_v47 = vld [vmem:[#allocation3 + $0x224] sm:$0xf]  ;;  %v7736_v48 = vor.u32 %v8430_v41, %v7735_v45 }
 0xb60   : > { %2743 = vrot.lane.b32.xlu0 %v2729_v55, %s11459_s18  ;;  %v7728_v53 = vor.u32 %v8429_v43, %v7727_v46  ;;  %v7732_v54 = vor.u32 %v8427_v47, %v7729_v44  ;;  %v2873_v43 = vld [vmem:[#allocation8 + $0x68] sm:$0xf] }
 0xb61   : > { %2745 = vrot.lane.b32.xlu1 %v2730_v60, %s11459_s18  ;;  %2741 = vrot.lane.b32.xlu2 %v2728_v59, %s11459_s18  ;;  %v7719_v59 = vld [vmem:[#allocation3 + $0x208] sm:$0xf]  ;;  %v7711_v60 = vld [vmem:[#allocation3 + $0x200] sm:$0xf]  ;;  %v2875_v46 = vperm.slane %v2873_v43, 0 }
 0xb62   : > { %3778 = vmatpush.bf16.msra.mxu0 %v7800_v0  ;;  %v7712_v63 = vor.u32 %v8425_v57, %v7711_v60  ;;  %v7716_v0 = vor.u32 %v8423_v61, %v7713_v58  ;;  %v8358_v60 = vld [vmem:[%s11511_s4 + $0x14] sm:$0xf0] }
 0xb63   : > { %3666 = vmatpush.bf16.msra.mxu2 %v7792_v1  ;;  %3722 = vmatpush.bf16.msrb.mxu1 %v7796_v2 }
 0xb66   : > { %3779 = vmatpush.bf16.msra.mxu0 %v7784_v15 }
 0xb67   : > { %3667 = vmatpush.bf16.msra.mxu2 %v7776_v17  ;;  %3723 = vmatpush.bf16.msrb.mxu1 %v7780_v18 }
 0xb68   : > { %2749 = vrot.lane.b32.xlu0 %v2729_v55, %s11459_s18  ;;  %v8426_v55 = vld [vmem:[#allocation3 + $0x214] sm:$0xf0] }
 0xb69   : > { %2790 = vrot.lane.b32.xlu1 %v2786_v19, %s11461_s14  ;;  %2747 = vrot.lane.b32.xlu2 %v2731_v23, %s11459_s18  ;;  %v7720_v62 = vor.u32 %v8426_v55, %v7719_v59  ;;  %v7447_v59 = vld [vmem:[%s11511_s4 + $0x8] sm:$0xf]  ;;  %s11513_s18 = smov 72  }
 0xb6a   : > { %3780 = vmatpush.bf16.msra.mxu0 %v7768_v27  ;;  %v9788_v61 = vor.u32 %v8358_v60, %v7447_v59 }
 0xb6b   : > { %3668 = vmatpush.bf16.msra.mxu2 %v7760_v28  ;;  %3724 = vmatpush.bf16.msrb.mxu1 %v7764_v29 }
 0xb6e   : > { %3781 = vmatpush.bf16.msra.mxu0 %v7752_v36 }
 0xb6f   : > { %3669 = vmatpush.bf16.msra.mxu2 %v7744_v38  ;;  %3725 = vmatpush.bf16.msrb.mxu1 %v7748_v39 }
 0xb70   : > { %2794 = vrot.lane.b32.xlu0 %v2788_v37, %s11461_s14 }
 0xb71   : > { %2796 = vrot.lane.b32.xlu1 %v2789_v40, %s11461_s14  ;;  %2792 = vrot.lane.b32.xlu2 %v2787_v42, %s11461_s14  ;;  %s11514_s14 = smov 57  }
 0xb72   : > { %3782 = vmatpush.bf16.msra.mxu0 %v7736_v48  ;;  %v2877_v48 = vperm.slane %v2873_v43, 2 }
 0xb73   : > { %3670 = vmatpush.bf16.msra.mxu2 %v7728_v53  ;;  %3726 = vmatpush.bf16.msrb.mxu1 %v7732_v54  ;;  %v2876_v53 = vperm.slane %v2873_v43, 1  ;;  %v2878_v54 = vperm.slane %v2873_v43, 3 }
 0xb76   : > { %3783 = vmatpush.bf16.msra.mxu0 %v7720_v62  ;;  %v8355_v62 = vld [vmem:[%s11511_s4 + $0x4] sm:$0xf] }
 0xb77   : > { %3671 = vmatpush.bf16.msra.mxu2 %v7712_v63  ;;  %3727 = vmatpush.bf16.msrb.mxu1 %v7716_v0  ;;  %v7441_v63 = vld [vmem:[%s11511_s4 + $0x10] sm:$0xf0] }
 0xb78   : > { %v9797_v0 = vor.u32 %v8355_v62, %v7441_v63 }
 0xb7a   : > { %3672 = vmatmul.bf16.vlgmr.msra.gmra.mxu2 %v9788_v61  ;;  %3658 = vmatmul.bf16.vlgmr.msra.gmra.mxu1 %v9797_v0 }
 0xb7b   : > { %3714 = vmatmul.bf16.vlgmr.msrb.gmra.mxu0 %v9797_v0 }
 0xb8a   : > { %3728 = vmatmul.bf16.vlgmr.msrb.gmra.mxu1 %v9788_v61 }
 0xb8b   : > { %3784 = vmatmul.bf16.vlgmr.msra.gmra.mxu0 %v9788_v61 }
 0xbbb   : > { %v2742_v1 = vpop.permute.xlu2 %2741 }
 0xbbc   : > { %v2752_v3 = vrot.slane %v2742_v1, 4 }
 0xbc3   : > { %v2748_v7 = vpop.permute.xlu2 %2747 }
 0xbc4   : > { %v2755_v15 = vrot.slane %v2748_v7, 4 }
 0xbcb   : > { %v2740_v2 = vpop.permute.xlu1 %2739  ;;  %v2793_v21 = vpop.permute.xlu2 %2792 }
 0xbcc   : > { %v2751_v4 = vrot.slane %v2740_v2, 4 }
 0xbce   : > { %v2757_v5 = vsel %vm641_vm5, %v2751_v4, %v2752_v3 }
 0xbcf   : > { %v2758_v6 = vsel %vm775_vm2, %v2740_v2, %v2757_v5 }
 0xbd0   : > { %2769 = vst [vmem:[#allocation3 + $0x300] sm:$0xff] %v2758_v6 }
 0xbd2   : > { %v2744_v12 = vpop.permute.xlu0 %2743 }
 0xbd3   : > { %v2753_v13 = vrot.slane %v2744_v12, 4  ;;  %v2746_v14 = vpop.permute.xlu1 %2745 }
 0xbd4   : > { %v2754_v16 = vrot.slane %v2746_v14, 4 }
 0xbd5   : > { %v2759_v17 = vsel %vm641_vm5, %v2752_v3, %v2753_v13 }
 0xbd6   : > { %v2760_v18 = vsel %vm775_vm2, %v2742_v1, %v2759_v17  ;;  %v2761_v19 = vsel %vm641_vm5, %v2754_v16, %v2755_v15 }
 0xbd7   : > { %2770 = vst [vmem:[#allocation3 + $0x308] sm:$0xff] %v2760_v18  ;;  %v2762_v20 = vsel %vm775_vm2, %v2746_v14, %v2761_v19 }
 0xbd8   : > { %2771 = vst [vmem:[#allocation3 + $0x310] sm:$0xff] %v2762_v20 }
 0xbda   : > { %v2750_v22 = vpop.permute.xlu0 %2749 }
 0xbdb   : > { %v2756_v23 = vrot.slane %v2750_v22, 4  ;;  %v2791_v24 = vpop.permute.xlu1 %2790 }
 0xbdc   : > { %v2806_v25 = vmul.f32 %v2791_v24, %v9045_v49  ;;  %v2798_v26 = vsel %vm734_vm7, %v2791_v24, %v2793_v21  ;;  %v2811_v32 = vmul.f32 %v2791_v24, %v9063_v8 }
 0xbdd   : > { %v2763_v27 = vsel %vm641_vm5, %v2755_v15, %v2756_v23  ;;  %v2807_v28 = vmul.f32 %v2798_v26, %v9047_v50  ;;  %v2812_v33 = vmul.f32 %v2798_v26, %v9065_v9 }
 0xbde   : > { %v2764_v29 = vsel %vm775_vm2, %v2748_v7, %v2763_v27 }
 0xbdf   : > { %2772 = vst [vmem:[#allocation3 + $0x318] sm:$0xff] %v2764_v29  ;;  %v2816_v30 = vpack.c.bf16 %v2807_v28, %v2806_v25  ;;  %v2819_v41 = vpack.c.bf16 %v2812_v33, %v2811_v32 }
 0xbe1   : > { %2828 = vrot.lane.b32.xlu2 %v2816_v30, %s11468_s20 }
 0xbe2   : > { %v2795_v31 = vpop.permute.xlu0 %2794 }
 0xbe3   : > { %v2799_v34 = vsel %vm734_vm7, %v2793_v21, %v2795_v31  ;;  %v2797_v35 = vpop.permute.xlu1 %2796 }
 0xbe4   : > { %v2808_v36 = vmul.f32 %v2799_v34, %v9049_v51  ;;  %v2800_v37 = vsel %vm734_vm7, %v2795_v31, %v2797_v35  ;;  %v2810_v38 = vmul.f32 0.0, %v2797_v35  ;;  %v2813_v44 = vmul.f32 %v2799_v34, %v9067_v10 }
 0xbe5   : > { %v2809_v39 = vmul.f32 %v2800_v37, %v9051_v52  ;;  %v2814_v45 = vmul.f32 %v2800_v37, %v9069_v11 }
 0xbe6   : > { %v2818_v40 = vpack.c.bf16 %v2810_v38, %v2810_v38 }
 0xbe7   : > { %v2817_v42 = vpack.c.bf16 %v2809_v39, %v2808_v36  ;;  %v2820_v47 = vpack.c.bf16 %v2814_v45, %v2813_v44 }
 0xbe8   : > { %2832 = vrot.lane.b32.xlu1 %v2818_v40, %s11468_s20 }
 0xbe9   : > { %2830 = vrot.lane.b32.xlu0 %v2817_v42, %s11468_s20  ;;  %2834 = vrot.lane.b32.xlu2 %v2819_v41, %s11468_s20 }
 0xbf0   : > { %2838 = vrot.lane.b32.xlu1 %v2818_v40, %s11468_s20 }
 0xbf1   : > { %2836 = vrot.lane.b32.xlu0 %v2820_v47, %s11468_s20  ;;  %2879 = vrot.lane.b32.xlu2 %v2875_v46, %s11466_s25 }
 0xbf8   : > { %2883 = vrot.lane.b32.xlu1 %v2877_v48, %s11466_s25 }
 0xbf9   : > { %2881 = vrot.lane.b32.xlu0 %v2876_v53, %s11466_s25  ;;  %2885 = vrot.lane.b32.xlu2 %v2878_v54, %s11466_s25 }
 0xc3b   : > { %v2829_v55 = vpop.permute.xlu2 %2828 }
 0xc3c   : > { %v2840_v7 = vrot.slane %v2829_v55, 4 }
 0xc43   : > { %v2835_v57 = vpop.permute.xlu2 %2834 }
 0xc44   : > { %v2843_v20 = vrot.slane %v2835_v57, 4 }
 0xc4b   : > { %v2880_v58 = vpop.permute.xlu2 %2879 }
 0xc4c   : > { %v2895_v32 = vmul.f32 %v2880_v58, %v9045_v49  ;;  %v2900_v39 = vmul.f32 %v2880_v58, %v9063_v8  ;;  %v3877_v8 = vld [vmem:[%s11412_s6 + $0x8] sm:$0xff] }
 0xc53   : > { %v2886_v1 = vpop.permute.xlu2 %2885 }
 0xc54   : > { %v2899_v2 = vmul.f32 0.0, %v2886_v1 }
 0xc56   : > { %v2907_v3 = vpack.c.bf16 %v2899_v2, %v2899_v2 }
 0xc58   : > { %2921 = vrot.lane.b32.xlu2 %v2907_v3, %s11464_s19 }
 0xc5a   : > { %v2833_v4 = vpop.permute.xlu1 %2832 }
 0xc5b   : > { %v2842_v5 = vrot.slane %v2833_v4, 4  ;;  %v2831_v6 = vpop.permute.xlu0 %2830 }
 0xc5c   : > { %v2841_v12 = vrot.slane %v2831_v6, 4 }
 0xc5e   : > { %v2846_v13 = vsel %vm641_vm5, %v2840_v7, %v2841_v12  ;;  %v2848_v14 = vsel %vm641_vm5, %v2841_v12, %v2842_v5 }
 0xc5f   : > { %v2847_v15 = vsel %vm684_vm1, %v2829_v55, %v2846_v13  ;;  %v2849_v16 = vsel %vm684_vm1, %v2831_v6, %v2848_v14 }
 0xc60   : > { %2858 = vst [vmem:[#allocation3 + $0x320] sm:$0xff] %v2847_v15  ;;  %2927 = vrot.lane.b32.xlu2 %v2907_v3, %s11464_s19 }
 0xc61   : > { %2859 = vst [vmem:[#allocation3 + $0x328] sm:$0xff] %v2849_v16 }
 0xc62   : > { %v2839_v17 = vpop.permute.xlu1 %2838 }
 0xc63   : > { %v2845_v18 = vrot.slane %v2839_v17, 4  ;;  %v2837_v19 = vpop.permute.xlu0 %2836 }
 0xc64   : > { %v2844_v21 = vrot.slane %v2837_v19, 4 }
 0xc66   : > { %v2850_v22 = vsel %vm641_vm5, %v2843_v20, %v2844_v21  ;;  %v2852_v23 = vsel %vm641_vm5, %v2844_v21, %v2845_v18 }
 0xc67   : > { %v2851_v24 = vsel %vm684_vm1, %v2835_v57, %v2850_v22  ;;  %v2853_v25 = vsel %vm684_vm1, %v2837_v19, %v2852_v23  ;;  %v7855_v22 = vld [vmem:[#allocation3 + $0x320] sm:$0xf]  ;;  %v8459_v23 = vld [vmem:[#allocation3 + $0x324] sm:$0xf] }
 0xc68   : > { %2860 = vst [vmem:[#allocation3 + $0x330] sm:$0xff] %v2851_v24  ;;  %v8457_v24 = vld [vmem:[#allocation3 + $0x30c] sm:$0xf0] }
 0xc69   : > { %2861 = vst [vmem:[#allocation3 + $0x338] sm:$0xff] %v2853_v25 }
 0xc6a   : > { %v2884_v26 = vpop.permute.xlu1 %2883 }
 0xc6b   : > { %v2889_v27 = vsel %vm643_vm6, %v2884_v26, %v2886_v1  ;;  %v2882_v28 = vpop.permute.xlu0 %2881 }
 0xc6c   : > { %v2898_v29 = vmul.f32 %v2889_v27, %v9051_v52  ;;  %v2887_v30 = vsel %vm643_vm6, %v2880_v58, %v2882_v28  ;;  %v2888_v31 = vsel %vm643_vm6, %v2882_v28, %v2884_v26  ;;  %v2903_v37 = vmul.f32 %v2889_v27, %v9069_v11  ;;  %v7863_v27 = vld [vmem:[#allocation3 + $0x328] sm:$0xf]  ;;  %v8460_v28 = vld [vmem:[#allocation3 + $0x32c] sm:$0xf] }
 0xc6d   : > { %v2896_v33 = vmul.f32 %v2887_v30, %v9047_v50  ;;  %v2897_v34 = vmul.f32 %v2888_v31, %v9049_v51  ;;  %v2901_v52 = vmul.f32 %v2887_v30, %v9065_v9  ;;  %v2902_v38 = vmul.f32 %v2888_v31, %v9067_v10  ;;  %v558_v50 = vld [vmem:[%s11512_s5] sm:$0xff]  ;;  %v559_v51 = vld [vmem:[%s11512_s5 + $0x8] sm:$0xff] }
 0xc6e   : > { %v3896_v9 = vld [vmem:[%s11413_s7] sm:$0xff] }
 0xc6f   : > { %v2905_v35 = vpack.c.bf16 %v2896_v33, %v2895_v32  ;;  %v2906_v36 = vpack.c.bf16 %v2898_v29, %v2897_v34  ;;  %v2908_v40 = vpack.c.bf16 %v2901_v52, %v2900_v39  ;;  %v2909_v49 = vpack.c.bf16 %v2903_v37, %v2902_v38  ;;  %v8461_v18 = vld [vmem:[#allocation3 + $0x32c] sm:$0xf0]  ;;  %v7857_v19 = vld [vmem:[#allocation3 + $0x330] sm:$0xf0]  ;;  %v8458_v32 = vld [vmem:[#allocation3 + $0x314] sm:$0xf0] }
 0xc70   : > { %v8462_v20 = vld [vmem:[#allocation3 + $0x334] sm:$0xf0]  ;;  %v7865_v21 = vld [vmem:[#allocation3 + $0x338] sm:$0xf0]  ;;  %v7856_v25 = vor.u32 %v8461_v18, %v7855_v22  ;;  %v7860_v26 = vor.u32 %v8459_v23, %v7857_v19  ;;  %v7841_v29 = vld [vmem:[#allocation3 + $0x310] sm:$0xf0] }
 0xc71   : > { %2917 = vrot.lane.b32.xlu0 %v2905_v35, %s11464_s19  ;;  %2919 = vrot.lane.b32.xlu1 %v2906_v36, %s11464_s19  ;;  %v7864_v30 = vor.u32 %v8462_v20, %v7863_v27  ;;  %v7868_v31 = vor.u32 %v8460_v28, %v7865_v21  ;;  %v7849_v33 = vld [vmem:[#allocation3 + $0x318] sm:$0xf0]  ;;  %v7569_v34 = vld [vmem:[#allocation3 + $0xf0] sm:$0xf0]  ;;  %v9848_v35 = vld [vmem:[#allocation8] sm:$0xf] }
 0xc72   : > { %v8356_v36 = vld [vmem:[%s11511_s4 + $0xc] sm:$0xf]  ;;  %v7449_v37 = vld [vmem:[%s11511_s4 + $0x18] sm:$0xf0]  ;;  %v3946_v52 = vperm.slane %v9848_v35, 0  ;;  %v3947_v38 = vperm.slane %v9848_v35, 1 }
 0xc73   : > { %v7839_v39 = vld [vmem:[#allocation3 + $0x300] sm:$0xf]  ;;  %v7655_v18 = vld [vmem:[#allocation3 + $0x188] sm:$0xf]  ;;  %v8408_v21 = vld [vmem:[#allocation3 + $0x18c] sm:$0xf] }
 0xc74   : > { %v3876_v22 = vld [vmem:[%s11412_s6] sm:$0xff]  ;;  %v7639_v28 = vld [vmem:[#allocation3 + $0x168] sm:$0xf] }
 0xc75   : > { %3880 = vperm.xlu2 %8664, %v3876_v22   ;;  %v8371_v27 = vld [vmem:[#allocation3 + $0x64] sm:$0xf] }
 0xc79   : > { %2923 = vrot.lane.b32.xlu0 %v2908_v40, %s11464_s19  ;;  %2925 = vrot.lane.b32.xlu1 %v2909_v49, %s11464_s19  ;;  %v8455_v40 = vld [vmem:[#allocation3 + $0x304] sm:$0xf]  ;;  %v8422_v49 = vld [vmem:[#allocation3 + $0x1f4] sm:$0xf0] }
 0xc81   : > { %3065 = vperm.xlu0 %8662, %v558_v50   ;;  %3070 = vperm.xlu1 %8663, %v559_v51   ;;  %v7840_v50 = vor.u32 %v8457_v24, %v7839_v39  ;;  %v7844_v51 = vor.u32 %v8455_v40, %v7841_v29  ;;  %v7505_v24 = vld [vmem:[#allocation3 + $0x70] sm:$0xf0]  ;;  %v8400_v40 = vld [vmem:[#allocation3 + $0x14c] sm:$0xf] }
 0xc82   : > { %v7508_v29 = vor.u32 %v8371_v27, %v7505_v24 }
 0xc89   : > { %3885 = vperm.xlu0 %8662, %v3877_v8   ;;  %3900 = vperm.xlu1 %8663, %v3896_v9   ;;  %v7847_v8 = vld [vmem:[#allocation3 + $0x308] sm:$0xf]  ;;  %v8456_v9 = vld [vmem:[#allocation3 + $0x30c] sm:$0xf] }
 0xc91   : > { %3950 = vrot.lane.b32.xlu0 %v3946_v52, %s11464_s19  ;;  %3952 = vrot.lane.b32.xlu1 %v3947_v38, %s11464_s19  ;;  %v7623_v52 = vld [vmem:[#allocation3 + $0x148] sm:$0xf] }
 0xcb2   : > { %v2922_v10 = vpop.permute.xlu2 %2921 }
 0xcb3   : > { %v2931_v42 = vrot.slane %v2922_v10, 4  ;;  %v7705_v10 = vld [vmem:[#allocation3 + $0x1f8] sm:$0xf0] }
 0xcba   : > { %v2928_v53 = vpop.permute.xlu2 %2927 }
 0xcbb   : > { %v2934_v57 = vrot.slane %v2928_v53, 4  ;;  %v7553_v53 = vld [vmem:[#allocation3 + $0xd0] sm:$0xf0] }
 0xce3   : > { %v2918_v11 = vpop.permute.xlu0 %2917  ;;  %v2920_v41 = vpop.permute.xlu1 %2919 }
 0xce4   : > { %v2929_v43 = vrot.slane %v2918_v11, 4  ;;  %v2930_v44 = vrot.slane %v2920_v41, 4 }
 0xce6   : > { %v2935_v45 = vsel %vm641_vm5, %v2929_v43, %v2930_v44  ;;  %v2937_v46 = vsel %vm641_vm5, %v2930_v44, %v2931_v42  ;;  %v8387_v42 = vld [vmem:[#allocation3 + $0xe4] sm:$0xf]  ;;  %v7703_v43 = vld [vmem:[#allocation3 + $0x1e8] sm:$0xf]  ;;  %v7452_v44 = vor.u32 %v8356_v36, %v7449_v37  ;;  %v7625_v36 = vld [vmem:[#allocation3 + $0x158] sm:$0xf0] }
 0xce7   : > { %v2936_v47 = vsel %vm592_vm0, %v2918_v11, %v2935_v45  ;;  %v2938_v48 = vsel %vm592_vm0, %v2920_v41, %v2937_v46  ;;  %v7848_v11 = vor.u32 %v8458_v32, %v7847_v8  ;;  %v7852_v41 = vor.u32 %v8456_v9, %v7849_v33  ;;  %v7489_v33 = vld [vmem:[#allocation3 + $0x50] sm:$0xf0]  ;;  %v8367_v37 = vld [vmem:[#allocation3 + $0x44] sm:$0xf]  ;;  %v7609_v8 = vld [vmem:[#allocation3 + $0x138] sm:$0xf0] }
 0xce8   : > { %2947 = vst [vmem:[#allocation3 + $0x340] sm:$0xff] %v2936_v47  ;;  %v7572_v45 = vor.u32 %v8387_v42, %v7569_v34  ;;  %v7704_v46 = vor.u32 %v8422_v49, %v7703_v43  ;;  %v8420_v47 = vld [vmem:[#allocation3 + $0x1ec] sm:$0xf]  ;;  %v8402_v34 = vld [vmem:[#allocation3 + $0x154] sm:$0xf0]  ;;  %v7492_v38 = vor.u32 %v8367_v37, %v7489_v33  ;;  %v7628_v49 = vor.u32 %v8400_v40, %v7625_v36 }
 0xce9   : > { %2948 = vst [vmem:[#allocation3 + $0x348] sm:$0xff] %v2938_v48  ;;  %v7708_v48 = vor.u32 %v8420_v47, %v7705_v10  ;;  %v7624_v39 = vor.u32 %v8402_v34, %v7623_v52  ;;  %v8363_v9 = vld [vmem:[#allocation3 + $0x24] sm:$0xf]  ;;  %v7607_v10 = vld [vmem:[#allocation3 + $0x128] sm:$0xf] }
 0xcea   : > { %v8396_v42 = vld [vmem:[#allocation3 + $0x12c] sm:$0xf]  ;;  %v7593_v47 = vld [vmem:[#allocation3 + $0x118] sm:$0xf0]  ;;  %v8366_v37 = vld [vmem:[#allocation3 + $0x34] sm:$0xf0] }
 0xceb   : > { %v2924_v54 = vpop.permute.xlu0 %2923  ;;  %v2926_v55 = vpop.permute.xlu1 %2925  ;;  %v3897_v43 = vld [vmem:[%s11413_s7 + $0x8] sm:$0xff]  ;;  %v7737_v52 = vld [vmem:[#allocation3 + $0x238] sm:$0xf0] }
 0xcec   : > { %v2932_v58 = vrot.slane %v2924_v54, 4  ;;  %v2933_v59 = vrot.slane %v2926_v55, 4  ;;  %3905 = vperm.xlu2 %8664, %v3897_v43   ;;  %v8432_v34 = vld [vmem:[#allocation3 + $0x24c] sm:$0xf] }
 0xcee   : > { %v2939_v60 = vsel %vm641_vm5, %v2932_v58, %v2933_v59  ;;  %v2941_v62 = vsel %vm641_vm5, %v2933_v59, %v2934_v57  ;;  %v8383_v57 = vld [vmem:[#allocation3 + $0xc4] sm:$0xf]  ;;  %v7687_v58 = vld [vmem:[#allocation3 + $0x1c8] sm:$0xf] }
 0xcef   : > { %v2940_v63 = vsel %vm592_vm0, %v2924_v54, %v2939_v60  ;;  %v2942_v1 = vsel %vm592_vm0, %v2926_v55, %v2941_v62  ;;  %v7871_v2 = vld [vmem:[#allocation3 + $0x340] sm:$0xf]  ;;  %v8463_v3 = vld [vmem:[#allocation3 + $0x344] sm:$0xf]  ;;  %v8418_v54 = vld [vmem:[#allocation3 + $0x1d4] sm:$0xf0]  ;;  %v7556_v59 = vor.u32 %v8383_v57, %v7553_v53 }
 0xcf0   : > { %2949 = vst [vmem:[#allocation3 + $0x350] sm:$0xff] %v2940_v63  ;;  %v7879_v6 = vld [vmem:[#allocation3 + $0x348] sm:$0xf]  ;;  %v8464_v14 = vld [vmem:[#allocation3 + $0x34c] sm:$0xf]  ;;  %v7688_v60 = vor.u32 %v8418_v54, %v7687_v58 }
 0xcf1   : > { %2950 = vst [vmem:[#allocation3 + $0x358] sm:$0xff] %v2942_v1  ;;  %v7689_v55 = vld [vmem:[#allocation3 + $0x1d8] sm:$0xf0]  ;;  %v8416_v62 = vld [vmem:[#allocation3 + $0x1cc] sm:$0xf] }
 0xcf2   : > { %v7692_v63 = vor.u32 %v8416_v62, %v7689_v55  ;;  %v7537_v1 = vld [vmem:[#allocation3 + $0xb0] sm:$0xf0]  ;;  %v8359_v53 = vld [vmem:[#allocation3 + $0x4] sm:$0xf]  ;;  %v7591_v54 = vld [vmem:[#allocation3 + $0x108] sm:$0xf] }
 0xcf3   : > { %v7833_v55 = vld [vmem:[#allocation3 + $0x2f8] sm:$0xf0] }
 0xcf7   : > { %v8465_v4 = vld [vmem:[#allocation3 + $0x34c] sm:$0xf0]  ;;  %v7873_v5 = vld [vmem:[#allocation3 + $0x350] sm:$0xf0] }
 0xcf8   : > { %v7872_v7 = vor.u32 %v8465_v4, %v7871_v2  ;;  %v7876_v12 = vor.u32 %v8463_v3, %v7873_v5  ;;  %v8466_v13 = vld [vmem:[#allocation3 + $0x354] sm:$0xf0]  ;;  %v7881_v15 = vld [vmem:[#allocation3 + $0x358] sm:$0xf0]  ;;  %v8379_v4 = vld [vmem:[#allocation3 + $0xa4] sm:$0xf] }
 0xcf9   : > { %v7880_v16 = vor.u32 %v8466_v13, %v7879_v6  ;;  %v7884_v17 = vor.u32 %v8464_v14, %v7881_v15  ;;  %v8414_v2 = vld [vmem:[#allocation3 + $0x1b4] sm:$0xf0]  ;;  %v7673_v3 = vld [vmem:[#allocation3 + $0x1b8] sm:$0xf0]  ;;  %v7671_v5 = vld [vmem:[#allocation3 + $0x1a8] sm:$0xf]  ;;  %v7540_v6 = vor.u32 %v8379_v4, %v7537_v1 }
 0xcfa   : > { %3683 = vmatpush.bf16.msra.mxu3 %v7872_v7  ;;  %3739 = vmatpush.bf16.msrb.mxu2 %v7876_v12  ;;  %v7672_v7 = vor.u32 %v8414_v2, %v7671_v5  ;;  %v8412_v12 = vld [vmem:[#allocation3 + $0x1ac] sm:$0xf]  ;;  %v7521_v14 = vld [vmem:[#allocation3 + $0x90] sm:$0xf0]  ;;  %v8410_v15 = vld [vmem:[#allocation3 + $0x194] sm:$0xf0] }
 0xcfb   : > { %3795 = vmatpush.bf16.msra.mxu1 %v7880_v16  ;;  %3851 = vmatpush.bf16.msrb.mxu0 %v7884_v17  ;;  %v7676_v13 = vor.u32 %v8412_v12, %v7673_v3  ;;  %v7657_v16 = vld [vmem:[#allocation3 + $0x198] sm:$0xf0]  ;;  %v8375_v17 = vld [vmem:[#allocation3 + $0x84] sm:$0xf]  ;;  %v7656_v20 = vor.u32 %v8410_v15, %v7655_v18  ;;  %v8452_v1 = vld [vmem:[#allocation3 + $0x2ec] sm:$0xf] }
 0xcfc   : > { %v7524_v19 = vor.u32 %v8375_v17, %v7521_v14  ;;  %v7660_v23 = vor.u32 %v8408_v21, %v7657_v16  ;;  %v7836_v2 = vor.u32 %v8452_v1, %v7833_v55  ;;  %v8386_v3 = vld [vmem:[#allocation3 + $0xd4] sm:$0xf0]  ;;  %v7817_v4 = vld [vmem:[#allocation3 + $0x2d8] sm:$0xf0]  ;;  %v7559_v5 = vld [vmem:[#allocation3 + $0xc8] sm:$0xf] }
 0xcfd   : > { %v7801_v14 = vld [vmem:[#allocation3 + $0x2b8] sm:$0xf0]  ;;  %v7543_v15 = vld [vmem:[#allocation3 + $0xa8] sm:$0xf]  ;;  %v8444_v17 = vld [vmem:[#allocation3 + $0x2ac] sm:$0xf] }
 0xcfe   : > { %3684 = vmatpush.bf16.msra.mxu3 %v7856_v25  ;;  %3740 = vmatpush.bf16.msrb.mxu2 %v7860_v26  ;;  %v8406_v25 = vld [vmem:[#allocation3 + $0x174] sm:$0xf0]  ;;  %v7641_v26 = vld [vmem:[#allocation3 + $0x178] sm:$0xf0]  ;;  %v7804_v18 = vor.u32 %v8444_v17, %v7801_v14  ;;  %v7527_v21 = vld [vmem:[#allocation3 + $0x88] sm:$0xf]  ;;  %v3645_v14 = vpop.f32.mrf.mxu0  ;;  %v3673_v17 = vpop.f32.mrf.mxu2 }
 0xcff   : > { %3796 = vmatpush.bf16.msra.mxu1 %v7864_v30  ;;  %3852 = vmatpush.bf16.msrb.mxu0 %v7868_v31  ;;  %v7640_v30 = vor.u32 %v8406_v25, %v7639_v28  ;;  %v8404_v31 = vld [vmem:[#allocation3 + $0x16c] sm:$0xf]  ;;  %v8374_v25 = vld [vmem:[#allocation3 + $0x74] sm:$0xf0] }
 0xd00   : > { %v7644_v32 = vor.u32 %v8404_v31, %v7641_v26  ;;  %v7769_v26 = vld [vmem:[#allocation3 + $0x278] sm:$0xf0]  ;;  %v8436_v28 = vld [vmem:[#allocation3 + $0x26c] sm:$0xf] }
 0xd01   : > { %v7753_v31 = vld [vmem:[#allocation3 + $0x258] sm:$0xf0]  ;;  %v8368_v1 = vld [vmem:[#allocation3 + $0x4c] sm:$0xf] }
 0xd02   : > { %3685 = vmatpush.bf16.msra.mxu3 %v7840_v50  ;;  %3741 = vmatpush.bf16.msrb.mxu2 %v7844_v51  ;;  %v7473_v50 = vld [vmem:[#allocation3 + $0x30] sm:$0xf0]  ;;  %v8398_v51 = vld [vmem:[#allocation3 + $0x134] sm:$0xf0]  ;;  %v7756_v36 = vor.u32 %v8432_v34, %v7753_v31 }
 0xd03   : > { %3797 = vmatpush.bf16.msra.mxu1 %v7848_v11  ;;  %3853 = vmatpush.bf16.msrb.mxu0 %v7852_v41  ;;  %v7476_v11 = vor.u32 %v8363_v9, %v7473_v50  ;;  %v7608_v41 = vor.u32 %v8398_v51, %v7607_v10  ;;  %v8362_v51 = vld [vmem:[#allocation3 + $0x14] sm:$0xf0]  ;;  %v7577_v9 = vld [vmem:[#allocation3 + $0xf8] sm:$0xf0]  ;;  %v7463_v10 = vld [vmem:[#allocation3 + $0x8] sm:$0xf] }
 0xd05   : > { %7885 = vmatmul.msk.bf16.vlgmr.msra.gmra.mxu3 %vm11463_vm13, %v7452_v44  ;;  %7886 = vmatmul.msk.bf16.vlgmr.msrb.gmra.mxu2 %vm11463_vm13, %v7452_v44 }
 0xd06   : > { %3692 = vmatpush.bf16.msrb.mxu3 %v7572_v45  ;;  %3762 = vmatpush.bf16.msra.mxu2 %v7704_v46  ;;  %v7457_v45 = vld [vmem:[#allocation3 + $0x10] sm:$0xf0]  ;;  %v8394_v46 = vld [vmem:[#allocation3 + $0x114] sm:$0xf0] }
 0xd07   : > { %3818 = vmatpush.bf16.msrb.mxu1 %v7708_v48  ;;  %7888 = vmatmul.msk.bf16.vlgmr.msrb.gmra.mxu0 %vm11463_vm13, %v7452_v44  ;;  %v8390_v48 = vld [vmem:[#allocation3 + $0xf4] sm:$0xf0]  ;;  %v7460_v57 = vor.u32 %v8359_v53, %v7457_v45  ;;  %v7592_v58 = vor.u32 %v8394_v46, %v7591_v54  ;;  %v7561_v45 = vld [vmem:[#allocation3 + $0xd8] sm:$0xf0]  ;;  %v3949_v46 = vperm.slane %v9848_v35, 3 }
 0xd08   : > { %7887 = vmatmul.msk.bf16.vlgmr.msra.gmra.mxu1 %vm11463_vm13, %v7452_v44  ;;  %v7612_v44 = vor.u32 %v8396_v42, %v7609_v8  ;;  %v7721_v8 = vld [vmem:[#allocation3 + $0x218] sm:$0xf0]  ;;  %v8388_v42 = vld [vmem:[#allocation3 + $0xec] sm:$0xf] }
 0xd09   : > { %3956 = vrot.lane.b32.xlu0 %v3949_v46, %s11464_s19  ;;  %v7545_v53 = vld [vmem:[#allocation3 + $0xb8] sm:$0xf0]  ;;  %v8380_v54 = vld [vmem:[#allocation3 + $0xac] sm:$0xf] }
 0xd0a   : > { %3693 = vmatpush.bf16.msrb.mxu3 %v7556_v59  ;;  %3763 = vmatpush.bf16.msra.mxu2 %v7688_v60  ;;  %v8392_v59 = vld [vmem:[#allocation3 + $0x10c] sm:$0xf]  ;;  %v7575_v60 = vld [vmem:[#allocation3 + $0xe8] sm:$0xf]  ;;  %v7548_v55 = vor.u32 %v8380_v54, %v7545_v53 }
 0xd0b   : > { %3819 = vmatpush.bf16.msrb.mxu1 %v7692_v63  ;;  %v7596_v62 = vor.u32 %v8392_v59, %v7593_v47  ;;  %v7576_v63 = vor.u32 %v8390_v48, %v7575_v60  ;;  %v8384_v47 = vld [vmem:[#allocation3 + $0xcc] sm:$0xf]  ;;  %v7513_v60 = vld [vmem:[#allocation3 + $0x78] sm:$0xf0] }
 0xd0c   : > { %v7564_v48 = vor.u32 %v8384_v47, %v7561_v45 }
 0xd0e   : > { %3694 = vmatpush.bf16.msrb.mxu3 %v7540_v6  ;;  %3764 = vmatpush.bf16.msra.mxu2 %v7672_v7  ;;  %v7560_v6 = vor.u32 %v8386_v3, %v7559_v5  ;;  %v8448_v7 = vld [vmem:[#allocation3 + $0x2cc] sm:$0xf]  ;;  %v7481_v3 = vld [vmem:[#allocation3 + $0x38] sm:$0xf0] }
 0xd0f   : > { %3820 = vmatpush.bf16.msrb.mxu1 %v7676_v13  ;;  %v7820_v12 = vor.u32 %v8448_v7, %v7817_v4  ;;  %v8382_v13 = vld [vmem:[#allocation3 + $0xb4] sm:$0xf0]  ;;  %v8364_v4 = vld [vmem:[#allocation3 + $0x2c] sm:$0xf] }
 0xd10   : > { %v7544_v16 = vor.u32 %v8382_v13, %v7543_v15  ;;  %v7484_v5 = vor.u32 %v8364_v4, %v7481_v3  ;;  %v9882_v13 = vpop.permute.xlu1 %3070  ;;  %v3659_v15 = vpop.f32.mrf.mxu1 }
 0xd12   : > { %3695 = vmatpush.bf16.msrb.mxu3 %v7524_v19  ;;  %3765 = vmatpush.bf16.msra.mxu2 %v7656_v20  ;;  %v8378_v19 = vld [vmem:[#allocation3 + $0x94] sm:$0xf0]  ;;  %v7785_v20 = vld [vmem:[#allocation3 + $0x298] sm:$0xf0] }
 0xd13   : > { %3821 = vmatpush.bf16.msrb.mxu1 %v7660_v23  ;;  %v7528_v22 = vor.u32 %v8378_v19, %v7527_v21  ;;  %v8440_v23 = vld [vmem:[#allocation3 + $0x28c] sm:$0xf]  ;;  %v3647_v21 = vpop.f32.mrf.mxu0 }
 0xd14   : > { %v7788_v24 = vor.u32 %v8440_v23, %v7785_v20 }
 0xd16   : > { %3696 = vmatpush.bf16.msrb.mxu3 %v7508_v29  ;;  %3766 = vmatpush.bf16.msra.mxu2 %v7640_v30  ;;  %v7772_v29 = vor.u32 %v8436_v28, %v7769_v26  ;;  %v8370_v30 = vld [vmem:[#allocation3 + $0x54] sm:$0xf0] }
 0xd17   : > { %3822 = vmatpush.bf16.msrb.mxu1 %v7644_v32  ;;  %v7495_v32 = vld [vmem:[#allocation3 + $0x48] sm:$0xf] }
 0xd18   : > { %v7496_v33 = vor.u32 %v8370_v30, %v7495_v32  ;;  %v9887_v19 = vpop.permute.xlu1 %3900  ;;  %v3661_v23 = vpop.f32.mrf.mxu1 }
 0xd19   : > { %v3675_v30 = vpop.f32.mrf.mxu2 }
 0xd1a   : > { %3697 = vmatpush.bf16.msrb.mxu3 %v7492_v38  ;;  %3767 = vmatpush.bf16.msra.mxu2 %v7624_v39  ;;  %v7479_v38 = vld [vmem:[#allocation3 + $0x28] sm:$0xf]  ;;  %v3948_v39 = vperm.slane %v9848_v35, 2  ;;  %v8372_v35 = vld [vmem:[#allocation3 + $0x6c] sm:$0xf] }
 0xd1b   : > { %3823 = vmatpush.bf16.msrb.mxu1 %v7628_v49  ;;  %v7480_v40 = vor.u32 %v8366_v37, %v7479_v38  ;;  %v8428_v49 = vld [vmem:[#allocation3 + $0x22c] sm:$0xf] }
 0xd1c   : > { %v7740_v50 = vor.u32 %v8428_v49, %v7737_v52  ;;  %3954 = vrot.lane.b32.xlu2 %v3948_v39, %s11464_s19 }
 0xd1e   : > { %3698 = vmatpush.bf16.msrb.mxu3 %v7476_v11  ;;  %3768 = vmatpush.bf16.msra.mxu2 %v7608_v41  ;;  %v7464_v11 = vor.u32 %v8362_v51, %v7463_v10  ;;  %v8424_v41 = vld [vmem:[#allocation3 + $0x20c] sm:$0xf]  ;;  %v9910_v10 = vld [vmem:[#allocation8 + $0x4] sm:$0xf] }
 0xd1f   : > { %3824 = vmatpush.bf16.msrb.mxu1 %v7612_v44  ;;  %v7724_v43 = vor.u32 %v8424_v41, %v7721_v8  ;;  %v7580_v44 = vor.u32 %v8388_v42, %v7577_v9  ;;  %v3715_v41 = vpop.f32.mrf.mxu0  ;;  %v4037_v47 = vperm.slane %v9910_v10, 3 }
 0xd22   : > { %3699 = vmatpush.bf16.msrb.mxu3 %v7460_v57  ;;  %3769 = vmatpush.bf16.msra.mxu2 %v7592_v58  ;;  %v7529_v57 = vld [vmem:[#allocation3 + $0x98] sm:$0xf0]  ;;  %v8376_v58 = vld [vmem:[#allocation3 + $0x8c] sm:$0xf] }
 0xd23   : > { %3825 = vmatpush.bf16.msrb.mxu1 %v7596_v62  ;;  %v7532_v59 = vor.u32 %v8376_v58, %v7529_v57  ;;  %v7516_v62 = vor.u32 %v8372_v35, %v7513_v60  ;;  %v9917_v57 = vld [vmem:[#allocation8 + $0x34] sm:$0xf] }
 0xd25   : > { %3700 = vmatmul.bf16.vlgmr.msrb.gmra.mxu3 %v9721_v56  ;;  %3770 = vmatmul.bf16.vlgmr.msra.gmra.mxu2 %v9797_v0 }
 0xd26   : > { %3748 = vmatpush.bf16.msra.mxu3 %v7576_v63  ;;  %3832 = vmatpush.bf16.msrb.mxu2 %v7836_v2  ;;  %v7497_v63 = vld [vmem:[#allocation3 + $0x58] sm:$0xf0] }
 0xd27   : > { %3826 = vmatmul.bf16.vlgmr.msrb.gmra.mxu1 %v9797_v0  ;;  %v7511_v0 = vld [vmem:[#allocation3 + $0x68] sm:$0xf]  ;;  %v7500_v2 = vor.u32 %v8368_v1, %v7497_v63  ;;  %v5088_v63 = vperm.slane %v9917_v57, 0  ;;  %v5089_v1 = vperm.slane %v9917_v57, 1 }
 0xd28   : > { %v7512_v27 = vor.u32 %v8374_v25, %v7511_v0  ;;  %v9890_v25 = vpop.permute.xlu2 %3880 }
 0xd2a   : > { %3749 = vmatpush.bf16.msra.mxu3 %v7560_v6  ;;  %3833 = vmatpush.bf16.msrb.mxu2 %v7820_v12  ;;  %v8360_v6 = vld [vmem:[#allocation3 + $0xc] sm:$0xf]  ;;  %v9880_v12 = vpop.permute.xlu0 %3065 }
 0xd2e   : > { %3750 = vmatpush.bf16.msra.mxu3 %v7544_v16  ;;  %3834 = vmatpush.bf16.msrb.mxu2 %v7804_v18  ;;  %v3646_v16 = vadd.f32 %v3645_v14, %v9880_v12 }
 0xd30   : > { %v3660_v20 = vadd.f32 %v3659_v15, %v3646_v16 }
 0xd32   : > { %3751 = vmatpush.bf16.msra.mxu3 %v7528_v22  ;;  %3835 = vmatpush.bf16.msrb.mxu2 %v7788_v24  ;;  %v9885_v18 = vpop.permute.xlu0 %3885  ;;  %v3648_v22 = vadd.f32 %v3647_v21, %v9882_v13  ;;  %v3674_v24 = vadd.f32 %v3673_v17, %v3660_v20 }
 0xd34   : > { %v3662_v0 = vadd.f32 %v3661_v23, %v3648_v22 }
 0xd36   : > { %3752 = vmatpush.bf16.msra.mxu3 %v7512_v27  ;;  %3836 = vmatpush.bf16.msrb.mxu2 %v7772_v29  ;;  %v9893_v29 = vpop.permute.xlu1 %3952 }
 0xd3a   : > { %3753 = vmatpush.bf16.msra.mxu3 %v7496_v33  ;;  %3837 = vmatpush.bf16.msrb.mxu2 %v7756_v36  ;;  %v3951_v28 = vpop.permute.xlu0 %3950  ;;  %v3676_v33 = vadd.f32 %v3675_v30, %v3662_v0 }
 0xd3b   : > { %v3958_v32 = vsel %vm592_vm0, %v3951_v28, %v9893_v29  ;;  %v3966_v36 = vmul.f32 0.0, %v3951_v28 }
 0xd3e   : > { %3754 = vmatpush.bf16.msra.mxu3 %v7480_v40  ;;  %3838 = vmatpush.bf16.msrb.mxu2 %v7740_v50 }
 0xd42   : > { %3755 = vmatpush.bf16.msra.mxu3 %v7464_v11  ;;  %3839 = vmatpush.bf16.msrb.mxu2 %v7724_v43  ;;  %v4034_v11 = vperm.slane %v9910_v10, 0  ;;  %v3729_v43 = vpop.f32.mrf.mxu1 }
 0xd45   : > { %3756 = vmatmul.bf16.vlgmr.msra.gmra.mxu3 %v9721_v56  ;;  %3840 = vmatmul.bf16.vlgmr.msrb.gmra.mxu2 %v9788_v61  ;;  %v7465_v61 = vld [vmem:[#allocation3 + $0x18] sm:$0xf0] }
 0xd46   : > { %3804 = vmatpush.bf16.msrb.mxu3 %v7580_v44  ;;  %v7468_v7 = vor.u32 %v8360_v6, %v7465_v61  ;;  %v9901_v39 = vpop.permute.xlu2 %3905 }
 0xd4a   : > { %3805 = vmatpush.bf16.msrb.mxu3 %v7564_v48  ;;  %v3731_v60 = vpop.f32.mrf.mxu1 }
 0xd4e   : > { %3806 = vmatpush.bf16.msrb.mxu3 %v7548_v55  ;;  %v3717_v55 = vpop.f32.mrf.mxu0 }
 0xd52   : > { %3807 = vmatpush.bf16.msrb.mxu3 %v7532_v59 }
 0xd56   : > { %3808 = vmatpush.bf16.msrb.mxu3 %v7516_v62 }
 0xd5a   : > { %3809 = vmatpush.bf16.msrb.mxu3 %v7500_v2 }
 0xd5e   : > { %3810 = vmatpush.bf16.msrb.mxu3 %v7484_v5 }
 0xd62   : > { %3811 = vmatpush.bf16.msrb.mxu3 %v7468_v7 }
 0xd65   : > { %3812 = vmatmul.bf16.vlgmr.msrb.gmra.mxu3 %v9721_v56 }
 0xd88   : > { %v3687_v56 = vpop.f32.mrf.mxu3  ;;  %v3743_v45 = vpop.f32.mrf.mxu2 }
 0xd89   : > { %v3688_v26 = vadd.f32 %v3687_v56, %v3674_v24  ;;  %v3785_v24 = vpop.f32.mrf.mxu0 }
 0xd8b   : > { %v3888_v27 = vmul.f32 %v9890_v25, %v3688_v26  ;;  %v3799_v26 = vpop.f32.mrf.mxu1 }
 0xd8d   : > { %v3908_v31 = vadd.f32 %v9887_v19, %v3888_v27 }
 0xd8f   : > { %v9898_v34 = vmax.f32 %v3908_v31, 0.0 }
 0xd90   : > { %v3689_v37 = vpop.f32.mrf.mxu3  ;;  %v3745_v2 = vpop.f32.mrf.mxu2 }
 0xd91   : > { %v3967_v52 = vmul.f32 %v3958_v32, %v9898_v34  ;;  %v3690_v38 = vadd.f32 %v3689_v37, %v3676_v33  ;;  %v5096_v61 = vmul.f32 %v5088_v63, %v9898_v34  ;;  %v3957_v37 = vpop.permute.xlu0 %3956 }
 0xd93   : > { %v3976_v40 = vpack.c.bf16 %v3967_v52, %v3966_v36  ;;  %v3892_v49 = vmul.f32 %v9885_v18, %v3690_v38  ;;  %v3787_v52 = vpop.f32.mrf.mxu0 }
 0xd95   : > { %v3912_v50 = vadd.f32 %v9901_v39, %v3892_v49  ;;  %3988 = vrot.lane.b32.xlu1 %v3976_v40, %s11466_s25 }
 0xd97   : > { %v9906_v51 = vmax.f32 %v3912_v50, 0.0 }
 0xd99   : > { %v3972_v8 = vmul.f32 %v3958_v32, %v9906_v51  ;;  %v5100_v17 = vmul.f32 %v5088_v63, %v9906_v51  ;;  %v3955_v32 = vpop.permute.xlu2 %3954 }
 0xd9a   : > { %v3959_v49 = vsel %vm592_vm0, %v9893_v29, %v3955_v32  ;;  %v3960_v50 = vsel %vm592_vm0, %v3955_v32, %v3957_v37 }
 0xd9b   : > { %v3979_v9 = vpack.c.bf16 %v3972_v8, %v3966_v36  ;;  %v3801_v8 = vpop.f32.mrf.mxu1 }
 0xd9d   : > { %3994 = vrot.lane.b32.xlu1 %v3979_v9, %s11466_s25 }
 0xda5   : > { %4038 = vrot.lane.b32.xlu1 %v4034_v11, %s11468_s20 }
 0xda8   : > { %v3701_v42 = vpop.f32.mrf.mxu3  ;;  %v3771_v22 = vpop.f32.mrf.mxu2 }
 0xda9   : > { %v3702_v44 = vadd.f32 %v3701_v42, %v9880_v12 }
 0xdab   : > { %v3716_v46 = vadd.f32 %v3715_v41, %v3702_v44 }
 0xdad   : > { %v3730_v48 = vadd.f32 %v3729_v43, %v3716_v46  ;;  %4044 = vrot.lane.b32.xlu1 %v4037_v47, %s11468_s20 }
 0xdaf   : > { %v3744_v53 = vadd.f32 %v3743_v45, %v3730_v48 }
 0xdb0   : > { %v3703_v54 = vpop.f32.mrf.mxu3  ;;  %v3773_v31 = vpop.f32.mrf.mxu2 }
 0xdb1   : > { %v3889_v58 = vmul.f32 %v9890_v25, %v3744_v53  ;;  %v3704_v59 = vadd.f32 %v3703_v54, %v9882_v13  ;;  %v3827_v54 = vpop.f32.mrf.mxu1 }
 0xdb3   : > { %v3909_v35 = vadd.f32 %v9887_v19, %v3889_v58  ;;  %v3718_v62 = vadd.f32 %v3717_v55, %v3704_v59 }
 0xdb5   : > { %v9924_v3 = vmax.f32 %v3909_v35, 0.0  ;;  %v3732_v4 = vadd.f32 %v3731_v60, %v3718_v62  ;;  %v4035_v60 = vperm.slane %v9910_v10, 1  ;;  %v3855_v62 = vpop.f32.mrf.mxu0 }
 0xdb7   : > { %v3746_v5 = vadd.f32 %v3745_v2, %v3732_v4  ;;  %v5097_v6 = vmul.f32 %v5089_v1, %v9924_v3  ;;  %v3968_v41 = vmul.f32 %v3959_v49, %v9924_v3 }
 0xdb9   : > { %v3893_v7 = vmul.f32 %v9885_v18, %v3746_v5  ;;  %v5104_v14 = vpack.c.bf16 %v5097_v6, %v5096_v61  ;;  %v3829_v61 = vpop.f32.mrf.mxu1 }
 0xdbb   : > { %v3913_v15 = vadd.f32 %v9901_v39, %v3893_v7  ;;  %5108 = vst [vmem:[#allocation3 + $0x1a0] sm:$0xff] %v5104_v14  ;;  %v5091_v14 = vperm.slane %v9917_v57, 3 }
 0xdbd   : > { %v9930_v16 = vmax.f32 %v3913_v15, 0.0 }
 0xdbf   : > { %v5101_v20 = vmul.f32 %v5089_v1, %v9930_v16  ;;  %v3973_v29 = vmul.f32 %v3959_v49, %v9930_v16  ;;  %v4120_v49 = vld [vmem:[#allocation8 + $0x8] sm:$0xf] }
 0xdc1   : > { %v5106_v21 = vpack.c.bf16 %v5101_v20, %v5100_v17 }
 0xdc3   : > { %5110 = vst [vmem:[#allocation3 + $0x1b0] sm:$0xff] %v5106_v21  ;;  %v3857_v21 = vpop.f32.mrf.mxu0 }
 0xdc8   : > { %v3757_v23 = vpop.f32.mrf.mxu3  ;;  %v3841_v59 = vpop.f32.mrf.mxu2 }
 0xdc9   : > { %v3758_v56 = vadd.f32 %v3757_v23, %v9880_v12 }
 0xdcb   : > { %v3772_v0 = vadd.f32 %v3771_v22, %v3758_v56 }
 0xdcd   : > { %v3786_v27 = vadd.f32 %v3785_v24, %v3772_v0 }
 0xdcf   : > { %v3800_v28 = vadd.f32 %v3799_v26, %v3786_v27 }
 0xdd0   : > { %v3759_v30 = vpop.f32.mrf.mxu3  ;;  %v3843_v15 = vpop.f32.mrf.mxu2 }
 0xdd1   : > { %v3890_v33 = vmul.f32 %v9890_v25, %v3800_v28  ;;  %v3760_v36 = vadd.f32 %v3759_v30, %v9882_v13 }
 0xdd3   : > { %v3910_v38 = vadd.f32 %v9887_v19, %v3890_v33  ;;  %v3774_v40 = vadd.f32 %v3773_v31, %v3760_v36 }
 0xdd5   : > { %v9941_v9 = vmax.f32 %v3910_v38, 0.0  ;;  %v3788_v11 = vadd.f32 %v3787_v52, %v3774_v40 }
 0xdd7   : > { %v3969_v42 = vmul.f32 %v3960_v50, %v9941_v9  ;;  %v3802_v43 = vadd.f32 %v3801_v8, %v3788_v11  ;;  %v4124_v8 = vperm.slane %v4120_v49, 2 }
 0xdd9   : > { %v3894_v44 = vmul.f32 %v9885_v18, %v3802_v43  ;;  %v3977_v45 = vpack.c.bf16 %v3969_v42, %v3968_v41 }
 0xddb   : > { %v3914_v46 = vadd.f32 %v9901_v39, %v3894_v44  ;;  %3990 = vrot.lane.b32.xlu2 %v3977_v45, %s11466_s25 }
 0xddd   : > { %v9948_v47 = vmax.f32 %v3914_v46, 0.0 }
 0xddf   : > { %v3974_v48 = vmul.f32 %v3960_v50, %v9948_v47 }
 0xde1   : > { %v3980_v53 = vpack.c.bf16 %v3974_v48, %v3973_v29 }
 0xde3   : > { %3996 = vrot.lane.b32.xlu2 %v3980_v53, %s11466_s25 }
 0xde8   : > { %v3813_v55 = vpop.f32.mrf.mxu3 }
 0xde9   : > { %v3814_v58 = vadd.f32 %v3813_v55, %v9880_v12  ;;  %v5090_v12 = vperm.slane %v9917_v57, 2 }
 0xdeb   : > { %v3828_v35 = vadd.f32 %v3827_v54, %v3814_v58  ;;  %4040 = vrot.lane.b32.xlu2 %v4035_v60, %s11468_s20  ;;  %v5102_v27 = vmul.f32 %v5090_v12, %v9948_v47 }
 0xded   : > { %v3842_v63 = vadd.f32 %v3841_v59, %v3828_v35  ;;  %v4122_v35 = vperm.slane %v4120_v49, 0 }
 0xdef   : > { %v3856_v1 = vadd.f32 %v3855_v62, %v3842_v63  ;;  %v4125_v62 = vperm.slane %v4120_v49, 3 }
 0xdf0   : > { %v3815_v2 = vpop.f32.mrf.mxu3 }
 0xdf1   : > { %v3891_v4 = vmul.f32 %v9890_v25, %v3856_v1  ;;  %v3816_v5 = vadd.f32 %v3815_v2, %v9882_v13  ;;  %v5098_v25 = vmul.f32 %v5090_v12, %v9941_v9 }
 0xdf3   : > { %v3911_v6 = vadd.f32 %v9887_v19, %v3891_v4  ;;  %v3830_v7 = vadd.f32 %v3829_v61, %v3816_v5 }
 0xdf5   : > { %v9961_v17 = vmax.f32 %v3911_v6, 0.0  ;;  %v3844_v20 = vadd.f32 %v3843_v15, %v3830_v7 }
 0xdf7   : > { %v3858_v22 = vadd.f32 %v3857_v21, %v3844_v20  ;;  %v3970_v23 = vmul.f32 %v3957_v37, %v9961_v17  ;;  %v5099_v13 = vmul.f32 %v5091_v14, %v9961_v17 }
 0xdf9   : > { %v3895_v24 = vmul.f32 %v9885_v18, %v3858_v22  ;;  %v3978_v19 = vpack.c.bf16 %v3970_v23, %v3970_v23  ;;  %v5105_v56 = vpack.c.bf16 %v5099_v13, %v5098_v25  ;;  %v4036_v18 = vperm.slane %v9910_v10, 2 }
 0xdfb   : > { %v3915_v26 = vadd.f32 %v9901_v39, %v3895_v24  ;;  %3992 = vrot.lane.b32.xlu0 %v3978_v19, %s11466_s25  ;;  %5109 = vst [vmem:[#allocation3 + $0x1a8] sm:$0xff] %v5105_v56  ;;  %v4123_v24 = vperm.slane %v4120_v49, 1 }
 0xdfd   : > { %v9969_v57 = vmax.f32 %v3915_v26, 0.0 }
 0xdff   : > { %v3975_v0 = vmul.f32 %v3957_v37, %v9969_v57  ;;  %v5103_v28 = vmul.f32 %v5091_v14, %v9969_v57 }
 0xe01   : > { %v3981_v30 = vpack.c.bf16 %v3975_v0, %v3975_v0  ;;  %v5107_v31 = vpack.c.bf16 %v5103_v28, %v5102_v27 }
 0xe03   : > { %3998 = vrot.lane.b32.xlu0 %v3981_v30, %s11466_s25  ;;  %5111 = vst [vmem:[#allocation3 + $0x1b8] sm:$0xff] %v5107_v31 }
 0xe07   : > { %v3989_v39 = vpop.permute.xlu1 %3988 }
 0xe08   : > { %v4000_v10 = vrot.slane %v3989_v39, 4 }
 0xe0b   : > { %4042 = vrot.lane.b32.xlu0 %v4036_v18, %s11468_s20 }
 0xe0f   : > { %v3995_v32 = vpop.permute.xlu1 %3994 }
 0xe10   : > { %v4003_v44 = vrot.slane %v3995_v32, 4 }
 0xe17   : > { %v4039_v33 = vpop.permute.xlu1 %4038 }
 0xe18   : > { %v4054_v48 = vmul.f32 0.0, %v4039_v33 }
 0xe1f   : > { %v4045_v36 = vpop.permute.xlu1 %4044 }
 0xe20   : > { %v4058_v52 = vmul.f32 %v4045_v36, %v9961_v17  ;;  %v4063_v38 = vmul.f32 %v4045_v36, %v9969_v57 }
 0xe22   : > { %v4066_v37 = vpack.c.bf16 %v4058_v52, %v4058_v52  ;;  %v4069_v40 = vpack.c.bf16 %v4063_v38, %v4063_v38 }
 0xe24   : > { %4080 = vrot.lane.b32.xlu1 %v4066_v37, %s11513_s18 }
 0xe2c   : > { %4086 = vrot.lane.b32.xlu1 %v4069_v40, %s11513_s18 }
 0xe34   : > { %4130 = vrot.lane.b32.xlu1 %v4124_v8, %s11514_s14 }
 0xe35   : > { %v3991_v50 = vpop.permute.xlu2 %3990 }
 0xe36   : > { %v4001_v11 = vrot.slane %v3991_v50, 4 }
 0xe38   : > { %v4006_v41 = vsel %vm641_vm5, %v4000_v10, %v4001_v11 }
 0xe39   : > { %v4007_v42 = vsel %vm643_vm6, %v3989_v39, %v4006_v41 }
 0xe3a   : > { %4018 = vst [vmem:[#allocation3] sm:$0xff] %v4007_v42 }
 0xe3d   : > { %v3997_v43 = vpop.permute.xlu2 %3996 }
 0xe3e   : > { %v4004_v45 = vrot.slane %v3997_v43, 4 }
 0xe40   : > { %v4010_v46 = vsel %vm641_vm5, %v4003_v44, %v4004_v45 }
 0xe41   : > { %v4011_v29 = vsel %vm643_vm6, %v3995_v32, %v4010_v46 }
 0xe42   : > { %4020 = vst [vmem:[#allocation3 + $0x10] sm:$0xff] %v4011_v29 }
 0xe45   : > { %v4041_v53 = vpop.permute.xlu2 %4040 }
 0xe46   : > { %v4046_v54 = vsel %vm684_vm1, %v4039_v33, %v4041_v53 }
 0xe47   : > { %v4055_v55 = vmul.f32 %v4046_v54, %v9898_v34  ;;  %v4060_v59 = vmul.f32 %v4046_v54, %v9906_v51 }
 0xe49   : > { %v4064_v58 = vpack.c.bf16 %v4055_v55, %v4054_v48  ;;  %v4067_v60 = vpack.c.bf16 %v4060_v59, %v4054_v48 }
 0xe4b   : > { %4076 = vrot.lane.b32.xlu2 %v4064_v58, %s11513_s18 }
 0xe53   : > { %4082 = vrot.lane.b32.xlu2 %v4067_v60, %s11513_s18  ;;  %v4208_v60 = vld [vmem:[#allocation8 + $0xc] sm:$0xf] }
 0xe5b   : > { %4126 = vrot.lane.b32.xlu2 %v4122_v35, %s11514_s14  ;;  %v4212_v35 = vperm.slane %v4208_v60, 2 }
 0xe63   : > { %4132 = vrot.lane.b32.xlu2 %v4125_v62, %s11514_s14 }
 0xe6d   : > { %v3993_v63 = vpop.permute.xlu0 %3992 }
 0xe6e   : > { %v4002_v1 = vrot.slane %v3993_v63, 4 }
 0xe70   : > { %v4008_v2 = vsel %vm641_vm5, %v4001_v11, %v4002_v1 }
 0xe71   : > { %v4009_v4 = vsel %vm643_vm6, %v3991_v50, %v4008_v2 }
 0xe72   : > { %4019 = vst [vmem:[#allocation3 + $0x8] sm:$0xff] %v4009_v4 }
 0xe75   : > { %v3999_v5 = vpop.permute.xlu0 %3998 }
 0xe76   : > { %v4005_v61 = vrot.slane %v3999_v5, 4 }
 0xe78   : > { %v4012_v6 = vsel %vm641_vm5, %v4004_v45, %v4005_v61 }
 0xe79   : > { %v4013_v7 = vsel %vm643_vm6, %v3997_v43, %v4012_v6  ;;  %v4211_v6 = vperm.slane %v4208_v60, 1 }
 0xe7a   : > { %4021 = vst [vmem:[#allocation3 + $0x18] sm:$0xff] %v4013_v7  ;;  %v4210_v7 = vperm.slane %v4208_v60, 0 }
 0xe7d   : > { %v4043_v12 = vpop.permute.xlu0 %4042 }
 0xe7e   : > { %v4047_v14 = vsel %vm684_vm1, %v4041_v53, %v4043_v12  ;;  %v4048_v15 = vsel %vm684_vm1, %v4043_v12, %v4045_v36  ;;  %v4213_v12 = vperm.slane %v4208_v60, 3 }
 0xe7f   : > { %v4056_v20 = vmul.f32 %v4047_v14, %v9924_v3  ;;  %v4057_v21 = vmul.f32 %v4048_v15, %v9941_v9  ;;  %v4061_v23 = vmul.f32 %v4047_v14, %v9930_v16  ;;  %v4062_v25 = vmul.f32 %v4048_v15, %v9948_v47 }
 0xe81   : > { %v4065_v22 = vpack.c.bf16 %v4057_v21, %v4056_v20  ;;  %v4068_v13 = vpack.c.bf16 %v4062_v25, %v4061_v23 }
 0xe83   : > { %4078 = vrot.lane.b32.xlu0 %v4065_v22, %s11513_s18 }
 0xe8b   : > { %4084 = vrot.lane.b32.xlu0 %v4068_v13, %s11513_s18 }
 0xe93   : > { %4128 = vrot.lane.b32.xlu0 %v4123_v24, %s11514_s14 }
 0xe96   : > { %v4081_v18 = vpop.permute.xlu1 %4080 }
 0xe97   : > { %v4090_v32 = vrot.slane %v4081_v18, 4 }
 0xe9e   : > { %v4087_v38 = vpop.permute.xlu1 %4086 }
 0xe9f   : > { %v4093_v8 = vrot.slane %v4087_v38, 4 }
 0xea5   : > { %v4077_v19 = vpop.permute.xlu2 %4076 }
 0xea6   : > { %v4088_v33 = vrot.slane %v4077_v19, 4  ;;  %v4131_v43 = vpop.permute.xlu1 %4130 }
 0xead   : > { %v4083_v56 = vpop.permute.xlu2 %4082 }
 0xeae   : > { %v4091_v10 = vrot.slane %v4083_v56, 4 }
 0xeb5   : > { %v4127_v26 = vpop.permute.xlu2 %4126 }
 0xeb6   : > { %v4142_v54 = vmul.f32 0.0, %v4127_v26 }
 0xebd   : > { %v4133_v0 = vpop.permute.xlu2 %4132 }
 0xebe   : > { %v4146_v27 = vmul.f32 %v4133_v0, %v9961_v17  ;;  %v4151_v30 = vmul.f32 %v4133_v0, %v9969_v57  ;;  %v4136_v46 = vsel %vm775_vm2, %v4131_v43, %v4133_v0 }
 0xebf   : > { %v4145_v55 = vmul.f32 %v4136_v46, %v9941_v9  ;;  %v4150_v4 = vmul.f32 %v4136_v46, %v9948_v47 }
 0xec0   : > { %v4154_v28 = vpack.c.bf16 %v4146_v27, %v4146_v27  ;;  %v4157_v31 = vpack.c.bf16 %v4151_v30, %v4151_v30 }
 0xec2   : > { %4168 = vrot.lane.b32.xlu2 %v4154_v28, %s11515_s28 }
 0xeca   : > { %4174 = vrot.lane.b32.xlu2 %v4157_v31, %s11515_s28 }
 0xed2   : > { %4218 = vrot.lane.b32.xlu2 %v4212_v35, %s11495_s21 }
 0xef5   : > { %v4079_v39 = vpop.permute.xlu0 %4078 }
 0xef6   : > { %v4089_v36 = vrot.slane %v4079_v39, 4 }
 0xef8   : > { %v4094_v52 = vsel %vm641_vm5, %v4088_v33, %v4089_v36  ;;  %v4096_v37 = vsel %vm641_vm5, %v4089_v36, %v4090_v32 }
 0xef9   : > { %v4095_v40 = vsel %vm734_vm7, %v4077_v19, %v4094_v52  ;;  %v4097_v49 = vsel %vm734_vm7, %v4079_v39, %v4096_v37 }
 0xefa   : > { %4106 = vst [vmem:[#allocation3 + $0x20] sm:$0xff] %v4095_v40 }
 0xefb   : > { %4107 = vst [vmem:[#allocation3 + $0x28] sm:$0xff] %v4097_v49 }
 0xefd   : > { %v4085_v50 = vpop.permute.xlu0 %4084 }
 0xefe   : > { %v4092_v11 = vrot.slane %v4085_v50, 4 }
 0xf00   : > { %v4098_v41 = vsel %vm641_vm5, %v4091_v10, %v4092_v11  ;;  %v4100_v42 = vsel %vm641_vm5, %v4092_v11, %v4093_v8 }
 0xf01   : > { %v4099_v44 = vsel %vm734_vm7, %v4083_v56, %v4098_v41  ;;  %v4101_v45 = vsel %vm734_vm7, %v4085_v50, %v4100_v42 }
 0xf02   : > { %4108 = vst [vmem:[#allocation3 + $0x30] sm:$0xff] %v4099_v44 }
 0xf03   : > { %4109 = vst [vmem:[#allocation3 + $0x38] sm:$0xff] %v4101_v45 }
 0xf05   : > { %v4129_v29 = vpop.permute.xlu0 %4128 }
 0xf06   : > { %v4134_v48 = vsel %vm775_vm2, %v4127_v26, %v4129_v29  ;;  %v4135_v53 = vsel %vm775_vm2, %v4129_v29, %v4131_v43 }
 0xf07   : > { %v4143_v58 = vmul.f32 %v4134_v48, %v9898_v34  ;;  %v4144_v59 = vmul.f32 %v4135_v53, %v9924_v3  ;;  %v4148_v1 = vmul.f32 %v4134_v48, %v9906_v51  ;;  %v4149_v2 = vmul.f32 %v4135_v53, %v9930_v16  ;;  %v4296_v48 = vld [vmem:[#allocation8 + $0x10] sm:$0xf] }
 0xf08   : > { %v4300_v60 = vperm.slane %v4296_v48, 2  ;;  %v4301_v35 = vperm.slane %v4296_v48, 3 }
 0xf09   : > { %v4152_v62 = vpack.c.bf16 %v4143_v58, %v4142_v54  ;;  %v4153_v63 = vpack.c.bf16 %v4145_v55, %v4144_v59  ;;  %v4155_v5 = vpack.c.bf16 %v4148_v1, %v4142_v54  ;;  %v4156_v61 = vpack.c.bf16 %v4150_v4, %v4149_v2 }
 0xf0a   : > { %v4298_v55 = vperm.slane %v4296_v48, 0 }
 0xf0b   : > { %4166 = vrot.lane.b32.xlu1 %v4153_v63, %s11515_s28  ;;  %4164 = vrot.lane.b32.xlu0 %v4152_v62, %s11515_s28  ;;  %v4299_v62 = vperm.slane %v4296_v48, 1 }
 0xf13   : > { %4172 = vrot.lane.b32.xlu1 %v4156_v61, %s11515_s28  ;;  %4170 = vrot.lane.b32.xlu0 %v4155_v5, %s11515_s28 }
 0xf1b   : > { %4216 = vrot.lane.b32.xlu1 %v4211_v6, %s11495_s21  ;;  %4214 = vrot.lane.b32.xlu0 %v4210_v7, %s11495_s21 }
 0xf1c   : > { %v4169_v14 = vpop.permute.xlu2 %4168 }
 0xf1d   : > { %v4178_v21 = vrot.slane %v4169_v14, 4 }
 0xf23   : > { %4220 = vrot.lane.b32.xlu0 %v4213_v12, %s11495_s21 }
 0xf24   : > { %v4175_v56 = vpop.permute.xlu2 %4174 }
 0xf25   : > { %v4181_v27 = vrot.slane %v4175_v56, 4 }
 0xf2c   : > { %v4219_v40 = vpop.permute.xlu2 %4218 }
 0xf7d   : > { %v4167_v15 = vpop.permute.xlu1 %4166  ;;  %v4165_v20 = vpop.permute.xlu0 %4164 }
 0xf7e   : > { %v4177_v22 = vrot.slane %v4167_v15, 4  ;;  %v4176_v23 = vrot.slane %v4165_v20, 4 }
 0xf80   : > { %v4184_v25 = vsel %vm641_vm5, %v4177_v22, %v4178_v21  ;;  %v4182_v13 = vsel %vm641_vm5, %v4176_v23, %v4177_v22 }
 0xf81   : > { %v4185_v24 = vsel %vm825_vm8, %v4167_v15, %v4184_v25  ;;  %v4183_v19 = vsel %vm825_vm8, %v4165_v20, %v4182_v13 }
 0xf82   : > { %4195 = vst [vmem:[#allocation3 + $0x48] sm:$0xff] %v4185_v24 }
 0xf83   : > { %4194 = vst [vmem:[#allocation3 + $0x40] sm:$0xff] %v4183_v19 }
 0xf85   : > { %v4173_v26 = vpop.permute.xlu1 %4172  ;;  %v4171_v0 = vpop.permute.xlu0 %4170 }
 0xf86   : > { %v4180_v28 = vrot.slane %v4173_v26, 4  ;;  %v4179_v30 = vrot.slane %v4171_v0, 4 }
 0xf88   : > { %v4188_v31 = vsel %vm641_vm5, %v4180_v28, %v4181_v27  ;;  %v4186_v18 = vsel %vm641_vm5, %v4179_v30, %v4180_v28 }
 0xf89   : > { %v4189_v39 = vsel %vm825_vm8, %v4173_v26, %v4188_v31  ;;  %v4187_v32 = vsel %vm825_vm8, %v4171_v0, %v4186_v18 }
 0xf8a   : > { %4197 = vst [vmem:[#allocation3 + $0x58] sm:$0xff] %v4189_v39 }
 0xf8b   : > { %4196 = vst [vmem:[#allocation3 + $0x50] sm:$0xff] %v4187_v32 }
 0xf8d   : > { %v4217_v33 = vpop.permute.xlu1 %4216  ;;  %v4215_v36 = vpop.permute.xlu0 %4214 }
 0xf8e   : > { %v4222_v52 = vsel %vm866_vm3, %v4215_v36, %v4217_v33  ;;  %v4230_v37 = vmul.f32 0.0, %v4215_v36  ;;  %v4223_v50 = vsel %vm866_vm3, %v4217_v33, %v4219_v40 }
 0xf8f   : > { %v4231_v38 = vmul.f32 %v4222_v52, %v9898_v34  ;;  %v4236_v8 = vmul.f32 %v4222_v52, %v9906_v51  ;;  %v4232_v42 = vmul.f32 %v4223_v50, %v9924_v3  ;;  %v4237_v54 = vmul.f32 %v4223_v50, %v9930_v16 }
 0xf91   : > { %v4240_v49 = vpack.c.bf16 %v4231_v38, %v4230_v37  ;;  %v4243_v45 = vpack.c.bf16 %v4236_v8, %v4230_v37 }
 0xf93   : > { %4252 = vrot.lane.b32.xlu1 %v4240_v49, %s11496_s15 }
 0xf95   : > { %v4221_v10 = vpop.permute.xlu0 %4220 }
 0xf96   : > { %v4224_v11 = vsel %vm866_vm3, %v4219_v40, %v4221_v10  ;;  %v4234_v41 = vmul.f32 %v4221_v10, %v9961_v17  ;;  %v4239_v29 = vmul.f32 %v4221_v10, %v9969_v57  ;;  %v4384_v10 = vld [vmem:[#allocation8 + $0x14] sm:$0xf] }
 0xf97   : > { %v4233_v43 = vmul.f32 %v4224_v11, %v9941_v9  ;;  %v4238_v53 = vmul.f32 %v4224_v11, %v9948_v47 }
 0xf98   : > { %v4242_v44 = vpack.c.bf16 %v4234_v41, %v4234_v41  ;;  %v4245_v58 = vpack.c.bf16 %v4239_v29, %v4239_v29  ;;  %v4389_v29 = vperm.slane %v4384_v10, 3 }
 0xf99   : > { %v4241_v46 = vpack.c.bf16 %v4233_v43, %v4232_v42  ;;  %v4244_v59 = vpack.c.bf16 %v4238_v53, %v4237_v54  ;;  %v4386_v42 = vperm.slane %v4384_v10, 0 }
 0xf9a   : > { %4256 = vrot.lane.b32.xlu0 %v4242_v44, %s11496_s15 }
 0xf9b   : > { %4258 = vrot.lane.b32.xlu1 %v4243_v45, %s11496_s15  ;;  %4254 = vrot.lane.b32.xlu2 %v4241_v46, %s11496_s15  ;;  %v4388_v45 = vperm.slane %v4384_v10, 2  ;;  %v4387_v46 = vperm.slane %v4384_v10, 1 }
 0xfa2   : > { %4262 = vrot.lane.b32.xlu0 %v4245_v58, %s11496_s15 }
 0xfa3   : > { %4302 = vrot.lane.b32.xlu1 %v4298_v55, %s11497_s24  ;;  %4260 = vrot.lane.b32.xlu2 %v4244_v59, %s11496_s15 }
 0xfaa   : > { %4306 = vrot.lane.b32.xlu0 %v4300_v60, %s11497_s24 }
 0xfab   : > { %4308 = vrot.lane.b32.xlu1 %v4301_v35, %s11497_s24  ;;  %4304 = vrot.lane.b32.xlu2 %v4299_v62, %s11497_s24 }
 0xff5   : > { %v4255_v63 = vpop.permute.xlu2 %4254 }
 0xff6   : > { %v4265_v2 = vrot.slane %v4255_v63, 4 }
 0xffd   : > { %v4261_v6 = vpop.permute.xlu2 %4260 }
 0xffe   : > { %v4268_v15 = vrot.slane %v4261_v6, 4 }
0x1005   : > { %v4253_v1 = vpop.permute.xlu1 %4252  ;;  %v4305_v13 = vpop.permute.xlu2 %4304 }
0x1006   : > { %v4264_v4 = vrot.slane %v4253_v1, 4 }
0x1008   : > { %v4270_v5 = vsel %vm641_vm5, %v4264_v4, %v4265_v2 }
0x1009   : > { %v4271_v61 = vsel %vm11516_vm9, %v4253_v1, %v4270_v5 }
0x100a   : > { %4282 = vst [vmem:[#allocation3 + $0x60] sm:$0xff] %v4271_v61 }
0x100c   : > { %v4257_v7 = vpop.permute.xlu0 %4256 }
0x100d   : > { %v4266_v12 = vrot.slane %v4257_v7, 4  ;;  %v4259_v14 = vpop.permute.xlu1 %4258 }
0x100e   : > { %v4267_v20 = vrot.slane %v4259_v14, 4 }
0x100f   : > { %v4272_v21 = vsel %vm641_vm5, %v4265_v2, %v4266_v12 }
0x1010   : > { %v4273_v22 = vsel %vm11517_vm15, %v4255_v63, %v4272_v21  ;;  %v4274_v23 = vsel %vm641_vm5, %v4267_v20, %v4268_v15  ;;  %vm11520_vm15 = vmmov %vm11519_vm4 }
0x1011   : > { %4283 = vst [vmem:[#allocation3 + $0x68] sm:$0xff] %v4273_v22  ;;  %v4275_v25 = vsel %vm11518_vm14, %v4259_v14, %v4274_v23  ;;  %vm11521_vm14 = vmmov %vm11519_vm4 }
0x1012   : > { %4284 = vst [vmem:[#allocation3 + $0x70] sm:$0xff] %v4275_v25 }
0x1014   : > { %v4263_v24 = vpop.permute.xlu0 %4262 }
0x1015   : > { %v4269_v19 = vrot.slane %v4263_v24, 4  ;;  %v4303_v56 = vpop.permute.xlu1 %4302  ;;  %v4472_v24 = vld [vmem:[#allocation8 + $0x18] sm:$0xf] }
0x1016   : > { %v4318_v26 = vmul.f32 0.0, %v4303_v56  ;;  %v4310_v0 = vsel %vm11519_vm4, %v4303_v56, %v4305_v13 }
0x1017   : > { %v4276_v27 = vsel %vm641_vm5, %v4268_v15, %v4269_v19  ;;  %v4319_v28 = vmul.f32 %v4310_v0, %v9898_v34  ;;  %v4324_v39 = vmul.f32 %v4310_v0, %v9906_v51  ;;  %v4476_v19 = vperm.slane %v4472_v24, 2 }
0x1018   : > { %v4277_v30 = vsel %vm11516_vm9, %v4261_v6, %v4276_v27  ;;  %vm11522_vm9 = vmmov %vm11519_vm4 }
0x1019   : > { %4285 = vst [vmem:[#allocation3 + $0x78] sm:$0xff] %v4277_v30  ;;  %v4328_v31 = vpack.c.bf16 %v4319_v28, %v4318_v26  ;;  %v4331_v49 = vpack.c.bf16 %v4324_v39, %v4318_v26 }
0x101b   : > { %4340 = vrot.lane.b32.xlu2 %v4328_v31, %s11497_s24 }
0x101c   : > { %v4307_v18 = vpop.permute.xlu0 %4306 }
0x101d   : > { %v4311_v32 = vsel %vm11520_vm15, %v4305_v13, %v4307_v18  ;;  %v4309_v33 = vpop.permute.xlu1 %4308  ;;  %vm11523_vm15 = vmmov %vm11519_vm4 }
0x101e   : > { %v4320_v36 = vmul.f32 %v4311_v32, %v9924_v3  ;;  %v4312_v52 = vsel %vm11521_vm14, %v4307_v18, %v4309_v33  ;;  %v4322_v37 = vmul.f32 %v4309_v33, %v9961_v17  ;;  %v4327_v8 = vmul.f32 %v4309_v33, %v9969_v57  ;;  %vm11524_vm14 = vmmov %vm11519_vm4 }
0x101f   : > { %v4321_v38 = vmul.f32 %v4312_v52, %v9941_v9  ;;  %v4325_v11 = vmul.f32 %v4311_v32, %v9930_v16  ;;  %v4326_v41 = vmul.f32 %v4312_v52, %v9948_v47 }
0x1020   : > { %v4330_v40 = vpack.c.bf16 %v4322_v37, %v4322_v37  ;;  %v4333_v43 = vpack.c.bf16 %v4327_v8, %v4327_v8  ;;  %v4477_v8 = vperm.slane %v4472_v24, 3 }
0x1021   : > { %v4329_v50 = vpack.c.bf16 %v4321_v38, %v4320_v36  ;;  %v4332_v44 = vpack.c.bf16 %v4326_v41, %v4325_v11 }
0x1022   : > { %4344 = vrot.lane.b32.xlu1 %v4330_v40, %s11497_s24 }
0x1023   : > { %4342 = vrot.lane.b32.xlu0 %v4329_v50, %s11497_s24  ;;  %4346 = vrot.lane.b32.xlu2 %v4331_v49, %s11497_s24  ;;  %v4474_v49 = vperm.slane %v4472_v24, 0  ;;  %v4475_v50 = vperm.slane %v4472_v24, 1 }
0x102a   : > { %4350 = vrot.lane.b32.xlu1 %v4333_v43, %s11497_s24 }
0x102b   : > { %4348 = vrot.lane.b32.xlu0 %v4332_v44, %s11497_s24  ;;  %4390 = vrot.lane.b32.xlu2 %v4386_v42, %s11496_s15 }
0x1032   : > { %4394 = vrot.lane.b32.xlu1 %v4388_v45, %s11496_s15 }
0x1033   : > { %4392 = vrot.lane.b32.xlu0 %v4387_v46, %s11496_s15  ;;  %4396 = vrot.lane.b32.xlu2 %v4389_v29, %s11496_s15 }
0x1075   : > { %v4341_v48 = vpop.permute.xlu2 %4340 }
0x1076   : > { %v4352_v1 = vrot.slane %v4341_v48, 4 }
0x107d   : > { %v4347_v53 = vpop.permute.xlu2 %4346 }
0x107e   : > { %v4355_v20 = vrot.slane %v4347_v53, 4 }
0x1085   : > { %v4391_v54 = vpop.permute.xlu2 %4390 }
0x1086   : > { %v4406_v31 = vmul.f32 0.0, %v4391_v54 }
0x108d   : > { %v4397_v55 = vpop.permute.xlu2 %4396 }
0x108e   : > { %v4410_v58 = vmul.f32 %v4397_v55, %v9961_v17  ;;  %v4415_v60 = vmul.f32 %v4397_v55, %v9969_v57 }
0x1090   : > { %v4418_v59 = vpack.c.bf16 %v4410_v58, %v4410_v58  ;;  %v4421_v4 = vpack.c.bf16 %v4415_v60, %v4415_v60 }
0x1092   : > { %4432 = vrot.lane.b32.xlu2 %v4418_v59, %s11495_s21 }
0x1094   : > { %v4345_v35 = vpop.permute.xlu1 %4344 }
0x1095   : > { %v4354_v62 = vrot.slane %v4345_v35, 4  ;;  %v4343_v63 = vpop.permute.xlu0 %4342 }
0x1096   : > { %v4353_v2 = vrot.slane %v4343_v63, 4 }
0x1098   : > { %v4358_v5 = vsel %vm641_vm5, %v4352_v1, %v4353_v2  ;;  %v4360_v61 = vsel %vm641_vm5, %v4353_v2, %v4354_v62 }
0x1099   : > { %v4359_v6 = vsel %vm11519_vm4, %v4341_v48, %v4358_v5  ;;  %v4361_v7 = vsel %vm11522_vm9, %v4343_v63, %v4360_v61  ;;  %vm11525_vm4 = vcmask 531456  }
0x109a   : > { %4370 = vst [vmem:[#allocation3 + $0x80] sm:$0xff] %v4359_v6  ;;  %4438 = vrot.lane.b32.xlu2 %v4421_v4, %s11495_s21  ;;  %vm11526_vm9 = vmmov %vm11525_vm4 }
0x109b   : > { %4371 = vst [vmem:[#allocation3 + $0x88] sm:$0xff] %v4361_v7  ;;  %vm11527_vm13 = vmmov %vm11525_vm4 }
0x109c   : > { %v4351_v12 = vpop.permute.xlu1 %4350 }
0x109d   : > { %v4357_v14 = vrot.slane %v4351_v12, 4  ;;  %v4349_v15 = vpop.permute.xlu0 %4348 }
0x109e   : > { %v4356_v21 = vrot.slane %v4349_v15, 4 }
0x10a0   : > { %v4362_v22 = vsel %vm641_vm5, %v4355_v20, %v4356_v21  ;;  %v4364_v23 = vsel %vm641_vm5, %v4356_v21, %v4357_v14 }
0x10a1   : > { %v4363_v25 = vsel %vm11523_vm15, %v4347_v53, %v4362_v22  ;;  %v4365_v13 = vsel %vm11524_vm14, %v4349_v15, %v4364_v23 }
0x10a2   : > { %4372 = vst [vmem:[#allocation3 + $0x90] sm:$0xff] %v4363_v25  ;;  %4482 = vrot.lane.b32.xlu2 %v4476_v19, %s11515_s28 }
0x10a3   : > { %4373 = vst [vmem:[#allocation3 + $0x98] sm:$0xff] %v4365_v13 }
0x10a4   : > { %v4395_v56 = vpop.permute.xlu1 %4394 }
0x10a5   : > { %v4400_v26 = vsel %vm11525_vm4, %v4395_v56, %v4397_v55  ;;  %v4393_v0 = vpop.permute.xlu0 %4392 }
0x10a6   : > { %v4409_v27 = vmul.f32 %v4400_v26, %v9941_v9  ;;  %v4398_v28 = vsel %vm11526_vm9, %v4391_v54, %v4393_v0  ;;  %v4399_v30 = vsel %vm11527_vm13, %v4393_v0, %v4395_v56  ;;  %v4414_v36 = vmul.f32 %v4400_v26, %v9948_v47  ;;  %v4560_v26 = vld [vmem:[#allocation8 + $0x1c] sm:$0xf] }
0x10a7   : > { %v4407_v18 = vmul.f32 %v4398_v28, %v9898_v34  ;;  %v4408_v39 = vmul.f32 %v4399_v30, %v9924_v3  ;;  %v4412_v52 = vmul.f32 %v4398_v28, %v9906_v51  ;;  %v4413_v37 = vmul.f32 %v4399_v30, %v9930_v16 }
0x10a8   : > { %v4562_v28 = vperm.slane %v4560_v26, 0  ;;  %vm11534_vm13 = vcmask 64512   ;;  %vm11538_vm9 = vcmask 990208  }
0x10a9   : > { %v4416_v32 = vpack.c.bf16 %v4407_v18, %v4406_v31  ;;  %v4417_v33 = vpack.c.bf16 %v4409_v27, %v4408_v39  ;;  %v4419_v38 = vpack.c.bf16 %v4412_v52, %v4406_v31  ;;  %v4420_v40 = vpack.c.bf16 %v4414_v36, %v4413_v37  ;;  %vm11535_vm15 = vmmov %vm11534_vm13 }
0x10aa   : > { %v4564_v18 = vperm.slane %v4560_v26, 2  ;;  %v4565_v39 = vperm.slane %v4560_v26, 3  ;;  %vm11536_vm14 = vmmov %vm11534_vm13 }
0x10ab   : > { %4428 = vrot.lane.b32.xlu0 %v4416_v32, %s11495_s21  ;;  %4430 = vrot.lane.b32.xlu1 %v4417_v33, %s11495_s21  ;;  %v4563_v32 = vperm.slane %v4560_v26, 1  ;;  %vm11537_vm4 = vmmov %vm11534_vm13 }
0x10b3   : > { %4434 = vrot.lane.b32.xlu0 %v4419_v38, %s11495_s21  ;;  %4436 = vrot.lane.b32.xlu1 %v4420_v40, %s11495_s21 }
0x10bb   : > { %4478 = vrot.lane.b32.xlu0 %v4474_v49, %s11515_s28  ;;  %4480 = vrot.lane.b32.xlu1 %v4475_v50, %s11515_s28 }
0x10c3   : > { %4484 = vrot.lane.b32.xlu0 %v4477_v8, %s11515_s28 }
0x10ec   : > { %v4433_v10 = vpop.permute.xlu2 %4432 }
0x10ed   : > { %v4442_v42 = vrot.slane %v4433_v10, 4 }
0x10f4   : > { %v4439_v53 = vpop.permute.xlu2 %4438 }
0x10f5   : > { %v4445_v58 = vrot.slane %v4439_v53, 4 }
0x10fc   : > { %v4483_v7 = vpop.permute.xlu2 %4482 }
0x111d   : > { %v4429_v11 = vpop.permute.xlu0 %4428  ;;  %v4431_v41 = vpop.permute.xlu1 %4430 }
0x111e   : > { %v4440_v43 = vrot.slane %v4429_v11, 4  ;;  %v4441_v44 = vrot.slane %v4431_v41, 4 }
0x1120   : > { %v4446_v45 = vsel %vm641_vm5, %v4440_v43, %v4441_v44  ;;  %v4448_v46 = vsel %vm641_vm5, %v4441_v44, %v4442_v42 }
0x1121   : > { %v4447_v29 = vsel %vm866_vm3, %v4429_v11, %v4446_v45  ;;  %v4449_v48 = vsel %vm866_vm3, %v4431_v41, %v4448_v46 }
0x1122   : > { %4458 = vst [vmem:[#allocation3 + $0xa0] sm:$0xff] %v4447_v29 }
0x1123   : > { %4459 = vst [vmem:[#allocation3 + $0xa8] sm:$0xff] %v4449_v48 }
0x1125   : > { %v4435_v54 = vpop.permute.xlu0 %4434  ;;  %v4437_v55 = vpop.permute.xlu1 %4436 }
0x1126   : > { %v4443_v59 = vrot.slane %v4435_v54, 4  ;;  %v4444_v60 = vrot.slane %v4437_v55, 4 }
0x1128   : > { %v4450_v35 = vsel %vm641_vm5, %v4443_v59, %v4444_v60  ;;  %v4452_v62 = vsel %vm641_vm5, %v4444_v60, %v4445_v58 }
0x1129   : > { %v4451_v63 = vsel %vm866_vm3, %v4435_v54, %v4450_v35  ;;  %v4453_v1 = vsel %vm866_vm3, %v4437_v55, %v4452_v62 }
0x112a   : > { %4460 = vst [vmem:[#allocation3 + $0xb0] sm:$0xff] %v4451_v63 }
0x112b   : > { %4461 = vst [vmem:[#allocation3 + $0xb8] sm:$0xff] %v4453_v1 }
0x112d   : > { %v4479_v2 = vpop.permute.xlu0 %4478  ;;  %v4481_v4 = vpop.permute.xlu1 %4480 }
0x112e   : > { %v4494_v5 = vmul.f32 0.0, %v4479_v2  ;;  %v4486_v61 = vsel %vm825_vm8, %v4479_v2, %v4481_v4  ;;  %v4487_v14 = vsel %vm825_vm8, %v4481_v4, %v4483_v7 }
0x112f   : > { %v4495_v6 = vmul.f32 %v4486_v61, %v9898_v34  ;;  %v4500_v15 = vmul.f32 %v4486_v61, %v9906_v51  ;;  %v4496_v23 = vmul.f32 %v4487_v14, %v9924_v3  ;;  %v4501_v27 = vmul.f32 %v4487_v14, %v9930_v16 }
0x1131   : > { %v4504_v12 = vpack.c.bf16 %v4495_v6, %v4494_v5  ;;  %v4507_v24 = vpack.c.bf16 %v4500_v15, %v4494_v5 }
0x1133   : > { %4516 = vrot.lane.b32.xlu1 %v4504_v12, %s11514_s14 }
0x1135   : > { %v4485_v20 = vpop.permute.xlu0 %4484 }
0x1136   : > { %v4488_v21 = vsel %vm825_vm8, %v4483_v7, %v4485_v20  ;;  %v4498_v22 = vmul.f32 %v4485_v20, %v9961_v17  ;;  %v4503_v56 = vmul.f32 %v4485_v20, %v9969_v57  ;;  %v4648_v20 = vld [vmem:[#allocation8 + $0x20] sm:$0xf] }
0x1137   : > { %v4497_v25 = vmul.f32 %v4488_v21, %v9941_v9  ;;  %v4502_v0 = vmul.f32 %v4488_v21, %v9948_v47 }
0x1138   : > { %v4506_v13 = vpack.c.bf16 %v4498_v22, %v4498_v22  ;;  %v4509_v30 = vpack.c.bf16 %v4503_v56, %v4503_v56  ;;  %v4651_v56 = vperm.slane %v4648_v20, 1 }
0x1139   : > { %v4505_v19 = vpack.c.bf16 %v4497_v25, %v4496_v23  ;;  %v4508_v31 = vpack.c.bf16 %v4502_v0, %v4501_v27  ;;  %v4650_v23 = vperm.slane %v4648_v20, 0 }
0x113a   : > { %4520 = vrot.lane.b32.xlu0 %v4506_v13, %s11514_s14 }
0x113b   : > { %4518 = vrot.lane.b32.xlu2 %v4505_v19, %s11514_s14  ;;  %4522 = vrot.lane.b32.xlu1 %v4507_v24, %s11514_s14  ;;  %v4652_v24 = vperm.slane %v4648_v20, 2  ;;  %v4653_v19 = vperm.slane %v4648_v20, 3 }
0x1142   : > { %4526 = vrot.lane.b32.xlu0 %v4509_v30, %s11514_s14 }
0x1143   : > { %4524 = vrot.lane.b32.xlu2 %v4508_v31, %s11514_s14  ;;  %4566 = vrot.lane.b32.xlu1 %v4562_v28, %s11513_s18 }
0x114a   : > { %4570 = vrot.lane.b32.xlu0 %v4564_v18, %s11513_s18 }
0x114b   : > { %4572 = vrot.lane.b32.xlu1 %v4565_v39, %s11513_s18  ;;  %4568 = vrot.lane.b32.xlu2 %v4563_v32, %s11513_s18 }
0x1195   : > { %v4519_v33 = vpop.permute.xlu2 %4518 }
0x1196   : > { %v4529_v52 = vrot.slane %v4519_v33, 4 }
0x119d   : > { %v4525_v49 = vpop.permute.xlu2 %4524 }
0x119e   : > { %v4532_v11 = vrot.slane %v4525_v49, 4 }
0x11a5   : > { %v4517_v36 = vpop.permute.xlu1 %4516  ;;  %v4569_v46 = vpop.permute.xlu2 %4568 }
0x11a6   : > { %v4528_v37 = vrot.slane %v4517_v36, 4 }
0x11a8   : > { %v4534_v38 = vsel %vm641_vm5, %v4528_v37, %v4529_v52 }
0x11a9   : > { %v4535_v40 = vsel %vm775_vm2, %v4517_v36, %v4534_v38 }
0x11aa   : > { %4546 = vst [vmem:[#allocation3 + $0xc0] sm:$0xff] %v4535_v40 }
0x11ac   : > { %v4521_v50 = vpop.permute.xlu0 %4520 }
0x11ad   : > { %v4530_v8 = vrot.slane %v4521_v50, 4  ;;  %v4523_v10 = vpop.permute.xlu1 %4522 }
0x11ae   : > { %v4531_v41 = vrot.slane %v4523_v10, 4 }
0x11af   : > { %v4536_v42 = vsel %vm641_vm5, %v4529_v52, %v4530_v8 }
0x11b0   : > { %v4537_v43 = vsel %vm775_vm2, %v4519_v33, %v4536_v42  ;;  %v4538_v44 = vsel %vm641_vm5, %v4531_v41, %v4532_v11 }
0x11b1   : > { %4547 = vst [vmem:[#allocation3 + $0xc8] sm:$0xff] %v4537_v43  ;;  %v4539_v45 = vsel %vm775_vm2, %v4523_v10, %v4538_v44 }
0x11b2   : > { %4548 = vst [vmem:[#allocation3 + $0xd0] sm:$0xff] %v4539_v45 }
0x11b4   : > { %v4527_v29 = vpop.permute.xlu0 %4526 }
0x11b5   : > { %v4533_v48 = vrot.slane %v4527_v29, 4  ;;  %v4567_v53 = vpop.permute.xlu1 %4566 }
0x11b6   : > { %v4574_v54 = vsel %vm734_vm7, %v4567_v53, %v4569_v46  ;;  %v4582_v55 = vmul.f32 0.0, %v4567_v53 }
0x11b7   : > { %v4540_v58 = vsel %vm641_vm5, %v4532_v11, %v4533_v48  ;;  %v4583_v59 = vmul.f32 %v4574_v54, %v9898_v34  ;;  %v4588_v63 = vmul.f32 %v4574_v54, %v9906_v51 }
0x11b8   : > { %v4541_v60 = vsel %vm775_vm2, %v4525_v49, %v4540_v58 }
0x11b9   : > { %4549 = vst [vmem:[#allocation3 + $0xd8] sm:$0xff] %v4541_v60  ;;  %v4592_v35 = vpack.c.bf16 %v4583_v59, %v4582_v55  ;;  %v4595_v12 = vpack.c.bf16 %v4588_v63, %v4582_v55 }
0x11bb   : > { %4604 = vrot.lane.b32.xlu2 %v4592_v35, %s11468_s20 }
0x11bc   : > { %v4571_v62 = vpop.permute.xlu0 %4570 }
0x11bd   : > { %v4575_v1 = vsel %vm734_vm7, %v4569_v46, %v4571_v62  ;;  %v4573_v2 = vpop.permute.xlu1 %4572 }
0x11be   : > { %v4584_v4 = vmul.f32 %v4575_v1, %v9924_v3  ;;  %v4576_v5 = vsel %vm734_vm7, %v4571_v62, %v4573_v2  ;;  %v4586_v61 = vmul.f32 %v4573_v2, %v9961_v17  ;;  %v4591_v15 = vmul.f32 %v4573_v2, %v9969_v57  ;;  %v4736_v62 = vld [vmem:[#allocation8 + $0x24] sm:$0xf] }
0x11bf   : > { %v4585_v6 = vmul.f32 %v4576_v5, %v9941_v9  ;;  %v4589_v21 = vmul.f32 %v4575_v1, %v9930_v16  ;;  %v4590_v22 = vmul.f32 %v4576_v5, %v9948_v47  ;;  %v4740_v63 = vperm.slane %v4736_v62, 2 }
0x11c0   : > { %v4594_v7 = vpack.c.bf16 %v4586_v61, %v4586_v61  ;;  %v4597_v25 = vpack.c.bf16 %v4591_v15, %v4591_v15  ;;  %v8003_v15 = vld [vmem:[#allocation3 + $0xc0] sm:$0xf] }
0x11c1   : > { %v4593_v14 = vpack.c.bf16 %v4585_v6, %v4584_v4  ;;  %v4596_v13 = vpack.c.bf16 %v4590_v22, %v4589_v21  ;;  %v8497_v6 = vld [vmem:[#allocation3 + $0xcc] sm:$0xf0] }
0x11c2   : > { %4608 = vrot.lane.b32.xlu1 %v4594_v7, %s11468_s20  ;;  %v8004_v20 = vor.u32 %v8497_v6, %v8003_v15  ;;  %v8493_v21 = vld [vmem:[#allocation3 + $0xac] sm:$0xf0] }
0x11c3   : > { %4610 = vrot.lane.b32.xlu2 %v4595_v12, %s11468_s20  ;;  %4606 = vrot.lane.b32.xlu0 %v4593_v14, %s11468_s20 }
0x11ca   : > { %4614 = vrot.lane.b32.xlu1 %v4597_v25, %s11468_s20  ;;  %v7987_v25 = vld [vmem:[#allocation3 + $0xa0] sm:$0xf] }
0x11cb   : > { %4654 = vrot.lane.b32.xlu2 %v4650_v23, %s11466_s25  ;;  %4612 = vrot.lane.b32.xlu0 %v4596_v13, %s11468_s20  ;;  %v7988_v13 = vor.u32 %v8493_v21, %v7987_v25  ;;  %s11542_s20 = smov 127  }
0x11d2   : > { %4658 = vrot.lane.b32.xlu1 %v4652_v24, %s11466_s25  ;;  %v8489_v24 = vld [vmem:[#allocation3 + $0x8c] sm:$0xf0] }
0x11d3   : > { %4660 = vrot.lane.b32.xlu2 %v4653_v19, %s11466_s25  ;;  %4656 = vrot.lane.b32.xlu0 %v4651_v56, %s11466_s25  ;;  %v7971_v19 = vld [vmem:[#allocation3 + $0x80] sm:$0xf]  ;;  %s11541_s25 = smov 1  }
0x11d4   : > { %v7972_v56 = vor.u32 %v8489_v24, %v7971_v19  ;;  %v4824_v24 = vld [vmem:[#allocation8 + $0x28] sm:$0xf] }
0x1215   : > { %v4605_v26 = vpop.permute.xlu2 %4604 }
0x1216   : > { %v4616_v36 = vrot.slane %v4605_v26, 4 }
0x121d   : > { %v4611_v0 = vpop.permute.xlu2 %4610 }
0x121e   : > { %v4619_v41 = vrot.slane %v4611_v0, 4 }
0x1225   : > { %v4655_v27 = vpop.permute.xlu2 %4654 }
0x1226   : > { %v4670_v59 = vmul.f32 0.0, %v4655_v27 }
0x122d   : > { %v4661_v28 = vpop.permute.xlu2 %4660 }
0x122e   : > { %v4674_v30 = vmul.f32 %v4661_v28, %v9961_v17  ;;  %v4679_v18 = vmul.f32 %v4661_v28, %v9969_v57 }
0x1230   : > { %v4682_v31 = vpack.c.bf16 %v4674_v30, %v4674_v30  ;;  %v4685_v37 = vpack.c.bf16 %v4679_v18, %v4679_v18  ;;  %v7939_v18 = vld [vmem:[#allocation3 + $0x40] sm:$0xf] }
0x1232   : > { %4696 = vrot.lane.b32.xlu2 %v4682_v31, %s11464_s19  ;;  %v8481_v31 = vld [vmem:[#allocation3 + $0x4c] sm:$0xf0] }
0x1234   : > { %v4609_v39 = vpop.permute.xlu1 %4608 }
0x1235   : > { %v4618_v32 = vrot.slane %v4609_v39, 4  ;;  %v4607_v33 = vpop.permute.xlu0 %4606  ;;  %v7940_v39 = vor.u32 %v8481_v31, %v7939_v18  ;;  %v4827_v31 = vperm.slane %v4824_v24, 1 }
0x1236   : > { %v4617_v52 = vrot.slane %v4607_v33, 4 }
0x1238   : > { %v4622_v38 = vsel %vm641_vm5, %v4616_v36, %v4617_v52  ;;  %v4624_v40 = vsel %vm641_vm5, %v4617_v52, %v4618_v32  ;;  %v4741_v32 = vperm.slane %v4736_v62, 3  ;;  %v7923_v36 = vld [vmem:[#allocation3 + $0x20] sm:$0xf] }
0x1239   : > { %v4623_v49 = vsel %vm684_vm1, %v4605_v26, %v4622_v38  ;;  %v4625_v50 = vsel %vm684_vm1, %v4607_v33, %v4624_v40  ;;  %v4739_v26 = vperm.slane %v4736_v62, 1  ;;  %v8477_v33 = vld [vmem:[#allocation3 + $0x2c] sm:$0xf0]  ;;  %v7907_v38 = vld [vmem:[#allocation3] sm:$0xf] }
0x123a   : > { %4634 = vst [vmem:[#allocation3 + $0xe0] sm:$0xff] %v4623_v49  ;;  %4702 = vrot.lane.b32.xlu2 %v4685_v37, %s11464_s19  ;;  %v7924_v52 = vor.u32 %v8477_v33, %v7923_v36  ;;  %v8473_v37 = vld [vmem:[#allocation3 + $0xc] sm:$0xf0] }
0x123b   : > { %4635 = vst [vmem:[#allocation3 + $0xe8] sm:$0xff] %v4625_v50  ;;  %v7908_v40 = vor.u32 %v8473_v37, %v7907_v38 }
0x123c   : > { %v4615_v8 = vpop.permute.xlu1 %4614 }
0x123d   : > { %v4621_v10 = vrot.slane %v4615_v8, 4  ;;  %v4613_v11 = vpop.permute.xlu0 %4612 }
0x123e   : > { %v4620_v42 = vrot.slane %v4613_v11, 4 }
0x1240   : > { %v4626_v43 = vsel %vm641_vm5, %v4619_v41, %v4620_v42  ;;  %v4628_v44 = vsel %vm641_vm5, %v4620_v42, %v4621_v10 }
0x1241   : > { %v4627_v45 = vsel %vm684_vm1, %v4611_v0, %v4626_v43  ;;  %v4629_v46 = vsel %vm684_vm1, %v4613_v11, %v4628_v44  ;;  %v8019_v4 = vld [vmem:[#allocation3 + $0xe0] sm:$0xf]  ;;  %v4738_v0 = vperm.slane %v4736_v62, 0 }
0x1242   : > { %4636 = vst [vmem:[#allocation3 + $0xf0] sm:$0xff] %v4627_v45  ;;  %4746 = vrot.lane.b32.xlu2 %v4740_v63, %s11528_s22 }
0x1243   : > { %4637 = vst [vmem:[#allocation3 + $0xf8] sm:$0xff] %v4629_v46 }
0x1244   : > { %v4659_v29 = vpop.permute.xlu1 %4658 }
0x1245   : > { %v4664_v48 = vsel %vm643_vm6, %v4659_v29, %v4661_v28  ;;  %v4657_v53 = vpop.permute.xlu0 %4656  ;;  %v7955_v28 = vld [vmem:[#allocation3 + $0x60] sm:$0xf] }
0x1246   : > { %v4673_v54 = vmul.f32 %v4664_v48, %v9941_v9  ;;  %v4662_v55 = vsel %vm643_vm6, %v4655_v27, %v4657_v53  ;;  %v4663_v58 = vsel %vm643_vm6, %v4657_v53, %v4659_v29  ;;  %v4678_v7 = vmul.f32 %v4664_v48, %v9948_v47  ;;  %v8485_v27 = vld [vmem:[#allocation3 + $0x6c] sm:$0xf0] }
0x1247   : > { %v4671_v60 = vmul.f32 %v4662_v55, %v9898_v34  ;;  %v4672_v35 = vmul.f32 %v4663_v58, %v9924_v3  ;;  %v4676_v12 = vmul.f32 %v4662_v55, %v9906_v51  ;;  %v4677_v14 = vmul.f32 %v4663_v58, %v9930_v16 }
0x1248   : > { %v7956_v30 = vor.u32 %v8485_v27, %v7955_v28  ;;  %v4828_v28 = vperm.slane %v4824_v24, 2 }
0x1249   : > { %v4680_v1 = vpack.c.bf16 %v4671_v60, %v4670_v59  ;;  %v4681_v2 = vpack.c.bf16 %v4673_v54, %v4672_v35  ;;  %v8501_v5 = vld [vmem:[#allocation3 + $0xec] sm:$0xf0]  ;;  %v4683_v22 = vpack.c.bf16 %v4676_v12, %v4670_v59  ;;  %v4684_v23 = vpack.c.bf16 %v4678_v7, %v4677_v14 }
0x124a   : > { %v8020_v61 = vor.u32 %v8501_v5, %v8019_v4 }
0x124b   : > { %4694 = vrot.lane.b32.xlu1 %v4681_v2, %s11464_s19  ;;  %4692 = vrot.lane.b32.xlu0 %v4680_v1, %s11464_s19 }
0x124c   : > { %6940 = vmatpush.bf16.msra.mxu3 %v8020_v61 }
0x1250   : > { %6941 = vmatpush.bf16.msra.mxu3 %v8004_v20 }
0x1253   : > { %4700 = vrot.lane.b32.xlu1 %v4684_v23, %s11464_s19  ;;  %4698 = vrot.lane.b32.xlu0 %v4683_v22, %s11464_s19  ;;  %s11533_s19 = smov 7  }
0x1254   : > { %6942 = vmatpush.bf16.msra.mxu3 %v7988_v13 }
0x1258   : > { %6943 = vmatpush.bf16.msra.mxu3 %v7972_v56 }
0x125b   : > { %4744 = vrot.lane.b32.xlu1 %v4739_v26, %s11528_s22  ;;  %4742 = vrot.lane.b32.xlu0 %v4738_v0, %s11528_s22  ;;  %v4826_v26 = vperm.slane %v4824_v24, 0 }
0x125c   : > { %6944 = vmatpush.bf16.msra.mxu3 %v7956_v30  ;;  %v4829_v30 = vperm.slane %v4824_v24, 3 }
0x1260   : > { %6945 = vmatpush.bf16.msra.mxu3 %v7940_v39 }
0x1263   : > { %4748 = vrot.lane.b32.xlu0 %v4741_v32, %s11528_s22 }
0x1264   : > { %6946 = vmatpush.bf16.msra.mxu3 %v7924_v52 }
0x1268   : > { %6947 = vmatpush.bf16.msra.mxu3 %v7908_v40 }
0x128c   : > { %v4697_v49 = vpop.permute.xlu2 %4696 }
0x128d   : > { %v4706_v10 = vrot.slane %v4697_v49, 4 }
0x1294   : > { %v4703_v46 = vpop.permute.xlu2 %4702 }
0x1295   : > { %v4709_v53 = vrot.slane %v4703_v46, 4 }
0x129c   : > { %v4747_v5 = vpop.permute.xlu2 %4746 }
0x12bd   : > { %v4695_v50 = vpop.permute.xlu1 %4694  ;;  %v4693_v8 = vpop.permute.xlu0 %4692 }
0x12be   : > { %v4705_v11 = vrot.slane %v4695_v50, 4  ;;  %v4704_v41 = vrot.slane %v4693_v8, 4 }
0x12c0   : > { %v4712_v42 = vsel %vm641_vm5, %v4705_v11, %v4706_v10  ;;  %v4710_v43 = vsel %vm641_vm5, %v4704_v41, %v4705_v11 }
0x12c1   : > { %v4713_v44 = vsel %vm592_vm0, %v4695_v50, %v4712_v42  ;;  %v4711_v45 = vsel %vm592_vm0, %v4693_v8, %v4710_v43 }
0x12c2   : > { %4723 = vst [vmem:[#allocation3 + $0x108] sm:$0xff] %v4713_v44 }
0x12c3   : > { %4722 = vst [vmem:[#allocation3 + $0x100] sm:$0xff] %v4711_v45 }
0x12c5   : > { %v4701_v29 = vpop.permute.xlu1 %4700  ;;  %v4699_v48 = vpop.permute.xlu0 %4698 }
0x12c6   : > { %v4708_v54 = vrot.slane %v4701_v29, 4  ;;  %v4707_v55 = vrot.slane %v4699_v48, 4 }
0x12c8   : > { %v4716_v58 = vsel %vm641_vm5, %v4708_v54, %v4709_v53  ;;  %v4714_v59 = vsel %vm641_vm5, %v4707_v55, %v4708_v54 }
0x12c9   : > { %v4717_v60 = vsel %vm592_vm0, %v4701_v29, %v4716_v58  ;;  %v4715_v35 = vsel %vm592_vm0, %v4699_v48, %v4714_v59 }
0x12ca   : > { %4725 = vst [vmem:[#allocation3 + $0x118] sm:$0xff] %v4717_v60 }
0x12cb   : > { %4724 = vst [vmem:[#allocation3 + $0x110] sm:$0xff] %v4715_v35 }
0x12cd   : > { %v4745_v62 = vpop.permute.xlu1 %4744  ;;  %v4743_v63 = vpop.permute.xlu0 %4742 }
0x12ce   : > { %v4750_v1 = vsel %vm1412_vm10, %v4743_v63, %v4745_v62  ;;  %v4758_v2 = vmul.f32 0.0, %v4743_v63  ;;  %v4751_v6 = vsel %vm1412_vm10, %v4745_v62, %v4747_v5 }
0x12cf   : > { %v4759_v4 = vmul.f32 %v4750_v1, %v9898_v34  ;;  %v4764_v7 = vmul.f32 %v4750_v1, %v9906_v51  ;;  %v4760_v20 = vmul.f32 %v4751_v6, %v9924_v3  ;;  %v4765_v56 = vmul.f32 %v4751_v6, %v9930_v16 }
0x12d1   : > { %v4768_v61 = vpack.c.bf16 %v4759_v4, %v4758_v2  ;;  %v4771_v23 = vpack.c.bf16 %v4764_v7, %v4758_v2 }
0x12d3   : > { %4780 = vrot.lane.b32.xlu1 %v4768_v61, %s11529_s27 }
0x12d5   : > { %v4749_v12 = vpop.permute.xlu0 %4748 }
0x12d6   : > { %v4752_v14 = vsel %vm1412_vm10, %v4747_v5, %v4749_v12  ;;  %v4762_v15 = vmul.f32 %v4749_v12, %v9961_v17  ;;  %v4767_v13 = vmul.f32 %v4749_v12, %v9969_v57  ;;  %v4912_v12 = vld [vmem:[#allocation8 + $0x2c] sm:$0xf] }
0x12d7   : > { %v4761_v21 = vmul.f32 %v4752_v14, %v9941_v9  ;;  %v4766_v19 = vmul.f32 %v4752_v14, %v9948_v47 }
0x12d8   : > { %v4770_v22 = vpack.c.bf16 %v4762_v15, %v4762_v15  ;;  %v4773_v0 = vpack.c.bf16 %v4767_v13, %v4767_v13  ;;  %v4917_v13 = vperm.slane %v4912_v12, 3 }
0x12d9   : > { %v4769_v25 = vpack.c.bf16 %v4761_v21, %v4760_v20  ;;  %v4772_v27 = vpack.c.bf16 %v4766_v19, %v4765_v56  ;;  %v4914_v20 = vperm.slane %v4912_v12, 0 }
0x12da   : > { %4784 = vrot.lane.b32.xlu0 %v4770_v22, %s11529_s27 }
0x12db   : > { %4786 = vrot.lane.b32.xlu1 %v4771_v23, %s11529_s27  ;;  %4782 = vrot.lane.b32.xlu2 %v4769_v25, %s11529_s27  ;;  %v4916_v23 = vperm.slane %v4912_v12, 2  ;;  %v4915_v25 = vperm.slane %v4912_v12, 1 }
0x12e2   : > { %4790 = vrot.lane.b32.xlu0 %v4773_v0, %s11529_s27 }
0x12e3   : > { %4830 = vrot.lane.b32.xlu1 %v4826_v26, %s11530_s29  ;;  %4788 = vrot.lane.b32.xlu2 %v4772_v27, %s11529_s27 }
0x12ea   : > { %4834 = vrot.lane.b32.xlu0 %v4828_v28, %s11530_s29  ;;  %v5210_v28 = vld [vmem:[#allocation8 + $0x3c] sm:$0xf] }
0x12eb   : > { %4836 = vrot.lane.b32.xlu1 %v4829_v30, %s11530_s29  ;;  %4832 = vrot.lane.b32.xlu2 %v4827_v31, %s11530_s29 }
0x1335   : > { %v4783_v18 = vpop.permute.xlu2 %4782 }
0x1336   : > { %v4793_v32 = vrot.slane %v4783_v18, 4 }
0x133d   : > { %v4789_v37 = vpop.permute.xlu2 %4788 }
0x133e   : > { %v4796_v50 = vrot.slane %v4789_v37, 4 }
0x1345   : > { %v4781_v39 = vpop.permute.xlu1 %4780  ;;  %v4833_v43 = vpop.permute.xlu2 %4832 }
0x1346   : > { %v4792_v33 = vrot.slane %v4781_v39, 4 }
0x1348   : > { %v4798_v36 = vsel %vm641_vm5, %v4792_v33, %v4793_v32  ;;  %v5213_v33 = vperm.slane %v5210_v28, 1 }
0x1349   : > { %v4799_v52 = vsel %vm1462_vm11, %v4781_v39, %v4798_v36 }
0x134a   : > { %4810 = vst [vmem:[#allocation3 + $0x120] sm:$0xff] %v4799_v52 }
0x134c   : > { %v4785_v38 = vpop.permute.xlu0 %4784 }
0x134d   : > { %v4794_v40 = vrot.slane %v4785_v38, 4  ;;  %v4787_v49 = vpop.permute.xlu1 %4786 }
0x134e   : > { %v4795_v8 = vrot.slane %v4787_v49, 4 }
0x134f   : > { %v4800_v10 = vsel %vm641_vm5, %v4793_v32, %v4794_v40  ;;  %v5914_v40 = vld [vmem:[#allocation8 + $0x5c] sm:$0xf] }
0x1350   : > { %v4801_v11 = vsel %vm1462_vm11, %v4783_v18, %v4800_v10  ;;  %v4802_v41 = vsel %vm641_vm5, %v4795_v8, %v4796_v50 }
0x1351   : > { %4811 = vst [vmem:[#allocation3 + $0x128] sm:$0xff] %v4801_v11  ;;  %v4803_v42 = vsel %vm1462_vm11, %v4787_v49, %v4802_v41  ;;  %v5916_v41 = vperm.slane %v5914_v40, 0 }
0x1352   : > { %4812 = vst [vmem:[#allocation3 + $0x130] sm:$0xff] %v4803_v42 }
0x1354   : > { %v4791_v44 = vpop.permute.xlu0 %4790 }
0x1355   : > { %v4797_v45 = vrot.slane %v4791_v44, 4  ;;  %v4831_v46 = vpop.permute.xlu1 %4830 }
0x1356   : > { %v4846_v29 = vmul.f32 0.0, %v4831_v46  ;;  %v4838_v48 = vsel %vm1503_vm12, %v4831_v46, %v4833_v43 }
0x1357   : > { %v4804_v53 = vsel %vm641_vm5, %v4796_v50, %v4797_v45  ;;  %v4847_v54 = vmul.f32 %v4838_v48, %v9898_v34  ;;  %v4852_v60 = vmul.f32 %v4838_v48, %v9906_v51 }
0x1358   : > { %v4805_v55 = vsel %vm1462_vm11, %v4789_v37, %v4804_v53  ;;  %v5919_v53 = vperm.slane %v5914_v40, 3 }
0x1359   : > { %4813 = vst [vmem:[#allocation3 + $0x138] sm:$0xff] %v4805_v55  ;;  %v4856_v58 = vpack.c.bf16 %v4847_v54, %v4846_v29  ;;  %v4859_v61 = vpack.c.bf16 %v4852_v60, %v4846_v29 }
0x135b   : > { %4868 = vrot.lane.b32.xlu2 %v4856_v58, %s11531_s23 }
0x135c   : > { %v4835_v59 = vpop.permute.xlu0 %4834 }
0x135d   : > { %v4839_v35 = vsel %vm1503_vm12, %v4833_v43, %v4835_v59  ;;  %v4837_v62 = vpop.permute.xlu1 %4836 }
0x135e   : > { %v4848_v63 = vmul.f32 %v4839_v35, %v9924_v3  ;;  %v4840_v1 = vsel %vm1503_vm12, %v4835_v59, %v4837_v62  ;;  %v4850_v2 = vmul.f32 %v4837_v62, %v9961_v17  ;;  %v4855_v7 = vmul.f32 %v4837_v62, %v9969_v57 }
0x135f   : > { %v4849_v4 = vmul.f32 %v4840_v1, %v9941_v9  ;;  %v4853_v14 = vmul.f32 %v4839_v35, %v9930_v16  ;;  %v4854_v15 = vmul.f32 %v4840_v1, %v9948_v47 }
0x1360   : > { %v4858_v5 = vpack.c.bf16 %v4850_v2, %v4850_v2  ;;  %v4861_v21 = vpack.c.bf16 %v4855_v7, %v4855_v7  ;;  %v5212_v7 = vperm.slane %v5210_v28, 0 }
0x1361   : > { %v4857_v6 = vpack.c.bf16 %v4849_v4, %v4848_v63  ;;  %v4860_v22 = vpack.c.bf16 %v4854_v15, %v4853_v14  ;;  %v5826_v14 = vld [vmem:[#allocation8 + $0x58] sm:$0xf] }
0x1362   : > { %4872 = vrot.lane.b32.xlu1 %v4858_v5, %s11531_s23  ;;  %v5122_v5 = vld [vmem:[#allocation8 + $0x38] sm:$0xf]  ;;  %v5829_v15 = vperm.slane %v5826_v14, 1 }
0x1363   : > { %4870 = vrot.lane.b32.xlu0 %v4857_v6, %s11531_s23  ;;  %4874 = vrot.lane.b32.xlu2 %v4859_v61, %s11531_s23  ;;  %v5126_v6 = vperm.slane %v5122_v5, 2 }
0x136a   : > { %4878 = vrot.lane.b32.xlu1 %v4861_v21, %s11531_s23  ;;  %v5215_v21 = vperm.slane %v5210_v28, 3 }
0x136b   : > { %4876 = vrot.lane.b32.xlu0 %v4860_v22, %s11531_s23  ;;  %4918 = vrot.lane.b32.xlu2 %v4914_v20, %s11532_s26  ;;  %v5214_v20 = vperm.slane %v5210_v28, 2  ;;  %v5738_v22 = vld [vmem:[#allocation8 + $0x54] sm:$0xf]  ;;  %v5127_v28 = vperm.slane %v5122_v5, 3 }
0x1372   : > { %4922 = vrot.lane.b32.xlu1 %v4916_v23, %s11532_s26  ;;  %v5740_v23 = vperm.slane %v5738_v22, 0 }
0x1373   : > { %4920 = vrot.lane.b32.xlu0 %v4915_v25, %s11532_s26  ;;  %4924 = vrot.lane.b32.xlu2 %v4917_v13, %s11532_s26  ;;  %v5917_v25 = vperm.slane %v5914_v40, 1  ;;  %v5918_v13 = vperm.slane %v5914_v40, 2 }
0x13b5   : > { %v4869_v24 = vpop.permute.xlu2 %4868 }
0x13b6   : > { %v4880_v39 = vrot.slane %v4869_v24, 4 }
0x13bd   : > { %v4875_v19 = vpop.permute.xlu2 %4874 }
0x13be   : > { %v4883_v10 = vrot.slane %v4875_v19, 4 }
0x13c5   : > { %v4919_v56 = vpop.permute.xlu2 %4918 }
0x13c6   : > { %v4934_v60 = vmul.f32 0.0, %v4919_v56 }
0x13cd   : > { %v10267_v26 = vpop.permute.xlu2 %4924 }
0x13ce   : > { %v4938_v0 = vmul.f32 %v10267_v26, %v9961_v17 }
0x13d0   : > { %v4946_v27 = vpack.c.bf16 %v4938_v0, %v4938_v0  ;;  %v5000_v0 = vld [vmem:[#allocation8 + $0x30] sm:$0xf] }
0x13d1   : > { %v5002_v40 = vperm.slane %v5000_v0, 0 }
0x13d2   : > { %4960 = vrot.lane.b32.xlu2 %v4946_v27, %s11533_s19  ;;  %v5004_v27 = vperm.slane %v5000_v0, 2 }
0x13d4   : > { %v4873_v30 = vpop.permute.xlu1 %4872 }
0x13d5   : > { %v4882_v31 = vrot.slane %v4873_v30, 4  ;;  %v4871_v18 = vpop.permute.xlu0 %4870  ;;  %v5828_v30 = vperm.slane %v5826_v14, 0 }
0x13d6   : > { %v4881_v32 = vrot.slane %v4871_v18, 4 }
0x13d8   : > { %v4886_v36 = vsel %vm641_vm5, %v4880_v39, %v4881_v32  ;;  %v4888_v52 = vsel %vm641_vm5, %v4881_v32, %v4882_v31  ;;  %v5650_v31 = vld [vmem:[#allocation8 + $0x50] sm:$0xf]  ;;  %v5830_v39 = vperm.slane %v5826_v14, 2  ;;  %v5831_v32 = vperm.slane %v5826_v14, 3 }
0x13d9   : > { %v4887_v37 = vsel %vm11534_vm13, %v4869_v24, %v4886_v36  ;;  %v4889_v38 = vsel %vm11535_vm15, %v4871_v18, %v4888_v52  ;;  %vm11539_vm13 = vmmov %vm11538_vm9  ;;  %v5743_v24 = vperm.slane %v5738_v22, 3  ;;  %v5653_v18 = vperm.slane %v5650_v31, 1 }
0x13da   : > { %4898 = vst [vmem:[#allocation3 + $0x140] sm:$0xff] %v4887_v37  ;;  %5218 = vrot.lane.b32.xlu2 %v5213_v33, %s11533_s19  ;;  %vm11540_vm15 = vmmov %vm11538_vm9  ;;  %v5562_v33 = vld [vmem:[#allocation8 + $0x4c] sm:$0xf]  ;;  %v5741_v52 = vperm.slane %v5738_v22, 1  ;;  %v5742_v37 = vperm.slane %v5738_v22, 2 }
0x13db   : > { %4899 = vst [vmem:[#allocation3 + $0x148] sm:$0xff] %v4889_v38  ;;  %v5564_v36 = vperm.slane %v5562_v33, 0  ;;  %v5567_v38 = vperm.slane %v5562_v33, 3 }
0x13dc   : > { %v4879_v49 = vpop.permute.xlu1 %4878 }
0x13dd   : > { %v4885_v50 = vrot.slane %v4879_v49, 4  ;;  %v4877_v8 = vpop.permute.xlu0 %4876  ;;  %v5003_v49 = vperm.slane %v5000_v0, 1 }
0x13de   : > { %v4884_v11 = vrot.slane %v4877_v8, 4 }
0x13e0   : > { %v4890_v42 = vsel %vm641_vm5, %v4883_v10, %v4884_v11  ;;  %v4892_v43 = vsel %vm641_vm5, %v4884_v11, %v4885_v50  ;;  %v6178_v50 = vld [vmem:[#allocation8 + $0x68] sm:$0xf]  ;;  %v5005_v11 = vperm.slane %v5000_v0, 3 }
0x13e1   : > { %v4891_v44 = vsel %vm11536_vm14, %v4875_v19, %v4890_v42  ;;  %v4893_v45 = vsel %vm11537_vm4, %v4877_v8, %v4892_v43  ;;  %v5124_v19 = vperm.slane %v5122_v5, 0  ;;  %v6182_v10 = vperm.slane %v6178_v50, 2  ;;  %v5474_v42 = vld [vmem:[#allocation8 + $0x48] sm:$0xf] }
0x13e2   : > { %4900 = vst [vmem:[#allocation3 + $0x150] sm:$0xff] %v4891_v44  ;;  %5920 = vrot.lane.b32.xlu2 %v5916_v41, %s11496_s15  ;;  %v5652_v41 = vperm.slane %v5650_v31, 0  ;;  %v5477_v44 = vperm.slane %v5474_v42, 1  ;;  %vm11546_vm14 = vcmask 56320  }
0x13e3   : > { %4901 = vst [vmem:[#allocation3 + $0x158] sm:$0xff] %v4893_v45  ;;  %v5654_v45 = vperm.slane %v5650_v31, 2  ;;  %vm11547_vm4 = vmmov %vm11546_vm14 }
0x13e4   : > { %v4923_v46 = vpop.permute.xlu1 %4922 }
0x13e5   : > { %v4928_v29 = vsel %vm11538_vm9, %v4923_v46, %v10267_v26  ;;  %v4921_v48 = vpop.permute.xlu0 %4920  ;;  %vm11548_vm9 = vmmov %vm11547_vm4 }
0x13e6   : > { %v4937_v54 = vmul.f32 %v4928_v29, %v9941_v9  ;;  %v10286_v55 = vmul.f32 %v4928_v29, %v9948_v47  ;;  %v4926_v58 = vsel %vm11539_vm13, %v4919_v56, %v4921_v48  ;;  %v4927_v59 = vsel %vm11540_vm15, %v4921_v48, %v4923_v46  ;;  %v6090_v29 = vld [vmem:[#allocation8 + $0x64] sm:$0xf] }
0x13e7   : > { %v4935_v35 = vmul.f32 %v4926_v58, %v9898_v34  ;;  %v4936_v62 = vmul.f32 %v4927_v59, %v9924_v3  ;;  %v10293_v63 = vmul.f32 %v4927_v59, %v9930_v16  ;;  %v4940_v61 = vmul.f32 %v4926_v58, %v9906_v51 }
0x13e8   : > { %v5125_v56 = vperm.slane %v5122_v5, 1  ;;  %v5655_v46 = vperm.slane %v5650_v31, 3  ;;  %v5566_v58 = vperm.slane %v5562_v33, 2  ;;  %v6093_v0 = vperm.slane %v6090_v29, 1 }
0x13e9   : > { %v4944_v1 = vpack.c.bf16 %v4935_v35, %v4934_v60  ;;  %v4945_v2 = vpack.c.bf16 %v4937_v54, %v4936_v62  ;;  %v4948_v4 = vpack.c.bf16 %v10286_v55, %v10293_v63  ;;  %v4947_v12 = vpack.c.bf16 %v4940_v61, %v4934_v60 }
0x13ea   : > { %5926 = vrot.lane.b32.xlu2 %v5919_v53, %s11496_s15  ;;  %v6092_v53 = vperm.slane %v6090_v29, 0  ;;  %v5565_v54 = vperm.slane %v5562_v33, 1  ;;  %v6095_v60 = vperm.slane %v6090_v29, 3  ;;  %v6180_v35 = vperm.slane %v6178_v50, 0 }
0x13eb   : > { %4956 = vrot.lane.b32.xlu0 %v4944_v1, %s11533_s19  ;;  %4958 = vrot.lane.b32.xlu1 %v4945_v2, %s11533_s19  ;;  %v6181_v62 = vperm.slane %v6178_v50, 1  ;;  %v5386_v1 = vld [vmem:[#allocation8 + $0x44] sm:$0xf]  ;;  %v6183_v61 = vperm.slane %v6178_v50, 3  ;;  %vm11549_vm13 = vcmask 531456  }
0x13ec   : > { %v5390_v5 = vperm.slane %v5386_v1, 2  ;;  %vm11550_vm15 = vmmov %vm11549_vm13 }
0x13f2   : > { %5132 = vrot.lane.b32.xlu2 %v5126_v6, %s11541_s25  ;;  %v5476_v6 = vperm.slane %v5474_v42, 0 }
0x13f3   : > { %4962 = vrot.lane.b32.xlu0 %v4947_v12, %s11533_s19  ;;  %5216 = vrot.lane.b32.xlu1 %v5212_v7, %s11533_s19  ;;  %v6002_v7 = vld [vmem:[#allocation8 + $0x60] sm:$0xf] }
0x13f4   : > { %v6005_v14 = vperm.slane %v6002_v7, 1 }
0x13fa   : > { %5834 = vrot.lane.b32.xlu2 %v5829_v15, %s11497_s24  ;;  %v5478_v15 = vperm.slane %v5474_v42, 2 }
0x13fb   : > { %5220 = vrot.lane.b32.xlu0 %v5214_v20, %s11533_s19  ;;  %5222 = vrot.lane.b32.xlu1 %v5215_v21, %s11533_s19  ;;  %v5479_v20 = vperm.slane %v5474_v42, 3  ;;  %v10353_v21 = vld [vmem:[#allocation8 + $0x40] sm:$0xf] }
0x1402   : > { %5744 = vrot.lane.b32.xlu2 %v5740_v23, %s11495_s21 }
0x1403   : > { %5922 = vrot.lane.b32.xlu0 %v5917_v25, %s11496_s15  ;;  %5924 = vrot.lane.b32.xlu1 %v5918_v13, %s11496_s15 }
0x140a   : > { %5750 = vrot.lane.b32.xlu2 %v5743_v24, %s11495_s21 }
0x140b   : > { %5128 = vrot.lane.b32.xlu0 %v5124_v19, %s11541_s25  ;;  %5130 = vrot.lane.b32.xlu1 %v5125_v56, %s11541_s25  ;;  %v5300_v56 = vperm.slane %v10353_v21, 0 }
0x1412   : > { %5010 = vrot.lane.b32.xlu2 %v5004_v27, %s11542_s20  ;;  %v6094_v27 = vperm.slane %v6090_v29, 2 }
0x1413   : > { %5134 = vrot.lane.b32.xlu0 %v5127_v28, %s11541_s25  ;;  %5832 = vrot.lane.b32.xlu1 %v5828_v30, %s11497_s24 }
0x141a   : > { %5658 = vrot.lane.b32.xlu2 %v5653_v18, %s11514_s14 }
0x141b   : > { %5836 = vrot.lane.b32.xlu0 %v5830_v39, %s11497_s24  ;;  %5838 = vrot.lane.b32.xlu1 %v5831_v32, %s11497_s24 }
0x1422   : > { %5568 = vrot.lane.b32.xlu2 %v5564_v36, %s11543_s0  ;;  %v5303_v36 = vperm.slane %v10353_v21, 3 }
0x1423   : > { %5746 = vrot.lane.b32.xlu0 %v5741_v52, %s11495_s21  ;;  %5748 = vrot.lane.b32.xlu1 %v5742_v37, %s11495_s21  ;;  %v5388_v52 = vperm.slane %v5386_v1, 0  ;;  %v5389_v37 = vperm.slane %v5386_v1, 1 }
0x142a   : > { %5574 = vrot.lane.b32.xlu2 %v5567_v38, %s11543_s0 }
0x142b   : > { %5006 = vrot.lane.b32.xlu0 %v5002_v40, %s11542_s20  ;;  %5008 = vrot.lane.b32.xlu1 %v5003_v49, %s11542_s20 }
0x142c   : > { %v4961_v8 = vpop.permute.xlu2 %4960 }
0x142d   : > { %v4970_v13 = vrot.slane %v4961_v8, 4 }
0x1432   : > { %6188 = vrot.lane.b32.xlu2 %v6182_v10, %s11544_s2 }
0x1433   : > { %5012 = vrot.lane.b32.xlu0 %v5005_v11, %s11542_s20  ;;  %5656 = vrot.lane.b32.xlu1 %v5652_v41, %s11514_s14  ;;  %v5391_v11 = vperm.slane %v5386_v1, 3  ;;  %v6004_v41 = vperm.slane %v6002_v7, 0 }
0x1434   : > { %v10328_v43 = vpop.permute.xlu2 %5218 }
0x143a   : > { %5482 = vrot.lane.b32.xlu2 %v5477_v44, %s11545_s3 }
0x143b   : > { %5660 = vrot.lane.b32.xlu0 %v5654_v45, %s11514_s14  ;;  %5662 = vrot.lane.b32.xlu1 %v5655_v46, %s11514_s14 }
0x143c   : > { %v10333_v48 = vpop.permute.xlu2 %5920 }
0x1442   : > { %6096 = vrot.lane.b32.xlu2 %v6092_v53, %s11513_s18 }
0x1443   : > { %5570 = vrot.lane.b32.xlu0 %v5565_v54, %s11543_s0  ;;  %5572 = vrot.lane.b32.xlu1 %v5566_v58, %s11543_s0 }
0x1444   : > { %v10338_v59 = vpop.permute.xlu2 %5926 }
0x144a   : > { %6102 = vrot.lane.b32.xlu2 %v6095_v60, %s11513_s18  ;;  %v6006_v60 = vperm.slane %v6002_v7, 2 }
0x144b   : > { %6184 = vrot.lane.b32.xlu0 %v6180_v35, %s11544_s2  ;;  %6186 = vrot.lane.b32.xlu1 %v6181_v62, %s11544_s2  ;;  %v6007_v35 = vperm.slane %v6002_v7, 3 }
0x144c   : > { %v10343_v2 = vpop.permute.xlu2 %5132 }
0x1452   : > { %5396 = vrot.lane.b32.xlu2 %v5390_v5, %s11529_s27 }
0x1453   : > { %6190 = vrot.lane.b32.xlu0 %v6183_v61, %s11544_s2  ;;  %5480 = vrot.lane.b32.xlu1 %v5476_v6, %s11545_s3 }
0x1454   : > { %v10348_v12 = vpop.permute.xlu2 %5834 }
0x145a   : > { %6010 = vrot.lane.b32.xlu2 %v6005_v14, %s11515_s28 }
0x145b   : > { %5484 = vrot.lane.b32.xlu0 %v5478_v15, %s11545_s3  ;;  %5486 = vrot.lane.b32.xlu1 %v5479_v20, %s11545_s3  ;;  %v5301_v15 = vperm.slane %v10353_v21, 1  ;;  %v5302_v20 = vperm.slane %v10353_v21, 2 }
0x145c   : > { %v10355_v22 = vpop.permute.xlu2 %5744 }
0x145d   : > { %v4957_v23 = vpop.permute.xlu0 %4956  ;;  %v4959_v25 = vpop.permute.xlu1 %4958 }
0x145e   : > { %v4968_v24 = vrot.slane %v4957_v23, 4  ;;  %v4969_v19 = vrot.slane %v4959_v25, 4 }
0x1460   : > { %v4974_v28 = vsel %vm641_vm5, %v4968_v24, %v4969_v19  ;;  %v4976_v30 = vsel %vm641_vm5, %v4969_v19, %v4970_v13 }
0x1461   : > { %v4975_v31 = vsel %vm11546_vm14, %v4957_v23, %v4974_v28  ;;  %v4977_v18 = vsel %vm11547_vm4, %v4959_v25, %v4976_v30  ;;  %vm11551_vm14 = vcmask 7168  }
0x1462   : > { %4986 = vst [vmem:[#allocation3 + $0x160] sm:$0xff] %v4975_v31  ;;  %5304 = vrot.lane.b32.xlu2 %v5300_v56, %s11531_s23 }
0x1463   : > { %4987 = vst [vmem:[#allocation3 + $0x168] sm:$0xff] %v4977_v18  ;;  %6098 = vrot.lane.b32.xlu0 %v6093_v0, %s11513_s18  ;;  %6100 = vrot.lane.b32.xlu1 %v6094_v27, %s11513_s18 }
0x1464   : > { %v10365_v39 = vpop.permute.xlu2 %5750 }
0x1465   : > { %v10367_v32 = vpop.permute.xlu0 %4962  ;;  %v5217_v33 = vpop.permute.xlu1 %5216 }
0x1466   : > { %v5224_v38 = vsel %vm11548_vm9, %v5217_v33, %v10328_v43  ;;  %v5237_v40 = vmul.f32 %v5217_v33, %v9906_v51  ;;  %vm11552_vm9 = vmmov %vm11547_vm4  ;;  %v5232_v21 = vmul.f32 %v5217_v33, %v9898_v34 }
0x1467   : > { %v5238_v49 = vmul.f32 %v5224_v38, %v9930_v16  ;;  %v5233_v56 = vmul.f32 %v5224_v38, %v9924_v3 }
0x1469   : > { %v5245_v42 = vpack.c.bf16 %v5238_v49, %v5237_v40 }
0x146a   : > { %5310 = vrot.lane.b32.xlu2 %v5303_v36, %s11531_s23 }
0x146b   : > { %5392 = vrot.lane.b32.xlu0 %v5388_v52, %s11529_s27  ;;  %5394 = vrot.lane.b32.xlu1 %v5389_v37, %s11529_s27  ;;  %v5242_v52 = vpack.c.bf16 %v5233_v56, %v5232_v21 }
0x146c   : > { %v10377_v50 = vpop.permute.xlu2 %5010 }
0x146d   : > { %v5221_v8 = vpop.permute.xlu0 %5220  ;;  %v10379_v10 = vpop.permute.xlu1 %5222 }
0x146e   : > { %v5225_v25 = vsel %vm11547_vm4, %v10328_v43, %v5221_v8  ;;  %v5226_v13 = vsel %vm11552_vm9, %v5221_v8, %v10379_v10  ;;  %vm11556_vm4 = vcmask 523264   ;;  %vm11557_vm9 = vcmask 1039360  }
0x146f   : > { %v5234_v43 = vmul.f32 %v5225_v25, %v9941_v9  ;;  %v5235_v0 = vmul.f32 %v5226_v13, %v9961_v17  ;;  %v5239_v40 = vmul.f32 %v5225_v25, %v9948_v47  ;;  %v5240_v49 = vmul.f32 %v5226_v13, %v9969_v57 }
0x1470   : > { %v5941_v25 = vmul.f32 %v10333_v48, %v9906_v51 }
0x1471   : > { %v5243_v36 = vpack.c.bf16 %v5235_v0, %v5234_v43 }
0x1472   : > { %5260 = vrot.lane.b32.xlu2 %v5245_v42, %s11532_s26 }
0x1473   : > { %5398 = vrot.lane.b32.xlu0 %v5391_v11, %s11529_s27  ;;  %6008 = vrot.lane.b32.xlu1 %v6004_v41, %s11515_s28  ;;  %s11592_s27 = sld [smem:[#allocation26_spill]] }
0x1474   : > { %v10384_v44 = vpop.permute.xlu2 %5658 }
0x1475   : > { %v5923_v45 = vpop.permute.xlu0 %5922  ;;  %v5925_v46 = vpop.permute.xlu1 %5924 }
0x1476   : > { %v5929_v29 = vsel %vm11549_vm13, %v5923_v45, %v5925_v46  ;;  %v5930_v53 = vsel %vm11550_vm15, %v5925_v46, %v10338_v59  ;;  %vm11553_vm13 = vmmov %vm11551_vm14  ;;  %v5936_v46 = vmul.f32 %v10333_v48, %v9898_v34 }
0x1477   : > { %v5938_v54 = vmul.f32 %v5929_v29, %v9941_v9  ;;  %v5939_v58 = vmul.f32 %v5930_v53, %v9961_v17  ;;  %vm11554_vm15 = vmmov %vm11553_vm13 }
0x1479   : > { %v5947_v62 = vpack.c.bf16 %v5939_v58, %v5938_v54  ;;  %v5246_v54 = vpack.c.bf16 %v5240_v49, %v5239_v40 }
0x147b   : > { %6012 = vrot.lane.b32.xlu0 %v6006_v60, %s11515_s28  ;;  %6014 = vrot.lane.b32.xlu1 %v6007_v35, %s11515_s28 }
0x147c   : > { %5960 = vrot.lane.b32.xlu2 %v5947_v62, %s11495_s21  ;;  %v10394_v1 = vpop.permute.xlu2 %5568 }
0x147d   : > { %v10396_v5 = vpop.permute.xlu0 %5128  ;;  %v5131_v61 = vpop.permute.xlu1 %5130  ;;  %v5589_v55 = vmul.f32 %v10394_v1, %v9906_v51 }
0x147e   : > { %v5144_v6 = vmul.f32 %v10396_v5, %v9898_v34  ;;  %v10402_v14 = vsel %vm11551_vm14, %v10396_v5, %v5131_v61  ;;  %v5137_v24 = vsel %vm11553_vm13, %v5131_v61, %v10343_v2  ;;  %vm11555_vm14 = vcmask 531456   ;;  %vm11558_vm13 = vmmov %vm11556_vm4 }
0x147f   : > { %v5145_v7 = vmul.f32 %v10402_v14, %v9924_v3  ;;  %v5151_v31 = vmul.f32 %v5137_v24, %v9948_v47  ;;  %v5928_v37 = vsel %vm11555_vm14, %v10333_v48, %v5923_v45  ;;  %v5943_v61 = vmul.f32 %v5929_v29, %v9948_v47  ;;  %vm11560_vm14 = vmmov %vm11557_vm9 }
0x1480   : > { %v5937_v8 = vmul.f32 %v5928_v37, %v9924_v3  ;;  %v5942_v62 = vmul.f32 %v5928_v37, %v9930_v16  ;;  %v5149_v48 = vmul.f32 %v10396_v5, %v9906_v51  ;;  %v5150_v0 = vmul.f32 %v10402_v14, %v9930_v16 }
0x1481   : > { %v5154_v23 = vpack.c.bf16 %v5145_v7, %v5144_v6  ;;  %v5944_v6 = vmul.f32 %v5930_v53, %v9969_v57  ;;  %v5146_v37 = vmul.f32 %v5137_v24, %v9941_v9 }
0x1482   : > { %v5946_v58 = vpack.c.bf16 %v5937_v8, %v5936_v46  ;;  %v5949_v21 = vpack.c.bf16 %v5942_v62, %v5941_v25  ;;  %v5157_v49 = vpack.c.bf16 %v5150_v0, %v5149_v48  ;;  %v5760_v0 = vmul.f32 %v10355_v22, %v9898_v34 }
0x1483   : > { %5306 = vrot.lane.b32.xlu0 %v5301_v15, %s11531_s23  ;;  %5308 = vrot.lane.b32.xlu1 %v5302_v20, %s11531_s23  ;;  %v5950_v53 = vpack.c.bf16 %v5944_v6, %v5943_v61 }
0x1484   : > { %5166 = vrot.lane.b32.xlu2 %v5154_v23, %s11542_s20  ;;  %v10417_v19 = vpop.permute.xlu2 %5574 }
0x1485   : > { %v10423_v27 = vpop.permute.xlu0 %5134  ;;  %v10425_v28 = vpop.permute.xlu1 %5832 }
0x1486   : > { %v5138_v30 = vsel %vm11554_vm15, %v10343_v2, %v10423_v27  ;;  %v5840_v38 = vsel %vm11556_vm4, %v10425_v28, %v10348_v12  ;;  %v5853_v42 = vmul.f32 %v10425_v28, %v9906_v51  ;;  %vm11559_vm15 = vmmov %vm11556_vm4 }
0x1487   : > { %v5152_v18 = vmul.f32 %v5138_v30, %v9969_v57  ;;  %v5854_v45 = vmul.f32 %v5840_v38, %v9930_v16  ;;  %v5849_v46 = vmul.f32 %v5840_v38, %v9924_v3  ;;  %vm11561_vm4 = vmmov %vm11557_vm9 }
0x1489   : > { %v5158_v33 = vpack.c.bf16 %v5152_v18, %v5151_v31  ;;  %v5861_v60 = vpack.c.bf16 %v5854_v45, %v5853_v42  ;;  %v5147_v31 = vmul.f32 %v5138_v30, %v9961_v17  ;;  %v5848_v45 = vmul.f32 %v10425_v28, %v9898_v34 }
0x148b   : > { %5254 = vrot.lane.b32.xlu0 %v5242_v52, %s11532_s26  ;;  %5256 = vrot.lane.b32.xlu1 %v5243_v36, %s11532_s26  ;;  %v5155_v8 = vpack.c.bf16 %v5147_v31, %v5146_v37  ;;  %v5858_v6 = vpack.c.bf16 %v5849_v46, %v5848_v45  ;;  %v5765_v45 = vmul.f32 %v10355_v22, %v9906_v51 }
0x148c   : > { %5174 = vrot.lane.b32.xlu2 %v5158_v33, %s11542_s20  ;;  %v10440_v2 = vpop.permute.xlu2 %6188  ;;  %v5584_v46 = vmul.f32 %v10394_v1, %v9898_v34 }
0x148d   : > { %v5837_v11 = vpop.permute.xlu0 %5836  ;;  %v10445_v41 = vpop.permute.xlu1 %5838 }
0x148e   : > { %v5841_v14 = vsel %vm11558_vm13, %v10348_v12, %v5837_v11  ;;  %v5842_v30 = vsel %vm11559_vm15, %v5837_v11, %v10445_v41 }
0x148f   : > { %v5850_v12 = vmul.f32 %v5841_v14, %v9941_v9  ;;  %v5851_v11 = vmul.f32 %v5842_v30, %v9961_v17 }
0x1491   : > { %v5859_v28 = vpack.c.bf16 %v5851_v11, %v5850_v12 }
0x1493   : > { %5262 = vrot.lane.b32.xlu0 %v5246_v54, %s11532_s26  ;;  %5958 = vrot.lane.b32.xlu1 %v5946_v58, %s11495_s21 }
0x1494   : > { %5876 = vrot.lane.b32.xlu2 %v5861_v60, %s11497_s24  ;;  %v10455_v35 = vpop.permute.xlu2 %5482 }
0x1495   : > { %v5747_v7 = vpop.permute.xlu0 %5746  ;;  %v5749_v15 = vpop.permute.xlu1 %5748 }
0x1496   : > { %v10461_v20 = vsel %vm866_vm3, %v5747_v7, %v5749_v15  ;;  %v10465_v23 = vsel %vm866_vm3, %v5749_v15, %v10365_v39  ;;  %v5752_v38 = vsel %vm866_vm3, %v10355_v22, %v5747_v7 }
0x1497   : > { %v5762_v13 = vmul.f32 %v10461_v20, %v9941_v9  ;;  %v5763_v29 = vmul.f32 %v10465_v23, %v9961_v17 }
0x1499   : > { %v5771_v56 = vpack.c.bf16 %v5763_v29, %v5762_v13  ;;  %v5855_v13 = vmul.f32 %v5841_v14, %v9948_v47  ;;  %v5856_v29 = vmul.f32 %v5842_v30, %v9969_v57 }
0x149b   : > { %5964 = vrot.lane.b32.xlu0 %v5949_v21, %s11495_s21  ;;  %5966 = vrot.lane.b32.xlu1 %v5950_v53, %s11495_s21  ;;  %v5761_v21 = vmul.f32 %v5752_v38, %v9924_v3  ;;  %v5862_v31 = vpack.c.bf16 %v5856_v29, %v5855_v13 }
0x149c   : > { %5784 = vrot.lane.b32.xlu2 %v5771_v56, %s11496_s15  ;;  %v10476_v43 = vpop.permute.xlu2 %6096 }
0x149d   : > { %v5007_v18 = vpop.permute.xlu0 %5006  ;;  %v5009_v36 = vpop.permute.xlu1 %5008  ;;  %v6112_v63 = vmul.f32 %v10476_v43, %v9898_v34 }
0x149e   : > { %v10483_v33 = vmul.f32 0.0, %v5007_v18  ;;  %v10486_v52 = vsel %vm11557_vm9, %v5007_v18, %v5009_v36  ;;  %v5015_v24 = vsel %vm11560_vm14, %v5009_v36, %v10377_v50  ;;  %v5770_v18 = vpack.c.bf16 %v5761_v21, %v5760_v0 }
0x149f   : > { %v5023_v40 = vmul.f32 %v10486_v52, %v9898_v34  ;;  %v5029_v62 = vmul.f32 %v5015_v24, %v9930_v16  ;;  %v5024_v21 = vmul.f32 %v5015_v24, %v9924_v3  ;;  %vm11562_vm9 = vcmask 64512  }
0x14a0   : > { %vm11563_vm13 = vmmov %vm11562_vm9 }
0x14a1   : > { %v5032_v5 = vpack.c.bf16 %v5023_v40, %v10483_v33  ;;  %v5766_v40 = vmul.f32 %v5752_v38, %v9930_v16  ;;  %vm11566_vm14 = vmmov %vm11562_vm9 }
0x14a3   : > { %5168 = vrot.lane.b32.xlu0 %v5155_v8, %s11542_s20  ;;  %5172 = vrot.lane.b32.xlu1 %v5157_v49, %s11542_s20  ;;  %v5767_v49 = vmul.f32 %v10461_v20, %v9948_v47  ;;  %v5768_v8 = vmul.f32 %v10465_v23, %v9969_v57  ;;  %v5773_v11 = vpack.c.bf16 %v5766_v40, %v5765_v45 }
0x14a4   : > { %5044 = vrot.lane.b32.xlu2 %v5032_v5, %s11541_s25  ;;  %v10501_v42 = vpop.permute.xlu2 %6102 }
0x14a5   : > { %v10508_v54 = vpop.permute.xlu0 %5012  ;;  %v10510_v58 = vpop.permute.xlu1 %5656 }
0x14a6   : > { %v5016_v60 = vsel %vm11561_vm4, %v10377_v50, %v10508_v54  ;;  %v5664_v25 = vsel %vm775_vm2, %v10510_v58, %v10384_v44  ;;  %v5677_v56 = vmul.f32 %v10510_v58, %v9906_v51 }
0x14a7   : > { %v5030_v61 = vmul.f32 %v5016_v60, %v9948_v47  ;;  %v5678_v48 = vmul.f32 %v5664_v25, %v9930_v16 }
0x14a9   : > { %v5036_v15 = vpack.c.bf16 %v5030_v61, %v5029_v62  ;;  %v5685_v36 = vpack.c.bf16 %v5678_v48, %v5677_v56  ;;  %v5774_v62 = vpack.c.bf16 %v5768_v8, %v5767_v49 }
0x14ab   : > { %5870 = vrot.lane.b32.xlu0 %v5858_v6, %s11497_s24  ;;  %5872 = vrot.lane.b32.xlu1 %v5859_v28, %s11497_s24  ;;  %v5028_v6 = vmul.f32 %v10486_v52, %v9906_v51  ;;  %v5025_v28 = vmul.f32 %v5016_v60, %v9941_v9 }
0x14ac   : > { %5052 = vrot.lane.b32.xlu2 %v5036_v15, %s11541_s25  ;;  %v10525_v50 = vpop.permute.xlu2 %5396 }
0x14ad   : > { %v5661_v53 = vpop.permute.xlu0 %5660  ;;  %v10530_v7 = vpop.permute.xlu1 %5662  ;;  %v5035_v56 = vpack.c.bf16 %v5028_v6, %v10483_v33  ;;  %v5033_v48 = vpack.c.bf16 %v5025_v28, %v5024_v21  ;;  %v5672_v33 = vmul.f32 %v10510_v58, %v9898_v34 }
0x14ae   : > { %v5665_v0 = vsel %vm775_vm2, %v10384_v44, %v5661_v53  ;;  %v5666_v52 = vsel %vm775_vm2, %v5661_v53, %v10530_v7  ;;  %v5673_v44 = vmul.f32 %v5664_v25, %v9924_v3 }
0x14af   : > { %v5675_v53 = vmul.f32 %v5666_v52, %v9961_v17  ;;  %v5679_v25 = vmul.f32 %v5665_v0, %v9948_v47 }
0x14b3   : > { %5878 = vrot.lane.b32.xlu0 %v5862_v31, %s11497_s24  ;;  %5782 = vrot.lane.b32.xlu1 %v5770_v18, %s11496_s15  ;;  %v5674_v18 = vmul.f32 %v5665_v0, %v9941_v9 }
0x14b4   : > { %5700 = vrot.lane.b32.xlu2 %v5685_v36, %s11515_s28  ;;  %v10540_v37 = vpop.permute.xlu2 %6010 }
0x14b5   : > { %v5571_v5 = vpop.permute.xlu0 %5570  ;;  %v5573_v14 = vpop.permute.xlu1 %5572 }
0x14b6   : > { %v5576_v30 = vsel %vm684_vm1, %v10394_v1, %v5571_v5  ;;  %v5577_v20 = vsel %vm684_vm1, %v5571_v5, %v5573_v14  ;;  %v5578_v23 = vsel %vm684_vm1, %v5573_v14, %v10417_v19  ;;  %v5682_v5 = vpack.c.bf16 %v5673_v44, %v5672_v33 }
0x14b7   : > { %v5585_v12 = vmul.f32 %v5576_v30, %v9924_v3  ;;  %v5591_v13 = vmul.f32 %v5577_v20, %v9948_v47  ;;  %v5592_v29 = vmul.f32 %v5578_v23, %v9969_v57  ;;  %v5683_v14 = vpack.c.bf16 %v5675_v53, %v5674_v18 }
0x14b8   : > { %v5590_v21 = vmul.f32 %v5576_v30, %v9930_v16 }
0x14b9   : > { %v5594_v61 = vpack.c.bf16 %v5585_v12, %v5584_v46  ;;  %v5598_v31 = vpack.c.bf16 %v5592_v29, %v5591_v13  ;;  %v5680_v46 = vmul.f32 %v5666_v52, %v9969_v57 }
0x14ba   : > { %v5597_v30 = vpack.c.bf16 %v5590_v21, %v5589_v55 }
0x14bb   : > { %5788 = vrot.lane.b32.xlu0 %v5773_v11, %s11496_s15  ;;  %5790 = vrot.lane.b32.xlu1 %v5774_v62, %s11496_s15  ;;  %v5686_v13 = vpack.c.bf16 %v5680_v46, %v5679_v25 }
0x14bc   : > { %5606 = vrot.lane.b32.xlu2 %v5594_v61, %s11513_s18  ;;  %v10560_v22 = vpop.permute.xlu2 %5304 }
0x14bd   : > { %v10565_v15 = vpop.permute.xlu0 %6184  ;;  %v6187_v38 = vpop.permute.xlu1 %6186 }
0x14be   : > { %v6192_v60 = vsel %vm643_vm6, %v10565_v15, %v6187_v38  ;;  %v6205_v49 = vmul.f32 %v10565_v15, %v9906_v51  ;;  %v6193_v1 = vsel %vm643_vm6, %v6187_v38, %v10440_v2 }
0x14bf   : > { %v6206_v8 = vmul.f32 %v6192_v60, %v9930_v16  ;;  %v6207_v55 = vmul.f32 %v6193_v1, %v9948_v47 }
0x14c1   : > { %v6213_v45 = vpack.c.bf16 %v6206_v8, %v6205_v49  ;;  %v6200_v49 = vmul.f32 %v10565_v15, %v9898_v34  ;;  %v6201_v8 = vmul.f32 %v6192_v60, %v9924_v3 }
0x14c3   : > { %5046 = vrot.lane.b32.xlu0 %v5033_v48, %s11541_s25  ;;  %5050 = vrot.lane.b32.xlu1 %v5035_v56, %s11541_s25  ;;  %v5586_v56 = vmul.f32 %v5577_v20, %v9941_v9  ;;  %v5587_v48 = vmul.f32 %v5578_v23, %v9961_v17  ;;  %v6210_v38 = vpack.c.bf16 %v6201_v8, %v6200_v49 }
0x14c4   : > { %5614 = vrot.lane.b32.xlu2 %v5598_v31, %s11513_s18  ;;  %v10580_v24 = vpop.permute.xlu2 %5310 }
0x14c5   : > { %v10587_v36 = vpop.permute.xlu0 %6190  ;;  %v10589_v40 = vpop.permute.xlu1 %5480  ;;  %v5595_v20 = vpack.c.bf16 %v5587_v48, %v5586_v56 }
0x14c6   : > { %v6194_v44 = vsel %vm643_vm6, %v10440_v2, %v10587_v36  ;;  %v6202_v2 = vmul.f32 %v6193_v1, %v9941_v9  ;;  %v5488_v15 = vsel %vm592_vm0, %v10589_v40, %v10455_v35 }
0x14c7   : > { %v5497_v21 = vmul.f32 %v5488_v15, %v9924_v3 }
0x14cb   : > { %5694 = vrot.lane.b32.xlu0 %v5682_v5, %s11515_s28  ;;  %5696 = vrot.lane.b32.xlu1 %v5683_v14, %s11515_s28  ;;  %v6203_v5 = vmul.f32 %v6194_v44, %v9961_v17 }
0x14cc   : > { %6228 = vrot.lane.b32.xlu2 %v6213_v45, %s11545_s3  ;;  %v10597_v58 = vpop.permute.xlu2 %5260 }
0x14cd   : > { %v5485_v12 = vpop.permute.xlu0 %5484  ;;  %v10601_v11 = vpop.permute.xlu1 %5486 }
0x14ce   : > { %v10605_v62 = vsel %vm592_vm0, %v10455_v35, %v5485_v12  ;;  %v10609_v61 = vsel %vm592_vm0, %v5485_v12, %v10601_v11 }
0x14cf   : > { %v5498_v6 = vmul.f32 %v10605_v62, %v9941_v9  ;;  %v5499_v28 = vmul.f32 %v10609_v61, %v9961_v17  ;;  %v5504_v1 = vmul.f32 %v10609_v61, %v9969_v57 }
0x14d1   : > { %v5507_v29 = vpack.c.bf16 %v5499_v28, %v5498_v6  ;;  %v6211_v6 = vpack.c.bf16 %v6203_v5, %v6202_v2 }
0x14d3   : > { %5702 = vrot.lane.b32.xlu0 %v5686_v13, %s11515_s28  ;;  %4964 = vrot.lane.b32.xlu1 %v4948_v4, %s11533_s19  ;;  %v6208_v13 = vmul.f32 %v6194_v44, %v9969_v57  ;;  %v5503_v44 = vmul.f32 %v10605_v62, %v9948_v47 }
0x14d4   : > { %5520 = vrot.lane.b32.xlu2 %v5507_v29, %s11544_s2  ;;  %v5496_v29 = vmul.f32 %v10589_v40, %v9898_v34 }
0x14d5   : > { %v6099_v0 = vpop.permute.xlu0 %6098  ;;  %v6101_v52 = vpop.permute.xlu1 %6100  ;;  %v5510_v2 = vpack.c.bf16 %v5504_v1, %v5503_v44 }
0x14d6   : > { %v10626_v31 = vsel %vm734_vm7, %v10476_v43, %v6099_v0  ;;  %v10628_v33 = vpop.permute.xlu2 %5960  ;;  %v6105_v18 = vsel %vm734_vm7, %v6099_v0, %v6101_v52  ;;  %v6106_v53 = vsel %vm734_vm7, %v6101_v52, %v10501_v42 }
0x14d7   : > { %v6113_v4 = vmul.f32 %v10626_v31, %v9924_v3  ;;  %v6119_v25 = vmul.f32 %v6105_v18, %v9948_v47  ;;  %v6120_v46 = vmul.f32 %v6106_v53, %v9969_v57 }
0x14d9   : > { %v6122_v23 = vpack.c.bf16 %v6113_v4, %v6112_v63  ;;  %v6126_v60 = vpack.c.bf16 %v6120_v46, %v6119_v25  ;;  %v6214_v63 = vpack.c.bf16 %v6208_v13, %v6207_v55  ;;  %v5506_v4 = vpack.c.bf16 %v5497_v21, %v5496_v29 }
0x14da   : > { %v5236_v21 = vmul.f32 0.0, %v10379_v10 }
0x14db   : > { %5612 = vrot.lane.b32.xlu1 %v5597_v30, %s11513_s18  ;;  %5608 = vrot.lane.b32.xlu0 %v5595_v20, %s11513_s18  ;;  %v5501_v20 = vmul.f32 %v10589_v40, %v9906_v51 }
0x14dc   : > { %6134 = vrot.lane.b32.xlu2 %v6122_v23, %s11543_s0  ;;  %v5502_v23 = vmul.f32 %v5488_v15, %v9930_v16  ;;  %v6114_v15 = vmul.f32 %v6105_v18, %v9941_v9 }
0x14dd   : > { %v10651_v14 = vpop.permute.xlu0 %5392  ;;  %v5395_v45 = vpop.permute.xlu1 %5394 }
0x14de   : > { %v10655_v12 = vpop.permute.xlu2 %5166  ;;  %v5400_v28 = vsel %vm1462_vm11, %v10651_v14, %v5395_v45  ;;  %v5413_v48 = vmul.f32 %v10651_v14, %v9906_v51  ;;  %v5509_v61 = vpack.c.bf16 %v5502_v23, %v5501_v20 }
0x14df   : > { %v5414_v0 = vmul.f32 %v5400_v28, %v9930_v16 }
0x14e1   : > { %v5421_v30 = vpack.c.bf16 %v5414_v0, %v5413_v48  ;;  %v6117_v0 = vmul.f32 %v10476_v43, %v9906_v51  ;;  %v5401_v43 = vsel %vm1462_vm11, %v5395_v45, %v10525_v50 }
0x14e3   : > { %6224 = vrot.lane.b32.xlu1 %v6211_v6, %s11545_s3  ;;  %6222 = vrot.lane.b32.xlu0 %v6210_v38, %s11545_s3  ;;  %v6118_v6 = vmul.f32 %v10626_v31, %v9930_v16 }
0x14e4   : > { %6142 = vrot.lane.b32.xlu2 %v6126_v60, %s11543_s0  ;;  %v6115_v60 = vmul.f32 %v6106_v53, %v9961_v17  ;;  %v5408_v53 = vmul.f32 %v10651_v14, %v9898_v34  ;;  %v5410_v14 = vmul.f32 %v5401_v43, %v9941_v9 }
0x14e5   : > { %v10670_v56 = vpop.permute.xlu0 %5398  ;;  %v10672_v35 = vpop.permute.xlu1 %6008  ;;  %v6125_v55 = vpack.c.bf16 %v6118_v6, %v6117_v0  ;;  %v5269_v0 = vrot.slane %v10597_v58, 4 }
0x14e6   : > { %v10677_v52 = vpop.permute.xlu2 %5174  ;;  %v5402_v31 = vsel %vm1462_vm11, %v10525_v50, %v10670_v56  ;;  %vm11564_vm11 = vcmask 990208  }
0x14e7   : > { %v5411_v20 = vmul.f32 %v5402_v31, %v9961_v17  ;;  %vm11565_vm15 = vmmov %vm11564_vm11 }
0x14eb   : > { %6230 = vrot.lane.b32.xlu0 %v6214_v63, %s11545_s3  ;;  %5518 = vrot.lane.b32.xlu1 %v5506_v4, %s11544_s2  ;;  %v6123_v63 = vpack.c.bf16 %v6115_v60, %v6114_v15  ;;  %v10720_v4 = vpack.c.bf16 %v5236_v21, %v5236_v21  ;;  %v5416_v15 = vmul.f32 %v5402_v31, %v9969_v57 }
0x14ec   : > { %5436 = vrot.lane.b32.xlu2 %v5421_v30, %s11528_s22  ;;  %v5409_v30 = vmul.f32 %v5400_v28, %v9924_v3  ;;  %v6024_v60 = vmul.f32 %v10672_v35, %v9898_v34 }
0x14ed   : > { %v6013_v49 = vpop.permute.xlu0 %6012  ;;  %v10690_v8 = vpop.permute.xlu1 %6014 }
0x14ee   : > { %v10694_v5 = vsel %vm825_vm8, %v10540_v37, %v6013_v49  ;;  %v10696_v25 = vpop.permute.xlu2 %5876  ;;  %v10700_v40 = vsel %vm825_vm8, %v6013_v49, %v10690_v8 }
0x14ef   : > { %v6026_v46 = vmul.f32 %v10694_v5, %v9941_v9  ;;  %v6027_v62 = vmul.f32 %v10700_v40, %v9961_v17 }
0x14f1   : > { %v6035_v38 = vpack.c.bf16 %v6027_v62, %v6026_v46  ;;  %v5418_v62 = vpack.c.bf16 %v5409_v30, %v5408_v53 }
0x14f3   : > { %5524 = vrot.lane.b32.xlu0 %v5509_v61, %s11544_s2  ;;  %5526 = vrot.lane.b32.xlu1 %v5510_v2, %s11544_s2  ;;  %v5419_v61 = vpack.c.bf16 %v5411_v20, %v5410_v14 }
0x14f4   : > { %6048 = vrot.lane.b32.xlu2 %v6035_v38, %s11514_s14  ;;  %v6016_v38 = vsel %vm825_vm8, %v10672_v35, %v10540_v37 }
0x14f5   : > { %v10713_v13 = vpop.permute.xlu0 %5306  ;;  %v5309_v29 = vpop.permute.xlu1 %5308 }
0x14f6   : > { %v10716_v48 = vpop.permute.xlu2 %5784  ;;  %v10727_v18 = vsel %vm11562_vm9, %v10713_v13, %v5309_v29  ;;  %v10731_v10 = vsel %vm11563_vm13, %v5309_v29, %v10580_v24  ;;  %v6025_v29 = vmul.f32 %v6016_v38, %v9924_v3  ;;  %vm11567_vm9 = vmmov %vm11561_vm4  ;;  %vm11568_vm13 = vcmask 523264  }
0x14f7   : > { %v5322_v1 = vmul.f32 %v10727_v18, %v9941_v9  ;;  %v5323_v49 = vmul.f32 %v10731_v10, %v9961_v17  ;;  %v5940_v9 = vmul.f32 0.0, %v10338_v59  ;;  %v5415_v59 = vmul.f32 %v5401_v43, %v9948_v47  ;;  %v7891_v43 = vld [vmem:[%s11414_s8] sm:$0xf] }
0x14f9   : > { %v5331_v6 = vpack.c.bf16 %v5323_v49, %v5322_v1  ;;  %v6034_v1 = vpack.c.bf16 %v6025_v29, %v6024_v60  ;;  %v10785_v14 = vpack.c.bf16 %v5940_v9, %v5940_v9  ;;  %v5148_v60 = vmul.f32 0.0, %v10423_v27 }
0x14fa   : > { %v5312_v27 = vsel %vm11566_vm14, %v10560_v22, %v10713_v13  ;;  %v5178_v13 = vrot.slane %v10655_v12, 4 }
0x14fb   : > { %6140 = vrot.lane.b32.xlu1 %v6125_v55, %s11543_s0  ;;  %6136 = vrot.lane.b32.xlu0 %v6123_v63, %s11543_s0  ;;  %v5971_v55 = vrot.slane %v10628_v33, 4 }
0x14fc   : > { %5258 = vrot.lane.b32.xlu2 %v10720_v4, %s11532_s26 }
0x14fd   : > { %v5255_v23 = vpop.permute.xlu0 %5254  ;;  %v10743_v44 = vpop.permute.xlu1 %5256 }
0x14fe   : > { %v5266_v50 = vrot.slane %v5255_v23, 4  ;;  %v10749_v45 = vpop.permute.xlu2 %5044  ;;  %v5267_v46 = vrot.slane %v10743_v44, 4 }
0x1500   : > { %v5272_v28 = vsel %vm641_vm5, %v5266_v50, %v5267_v46 }
0x1501   : > { %v5273_v2 = vsel %vm11564_vm11, %v5255_v23, %v5272_v28  ;;  %v5422_v23 = vpack.c.bf16 %v5416_v15, %v5415_v59  ;;  %v8469_v28 = vld [vmem:[%s11414_s8 + $0xc] sm:$0xf0]  ;;  %vm11569_vm11 = vmmov %vm11568_vm13 }
0x1502   : > { %5284 = vst [vmem:[#allocation3 + $0x1e0] sm:$0xff] %v5273_v2  ;;  %v6031_v2 = vmul.f32 %v10694_v5, %v9948_v47 }
0x1503   : > { %5432 = vrot.lane.b32.xlu1 %v5419_v61, %s11528_s22  ;;  %5430 = vrot.lane.b32.xlu0 %v5418_v62, %s11528_s22  ;;  %v10795_v62 = vor.u32 %v8469_v28, %v7891_v43  ;;  %v6030_v61 = vmul.f32 %v6016_v38, %v9930_v16  ;;  %v5321_v43 = vmul.f32 %v5312_v27, %v9924_v3 }
0x1504   : > { %5344 = vrot.lane.b32.xlu2 %v5331_v6, %s11530_s29  ;;  %v6032_v6 = vmul.f32 %v10700_v40, %v9969_v57 }
0x1505   : > { %v10768_v21 = vpop.permute.xlu0 %5262  ;;  %v5959_v37 = vpop.permute.xlu1 %5958  ;;  %6948 = vmatmul.bf16.vlgmr.msra.gmra.mxu3 %v10795_v62 }
0x1506   : > { %v5270_v63 = vrot.slane %v10768_v21, 4  ;;  %v10773_v53 = vpop.permute.xlu2 %5052  ;;  %v5970_v30 = vrot.slane %v5959_v37, 4 }
0x1508   : > { %v5276_v31 = vsel %vm641_vm5, %v5269_v0, %v5270_v63  ;;  %v5976_v20 = vsel %vm641_vm5, %v5970_v30, %v5971_v55  ;;  %v6038_v30 = vpack.c.bf16 %v6032_v6, %v6031_v2 }
0x1509   : > { %v5277_v49 = vsel %vm11565_vm15, %v10597_v58, %v5276_v31  ;;  %v5977_v50 = vsel %vm866_vm3, %v5959_v37, %v5976_v20  ;;  %v6029_v58 = vmul.f32 %v10672_v35, %v9906_v51  ;;  %v8147_v5 = vld [vmem:[#allocation3 + $0x1e0] sm:$0xf]  ;;  %v8531_v31 = vld [vmem:[#allocation3 + $0x1e4] sm:$0xf]  ;;  %vm11570_vm15 = vcmask 531456  }
0x150a   : > { %5286 = vst [vmem:[#allocation3 + $0x1f0] sm:$0xff] %v5277_v49  ;;  %vm11571_vm14 = vmmov %vm11570_vm15 }
0x150b   : > { %5988 = vst [vmem:[#allocation3 + $0x2e0] sm:$0xff] %v5977_v50  ;;  %5438 = vrot.lane.b32.xlu0 %v5422_v23, %s11528_s22  ;;  %6046 = vrot.lane.b32.xlu1 %v6034_v1, %s11514_s14  ;;  %v6037_v0 = vpack.c.bf16 %v6030_v61, %v6029_v58  ;;  %v10817_v23 = vpack.c.bf16 %v5148_v60, %v5148_v60  ;;  %v5764_v50 = vmul.f32 0.0, %v10365_v39  ;;  %v5182_v61 = vrot.slane %v10677_v52, 4 }
0x150c   : > { %5962 = vrot.lane.b32.xlu2 %v10785_v14, %s11495_s21  ;;  %v5320_v60 = vmul.f32 %v10560_v22, %v9898_v34 }
0x150d   : > { %v5965_v9 = vpop.permute.xlu0 %5964  ;;  %v10806_v15 = vpop.permute.xlu1 %5966 }
0x150e   : > { %v5973_v29 = vrot.slane %v5965_v9, 4  ;;  %v10810_v37 = vpop.permute.xlu2 %5700  ;;  %v5974_v35 = vrot.slane %v10806_v15, 4 }
0x1510   : > { %v5980_v38 = vsel %vm641_vm5, %v5973_v29, %v5974_v35  ;;  %v5330_v29 = vpack.c.bf16 %v5321_v43, %v5320_v60 }
0x1511   : > { %v5981_v40 = vsel %vm866_vm3, %v5965_v9, %v5980_v38  ;;  %v8533_v59 = vld [vmem:[#allocation3 + $0x1ec] sm:$0xf0]  ;;  %v8149_v20 = vld [vmem:[#allocation3 + $0x1f0] sm:$0xf0] }
0x1512   : > { %5990 = vst [vmem:[#allocation3 + $0x2f0] sm:$0xff] %v5981_v40  ;;  %v8148_v1 = vor.u32 %v8533_v59, %v8147_v5  ;;  %v8152_v49 = vor.u32 %v8531_v31, %v8149_v20  ;;  %v10846_v40 = vpack.c.bf16 %v5764_v50, %v5764_v50  ;;  %v5327_v59 = vmul.f32 %v10727_v18, %v9948_v47 }
0x1513   : > { %6052 = vrot.lane.b32.xlu0 %v6037_v0, %s11514_s14  ;;  %6054 = vrot.lane.b32.xlu1 %v6038_v30, %s11514_s14  ;;  %v8275_v0 = vld [vmem:[#allocation3 + $0x2e0] sm:$0xf]  ;;  %v5328_v31 = vmul.f32 %v10731_v10, %v9969_v57 }
0x1514   : > { %5176 = vrot.lane.b32.xlu2 %v10817_v23, %s11542_s20  ;;  %6954 = vmatpush.bf16.msra.mxu0 %v8148_v1 }
0x1515   : > { %7010 = vmatpush.bf16.msrb.mxu3 %v8152_v49  ;;  %v10828_v28 = vpop.permute.xlu0 %5168  ;;  %v5173_v58 = vpop.permute.xlu1 %5172  ;;  %v5334_v10 = vpack.c.bf16 %v5328_v31, %v5327_v59 }
0x1516   : > { %v5179_v2 = vrot.slane %v10828_v28, 4  ;;  %v10833_v6 = vpop.permute.xlu2 %5606  ;;  %v5181_v9 = vrot.slane %v5173_v58, 4 }
0x1518   : > { %v5184_v3 = vsel %vm641_vm5, %v5178_v13, %v5179_v2  ;;  %v5188_v39 = vsel %vm641_vm5, %v5181_v9, %v5182_v61 }
0x1519   : > { %v5185_v38 = vsel %vm11561_vm4, %v10655_v12, %v5184_v3  ;;  %v5189_v5 = vsel %vm11567_vm9, %v5173_v58, %v5188_v39  ;;  %v8565_v30 = vld [vmem:[#allocation3 + $0x2ec] sm:$0xf0]  ;;  %v5326_v12 = vmul.f32 %v5312_v27, %v9930_v16  ;;  %v5325_v16 = vmul.f32 %v10560_v22, %v9906_v51 }
0x151a   : > { %5196 = vst [vmem:[#allocation3 + $0x1c0] sm:$0xff] %v5185_v38  ;;  %v8276_v34 = vor.u32 %v8565_v30, %v8275_v0  ;;  %v8525_v22 = vld [vmem:[#allocation3 + $0x1ac] sm:$0xf0]  ;;  %v4943_v38 = vmul.f32 %v10267_v26, %v9969_v57  ;;  %v8115_v30 = vld [vmem:[#allocation3 + $0x1a0] sm:$0xf]  ;;  %vm11572_vm4 = vcmask 7168  }
0x151b   : > { %5198 = vst [vmem:[#allocation3 + $0x1d0] sm:$0xff] %v5189_v5  ;;  %5264 = vrot.lane.b32.xlu0 %v10720_v4, %s11532_s26  ;;  %5342 = vrot.lane.b32.xlu1 %v5330_v29, %s11530_s29  ;;  %v5031_v4 = vmul.f32 %v10508_v54, %v9969_v57  ;;  %v5333_v18 = vpack.c.bf16 %v5326_v12, %v5325_v16  ;;  %v8117_v29 = vld [vmem:[#allocation3 + $0x1b0] sm:$0xf0]  ;;  %v5795_v12 = vrot.slane %v10716_v48, 4  ;;  %vm11573_vm9 = vmmov %vm11572_vm4 }
0x151c   : > { %5786 = vrot.lane.b32.xlu2 %v10846_v40, %s11496_s15  ;;  %6968 = vmatpush.bf16.msra.mxu1 %v8276_v34  ;;  %v5885_v34 = vrot.slane %v10696_v25, 4 }
0x151d   : > { %v5871_v20 = vpop.permute.xlu0 %5870  ;;  %v10858_v1 = vpop.permute.xlu1 %5872  ;;  %v5037_v9 = vpack.c.bf16 %v5031_v4, %v5031_v4  ;;  %v8523_v4 = vld [vmem:[#allocation3 + $0x1a4] sm:$0xf] }
0x151e   : > { %v5882_v49 = vrot.slane %v5871_v20, 4  ;;  %v10862_v50 = vpop.permute.xlu2 %5614  ;;  %v5883_v43 = vrot.slane %v10858_v1, 4  ;;  %v8120_v16 = vor.u32 %v8523_v4, %v8117_v29 }
0x1520   : > { %v5888_v47 = vsel %vm641_vm5, %v5882_v49, %v5883_v43  ;;  %v8116_v49 = vor.u32 %v8525_v22, %v8115_v30 }
0x1521   : > { %v5889_v27 = vsel %vm11568_vm13, %v5871_v20, %v5888_v47  ;;  %v8131_v58 = vld [vmem:[#allocation3 + $0x1c0] sm:$0xf]  ;;  %v8527_v13 = vld [vmem:[#allocation3 + $0x1c4] sm:$0xf]  ;;  %vm11574_vm13 = vcmask 56320  }
0x1522   : > { %5900 = vst [vmem:[#allocation3 + $0x2c0] sm:$0xff] %v5889_v27  ;;  %v8529_v60 = vld [vmem:[#allocation3 + $0x1cc] sm:$0xf0]  ;;  %v8133_v3 = vld [vmem:[#allocation3 + $0x1d0] sm:$0xf0]  ;;  %v5852_v27 = vmul.f32 0.0, %v10445_v41 }
0x1523   : > { %5348 = vrot.lane.b32.xlu0 %v5333_v18, %s11530_s29  ;;  %5350 = vrot.lane.b32.xlu1 %v5334_v10, %s11530_s29  ;;  %v8132_v39 = vor.u32 %v8529_v60, %v8131_v58  ;;  %v8136_v51 = vor.u32 %v8527_v13, %v8133_v3  ;;  %v4949_v10 = vpack.c.bf16 %v4943_v38, %v4943_v38  ;;  %v6204_v38 = vmul.f32 0.0, %v10587_v36 }
0x1524   : > { %5054 = vrot.lane.b32.xlu2 %v5037_v9, %s11541_s25 }
0x1525   : > { %6955 = vmatpush.bf16.msra.mxu0 %v8132_v39  ;;  %7011 = vmatpush.bf16.msrb.mxu3 %v8136_v51  ;;  %v10876_v5 = vpop.permute.xlu0 %5878  ;;  %v5783_v0 = vpop.permute.xlu1 %5782  ;;  %v5860_v39 = vpack.c.bf16 %v5852_v27, %v5852_v27 }
0x1526   : > { %v5886_v59 = vrot.slane %v10876_v5, 4  ;;  %v10881_v31 = vpop.permute.xlu2 %6228  ;;  %v5794_v20 = vrot.slane %v5783_v0, 4 }
0x1528   : > { %v5892_v57 = vsel %vm641_vm5, %v5885_v34, %v5886_v59  ;;  %v5800_v26 = vsel %vm641_vm5, %v5794_v20, %v5795_v12  ;;  %v5056_v34 = vrot.slane %v10749_v45, 4  ;;  %v5060_v20 = vrot.slane %v10773_v53, 4 }
0x1529   : > { %v5893_v47 = vsel %vm11569_vm11, %v10696_v25, %v5892_v57  ;;  %v5801_v18 = vsel %vm11570_vm15, %v5783_v0, %v5800_v26  ;;  %6956 = vmatpush.bf16.msra.mxu0 %v8116_v49  ;;  %7012 = vmatpush.bf16.msrb.mxu3 %v8120_v16  ;;  %v5500_v25 = vmul.f32 0.0, %v10601_v11  ;;  %v8259_v51 = vld [vmem:[#allocation3 + $0x2c0] sm:$0xf]  ;;  %v5026_v11 = vmul.f32 %v10508_v54, %v9961_v17 }
0x152a   : > { %5902 = vst [vmem:[#allocation3 + $0x2d0] sm:$0xff] %v5893_v47  ;;  %vm11575_vm11 = vcmask 990208   ;;  %vm11576_vm15 = vcmask 1039360  }
0x152b   : > { %5812 = vst [vmem:[#allocation3 + $0x2a0] sm:$0xff] %v5801_v18  ;;  %5968 = vrot.lane.b32.xlu0 %v10785_v14, %s11495_s21  ;;  %5170 = vrot.lane.b32.xlu1 %v10817_v23, %s11542_s20  ;;  %v10908_v41 = vpack.c.bf16 %v5500_v25, %v5500_v25  ;;  %v5034_v54 = vpack.c.bf16 %v5026_v11, %v5026_v11 }
0x152c   : > { %4966 = vrot.lane.b32.xlu2 %v4949_v10, %s11533_s19  ;;  %v10933_v10 = vpack.c.bf16 %v6204_v38, %v6204_v38 }
0x152d   : > { %v5789_v58 = vpop.permute.xlu0 %5788  ;;  %v10898_v13 = vpop.permute.xlu1 %5790 }
0x152e   : > { %v5797_v9 = vrot.slane %v5789_v58, 4  ;;  %v10901_v60 = vpop.permute.xlu2 %5520  ;;  %v5798_v3 = vrot.slane %v10898_v13, 4 }
0x1530   : > { %v5804_v14 = vsel %vm641_vm5, %v5797_v9, %v5798_v3  ;;  %v6116_v9 = vmul.f32 0.0, %v10501_v42 }
0x1531   : > { %v5805_v23 = vsel %vm11571_vm14, %v5789_v58, %v5804_v14  ;;  %v8561_v22 = vld [vmem:[#allocation3 + $0x2cc] sm:$0xf0] }
0x1532   : > { %5814 = vst [vmem:[#allocation3 + $0x2b0] sm:$0xff] %v5805_v23  ;;  %v8260_v29 = vor.u32 %v8561_v22, %v8259_v51  ;;  %v8243_v47 = vld [vmem:[#allocation3 + $0x2a0] sm:$0xf] }
0x1533   : > { %5874 = vrot.lane.b32.xlu0 %v5860_v39, %s11497_s24  ;;  %5880 = vrot.lane.b32.xlu1 %v5860_v39, %s11497_s24 }
0x1534   : > { %5522 = vrot.lane.b32.xlu2 %v10908_v41, %s11544_s2  ;;  %6969 = vmatpush.bf16.msra.mxu1 %v8260_v29 }
0x1535   : > { %v10917_v0 = vpop.permute.xlu0 %5046  ;;  %v5051_v30 = vpop.permute.xlu1 %5050 }
0x1536   : > { %v5057_v4 = vrot.slane %v10917_v0, 4  ;;  %v10922_v49 = vpop.permute.xlu2 %6134  ;;  %v5059_v16 = vrot.slane %v5051_v30, 4 }
0x1538   : > { %v5062_v57 = vsel %vm641_vm5, %v5056_v34, %v5057_v4  ;;  %v5066_v17 = vsel %vm641_vm5, %v5059_v16, %v5060_v20  ;;  %v4971_v16 = vrot.slane %v10367_v32, 4 }
0x1539   : > { %v5063_v36 = vsel %vm11572_vm4, %v10749_v45, %v5062_v57  ;;  %v5067_v26 = vsel %vm11573_vm9, %v5051_v30, %v5066_v17  ;;  %v8557_v18 = vld [vmem:[#allocation3 + $0x2ac] sm:$0xf0]  ;;  %v5676_v45 = vmul.f32 0.0, %v10530_v7  ;;  %v10951_v7 = vpack.c.bf16 %v6116_v9, %v6116_v9  ;;  %vm11577_vm9 = vmmov %vm11574_vm13 }
0x153a   : > { %5074 = vst [vmem:[#allocation3 + $0x180] sm:$0xff] %v5063_v36  ;;  %v8244_v27 = vor.u32 %v8557_v18, %v8243_v47  ;;  %v5588_v57 = vmul.f32 0.0, %v10417_v19  ;;  %v5324_v36 = vmul.f32 0.0, %v10580_v24 }
0x153b   : > { %5076 = vst [vmem:[#allocation3 + $0x190] sm:$0xff] %v5067_v26  ;;  %5792 = vrot.lane.b32.xlu0 %v10846_v40, %s11496_s15  ;;  %5048 = vrot.lane.b32.xlu1 %v5034_v54, %s11541_s25  ;;  %v5684_v51 = vpack.c.bf16 %v5676_v45, %v5676_v45  ;;  %v5709_v26 = vrot.slane %v10810_v37, 4  ;;  %s8745_s15 = scalar_lea.hbm %s11592_s27, 128 }
0x153c   : > { %6232 = vrot.lane.b32.xlu2 %v10933_v10, %s11545_s3  ;;  %6970 = vmatpush.bf16.msra.mxu1 %v8244_v27 }
0x153d   : > { %v5695_v58 = vpop.permute.xlu0 %5694  ;;  %v10941_v25 = vpop.permute.xlu1 %5696 }
0x153e   : > { %v5706_v14 = vrot.slane %v5695_v58, 4  ;;  %v10944_v39 = vpop.permute.xlu2 %6142  ;;  %v5707_v23 = vrot.slane %v10941_v25, 4 }
0x1540   : > { %v5712_v40 = vsel %vm641_vm5, %v5706_v14, %v5707_v23  ;;  %v10979_v14 = vpack.c.bf16 %v5324_v36, %v5324_v36  ;;  %v3924_v36 = vld [vmem:[%s11415_s9] sm:$0xff] }
0x1541   : > { %v5713_v22 = vsel %vm825_vm8, %v5695_v58, %v5712_v40  ;;  %v8099_v29 = vld [vmem:[#allocation3 + $0x180] sm:$0xf]  ;;  %v8519_v11 = vld [vmem:[#allocation3 + $0x184] sm:$0xf]  ;;  %v5596_v58 = vpack.c.bf16 %v5588_v57, %v5588_v57 }
0x1542   : > { %5724 = vst [vmem:[#allocation3 + $0x280] sm:$0xff] %v5713_v22  ;;  %v8521_v38 = vld [vmem:[#allocation3 + $0x18c] sm:$0xf0]  ;;  %v8101_v30 = vld [vmem:[#allocation3 + $0x190] sm:$0xf0]  ;;  %v5618_v22 = vrot.slane %v10833_v6, 4 }
0x1543   : > { %5698 = vrot.lane.b32.xlu0 %v5684_v51, %s11515_s28  ;;  %5704 = vrot.lane.b32.xlu1 %v5684_v51, %s11515_s28  ;;  %v8100_v42 = vor.u32 %v8521_v38, %v8099_v29  ;;  %v8104_v34 = vor.u32 %v8519_v11, %v8101_v30 }
0x1544   : > { %6138 = vrot.lane.b32.xlu2 %v10951_v7, %s11543_s0 }
0x1545   : > { %6957 = vmatpush.bf16.msra.mxu0 %v8100_v42  ;;  %7013 = vmatpush.bf16.msrb.mxu3 %v8104_v34  ;;  %v10959_v17 = vpop.permute.xlu0 %5702  ;;  %v10961_v54 = vpop.permute.xlu1 %4964  ;;  %v8083_v42 = vld [vmem:[#allocation3 + $0x160] sm:$0xf]  ;;  %v8515_v34 = vld [vmem:[#allocation3 + $0x164] sm:$0xf] }
0x1546   : > { %v5710_v47 = vrot.slane %v10959_v17, 4  ;;  %v10966_v18 = vpop.permute.xlu2 %5436  ;;  %v4972_v27 = vrot.slane %v10961_v54, 4 }
0x1548   : > { %v5716_v19 = vsel %vm641_vm5, %v5709_v26, %v5710_v47  ;;  %v4978_v45 = vsel %vm641_vm5, %v4971_v16, %v4972_v27 }
0x1549   : > { %v5717_v24 = vsel %vm825_vm8, %v10810_v37, %v5716_v19  ;;  %v4979_v9 = vsel %vm11574_vm13, %v10367_v32, %v4978_v45  ;;  %v11471_v37 = vrot.slane %v10862_v50, 4  ;;  %v8227_v26 = vld [vmem:[#allocation3 + $0x280] sm:$0xf]  ;;  %vm11578_vm13 = vmmov %vm11575_vm11 }
0x154a   : > { %5726 = vst [vmem:[#allocation3 + $0x290] sm:$0xff] %v5717_v24 }
0x154b   : > { %4988 = vst [vmem:[#allocation3 + $0x170] sm:$0xff] %v4979_v9  ;;  %5610 = vrot.lane.b32.xlu0 %v5596_v58, %s11513_s18  ;;  %5616 = vrot.lane.b32.xlu1 %v5596_v58, %s11513_s18  ;;  %s11590_s18 = sld [smem:[#allocation25_spill]] }
0x154c   : > { %5352 = vrot.lane.b32.xlu2 %v10979_v14, %s11530_s29 }
0x154d   : > { %v10985_v40 = vpop.permute.xlu0 %5608  ;;  %v5613_v51 = vpop.permute.xlu1 %5612 }
0x154e   : > { %v11472_v32 = vrot.slane %v10985_v40, 4  ;;  %v10990_v29 = vpop.permute.xlu2 %6048  ;;  %v5621_v11 = vrot.slane %v5613_v51, 4 }
0x1550   : > { %v5624_v38 = vsel %vm641_vm5, %v5618_v22, %v11472_v32  ;;  %v5628_v30 = vsel %vm641_vm5, %v5621_v11, %v11471_v37  ;;  %v8069_v22 = vld [vmem:[#allocation3 + $0x150] sm:$0xf0]  ;;  %v5412_v11 = vmul.f32 0.0, %v10670_v56 }
0x1551   : > { %v5625_v16 = vsel %vm734_vm7, %v10833_v6, %v5624_v38  ;;  %v5629_v57 = vsel %vm734_vm7, %v5613_v51, %v5628_v30  ;;  %v8553_v19 = vld [vmem:[#allocation3 + $0x28c] sm:$0xf0] }
0x1552   : > { %5636 = vst [vmem:[#allocation3 + $0x260] sm:$0xff] %v5625_v16  ;;  %v8517_v45 = vld [vmem:[#allocation3 + $0x16c] sm:$0xf0]  ;;  %v8228_v58 = vor.u32 %v8553_v19, %v8227_v26  ;;  %v8085_v24 = vld [vmem:[#allocation3 + $0x170] sm:$0xf0]  ;;  %v5420_v56 = vpack.c.bf16 %v5412_v11, %v5412_v11 }
0x1553   : > { %5638 = vst [vmem:[#allocation3 + $0x270] sm:$0xff] %v5629_v57  ;;  %5528 = vrot.lane.b32.xlu0 %v10908_v41, %s11544_s2  ;;  %6226 = vrot.lane.b32.xlu1 %v10933_v10, %s11545_s3  ;;  %v8084_v6 = vor.u32 %v8517_v45, %v8083_v42  ;;  %v8088_v9 = vor.u32 %v8515_v34, %v8085_v24  ;;  %v8513_v51 = vld [vmem:[#allocation3 + $0x14c] sm:$0xf0]  ;;  %v8067_v26 = vld [vmem:[#allocation3 + $0x140] sm:$0xf]  ;;  %s7328_s2 = scalar_lea.sflag [#allocation7], %s8992_s12 }
0x1554   : > { %6370 = vperm.xlu2 %8664, %v3924_v36   ;;  %6971 = vmatpush.bf16.msra.mxu1 %v8228_v58  ;;  %v8511_v19 = vld [vmem:[#allocation3 + $0x144] sm:$0xf]  ;;  %v8068_v42 = vor.u32 %v8513_v51, %v8067_v26  ;;  %v8509_v45 = vld [vmem:[#allocation3 + $0x12c] sm:$0xf0]  ;;  %v8053_v51 = vld [vmem:[#allocation3 + $0x130] sm:$0xf0] }
0x1555   : > { %6958 = vmatpush.bf16.msra.mxu0 %v8084_v6  ;;  %7014 = vmatpush.bf16.msrb.mxu3 %v8088_v9  ;;  %v6223_v38 = vpop.permute.xlu0 %6222  ;;  %v11009_v30 = vpop.permute.xlu1 %6224  ;;  %v8072_v34 = vor.u32 %v8511_v19, %v8069_v22  ;;  %v7181_v6 = vld [vmem:[%s11416_s10 + $0x8] sm:$0xff]  ;;  %v8035_v19 = vld [vmem:[#allocation3 + $0x100] sm:$0xf] }
0x1556   : > { %v6234_v16 = vrot.slane %v6223_v38, 4  ;;  %v5259_v57 = vpop.permute.xlu2 %5258  ;;  %v11470_v41 = vrot.slane %v11009_v30, 4 }
0x1557   : > { %v5268_v10 = vrot.slane %v5259_v57, 4  ;;  %v8507_v57 = vld [vmem:[#allocation3 + $0x124] sm:$0xf] }
0x1558   : > { %v6240_v36 = vsel %vm641_vm5, %v6234_v16, %v11470_v41  ;;  %v8051_v16 = vld [vmem:[#allocation3 + $0x120] sm:$0xf]  ;;  %v8056_v26 = vor.u32 %v8507_v57, %v8053_v51 }
0x1559   : > { %v5274_v58 = vsel %vm641_vm5, %v5267_v46, %v5268_v10  ;;  %v6241_v24 = vsel %vm592_vm0, %v6223_v38, %v6240_v36  ;;  %6959 = vmatpush.bf16.msra.mxu0 %v8068_v42  ;;  %7015 = vmatpush.bf16.msrb.mxu3 %v8072_v34  ;;  %v8211_v9 = vld [vmem:[#allocation3 + $0x260] sm:$0xf]  ;;  %v8052_v46 = vor.u32 %v8509_v45, %v8051_v16  ;;  %v8505_v10 = vld [vmem:[#allocation3 + $0x10c] sm:$0xf0]  ;;  %v8037_v42 = vld [vmem:[#allocation3 + $0x110] sm:$0xf0] }
0x155a   : > { %v5275_v22 = vsel %vm11575_vm11, %v10743_v44, %v5274_v58  ;;  %6252 = vst [vmem:[#allocation3 + $0x340] sm:$0xff] %v6241_v24  ;;  %v8549_v11 = vld [vmem:[#allocation3 + $0x26c] sm:$0xf0]  ;;  %v8277_v36 = vld [vmem:[#allocation3 + $0x2f0] sm:$0xf0]  ;;  %v5531_v24 = vrot.slane %v10901_v60, 4  ;;  %v8036_v16 = vor.u32 %v8505_v10, %v8035_v19 }
0x155b   : > { %5285 = vst [vmem:[#allocation3 + $0x1e8] sm:$0xff] %v5275_v22  ;;  %5434 = vrot.lane.b32.xlu0 %v5420_v56, %s11528_s22  ;;  %5440 = vrot.lane.b32.xlu1 %v5420_v56, %s11528_s22  ;;  %v8212_v38 = vor.u32 %v8549_v11, %v8211_v9  ;;  %v8467_v58 = vld [vmem:[%s11414_s8 + $0x4] sm:$0xf]  ;;  %v7893_v45 = vld [vmem:[%s11414_s8 + $0x10] sm:$0xf0]  ;;  %v6237_v56 = vrot.slane %v10881_v31, 4 }
0x155c   : > { %7189 = vperm.xlu2 %8664, %v7181_v6   ;;  %v8503_v22 = vld [vmem:[#allocation3 + $0x104] sm:$0xf]  ;;  %v11045_v37 = vor.u32 %v8467_v58, %v7893_v45  ;;  %v8261_v10 = vld [vmem:[#allocation3 + $0x2d0] sm:$0xf0]  ;;  %vm11579_vm11 = vcmask 392192   ;;  %s8580_s22 = sshll.u32 %s8918_s17, 6 }
0x155d   : > { %6960 = vmatpush.bf16.msra.mxu0 %v8052_v46  ;;  %6972 = vmatpush.bf16.msra.mxu1 %v8212_v38  ;;  %v11026_v34 = vpop.permute.xlu0 %6230  ;;  %v5519_v44 = vpop.permute.xlu1 %5518  ;;  %v8040_v11 = vor.u32 %v8503_v22, %v8037_v42  ;;  %v8563_v46 = vld [vmem:[#allocation3 + $0x2e4] sm:$0xf]  ;;  %v8245_v45 = vld [vmem:[#allocation3 + $0x2b0] sm:$0xf0]  ;;  %s7339_s23 = scalar_lea.hbm %s11592_s27, %s8580_s22 }
0x155e   : > { %7016 = vmatpush.bf16.msrb.mxu3 %v8056_v26  ;;  %v6238_v6 = vrot.slane %v11026_v34, 4  ;;  %v11037_v9 = vpop.permute.xlu2 %5344  ;;  %v5530_v51 = vrot.slane %v5519_v44, 4  ;;  %v8280_v41 = vor.u32 %v8563_v46, %v8277_v36  ;;  %v7234_v19 = vld [vmem:[%s11419_s13] sm:$0xff]  ;;  %s7342_s5 = sshll.u32 %s7339_s23, 4  ;;  %s7343_s5 = int_to_ptr.hbm [resolvable:$true] %s7342_s5 }
0x155f   : > { %v8559_v42 = vld [vmem:[#allocation3 + $0x2c4] sm:$0xf]  ;;  %s8739_s3 = sshra.s32 %s7343_s5, 4  ;;  %s8740_s3 = int_to_ptr.hbm [resolvable:$true] %s8739_s3 }
0x1560   : > { %v6244_v38 = vsel %vm641_vm5, %v6237_v56, %v6238_v6  ;;  %v5536_v57 = vsel %vm641_vm5, %v5530_v51, %v5531_v24  ;;  %s8741_s19 = scalar_lea.hbm %s8740_s3, 64  ;;  %p8746_p11 = scmp.lt.s32.totalorder %s8740_s3, %s11592_s27 }
0x1561   : > { %v6245_v26 = vsel %vm592_vm0, %v10881_v31, %v6244_v38  ;;  %v5537_v32 = vsel %vm643_vm6, %v5519_v44, %v5536_v57  ;;  %6961 = vmatpush.bf16.msra.mxu0 %v8036_v16  ;;  %v8264_v31 = vor.u32 %v8559_v42, %v8261_v10  ;;  %v6028_v44 = vmul.f32 0.0, %v10690_v8  ;;  %v8323_v46 = vld [vmem:[#allocation3 + $0x340] sm:$0xf]  ;;  %v8229_v57 = vld [vmem:[#allocation3 + $0x290] sm:$0xf0]  ;;  %p8742_p1 = scmp.ne.s32.totalorder %s8740_s3, %s8741_s19  ;;  %p8747_p9 = scmp.lt.s32.totalorder %s8745_s15, %s8741_s19 }
0x1562   : > { %6254 = vst [vmem:[#allocation3 + $0x350] sm:$0xff] %v6245_v26  ;;  %7017 = vmatpush.bf16.msrb.mxu3 %v8040_v11  ;;  %v8551_v10 = vld [vmem:[#allocation3 + $0x284] sm:$0xf] }
0x1563   : > { %5548 = vst [vmem:[#allocation3 + $0x240] sm:$0xff] %v5537_v32  ;;  %6144 = vrot.lane.b32.xlu0 %v10951_v7, %s11543_s0  ;;  %5346 = vrot.lane.b32.xlu1 %v10979_v14, %s11530_s29  ;;  %v8555_v14 = vld [vmem:[#allocation3 + $0x2a4] sm:$0xf]  ;;  %v6036_v16 = vpack.c.bf16 %v6028_v44, %v6028_v44  ;;  %v8232_v42 = vor.u32 %v8551_v10, %v8229_v57  ;;  %p8743_p4 = pnand %p8742_p1, %p8964_p7  ;;  %p8748_p2 = por %p8747_p9, %p8746_p11 }
0x1564   : > { %7238 = vperm.xlu2 %8664, %v7234_v19   ;;  %6962 = vmatmul.bf16.vlgmr.msra.gmra.mxu0 %v11045_v37  ;;  %v8248_v22 = vor.u32 %v8555_v14, %v8245_v45  ;;  %v8547_v44 = vld [vmem:[#allocation3 + $0x264] sm:$0xf]  ;;  %v6146_v45 = vrot.slane %v10922_v49, 4 }
0x1565   : > { %7024 = vmatpush.bf16.msrb.mxu0 %v8280_v41  ;;  %v5525_v36 = vpop.permute.xlu0 %5524  ;;  %v11059_v58 = vpop.permute.xlu1 %5526  ;;  %7018 = vmatmul.bf16.vlgmr.msrb.gmra.mxu3 %v11045_v37  ;;  %p8744_p8 = pneg %p8743_p4 }
0x1566   : > { %v5533_v32 = vrot.slane %v5525_v36, 4  ;;  %v5963_v41 = vpop.permute.xlu2 %5962  ;;  %v5534_v7 = vrot.slane %v11059_v58, 4 }
0x1567   : > { %v5972_v56 = vrot.slane %v5963_v41, 4  ;;  %p8749_p10 = pnand %p8748_p2, %p8744_p8 }
0x1568   : > { %v5540_v51 = vsel %vm641_vm5, %v5533_v32, %v5534_v7 }
0x1569   : > { %7025 = vmatpush.bf16.msrb.mxu0 %v8264_v31  ;;  %v5978_v8 = vsel %vm641_vm5, %v5971_v55, %v5972_v56  ;;  %v5541_v11 = vsel %vm643_vm6, %v5525_v36, %v5540_v51  ;;  %v8577_v38 = vld [vmem:[#allocation3 + $0x34c] sm:$0xf0]  ;;  %v8213_v36 = vld [vmem:[#allocation3 + $0x270] sm:$0xf0] }
0x156a   : > { %v5979_v26 = vsel %vm866_vm3, %v10628_v33, %v5978_v8  ;;  %5550 = vst [vmem:[#allocation3 + $0x250] sm:$0xff] %v5541_v11  ;;  %v8324_v19 = vor.u32 %v8577_v38, %v8323_v46  ;;  %v6150_v33 = vrot.slane %v10944_v39, 4  ;;  %v3925_v8 = vld [vmem:[%s11415_s9 + $0x8] sm:$0xff]  ;;  %v7180_v11 = vld [vmem:[%s11416_s10] sm:$0xff] }
0x156b   : > { %5989 = vst [vmem:[#allocation3 + $0x2e8] sm:$0xff] %v5979_v26  ;;  %6050 = vrot.lane.b32.xlu0 %v6036_v16, %s11514_s14  ;;  %6056 = vrot.lane.b32.xlu1 %v6036_v16, %s11514_s14  ;;  %v8216_v16 = vor.u32 %v8547_v44, %v8213_v36  ;;  %v8195_v46 = vld [vmem:[#allocation3 + $0x240] sm:$0xf]  ;;  %v8543_v10 = vld [vmem:[#allocation3 + $0x244] sm:$0xf]  ;;  %s11591_s14 = sshll.u32 %s8992_s12, 6 }
0x156c   : > { %6987 = vmatpush.bf16.msra.mxu2 %v8324_v19  ;;  %s11362_s28 = scalar_lea.vmem [#allocation10], %s11591_s14 }
0x156d   : > { %7026 = vmatpush.bf16.msrb.mxu0 %v8248_v22  ;;  %v11074_v55 = vpop.permute.xlu0 %6136  ;;  %v6141_v31 = vpop.permute.xlu1 %6140  ;;  %s7340_s4 = sshll.u32 %s11362_s28, 4  ;;  %s7341_s4 = int_to_ptr.vmem [resolvable:$true] %s7340_s4 }
0x156e   : > { %v6147_v32 = vrot.slane %v11074_v55, 4  ;;  %v5177_v41 = vpop.permute.xlu2 %5176  ;;  %v6149_v56 = vrot.slane %v6141_v31, 4 }
0x156f   : > { %v5183_v14 = vrot.slane %v5177_v41, 4 }
0x1570   : > { %v6152_v51 = vsel %vm641_vm5, %v6146_v45, %v6147_v32  ;;  %v6156_v22 = vsel %vm641_vm5, %v6149_v56, %v6150_v33 }
0x1571   : > { %7027 = vmatpush.bf16.msrb.mxu0 %v8232_v42  ;;  %v6153_v38 = vsel %vm684_vm1, %v10922_v49, %v6152_v51  ;;  %v5190_v57 = vsel %vm641_vm5, %v5182_v61, %v5183_v14  ;;  %v6157_v26 = vsel %vm684_vm1, %v6141_v31, %v6156_v22  ;;  %v8545_v19 = vld [vmem:[#allocation3 + $0x24c] sm:$0xf0]  ;;  %v8197_v42 = vld [vmem:[#allocation3 + $0x250] sm:$0xf0]  ;;  %v7200_v51 = vld [vmem:[%s11417_s11] sm:$0xff] }
0x1572   : > { %6164 = vst [vmem:[#allocation3 + $0x320] sm:$0xff] %v6153_v38  ;;  %v5191_v44 = vsel %vm11576_vm15, %v10677_v52, %v5190_v57  ;;  %v8196_v36 = vor.u32 %v8545_v19, %v8195_v46  ;;  %v8200_v45 = vor.u32 %v8543_v10, %v8197_v42  ;;  %v7201_v22 = vld [vmem:[%s11417_s11 + $0x8] sm:$0xff]  ;;  %v5445_v10 = vrot.slane %v10966_v18, 4 }
0x1573   : > { %5199 = vst [vmem:[#allocation3 + $0x1d8] sm:$0xff] %v5191_v44  ;;  %6375 = vperm.xlu0 %8662, %v3925_v8   ;;  %7184 = vperm.xlu1 %8663, %v7180_v11   ;;  %v6059_v42 = vrot.slane %v10990_v29, 4 }
0x1574   : > { %6166 = vst [vmem:[#allocation3 + $0x330] sm:$0xff] %v6157_v26  ;;  %6973 = vmatpush.bf16.msra.mxu1 %v8196_v36 }
0x1575   : > { %7028 = vmatpush.bf16.msrb.mxu0 %v8216_v16  ;;  %v5431_v49 = vpop.permute.xlu0 %5430  ;;  %v11099_v41 = vpop.permute.xlu1 %5432 }
0x1576   : > { %v5442_v61 = vrot.slane %v5431_v49, 4  ;;  %v5787_v31 = vpop.permute.xlu2 %5786  ;;  %v5443_v56 = vrot.slane %v11099_v41, 4 }
0x1577   : > { %v5796_v14 = vrot.slane %v5787_v31, 4 }
0x1578   : > { %v5448_v52 = vsel %vm641_vm5, %v5442_v61, %v5443_v56  ;;  %v7235_v61 = vld [vmem:[%s11419_s13 + $0x8] sm:$0xff] }
0x1579   : > { %7029 = vmatpush.bf16.msrb.mxu0 %v8200_v45  ;;  %v5802_v16 = vsel %vm641_vm5, %v5795_v12, %v5796_v14  ;;  %v5449_v8 = vsel %vm1412_vm10, %v5431_v49, %v5448_v52  ;;  %v8307_v11 = vld [vmem:[#allocation3 + $0x320] sm:$0xf] }
0x157a   : > { %v5803_v46 = vsel %vm11571_vm14, %v10716_v48, %v5802_v16  ;;  %5460 = vst [vmem:[#allocation3 + $0x220] sm:$0xff] %v5449_v8 }
0x157b   : > { %5813 = vst [vmem:[#allocation3 + $0x2a8] sm:$0xff] %v5803_v46  ;;  %7204 = vperm.xlu0 %8662, %v7200_v51   ;;  %7209 = vperm.xlu1 %8663, %v7201_v22   ;;  %v8573_v38 = vld [vmem:[#allocation3 + $0x32c] sm:$0xf0] }
0x157c   : > { %v8308_v57 = vor.u32 %v8573_v38, %v8307_v11 }
0x157d   : > { %v11117_v26 = vpop.permute.xlu0 %5438  ;;  %v6047_v19 = vpop.permute.xlu1 %6046 }
0x157e   : > { %6988 = vmatpush.bf16.msra.mxu2 %v8308_v57  ;;  %v5446_v12 = vrot.slane %v11117_v26, 4  ;;  %v5055_v44 = vpop.permute.xlu2 %5054  ;;  %v6058_v36 = vrot.slane %v6047_v19, 4 }
0x157f   : > { %v5061_v45 = vrot.slane %v5055_v44, 4 }
0x1580   : > { %v5452_v48 = vsel %vm641_vm5, %v5445_v10, %v5446_v12  ;;  %v6064_v49 = vsel %vm641_vm5, %v6058_v36, %v6059_v42 }
0x1581   : > { %v5453_v31 = vsel %vm1412_vm10, %v10966_v18, %v5452_v48  ;;  %v5068_v14 = vsel %vm641_vm5, %v5060_v20, %v5061_v45  ;;  %v6065_v52 = vsel %vm775_vm2, %v6047_v19, %v6064_v49  ;;  %v8179_v38 = vld [vmem:[#allocation3 + $0x220] sm:$0xf]  ;;  %v8539_v10 = vld [vmem:[#allocation3 + $0x224] sm:$0xf] }
0x1582   : > { %5462 = vst [vmem:[#allocation3 + $0x230] sm:$0xff] %v5453_v31  ;;  %v5069_v51 = vsel %vm11572_vm4, %v10773_v53, %v5068_v14  ;;  %v5355_v31 = vrot.slane %v11037_v9, 4  ;;  %vm11582_vm4 = vcmask 531456  }
0x1583   : > { %5077 = vst [vmem:[#allocation3 + $0x198] sm:$0xff] %v5069_v51  ;;  %7243 = vperm.xlu0 %8662, %v7235_v61  }
0x1584   : > { %6076 = vst [vmem:[#allocation3 + $0x300] sm:$0xff] %v6065_v52 }
0x1585   : > { %v6053_v22 = vpop.permute.xlu0 %6052  ;;  %v11139_v16 = vpop.permute.xlu1 %6054 }
0x1586   : > { %v6061_v8 = vrot.slane %v6053_v22, 4  ;;  %v4967_v11 = vpop.permute.xlu2 %4966  ;;  %v6062_v18 = vrot.slane %v11139_v16, 4 }
0x1587   : > { %v4973_v46 = vrot.slane %v4967_v11, 4  ;;  %v8468_v11 = vld [vmem:[%s11414_s8 + $0xc] sm:$0xf] }
0x1588   : > { %v6068_v20 = vsel %vm641_vm5, %v6061_v8, %v6062_v18  ;;  %v8021_v8 = vld [vmem:[#allocation3 + $0xf0] sm:$0xf0] }
0x1589   : > { %v4980_v53 = vsel %vm641_vm5, %v4972_v27, %v4973_v46  ;;  %v6069_v57 = vsel %vm775_vm2, %v6053_v22, %v6068_v20  ;;  %v8541_v19 = vld [vmem:[#allocation3 + $0x22c] sm:$0xf0]  ;;  %v8181_v44 = vld [vmem:[#allocation3 + $0x230] sm:$0xf0]  ;;  %v7901_v46 = vld [vmem:[%s11414_s8 + $0x18] sm:$0xf0] }
0x158a   : > { %v4981_v36 = vsel %vm11577_vm9, %v10961_v54, %v4980_v53  ;;  %6078 = vst [vmem:[#allocation3 + $0x310] sm:$0xff] %v6069_v57  ;;  %v8180_v45 = vor.u32 %v8541_v19, %v8179_v38  ;;  %v8184_v48 = vor.u32 %v8539_v10, %v8181_v44  ;;  %v8499_v44 = vld [vmem:[#allocation3 + $0xe4] sm:$0xf]  ;;  %vm11583_vm9 = vcmask 7168  }
0x158b   : > { %4989 = vst [vmem:[#allocation3 + $0x178] sm:$0xff] %v4981_v36  ;;  %v8291_v53 = vld [vmem:[#allocation3 + $0x300] sm:$0xf]  ;;  %v8024_v36 = vor.u32 %v8499_v44, %v8021_v8  ;;  %v8487_v44 = vld [vmem:[#allocation3 + $0x84] sm:$0xf] }
0x158c   : > { %6974 = vmatpush.bf16.msra.mxu1 %v8180_v45  ;;  %7030 = vmatpush.bf16.msrb.mxu0 %v8184_v48  ;;  %v11172_v45 = vor.u32 %v8468_v11, %v7901_v46  ;;  %v8491_v46 = vld [vmem:[#allocation3 + $0xa4] sm:$0xf] }
0x158d   : > { %v5265_v49 = vpop.permute.xlu0 %5264  ;;  %v5343_v61 = vpop.permute.xlu1 %5342 }
0x158e   : > { %v5271_v14 = vrot.slane %v5265_v49, 4  ;;  %v5523_v27 = vpop.permute.xlu2 %5522  ;;  %v5354_v52 = vrot.slane %v5343_v61, 4 }
0x158f   : > { %v5532_v51 = vrot.slane %v5523_v27, 4  ;;  %v8495_v27 = vld [vmem:[#allocation3 + $0xc4] sm:$0xf] }
0x1590   : > { %v5278_v22 = vsel %vm641_vm5, %v5270_v63, %v5271_v14  ;;  %v5360_v54 = vsel %vm641_vm5, %v5354_v52, %v5355_v31 }
0x1591   : > { %v5279_v20 = vsel %vm11578_vm13, %v10768_v21, %v5278_v22  ;;  %v5538_v63 = vsel %vm641_vm5, %v5531_v24, %v5532_v51  ;;  %v5361_v38 = vsel %vm1503_vm12, %v5343_v61, %v5360_v54  ;;  %v8569_v57 = vld [vmem:[#allocation3 + $0x30c] sm:$0xf0]  ;;  %v8005_v21 = vld [vmem:[#allocation3 + $0xd0] sm:$0xf0]  ;;  %vm11584_vm13 = vmmov %vm11579_vm11 }
0x1592   : > { %5287 = vst [vmem:[#allocation3 + $0x1f8] sm:$0xff] %v5279_v20  ;;  %v5539_v19 = vsel %vm643_vm6, %v10901_v60, %v5538_v63  ;;  %v8292_v10 = vor.u32 %v8569_v57, %v8291_v53  ;;  %v8008_v60 = vor.u32 %v8495_v27, %v8005_v21  ;;  %v7989_v22 = vld [vmem:[#allocation3 + $0xb0] sm:$0xf0]  ;;  %v7899_v27 = vld [vmem:[%s11414_s8 + $0x8] sm:$0xf] }
0x1593   : > { %5549 = vst [vmem:[#allocation3 + $0x248] sm:$0xff] %v5539_v19  ;;  %v7992_v20 = vor.u32 %v8491_v46, %v7989_v22  ;;  %v7973_v63 = vld [vmem:[#allocation3 + $0x90] sm:$0xf0] }
0x1594   : > { %5372 = vst [vmem:[#allocation3 + $0x200] sm:$0xff] %v5361_v38  ;;  %6989 = vmatpush.bf16.msra.mxu2 %v8292_v10  ;;  %v7957_v21 = vld [vmem:[#allocation3 + $0x70] sm:$0xf0] }
0x1595   : > { %v5349_v48 = vpop.permute.xlu0 %5348  ;;  %v11174_v24 = vpop.permute.xlu1 %5350 }
0x1596   : > { %v5357_v49 = vrot.slane %v5349_v48, 4  ;;  %v6233_v61 = vpop.permute.xlu2 %6232  ;;  %v5358_v14 = vrot.slane %v11174_v24, 4 }
0x1597   : > { %v6239_v52 = vrot.slane %v6233_v61, 4  ;;  %8337 = vmatmul.msk.bf16.vlgmr.msra.gmra.mxu2 %vm11579_vm11, %v11172_v45 }
0x1598   : > { %6996 = vmatpush.bf16.msrb.mxu2 %v8024_v36  ;;  %v5364_v51 = vsel %vm641_vm5, %v5357_v49, %v5358_v14 }
0x1599   : > { %v6246_v54 = vsel %vm641_vm5, %v6238_v6, %v6239_v52  ;;  %v5365_v8 = vsel %vm1503_vm12, %v5349_v48, %v5364_v51  ;;  %v7976_v6 = vor.u32 %v8487_v44, %v7973_v63  ;;  %v8325_v48 = vld [vmem:[#allocation3 + $0x350] sm:$0xf0]  ;;  %v8470_v52 = vld [vmem:[%s11414_s8 + $0x14] sm:$0xf0]  ;;  %v8575_v63 = vld [vmem:[#allocation3 + $0x344] sm:$0xf] }
0x159a   : > { %v6247_v11 = vsel %vm592_vm0, %v11026_v34, %v6246_v54  ;;  %5374 = vst [vmem:[#allocation3 + $0x210] sm:$0xff] %v5365_v8 }
0x159b   : > { %6255 = vst [vmem:[#allocation3 + $0x358] sm:$0xff] %v6247_v11  ;;  %v8163_v61 = vld [vmem:[#allocation3 + $0x200] sm:$0xf]  ;;  %v8535_v22 = vld [vmem:[#allocation3 + $0x204] sm:$0xf] }
0x159c   : > { %6997 = vmatpush.bf16.msrb.mxu2 %v8008_v60 }
0x159d   : > { %v5969_v38 = vpop.permute.xlu0 %5968  ;;  %v5171_v53 = vpop.permute.xlu1 %5170 }
0x159e   : > { %v5975_v57 = vrot.slane %v5969_v38, 4  ;;  %v6139_v19 = vpop.permute.xlu2 %6138  ;;  %v5180_v10 = vrot.slane %v5171_v53, 4  ;;  %v8328_v38 = vor.u32 %v8575_v63, %v8325_v48  ;;  %v11209_v53 = vor.u32 %v8470_v52, %v7899_v27  ;;  %v7925_v27 = vld [vmem:[#allocation3 + $0x30] sm:$0xf0] }
0x159f   : > { %v6148_v36 = vrot.slane %v6139_v19, 4  ;;  %v8293_v52 = vld [vmem:[#allocation3 + $0x310] sm:$0xf0] }
0x15a0   : > { %6998 = vmatpush.bf16.msrb.mxu2 %v7992_v20  ;;  %v5982_v34 = vsel %vm641_vm5, %v5974_v35, %v5975_v57  ;;  %v5186_v49 = vsel %vm641_vm5, %v5179_v2, %v5180_v10  ;;  %v8483_v20 = vld [vmem:[#allocation3 + $0x64] sm:$0xf]  ;;  %v8309_v57 = vld [vmem:[#allocation3 + $0x330] sm:$0xf0] }
0x15a1   : > { %v5983_v60 = vsel %vm866_vm3, %v10806_v15, %v5982_v34  ;;  %v6154_v35 = vsel %vm641_vm5, %v6147_v32, %v6148_v36  ;;  %v5187_v51 = vsel %vm11576_vm15, %v10828_v28, %v5186_v49  ;;  %v8537_v2 = vld [vmem:[#allocation3 + $0x20c] sm:$0xf0]  ;;  %v8165_v54 = vld [vmem:[#allocation3 + $0x210] sm:$0xf0]  ;;  %v7960_v15 = vor.u32 %v8483_v20, %v7957_v21  ;;  %v8571_v28 = vld [vmem:[#allocation3 + $0x324] sm:$0xf] }
0x15a2   : > { %5991 = vst [vmem:[#allocation3 + $0x2f8] sm:$0xff] %v5983_v60  ;;  %v6155_v8 = vsel %vm684_vm1, %v11074_v55, %v6154_v35  ;;  %v8164_v11 = vor.u32 %v8537_v2, %v8163_v61  ;;  %v8168_v46 = vor.u32 %v8535_v22, %v8165_v54  ;;  %v7941_v32 = vld [vmem:[#allocation3 + $0x50] sm:$0xf0]  ;;  %v8312_v48 = vor.u32 %v8571_v28, %v8309_v57  ;;  %v8283_v2 = vld [vmem:[#allocation3 + $0x2e8] sm:$0xf] }
0x15a3   : > { %6165 = vst [vmem:[#allocation3 + $0x328] sm:$0xff] %v6155_v8  ;;  %vm11580_vm3 = vcmask 523264   ;;  %v8502_v22 = vld [vmem:[#allocation3 + $0xf4] sm:$0xf0]  ;;  %v8475_v8 = vld [vmem:[#allocation3 + $0x24] sm:$0xf] }
0x15a4   : > { %6999 = vmatpush.bf16.msrb.mxu2 %v7976_v6  ;;  %5197 = vst [vmem:[#allocation3 + $0x1c8] sm:$0xff] %v5187_v51  ;;  %6975 = vmatpush.bf16.msra.mxu1 %v8164_v11  ;;  %v8479_v6 = vld [vmem:[#allocation3 + $0x44] sm:$0xf]  ;;  %vm11581_vm14 = vmmov %vm11580_vm3  ;;  %v8027_v20 = vld [vmem:[#allocation3 + $0xe8] sm:$0xf] }
0x15a5   : > { %7031 = vmatpush.bf16.msrb.mxu0 %v8168_v46  ;;  %v5875_v19 = vpop.permute.xlu0 %5874  ;;  %v5881_v10 = vpop.permute.xlu1 %5880  ;;  %v7944_v21 = vor.u32 %v8479_v6, %v7941_v32  ;;  %v8567_v11 = vld [vmem:[#allocation3 + $0x304] sm:$0xf]  ;;  %v8534_v32 = vld [vmem:[#allocation3 + $0x1f4] sm:$0xf0] }
0x15a6   : > { %v5884_v55 = vrot.slane %v5875_v19, 4  ;;  %v5353_v44 = vpop.permute.xlu2 %5352  ;;  %v5887_v36 = vrot.slane %v5881_v10, 4  ;;  %v8296_v46 = vor.u32 %v8567_v11, %v8293_v52  ;;  %v8011_v10 = vld [vmem:[#allocation3 + $0xc8] sm:$0xf] }
0x15a7   : > { %v5359_v34 = vrot.slane %v5353_v44, 4  ;;  %6976 = vmatmul.bf16.vlgmr.msra.gmra.mxu1 %v11209_v53  ;;  %v7995_v52 = vld [vmem:[#allocation3 + $0xa8] sm:$0xf] }
0x15a8   : > { %7000 = vmatpush.bf16.msrb.mxu2 %v7960_v15  ;;  %7043 = vmatpush.bf16.msrb.mxu1 %v8328_v38  ;;  %v5890_v49 = vsel %vm641_vm5, %v5883_v43, %v5884_v55  ;;  %v5894_v61 = vsel %vm641_vm5, %v5886_v59, %v5887_v36  ;;  %v8498_v38 = vld [vmem:[#allocation3 + $0xd4] sm:$0xf0]  ;;  %v8155_v55 = vld [vmem:[#allocation3 + $0x1e8] sm:$0xf] }
0x15a9   : > { %7032 = vmatmul.bf16.vlgmr.msrb.gmra.mxu0 %v11209_v53  ;;  %v5891_v60 = vsel %vm11580_vm3, %v10858_v1, %v5890_v49  ;;  %v5366_v35 = vsel %vm641_vm5, %v5358_v14, %v5359_v34  ;;  %v5895_v51 = vsel %vm11581_vm14, %v10876_v5, %v5894_v61  ;;  %v8566_v43 = vld [vmem:[#allocation3 + $0x2f4] sm:$0xf0]  ;;  %v7928_v1 = vor.u32 %v8475_v8, %v7925_v27  ;;  %v7909_v5 = vld [vmem:[#allocation3 + $0x10] sm:$0xf0] }
0x15aa   : > { %5901 = vst [vmem:[#allocation3 + $0x2c8] sm:$0xff] %v5891_v60  ;;  %v5367_v59 = vsel %vm1503_vm12, %v11174_v24, %v5366_v35  ;;  %v8284_v54 = vor.u32 %v8566_v43, %v8283_v2  ;;  %v8028_v14 = vor.u32 %v8502_v22, %v8027_v20  ;;  %v8471_v24 = vld [vmem:[#allocation3 + $0x4] sm:$0xf]  ;;  %v8012_v6 = vor.u32 %v8498_v38, %v8011_v10  ;;  %v8494_v61 = vld [vmem:[#allocation3 + $0xb4] sm:$0xf0] }
0x15ab   : > { %5375 = vst [vmem:[#allocation3 + $0x218] sm:$0xff] %v5367_v59  ;;  %v7912_v19 = vor.u32 %v8471_v24, %v7909_v5  ;;  %v8156_v34 = vor.u32 %v8534_v32, %v8155_v55  ;;  %v8139_v27 = vld [vmem:[#allocation3 + $0x1c8] sm:$0xf]  ;;  %v7996_v60 = vor.u32 %v8494_v61, %v7995_v52  ;;  %v8530_v35 = vld [vmem:[#allocation3 + $0x1d4] sm:$0xf0] }
0x15ac   : > { %7001 = vmatpush.bf16.msrb.mxu2 %v7944_v21  ;;  %7044 = vmatpush.bf16.msrb.mxu1 %v8312_v48  ;;  %5903 = vst [vmem:[#allocation3 + $0x2d8] sm:$0xff] %v5895_v51  ;;  %v8140_v2 = vor.u32 %v8530_v35, %v8139_v27  ;;  %v8490_v43 = vld [vmem:[#allocation3 + $0x94] sm:$0xf0]  ;;  %v8091_v61 = vld [vmem:[#allocation3 + $0x168] sm:$0xf] }
0x15ad   : > { %7080 = vmatpush.bf16.msra.mxu3 %v8284_v54  ;;  %v5793_v63 = vpop.permute.xlu0 %5792  ;;  %v5049_v15 = vpop.permute.xlu1 %5048  ;;  %v8526_v59 = vld [vmem:[#allocation3 + $0x1b4] sm:$0xf0]  ;;  %v7979_v54 = vld [vmem:[#allocation3 + $0x88] sm:$0xf] }
0x15ae   : > { %v5799_v28 = vrot.slane %v5793_v63, 4  ;;  %v5058_v57 = vrot.slane %v5049_v15, 4  ;;  %v8251_v63 = vld [vmem:[#allocation3 + $0x2a8] sm:$0xf]  ;;  %v8486_v38 = vld [vmem:[#allocation3 + $0x74] sm:$0xf0] }
0x15af   : > { %v8482_v10 = vld [vmem:[#allocation3 + $0x54] sm:$0xf0] }
0x15b0   : > { %7002 = vmatpush.bf16.msrb.mxu2 %v7928_v1  ;;  %7045 = vmatpush.bf16.msrb.mxu1 %v8296_v46  ;;  %v5806_v44 = vsel %vm641_vm5, %v5798_v3, %v5799_v28  ;;  %v5064_v36 = vsel %vm641_vm5, %v5057_v4, %v5058_v57  ;;  %v7980_v1 = vor.u32 %v8490_v43, %v7979_v54  ;;  %v8123_v46 = vld [vmem:[#allocation3 + $0x1a8] sm:$0xf]  ;;  %v8522_v57 = vld [vmem:[#allocation3 + $0x194] sm:$0xf0] }
0x15b1   : > { %v5807_v21 = vsel %vm11582_vm4, %v10898_v13, %v5806_v44  ;;  %v5065_v48 = vsel %vm11583_vm9, %v10917_v0, %v5064_v36  ;;  %v8267_v49 = vld [vmem:[#allocation3 + $0x2c8] sm:$0xf]  ;;  %v8124_v5 = vor.u32 %v8526_v59, %v8123_v46  ;;  %v8518_v44 = vld [vmem:[#allocation3 + $0x174] sm:$0xf0] }
0x15b2   : > { %5815 = vst [vmem:[#allocation3 + $0x2b8] sm:$0xff] %v5807_v21  ;;  %v7963_v28 = vld [vmem:[#allocation3 + $0x68] sm:$0xf]  ;;  %v11586_v21 = vrot.slane %v10862_v50, 4  ;;  %v8092_v52 = vor.u32 %v8518_v44, %v8091_v61  ;;  %v8474_v54 = vld [vmem:[#allocation3 + $0x14] sm:$0xf0] }
0x15b3   : > { %5075 = vst [vmem:[#allocation3 + $0x188] sm:$0xff] %v5065_v48  ;;  %v8562_v3 = vld [vmem:[#allocation3 + $0x2d4] sm:$0xf0]  ;;  %v7947_v36 = vld [vmem:[#allocation3 + $0x48] sm:$0xf] }
0x15b4   : > { %7052 = vmatpush.bf16.msra.mxu1 %v8028_v14  ;;  %7003 = vmatpush.bf16.msrb.mxu2 %v7912_v19  ;;  %v8268_v4 = vor.u32 %v8562_v3, %v8267_v49  ;;  %v7948_v49 = vor.u32 %v8482_v10, %v7947_v36  ;;  %v7915_v46 = vld [vmem:[#allocation3 + $0x8] sm:$0xf]  ;;  %v8285_v10 = vld [vmem:[#allocation3 + $0x2f8] sm:$0xf0]  ;;  %v8560_v61 = vld [vmem:[#allocation3 + $0x2cc] sm:$0xf] }
0x15b5   : > { %v5699_v51 = vpop.permute.xlu0 %5698  ;;  %v5705_v13 = vpop.permute.xlu1 %5704 }
0x15b6   : > { %7081 = vmatpush.bf16.msra.mxu3 %v8268_v4  ;;  %v5708_v0 = vrot.slane %v5699_v51, 4  ;;  %v5711_v22 = vrot.slane %v5705_v13, 4  ;;  %v8514_v51 = vld [vmem:[#allocation3 + $0x154] sm:$0xf0] }
0x15b7   : > { %7004 = vmatmul.bf16.vlgmr.msrb.gmra.mxu2 %v10795_v62  ;;  %8338 = vmatmul.msk.bf16.vlgmr.msrb.gmra.mxu1 %vm11584_vm13, %v11172_v45 }
0x15b8   : > { %7053 = vmatpush.bf16.msra.mxu1 %v8012_v6  ;;  %7066 = vmatpush.bf16.msra.mxu2 %v8156_v34  ;;  %v5714_v8 = vsel %vm641_vm5, %v5707_v23, %v5708_v0  ;;  %v5718_v11 = vsel %vm641_vm5, %v5710_v47, %v5711_v22  ;;  %v7964_v47 = vor.u32 %v8486_v38, %v7963_v28  ;;  %v11585_v6 = vrot.slane %v10985_v40, 4  ;;  %v8075_v0 = vld [vmem:[#allocation3 + $0x148] sm:$0xf]  ;;  %v8532_v38 = vld [vmem:[#allocation3 + $0x1ec] sm:$0xf] }
0x15b9   : > { %v5715_v20 = vsel %vm825_vm8, %v10941_v25, %v5714_v8  ;;  %v5719_v14 = vsel %vm825_vm8, %v10959_v17, %v5718_v11  ;;  %v8558_v15 = vld [vmem:[#allocation3 + $0x2b4] sm:$0xf0] }
0x15ba   : > { %5725 = vst [vmem:[#allocation3 + $0x288] sm:$0xff] %v5715_v20  ;;  %v8252_v32 = vor.u32 %v8558_v15, %v8251_v63  ;;  %v8107_v23 = vld [vmem:[#allocation3 + $0x188] sm:$0xf]  ;;  %v8510_v11 = vld [vmem:[#allocation3 + $0x134] sm:$0xf0]  ;;  %v7916_v63 = vor.u32 %v8474_v54, %v7915_v46 }
0x15bb   : > { %5727 = vst [vmem:[#allocation3 + $0x298] sm:$0xff] %v5719_v14  ;;  %v8108_v25 = vor.u32 %v8522_v57, %v8107_v23  ;;  %v11587_v14 = vrot.slane %v11009_v30, 4  ;;  %v8059_v15 = vld [vmem:[#allocation3 + $0x128] sm:$0xf] }
0x15bc   : > { %7054 = vmatpush.bf16.msra.mxu1 %v7996_v60  ;;  %7067 = vmatpush.bf16.msra.mxu2 %v8140_v2  ;;  %v8478_v60 = vld [vmem:[#allocation3 + $0x34] sm:$0xf0]  ;;  %v7931_v2 = vld [vmem:[#allocation3 + $0x28] sm:$0xf]  ;;  %v8060_v28 = vor.u32 %v8510_v11, %v8059_v15 }
0x15bd   : > { %7082 = vmatpush.bf16.msra.mxu3 %v8252_v32  ;;  %v5611_v24 = vpop.permute.xlu0 %5610  ;;  %v5617_v19 = vpop.permute.xlu1 %5616  ;;  %v7932_v43 = vor.u32 %v8478_v60, %v7931_v2 }
0x15be   : > { %v5620_v55 = vrot.slane %v5611_v24, 4  ;;  %v5623_v17 = vrot.slane %v5617_v19, 4  ;;  %v8506_v24 = vld [vmem:[#allocation3 + $0x114] sm:$0xf0]  ;;  %v8528_v19 = vld [vmem:[#allocation3 + $0x1cc] sm:$0xf] }
0x15c0   : > { %7055 = vmatpush.bf16.msra.mxu1 %v7980_v1  ;;  %7068 = vmatpush.bf16.msra.mxu2 %v8124_v5  ;;  %v5626_v34 = vsel %vm641_vm5, %v11585_v6, %v5620_v55  ;;  %v5630_v48 = vsel %vm641_vm5, %v11586_v21, %v5623_v17  ;;  %v8157_v1 = vld [vmem:[#allocation3 + $0x1f8] sm:$0xf0]  ;;  %v8043_v55 = vld [vmem:[#allocation3 + $0x108] sm:$0xf]  ;;  %v8564_v6 = vld [vmem:[#allocation3 + $0x2ec] sm:$0xf] }
0x15c1   : > { %v5627_v27 = vsel %vm734_vm7, %v10985_v40, %v5626_v34  ;;  %v5631_v3 = vsel %vm734_vm7, %v10862_v50, %v5630_v48  ;;  %v8235_v4 = vld [vmem:[#allocation3 + $0x288] sm:$0xf]  ;;  %v8076_v40 = vor.u32 %v8514_v51, %v8075_v0  ;;  %v8141_v17 = vld [vmem:[#allocation3 + $0x1d8] sm:$0xf0]  ;;  %v8044_v44 = vor.u32 %v8506_v24, %v8043_v55 }
0x15c2   : > { %5637 = vst [vmem:[#allocation3 + $0x268] sm:$0xff] %v5627_v27  ;;  %v8554_v35 = vld [vmem:[#allocation3 + $0x294] sm:$0xf0]  ;;  %v8144_v36 = vor.u32 %v8528_v19, %v8141_v17  ;;  %v8288_v48 = vor.u32 %v8564_v6, %v8285_v10  ;;  %v8269_v27 = vld [vmem:[#allocation3 + $0x2d8] sm:$0xf0] }
0x15c3   : > { %5639 = vst [vmem:[#allocation3 + $0x278] sm:$0xff] %v5631_v3  ;;  %v8236_v13 = vor.u32 %v8554_v35, %v8235_v4  ;;  %v8524_v4 = vld [vmem:[#allocation3 + $0x1ac] sm:$0xf] }
0x15c4   : > { %7056 = vmatpush.bf16.msra.mxu1 %v7964_v47  ;;  %7069 = vmatpush.bf16.msra.mxu2 %v8108_v25  ;;  %v8160_v47 = vor.u32 %v8532_v38, %v8157_v1  ;;  %v8516_v38 = vld [vmem:[#allocation3 + $0x16c] sm:$0xf] }
0x15c5   : > { %7083 = vmatpush.bf16.msra.mxu3 %v8236_v13  ;;  %v5529_v22 = vpop.permute.xlu0 %5528  ;;  %v6227_v59 = vpop.permute.xlu1 %6226  ;;  %v8203_v13 = vld [vmem:[#allocation3 + $0x248] sm:$0xf] }
0x15c6   : > { %v5535_v8 = vrot.slane %v5529_v22, 4  ;;  %v6236_v50 = vrot.slane %v6227_v59, 4  ;;  %v8520_v59 = vld [vmem:[#allocation3 + $0x18c] sm:$0xf] }
0x15c8   : > { %7057 = vmatpush.bf16.msra.mxu1 %v7948_v49  ;;  %7070 = vmatpush.bf16.msra.mxu2 %v8092_v52  ;;  %v5542_v20 = vsel %vm641_vm5, %v5534_v7, %v5535_v8  ;;  %v6242_v5 = vsel %vm641_vm5, %v11587_v14, %v6236_v50  ;;  %v8125_v49 = vld [vmem:[#allocation3 + $0x1b8] sm:$0xf0]  ;;  %v8556_v50 = vld [vmem:[#allocation3 + $0x2ac] sm:$0xf] }
0x15c9   : > { %v5543_v32 = vsel %vm643_vm6, %v11059_v58, %v5542_v20  ;;  %v6243_v23 = vsel %vm592_vm0, %v11009_v30, %v6242_v5  ;;  %v8219_v57 = vld [vmem:[#allocation3 + $0x268] sm:$0xf]  ;;  %v8128_v51 = vor.u32 %v8524_v4, %v8125_v49  ;;  %v8093_v20 = vld [vmem:[#allocation3 + $0x178] sm:$0xf0]  ;;  %v8552_v14 = vld [vmem:[#allocation3 + $0x28c] sm:$0xf] }
0x15ca   : > { %5551 = vst [vmem:[#allocation3 + $0x258] sm:$0xff] %v5543_v32  ;;  %v8550_v7 = vld [vmem:[#allocation3 + $0x274] sm:$0xf0]  ;;  %v8237_v5 = vld [vmem:[#allocation3 + $0x298] sm:$0xf0]  ;;  %vm11588_vm0 = vmmov %vm11579_vm11 }
0x15cb   : > { %6253 = vst [vmem:[#allocation3 + $0x348] sm:$0xff] %v6243_v23  ;;  %v8220_v25 = vor.u32 %v8550_v7, %v8219_v57  ;;  %v8240_v57 = vor.u32 %v8552_v14, %v8237_v5  ;;  %v8077_v7 = vld [vmem:[#allocation3 + $0x158] sm:$0xf0]  ;;  %v8548_v19 = vld [vmem:[#allocation3 + $0x26c] sm:$0xf] }
0x15cc   : > { %7058 = vmatpush.bf16.msra.mxu1 %v7932_v43  ;;  %7071 = vmatpush.bf16.msra.mxu2 %v8076_v40  ;;  %v8578_v43 = vld [vmem:[#allocation3 + $0x354] sm:$0xf0]  ;;  %v8253_v40 = vld [vmem:[#allocation3 + $0x2b8] sm:$0xf0] }
0x15cd   : > { %7084 = vmatpush.bf16.msra.mxu3 %v8220_v25  ;;  %v5435_v58 = vpop.permute.xlu0 %5434  ;;  %v5441_v30 = vpop.permute.xlu1 %5440  ;;  %v8256_v46 = vor.u32 %v8556_v50, %v8253_v40  ;;  %v8221_v25 = vld [vmem:[#allocation3 + $0x278] sm:$0xf0] }
0x15ce   : > { %v5444_v34 = vrot.slane %v5435_v58, 4  ;;  %v5447_v21 = vrot.slane %v5441_v30, 4  ;;  %v8061_v30 = vld [vmem:[#allocation3 + $0x138] sm:$0xf0] }
0x15d0   : > { %7059 = vmatpush.bf16.msra.mxu1 %v7916_v63  ;;  %7072 = vmatpush.bf16.msra.mxu2 %v8060_v28  ;;  %v5450_v3 = vsel %vm641_vm5, %v5443_v56, %v5444_v34  ;;  %v5454_v52 = vsel %vm641_vm5, %v5446_v12, %v5447_v21  ;;  %v8272_v56 = vor.u32 %v8560_v61, %v8269_v27  ;;  %v8508_v34 = vld [vmem:[#allocation3 + $0x12c] sm:$0xf] }
0x15d1   : > { %v5451_v60 = vsel %vm1412_vm10, %v11099_v41, %v5450_v3  ;;  %v5455_v35 = vsel %vm1412_vm10, %v11117_v26, %v5454_v52  ;;  %v8546_v2 = vld [vmem:[#allocation3 + $0x254] sm:$0xf0]  ;;  %v8109_v41 = vld [vmem:[#allocation3 + $0x198] sm:$0xf0]  ;;  %v8096_v28 = vor.u32 %v8516_v38, %v8093_v20  ;;  %v8544_v21 = vld [vmem:[#allocation3 + $0x24c] sm:$0xf]  ;;  %v8064_v27 = vor.u32 %v8508_v34, %v8061_v30 }
0x15d2   : > { %5461 = vst [vmem:[#allocation3 + $0x228] sm:$0xff] %v5451_v60  ;;  %v8204_v0 = vor.u32 %v8546_v2, %v8203_v13  ;;  %v8331_v22 = vld [vmem:[#allocation3 + $0x348] sm:$0xf]  ;;  %v8112_v8 = vor.u32 %v8520_v59, %v8109_v41  ;;  %v8576_v4 = vld [vmem:[#allocation3 + $0x34c] sm:$0xf] }
0x15d3   : > { %7060 = vmatmul.bf16.vlgmr.msra.gmra.mxu1 %v10795_v62  ;;  %5463 = vst [vmem:[#allocation3 + $0x238] sm:$0xff] %v5455_v35  ;;  %v8332_v12 = vor.u32 %v8578_v43, %v8331_v22  ;;  %v8315_v3 = vld [vmem:[#allocation3 + $0x328] sm:$0xf]  ;;  %v8333_v60 = vld [vmem:[#allocation3 + $0x358] sm:$0xf0] }
0x15d4   : > { %7122 = vmatpush.bf16.msrb.mxu1 %v8160_v47  ;;  %7073 = vmatpush.bf16.msra.mxu2 %v8044_v44  ;;  %v8205_v44 = vld [vmem:[#allocation3 + $0x258] sm:$0xf0]  ;;  %v8572_v59 = vld [vmem:[#allocation3 + $0x32c] sm:$0xf] }
0x15d5   : > { %7085 = vmatpush.bf16.msra.mxu3 %v8204_v0  ;;  %7099 = vmatpush.bf16.msra.mxu0 %v8332_v12  ;;  %v6145_v26 = vpop.permute.xlu0 %6144  ;;  %v5347_v54 = vpop.permute.xlu1 %5346  ;;  %v8029_v41 = vld [vmem:[#allocation3 + $0xf8] sm:$0xf0]  ;;  %v8500_v20 = vld [vmem:[#allocation3 + $0xec] sm:$0xf] }
0x15d6   : > { %v6151_v11 = vrot.slane %v6145_v26, 4  ;;  %v5356_v1 = vrot.slane %v5347_v54, 4  ;;  %v8173_v26 = vld [vmem:[#allocation3 + $0x218] sm:$0xf0]  ;;  %v8032_v5 = vor.u32 %v8500_v20, %v8029_v41 }
0x15d7   : > { %7074 = vmatmul.bf16.vlgmr.msra.gmra.mxu2 %v11045_v37 }
0x15d8   : > { %7123 = vmatpush.bf16.msrb.mxu1 %v8144_v36  ;;  %7136 = vmatpush.bf16.msrb.mxu2 %v8288_v48  ;;  %v6158_v63 = vsel %vm641_vm5, %v6150_v33, %v6151_v11  ;;  %v5362_v15 = vsel %vm641_vm5, %v5355_v31, %v5356_v1  ;;  %v8512_v31 = vld [vmem:[#allocation3 + $0x14c] sm:$0xf]  ;;  %v8045_v48 = vld [vmem:[#allocation3 + $0x118] sm:$0xf0] }
0x15d9   : > { %v6159_v32 = vsel %vm684_vm1, %v10944_v39, %v6158_v63  ;;  %v5363_v23 = vsel %vm1503_vm12, %v11037_v9, %v5362_v15  ;;  %v8187_v47 = vld [vmem:[#allocation3 + $0x228] sm:$0xf]  ;;  %v8080_v39 = vor.u32 %v8512_v31, %v8077_v7  ;;  %v8224_v9 = vor.u32 %v8548_v19, %v8221_v25  ;;  %v8540_v2 = vld [vmem:[#allocation3 + $0x22c] sm:$0xf]  ;;  %v8013_v63 = vld [vmem:[#allocation3 + $0xd8] sm:$0xf0] }
0x15da   : > { %6167 = vst [vmem:[#allocation3 + $0x338] sm:$0xff] %v6159_v32  ;;  %v8542_v24 = vld [vmem:[#allocation3 + $0x234] sm:$0xf0]  ;;  %v8189_v43 = vld [vmem:[#allocation3 + $0x238] sm:$0xf0]  ;;  %vm11589_vm1 = vmmov %vm11588_vm0 }
0x15db   : > { %5373 = vst [vmem:[#allocation3 + $0x208] sm:$0xff] %v5363_v23  ;;  %v8188_v33 = vor.u32 %v8542_v24, %v8187_v47  ;;  %v8192_v22 = vor.u32 %v8540_v2, %v8189_v43  ;;  %v8496_v15 = vld [vmem:[#allocation3 + $0xcc] sm:$0xf]  ;;  %v7997_v32 = vld [vmem:[#allocation3 + $0xb8] sm:$0xf0] }
0x15dc   : > { %7124 = vmatpush.bf16.msrb.mxu1 %v8128_v51  ;;  %7137 = vmatpush.bf16.msrb.mxu2 %v8272_v56  ;;  %v8538_v51 = vld [vmem:[#allocation3 + $0x214] sm:$0xf0]  ;;  %v8504_v56 = vld [vmem:[#allocation3 + $0x10c] sm:$0xf]  ;;  %v8016_v38 = vor.u32 %v8496_v15, %v8013_v63  ;;  %v7965_v24 = vld [vmem:[#allocation3 + $0x78] sm:$0xf0] }
0x15dd   : > { %7086 = vmatpush.bf16.msra.mxu3 %v8188_v33  ;;  %v6051_v10 = vpop.permute.xlu0 %6050  ;;  %v6057_v55 = vpop.permute.xlu1 %6056  ;;  %v8492_v23 = vld [vmem:[#allocation3 + $0xac] sm:$0xf]  ;;  %v7933_v31 = vld [vmem:[#allocation3 + $0x38] sm:$0xf0] }
0x15de   : > { %v6060_v17 = vrot.slane %v6051_v10, 4  ;;  %v6063_v58 = vrot.slane %v6057_v55, 4  ;;  %v8488_v47 = vld [vmem:[#allocation3 + $0x8c] sm:$0xf] }
0x15df   : > { %v8484_v7 = vld [vmem:[#allocation3 + $0x6c] sm:$0xf] }
0x15e0   : > { %7125 = vmatpush.bf16.msrb.mxu1 %v8112_v8  ;;  %7138 = vmatpush.bf16.msrb.mxu2 %v8256_v46  ;;  %v6066_v36 = vsel %vm641_vm5, %v6059_v42, %v6060_v17  ;;  %v6070_v6 = vsel %vm641_vm5, %v6062_v18, %v6063_v58  ;;  %v8208_v42 = vor.u32 %v8544_v21, %v8205_v44  ;;  %v8480_v19 = vld [vmem:[#allocation3 + $0x4c] sm:$0xf] }
0x15e1   : > { %v6067_v49 = vsel %vm775_vm2, %v10990_v29, %v6066_v36  ;;  %v6071_v61 = vsel %vm775_vm2, %v11139_v16, %v6070_v6  ;;  %v8574_v52 = vld [vmem:[#allocation3 + $0x334] sm:$0xf0]  ;;  %v8336_v29 = vor.u32 %v8576_v4, %v8333_v60  ;;  %v8048_v16 = vor.u32 %v8504_v56, %v8045_v48  ;;  %v8317_v0 = vld [vmem:[#allocation3 + $0x338] sm:$0xf0]  ;;  %v8476_v10 = vld [vmem:[#allocation3 + $0x2c] sm:$0xf]  ;;  %v6963_v30 = vpop.f32.mrf.mxu0 }
0x15e2   : > { %6077 = vst [vmem:[#allocation3 + $0x308] sm:$0xff] %v6067_v49  ;;  %v8171_v35 = vld [vmem:[#allocation3 + $0x208] sm:$0xf]  ;;  %v8316_v18 = vor.u32 %v8574_v52, %v8315_v3  ;;  %v8536_v12 = vld [vmem:[#allocation3 + $0x20c] sm:$0xf]  ;;  %v8320_v40 = vor.u32 %v8572_v59, %v8317_v0  ;;  %v7968_v33 = vor.u32 %v8484_v7, %v7965_v24  ;;  %v7936_v55 = vor.u32 %v8476_v10, %v7933_v31 }
0x15e3   : > { %6079 = vst [vmem:[#allocation3 + $0x318] sm:$0xff] %v6071_v61  ;;  %v8172_v13 = vor.u32 %v8538_v51, %v8171_v35  ;;  %v8176_v50 = vor.u32 %v8536_v12, %v8173_v26  ;;  %v8472_v17 = vld [vmem:[#allocation3 + $0xc] sm:$0xf]  ;;  %v11333_v26 = vld [vmem:[%s11590_s18] sm:$0xff]  ;;  %vm7251_vm2 = vcmask 130048  }
0x15e4   : > { %7126 = vmatpush.bf16.msrb.mxu1 %v8096_v28  ;;  %7139 = vmatpush.bf16.msrb.mxu2 %v8240_v57  ;;  %v7981_v28 = vld [vmem:[#allocation3 + $0x98] sm:$0xf0] }
0x15e5   : > { %7100 = vmatpush.bf16.msra.mxu0 %v8316_v18  ;;  %7087 = vmatpush.bf16.msra.mxu3 %v8172_v13  ;;  %v7984_v57 = vor.u32 %v8488_v47, %v7981_v28  ;;  %v11314_v21 = vpop.permute.xlu0 %6375 }
0x15e8   : > { %7127 = vmatpush.bf16.msrb.mxu1 %v8080_v39  ;;  %7140 = vmatpush.bf16.msrb.mxu2 %v8224_v9  ;;  %v7917_v39 = vld [vmem:[#allocation3 + $0x18] sm:$0xf0]  ;;  %v11311_v9 = vpop.permute.xlu2 %6370 }
0x15e9   : > { %7155 = vmatpush.bf16.msrb.mxu3 %v8336_v29  ;;  %v8299_v54 = vld [vmem:[#allocation3 + $0x308] sm:$0xf]  ;;  %v8568_v8 = vld [vmem:[#allocation3 + $0x30c] sm:$0xf]  ;;  %v7920_v58 = vor.u32 %v8472_v17, %v7917_v39  ;;  %v6965_v3 = vpop.f32.mrf.mxu0 }
0x15ea   : > { %7088 = vmatmul.bf16.vlgmr.msra.gmra.mxu3 %v11209_v53  ;;  %v8570_v11 = vld [vmem:[#allocation3 + $0x314] sm:$0xf0]  ;;  %v8301_v1 = vld [vmem:[#allocation3 + $0x318] sm:$0xf0] }
0x15eb   : > { %v8300_v46 = vor.u32 %v8570_v11, %v8299_v54  ;;  %v8304_v14 = vor.u32 %v8568_v8, %v8301_v1 }
0x15ec   : > { %7128 = vmatpush.bf16.msrb.mxu1 %v8064_v27  ;;  %7141 = vmatpush.bf16.msrb.mxu2 %v8208_v42  ;;  %v11317_v27 = vpop.permute.xlu1 %7184 }
0x15ed   : > { %7156 = vmatpush.bf16.msrb.mxu3 %v8320_v40  ;;  %7101 = vmatpush.bf16.msra.mxu0 %v8300_v46  ;;  %v11322_v13 = vpop.permute.xlu0 %7204 }
0x15f0   : > { %7129 = vmatpush.bf16.msrb.mxu1 %v8048_v16  ;;  %7142 = vmatpush.bf16.msrb.mxu2 %v8192_v22  ;;  %v11320_v18 = vpop.permute.xlu2 %7189 }
0x15f1   : > { %7108 = vmatpush.bf16.msrb.mxu0 %v8032_v5  ;;  %7157 = vmatpush.bf16.msrb.mxu3 %v8304_v14 }
0x15f2   : > { %8339 = vmatmul.msk.bf16.vlgmr.msra.gmra.mxu0 %vm11588_vm0, %v11172_v45 }
0x15f3   : > { %7130 = vmatmul.bf16.vlgmr.msrb.gmra.mxu1 %v11045_v37  ;;  %v8000_v37 = vor.u32 %v8492_v23, %v7997_v32 }
0x15f4   : > { %7143 = vmatpush.bf16.msrb.mxu2 %v8176_v50  ;;  %v11326_v29 = vpop.permute.xlu1 %7209 }
0x15f5   : > { %7109 = vmatpush.bf16.msrb.mxu0 %v8016_v38 }
0x15f7   : > { %7144 = vmatmul.bf16.vlgmr.msrb.gmra.mxu2 %v11209_v53  ;;  %v7949_v53 = vld [vmem:[#allocation3 + $0x58] sm:$0xf0] }
0x15f8   : > { %v7952_v25 = vor.u32 %v8480_v19, %v7949_v53 }
0x15f9   : > { %7110 = vmatpush.bf16.msrb.mxu0 %v8000_v37 }
0x15fa   : > { %8340 = vmatmul.msk.bf16.vlgmr.msrb.gmra.mxu3 %vm11589_vm1, %v11172_v45  ;;  %v6949_v45 = vpop.f32.mrf.mxu3 }
0x15fb   : > { %v6950_v44 = vadd.f32 %v6949_v45, %v11311_v9 }
0x15fd   : > { %7111 = vmatpush.bf16.msrb.mxu0 %v7984_v57  ;;  %v6964_v6 = vadd.f32 %v6963_v30, %v6950_v44 }
0x1601   : > { %7112 = vmatpush.bf16.msrb.mxu0 %v7968_v33 }
0x1602   : > { %v6951_v34 = vpop.f32.mrf.mxu3 }
0x1603   : > { %v6952_v61 = vadd.f32 %v6951_v34, %v11314_v21 }
0x1605   : > { %7113 = vmatpush.bf16.msrb.mxu0 %v7952_v25 }
0x1609   : > { %7114 = vmatpush.bf16.msrb.mxu0 %v7936_v55 }
0x160a   : > { %v7019_v22 = vpop.f32.mrf.mxu3 }
0x160d   : > { %7115 = vmatpush.bf16.msrb.mxu0 %v7920_v58 }
0x1610   : > { %7116 = vmatmul.bf16.vlgmr.msrb.gmra.mxu0 %v10795_v62  ;;  %v6966_v62 = vadd.f32 %v6965_v3, %v6952_v61 }
0x1612   : > { %v7021_v1 = vpop.f32.mrf.mxu3 }
0x161a   : > { %v6991_v36 = vpop.f32.mrf.mxu2 }
0x1622   : > { %v6993_v60 = vpop.f32.mrf.mxu2 }
0x1624   : > { %v6977_v48 = vpop.f32.mrf.mxu1 }
0x1625   : > { %v6978_v49 = vadd.f32 %v6977_v48, %v6964_v6 }
0x1626   : > { %v7033_v40 = vpop.f32.mrf.mxu0 }
0x1627   : > { %v6992_v52 = vadd.f32 %v6991_v36, %v6978_v49 }
0x1629   : > { %v7192_v42 = vmul.f32 %v11317_v27, %v6992_v52 }
0x162b   : > { %v7212_v2 = vadd.f32 %v11322_v13, %v7192_v42 }
0x162c   : > { %v6979_v4 = vpop.f32.mrf.mxu1 }
0x162d   : > { %v6980_v35 = vadd.f32 %v6979_v4, %v6966_v62  ;;  %v7220_v16 = vmax.f32 %v7212_v2, 0.0 }
0x162e   : > { %v7035_v14 = vpop.f32.mrf.mxu0 }
0x162f   : > { %v6994_v51 = vadd.f32 %v6993_v60, %v6980_v35 }
0x1631   : > { %v7196_v43 = vmul.f32 %v11320_v18, %v6994_v51 }
0x1633   : > { %v7216_v56 = vadd.f32 %v11326_v29, %v7196_v43 }
0x1634   : > { %v7047_v8 = vpop.f32.mrf.mxu1 }
0x1635   : > { %v7224_v0 = vmax.f32 %v7216_v56, 0.0 }
0x1637   : > { %v7230_v59 = vpack.c.bf16 %v7224_v0, %v7220_v16 }
0x1639   : > { %7262 = vmatpush.bf16.msra.mxu3 %v7230_v59 }
0x163a   : > { %v7005_v12 = vpop.f32.mrf.mxu2 }
0x163b   : > { %v7006_v41 = vadd.f32 %v7005_v12, %v11311_v9 }
0x163c   : > { %8345 = vmatmul.msk.bf16.vlgmr.msra.gmra.mxu3 %vm7251_vm2, %v11333_v26  ;;  %v7049_v38 = vpop.f32.mrf.mxu1 }
0x163d   : > { %v7020_v54 = vadd.f32 %v7019_v22, %v7006_v41 }
0x163f   : > { %v7034_v50 = vadd.f32 %v7033_v40, %v7020_v54 }
0x1641   : > { %v7048_v46 = vadd.f32 %v7047_v8, %v7034_v50 }
0x1642   : > { %v7007_v11 = vpop.f32.mrf.mxu2 }
0x1643   : > { %v7008_v20 = vadd.f32 %v7007_v11, %v11314_v21  ;;  %v7193_v63 = vmul.f32 %v11317_v27, %v7048_v46 }
0x1645   : > { %v7022_v5 = vadd.f32 %v7021_v1, %v7008_v20  ;;  %v7213_v23 = vadd.f32 %v11322_v13, %v7193_v63 }
0x1647   : > { %v7036_v15 = vadd.f32 %v7035_v14, %v7022_v5  ;;  %v7221_v47 = vmax.f32 %v7213_v23, 0.0 }
0x1649   : > { %v7050_v32 = vadd.f32 %v7049_v38, %v7036_v15 }
0x164b   : > { %v7197_v37 = vmul.f32 %v11320_v18, %v7050_v32 }
0x164d   : > { %v7217_v28 = vadd.f32 %v11326_v29, %v7197_v37 }
0x164f   : > { %v7225_v57 = vmax.f32 %v7217_v28, 0.0 }
0x1650   : > { %v7061_v7 = vpop.f32.mrf.mxu1 }
0x1651   : > { %v7231_v24 = vpack.c.bf16 %v7225_v57, %v7221_v47  ;;  %v7062_v53 = vadd.f32 %v7061_v7, %v11311_v9 }
0x1653   : > { %7276 = vmatpush.bf16.msra.mxu0 %v7231_v24 }
0x1656   : > { %8346 = vmatmul.msk.bf16.vlgmr.msra.gmra.mxu0 %vm7251_vm2, %v11333_v26 }
0x1658   : > { %v7063_v10 = vpop.f32.mrf.mxu1 }
0x1659   : > { %v7064_v17 = vadd.f32 %v7063_v10, %v11314_v21 }
0x165a   : > { %v7075_v33 = vpop.f32.mrf.mxu2 }
0x165b   : > { %v7076_v19 = vadd.f32 %v7075_v33, %v7062_v53 }
0x1662   : > { %v7077_v39 = vpop.f32.mrf.mxu2 }
0x1663   : > { %v7078_v45 = vadd.f32 %v7077_v39, %v7064_v17 }
0x166d   : > { %v7089_v25 = vpop.f32.mrf.mxu3 }
0x166e   : > { %v7090_v31 = vadd.f32 %v7089_v25, %v7076_v19 }
0x166f   : > { %v7103_v55 = vpop.f32.mrf.mxu0 }
0x1670   : > { %v7104_v58 = vadd.f32 %v7103_v55, %v7090_v31  ;;  %v7131_v4 = vpop.f32.mrf.mxu1 }
0x1672   : > { %v7194_v44 = vmul.f32 %v11317_v27, %v7104_v58 }
0x1674   : > { %v7214_v48 = vadd.f32 %v11322_v13, %v7194_v44 }
0x1675   : > { %v7091_v30 = vpop.f32.mrf.mxu3 }
0x1676   : > { %v7092_v36 = vadd.f32 %v7091_v30, %v7078_v45  ;;  %v7222_v3 = vmax.f32 %v7214_v48, 0.0 }
0x1677   : > { %v7105_v6 = vpop.f32.mrf.mxu0 }
0x1678   : > { %v7106_v34 = vadd.f32 %v7105_v6, %v7092_v36  ;;  %v7133_v22 = vpop.f32.mrf.mxu1 }
0x167a   : > { %v7198_v49 = vmul.f32 %v11320_v18, %v7106_v34  ;;  %v7145_v35 = vpop.f32.mrf.mxu2 }
0x167c   : > { %v7218_v61 = vadd.f32 %v11326_v29, %v7198_v49 }
0x167d   : > { %v7159_v2 = vpop.f32.mrf.mxu3 }
0x167e   : > { %v7226_v52 = vmax.f32 %v7218_v61, 0.0 }
0x1680   : > { %v7232_v62 = vpack.c.bf16 %v7226_v52, %v7222_v3 }
0x1682   : > { %7290 = vmatpush.bf16.msra.mxu1 %v7232_v62  ;;  %v7147_v12 = vpop.f32.mrf.mxu2 }
0x1685   : > { %8347 = vmatmul.msk.bf16.vlgmr.msra.gmra.mxu1 %vm7251_vm2, %v11333_v26  ;;  %v7161_v54 = vpop.f32.mrf.mxu3 }
0x168d   : > { %v7117_v60 = vpop.f32.mrf.mxu0 }
0x168e   : > { %v7118_v42 = vadd.f32 %v7117_v60, %v11311_v9 }
0x1690   : > { %v7132_v51 = vadd.f32 %v7131_v4, %v7118_v42 }
0x1692   : > { %v7146_v43 = vadd.f32 %v7145_v35, %v7132_v51 }
0x1694   : > { %v7160_v16 = vadd.f32 %v7159_v2, %v7146_v43 }
0x1695   : > { %v7119_v56 = vpop.f32.mrf.mxu0 }
0x1696   : > { %v7120_v0 = vadd.f32 %v7119_v56, %v11314_v21  ;;  %v7195_v40 = vmul.f32 %v11317_v27, %v7160_v16  ;;  %v7239_v21 = vpop.permute.xlu2 %7238 }
0x1698   : > { %v7134_v59 = vadd.f32 %v7133_v22, %v7120_v0  ;;  %v7215_v9 = vadd.f32 %v11322_v13, %v7195_v40 }
0x169a   : > { %v7148_v41 = vadd.f32 %v7147_v12, %v7134_v59  ;;  %v7223_v1 = vmax.f32 %v7215_v9, 0.0 }
0x169c   : > { %v7162_v8 = vadd.f32 %v7161_v54, %v7148_v41 }
0x169e   : > { %v7199_v50 = vmul.f32 %v11320_v18, %v7162_v8  ;;  %v7244_v18 = vpop.permute.xlu0 %7243 }
0x16a0   : > { %v7219_v11 = vadd.f32 %v11326_v29, %v7199_v50 }
0x16a2   : > { %v7227_v46 = vmax.f32 %v7219_v11, 0.0 }
0x16a4   : > { %v7233_v20 = vpack.c.bf16 %v7227_v46, %v7223_v1 }
0x16a6   : > { %7304 = vmatpush.bf16.msra.mxu2 %v7233_v20 }
0x16a9   : > { %8348 = vmatmul.msk.bf16.vlgmr.msra.gmra.mxu2 %vm7251_vm2, %v11333_v26 }
0x16bf   : > { %v7264_v14 = vpop.f32.mrf.mxu3 }
0x16c0   : > { %v7265_v27 = vadd.f32 %v7264_v14, %v7239_v21 }
0x16c2   : > { %v7311_v5 = vmax.f32 %v7265_v27, 0.0 }
0x16c4   : > { %7319 = vst [vmem:[%s11362_s28] sm:$0xff] %v7311_v5 }
0x16c7   : > { %v7266_v13 = vpop.f32.mrf.mxu3 }
0x16c8   : > { %v7267_v29 = vadd.f32 %v7266_v13, %v7244_v18 }
0x16ca   : > { %v7315_v63 = vmax.f32 %v7267_v29, 0.0 }
0x16cc   : > { %7323 = vst [vmem:[%s11362_s28 + $0x20] sm:$0xff] %v7315_v63 }
0x16d3   : > { %v7278_v26 = vpop.f32.mrf.mxu0 }
0x16d4   : > { %v7279_v15 = vadd.f32 %v7278_v26, %v7239_v21 }
0x16d6   : > { %v7312_v38 = vmax.f32 %v7279_v15, 0.0 }
0x16d8   : > { %7320 = vst [vmem:[%s11362_s28 + $0x8] sm:$0xff] %v7312_v38 }
0x16db   : > { %v7280_v32 = vpop.f32.mrf.mxu0 }
0x16dc   : > { %v7281_v23 = vadd.f32 %v7280_v32, %v7244_v18 }
0x16de   : > { %v7316_v37 = vmax.f32 %v7281_v23, 0.0 }
0x16e0   : > { %7324 = vst [vmem:[%s11362_s28 + $0x28] sm:$0xff] %v7316_v37 }
0x1702   : > { %v7292_v28 = vpop.f32.mrf.mxu1 }
0x1703   : > { %v7293_v47 = vadd.f32 %v7292_v28, %v7239_v21 }
0x1705   : > { %v7313_v57 = vmax.f32 %v7293_v47, 0.0 }
0x1707   : > { %7321 = vst [vmem:[%s11362_s28 + $0x10] sm:$0xff] %v7313_v57 }
0x170a   : > { %v7294_v24 = vpop.f32.mrf.mxu1 }
0x170b   : > { %v7295_v7 = vadd.f32 %v7294_v24, %v7244_v18 }
0x170d   : > { %v7317_v33 = vmax.f32 %v7295_v7, 0.0 }
0x170f   : > { %7325 = vst [vmem:[%s11362_s28 + $0x30] sm:$0xff] %v7317_v33 }
0x172c   : > { %v7306_v53 = vpop.f32.mrf.mxu2 }
0x172d   : > { %v7307_v19 = vadd.f32 %v7306_v53, %v7239_v21 }
0x172f   : > { %v7314_v25 = vmax.f32 %v7307_v19, 0.0 }
0x1731   : > { %7322 = vst [vmem:[%s11362_s28 + $0x18] sm:$0xff] %v7314_v25 }
0x1734   : > { %v7308_v31 = vpop.f32.mrf.mxu2 }
0x1735   : > { %v7309_v10 = vadd.f32 %v7308_v31, %v7244_v18 }
0x1737   : > { %v7318_v55 = vmax.f32 %v7309_v10, 0.0 }
0x1739   : > { %7326 = vst [vmem:[%s11362_s28 + $0x38] sm:$0xff] %v7318_v55 }
0x173a   : > { %8752 = shalt.err (!%p8749_p10)
}
0x173b   : > { %s8820_s12 = smov 512   ;;  %s8821_s21 = smov 32  }
0x173c   : > { %8587 = dma.vmem_to_hbm [thread:$0]  (%p8964_p7), %s7341_s4, 1024, %s7343_s5, %s7328_s2, %s8820_s12, %s8820_s12, %s8821_s21  }
0x173d PF: > { %s11593_s0 = sld [smem:[#allocation14_spill]]  ;;  %p11595_p12 = scmp.ge.s32.totalorder %s8795_s16, 2 }
0x173f   : > { %p8598_p13 = pnand %p11595_p12, %p8932_p6 }
0x1741   : > { %p8599_p0 = pneg %p8598_p13 }
0x1743   : > { %s7357_s14 = sand.u32 1, %s11593_s0  }
0x1744   : > { %s7358_s28 = scalar_lea.sflag [#allocation7], %s7357_s14 }
0x1745   : > { %8778 = dma.done.wait (%p8599_p0), %s7358_s28, 1024  }
0x1746   : > { %8780 = vsyncadd (%p8599_p0), %s7358_s28, 4294966272  ;;  %s11596_s16 = sld [smem:[#allocation17_spill]]  ;;  %s11599_s29 = smov %s8787_s30 }
0x1747   : > { %s11597_s22 = sld [smem:[#allocation15_spill]] }
0x1748   : > { %s11598_s15 = sld [smem:[#allocation18_spill]] }
0x174c   : > { %p28_p3 = scmp.ge.s32.totalorder %s11596_s16, 4  }
0x174d   : > { %s11600_s30 = smov %s11597_s22 }
0x174e   :  { %30 = sbr.rel (!%p28_p3) target bundleno = 15 (0xf), region = 151 }
0x1753   :  { %7364 = vsyncpa [#allocation6], 1 }
0x1754   :  { %7366 = vsyncpa [#allocation6 + $0x1], 1 }
0x1755   :  { %7367 = vsyncpa [#allocation9], 1 }
0x1756   :  { %7368 = vsyncpa [#allocation7], 1 }
0x1757   :  { %7370 = vsyncpa [#allocation7 + $0x1], 1 }

</bundles_post_ra>
